<compile_context>
chip_gen: v6e
topology: v6e:2x2x1
jax: 0.10.0
libtpu: 0.0.40
codegen_flags: <defaults>
</compile_context>

<pallas_src>
import jax
import jax.numpy as jnp
from jax import lax
from jax.experimental import pallas as pl
from jax.experimental.pallas import tpu as pltpu

_EPS = 1e-5  # PyTorch BatchNorm default eps


def _elu(x):
    # ELU with alpha=1.0 (nn.ELU default); min() keeps exp() in range.
    return jnp.where(x > 0, x, jnp.exp(jnp.minimum(x, 0.0)) - 1.0)


def _row_tile(rows, target=256):
    """Largest divisor of `rows` that is <= target and a multiple of 8."""
    for t in range(min(rows, target), 7, -1):
        if rows % t == 0 and t % 8 == 0:
            return t
    return rows


def _parallel(n):
    return pltpu.CompilerParams(dimension_semantics=("parallel",) * n)


# ---------------------------------------------------------------------------
# Pallas kernels
# ---------------------------------------------------------------------------
def _upconv_stats_kernel(x_ref, w_ref, b_ref, y_ref, sum_ref, ssd_ref):
    """ConvTranspose3d(k=2, s=2) as ONE fused matmul over the 8 (kd,kh,kw)
    offsets, plus per-tile BN statistics (sum, centered sum of sq. deviations).

    x_ref: (TM, Cin) bf16, w_ref: (Cin, 8*C2) bf16, b_ref: (1, 8*C2) f32,
    y_ref: (TM, 8*C2) f32, sum_ref/ssd_ref: (1, 1, 8*C2) f32 per-tile stats.
    """
    y = jnp.dot(x_ref[...], w_ref[...],
                preferred_element_type=jnp.float32) + b_ref[...]
    y_ref[...] = y
    s = jnp.sum(y, axis=0, keepdims=True)
    d = y - s * (1.0 / y.shape[0])
    sum_ref[0] = s
    ssd_ref[0] = jnp.sum(d * d, axis=0, keepdims=True)


def _make_luconv_kernel(w2, h2w2):
    """Conv3d(k=5, p=2) on one (n, d) output slab.

    The five x*_ref inputs are the SAME kw-folded padded activation, windowed
    at depth offsets d+kd (kd = 0..4); each block is (1, 1, Hp*W2, 5*C).  The
    conv is 25 shifted (H2*W2, 5C) x (5C, C) MXU matmuls accumulated in f32,
    so no 125x im2col tensor ever touches HBM.
    """

    def kernel(x0, x1, x2, x3, x4, w_ref, b_ref, y_ref, sum_ref, ssd_ref):
        xs = (x0, x1, x2, x3, x4)
        c_out = b_ref.shape[-1]
        acc = jnp.zeros((h2w2, c_out), jnp.float32)
        for kd in range(5):
            for kh in range(5):
                xw = xs[kd][0, 0, kh * w2:kh * w2 + h2w2, :]
                acc = acc + jnp.dot(xw, w_ref[kd * 5 + kh],
                                    preferred_element_type=jnp.float32)
        y = acc + b_ref[...]
        y_ref[0, 0] = y
        s = jnp.sum(y, axis=0, keepdims=True)
        d = y - s * (1.0 / h2w2)
        sum_ref[0, 0] = s
        ssd_ref[0, 0] = jnp.sum(d * d, axis=0, keepdims=True)

    return kernel


def _bn_elu_kernel(y_ref, sc_ref, sh_ref, o_ref):
    o_ref[...] = _elu(y_ref[...] * sc_ref[...] + sh_ref[...])


def _bn_elu_add_elu_kernel(y_ref, r_ref, sc_ref, sh_ref, o_ref):
    o_ref[...] = _elu(_elu(y_ref[...] * sc_ref[...] + sh_ref[...]) + r_ref[...])


def _add_elu_kernel(a_ref, b_ref, o_ref):
    o_ref[...] = _elu(a_ref[...] + b_ref[...])


# ---------------------------------------------------------------------------
# Tiled elementwise launcher (lane-dense) + BN-stat helpers
# ---------------------------------------------------------------------------
def _launch_rows(kernel, row_arrays, bcast_arrays, alias_first=False):
    """Row-tiled elementwise pallas_call; row_arrays tile over rows, bcast
    arrays are (1, C) and replicated to every tile."""
    rows, cols = row_arrays[0].shape
    tr = _row_tile(rows)
    in_specs = ([pl.BlockSpec((tr, cols), lambda i: (i, 0)) for _ in row_arrays]
                + [pl.BlockSpec((1, cols), lambda i: (0, 0)) for _ in bcast_arrays])
    return pl.pallas_call(
        kernel,
        grid=(rows // tr,),
        in_specs=in_specs,
        out_specs=pl.BlockSpec((tr, cols), lambda i: (i, 0)),
        out_shape=jax.ShapeDtypeStruct((rows, cols), jnp.float32),
        input_output_aliases=({0: 0} if alias_first else {}),
        compiler_params=_parallel(1),
    )(*row_arrays, *bcast_arrays)


def _lane_fold(x2d):
    """Reshape (M, C) -> (M//r, r*C) so that r*C == 128 when possible:
    lane-dense vector stores.  Per-channel params repeat with period C."""
    m, c = x2d.shape
    r = 1
    if c < 128 and 128 % c == 0 and m % (128 // c) == 0:
        r = 128 // c
    return x2d.reshape(m // r, r * c), r


def _batch_stats(sums, ssds, n):
    """Combine per-group (sum, centered ssd) -> global biased mean/var
    (Chan's parallel-variance formula; avoids E[x^2]-E[x]^2 cancellation)."""
    groups = sums.shape[0]
    total = groups * n
    mean = jnp.sum(sums, axis=0) / total
    mu = sums / n
    var = (jnp.sum(ssds, axis=0) + n * jnp.sum((mu - mean) ** 2, axis=0)) / total
    return mean, var


def _bn_affine(mean, var, gamma, beta):
    scale = gamma * lax.rsqrt(var + _EPS)
    return scale, beta - mean * scale


def _bn_elu_apply(y2d, scale, shift, residual2d=None):
    """Tiled, lane-dense ELU(y*scale + shift) [optionally + residual, ELU]."""
    m, c = y2d.shape
    yv, r = _lane_fold(y2d)
    scv = jnp.tile(scale.astype(jnp.float32), r).reshape(1, r * c)
    shv = jnp.tile(shift.astype(jnp.float32), r).reshape(1, r * c)
    if residual2d is None:
        out = _launch_rows(_bn_elu_kernel, [yv], [scv, shv], alias_first=True)
    else:
        rv, _ = _lane_fold(residual2d)
        out = _launch_rows(_bn_elu_add_elu_kernel, [yv, rv], [scv, shv],
                           alias_first=True)
    return out.reshape(m, c)


# ---------------------------------------------------------------------------
# Layer wrappers
# ---------------------------------------------------------------------------
def _upconv_bn_elu(x, w_fused, b_tiled, gamma, beta):
    """ConvTranspose3d(k=2,s=2) + BN(train) + ELU -> channels-last (N,2D,2H,2W,C2)."""
    n, cin, d, h, w = x.shape
    c2 = gamma.shape[0]
    m0 = n * d * h * w
    x2d = jnp.transpose(x, (0, 2, 3, 4, 1)).reshape(m0, cin).astype(w_fused.dtype)

    tm = _row_tile(m0)
    g0 = m0 // tm
    y, s, q = pl.pallas_call(
        _upconv_stats_kernel,
        grid=(g0,),
        in_specs=[pl.BlockSpec((tm, cin), lambda i: (i, 0)),
                  pl.BlockSpec((cin, 8 * c2), lambda i: (0, 0)),
                  pl.BlockSpec((1, 8 * c2), lambda i: (0, 0))],
        out_specs=[pl.BlockSpec((tm, 8 * c2), lambda i: (i, 0)),
                   pl.BlockSpec((1, 1, 8 * c2), lambda i: (i, 0, 0)),
                   pl.BlockSpec((1, 1, 8 * c2), lambda i: (i, 0, 0))],
        out_shape=[jax.ShapeDtypeStruct((m0, 8 * c2), jnp.float32),
                   jax.ShapeDtypeStruct((g0, 1, 8 * c2), jnp.float32),
                   jax.ShapeDtypeStruct((g0, 1, 8 * c2), jnp.float32)],
        compiler_params=_parallel(1),
    )(x2d, w_fused, b_tiled)

    # BN1 statistics are per channel over all 8 offsets x all input voxels.
    mean, var = _batch_stats(s.reshape(g0 * 8, c2), q.reshape(g0 * 8, c2), tm)
    scale, shift = _bn_affine(mean, var, gamma, beta)
    up2d = _bn_elu_apply(y, jnp.tile(scale, 8), jnp.tile(shift, 8))

    # scatter the 8 (kd, kh, kw) offsets into the 2x-upsampled volume (layout glue)
    up = up2d.reshape(n, d, h, w, 2, 2, 2, c2)
    up = jnp.transpose(up, (0, 1, 4, 2, 5, 3, 6, 7))
    return up.reshape(n, 2 * d, 2 * h, 2 * w, c2)


def _luconv_layer(cur, wk, bias2d, gamma, beta, residual2d=None):
    """One LUConv: Conv3d(k=5, p=2) + BN(train) + ELU on channels-last `cur`.
    If residual2d is given, also fuses the final ELU(. + residual)."""
    n, d2, h2, w2, c = cur.shape
    dp, hp = d2 + 4, h2 + 4
    h2w2, hpw2 = h2 * w2, hp * w2

    # Pad and fold the 5 kw taps into the channel axis (5x, not 125x, traffic);
    # flatten (Hp, W2) so every kh shift becomes a contiguous, aligned row slice.
    xp = jnp.pad(cur, ((0, 0), (2, 2), (2, 2), (2, 2), (0, 0)))
    xcol = jnp.concatenate([xp[:, :, :, kw:kw + w2, :] for kw in range(5)],
                           axis=-1)
    xcol = xcol.reshape(n, dp, hpw2, 5 * c).astype(wk.dtype)

    kernel = _make_luconv_kernel(w2, h2w2)
    x_specs = [pl.BlockSpec((1, 1, hpw2, 5 * c),
                            lambda i, j, kd=kd: (i, j + kd, 0, 0))
               for kd in range(5)]
    y, s, q = pl.pallas_call(
        kernel,
        grid=(n, d2),
        in_specs=x_specs
        + [pl.BlockSpec((25, 5 * c, c), lambda i, j: (0, 0, 0)),
           pl.BlockSpec((1, c), lambda i, j: (0, 0))],
        out_specs=[pl.BlockSpec((1, 1, h2w2, c), lambda i, j: (i, j, 0, 0)),
                   pl.BlockSpec((1, 1, 1, c), lambda i, j: (i, j, 0, 0)),
                   pl.BlockSpec((1, 1, 1, c), lambda i, j: (i, j, 0, 0))],
        out_shape=[jax.ShapeDtypeStruct((n, d2, h2w2, c), jnp.float32),
                   jax.ShapeDtypeStruct((n, d2, 1, c), jnp.float32),
                   jax.ShapeDtypeStruct((n, d2, 1, c), jnp.float32)],
        compiler_params=_parallel(2),
    )(xcol, xcol, xcol, xcol, xcol, wk, bias2d)

    mean, var = _batch_stats(s.reshape(n * d2, c), q.reshape(n * d2, c), h2w2)
    scale, shift = _bn_affine(mean, var, gamma, beta)
    out2d = _bn_elu_apply(y.reshape(n * d2 * h2w2, c), scale, shift, residual2d)
    return out2d.reshape(n, d2, h2, w2, c)


# ---------------------------------------------------------------------------
# UpTransition forward
# ---------------------------------------------------------------------------
def up_transition_forward(x, skipx, prepped):
    """x: (N, inChans, D, H, W); skipx: (N, outChans//2, 2D, 2H, 2W)  (NCDHW).
    Returns (N, outChans, 2D, 2H, 2W) float32, matching PyTorch layout."""
    # do1 = passthrough (dropout=False).
    # TODO(synk): do2 = Dropout3d(p=0.2) implemented as identity (eval-mode);
    # training-mode channel dropout and BN running-stat updates not replicated.
    up = _upconv_bn_elu(x, prepped["up_w"], prepped["up_b"],
                        prepped["bn1_w"], prepped["bn1_b"])
    skip_cl = jnp.transpose(skipx, (0, 2, 3, 4, 1)).astype(jnp.float32)
    xcat = jnp.concatenate([up, skip_cl], axis=-1)      # (N, D2, H2, W2, Cout)
    cout = xcat.shape[-1]
    xcat2d = xcat.reshape(-1, cout)

    ops = prepped["ops"]
    if ops:
        cur = xcat
        for li, (wk, bk, gamma, beta) in enumerate(ops):
            res = xcat2d if li == len(ops) - 1 else None
            cur = _luconv_layer(cur, wk, bk, gamma, beta, residual2d=res)
        out = cur
    else:
        folded, _ = _lane_fold(xcat2d)
        out = _launch_rows(_add_elu_kernel, [folded, folded], [])
        out = out.reshape(xcat.shape)
    return jnp.transpose(out, (0, 4, 1, 2, 3))          # back to NCDHW


# ---------------------------------------------------------------------------
# Parameter prep (layout transposes / casts hoisted out of the forward)
# ---------------------------------------------------------------------------
def prepare_params(params, matmul_dtype=jnp.bfloat16):
    up_w = params["up_w"]                              # (Cin, C2, 2, 2, 2)
    cin, c2 = up_w.shape[0], up_w.shape[1]
    # fuse the 8 (kd, kh, kw) offsets into one (Cin, 8*C2) matmul (offset-major)
    w_fused = jnp.transpose(up_w, (0, 2, 3, 4, 1)).reshape(cin, 8 * c2)
    prepped = {
        "up_w": w_fused.astype(matmul_dtype),
        "up_b": jnp.tile(params["up_b"].astype(jnp.float32), 8).reshape(1, 8 * c2),
        "bn1_w": params["bn1_w"].astype(jnp.float32),
        "bn1_b": params["bn1_b"].astype(jnp.float32),
        "ops": [],
    }
    for lw, lb, lg, lbeta in params["ops"]:
        c = lw.shape[0]
        # torch Conv3d weight (Cout, Cin, 5, 5, 5) -> (kd*5+kh, kw*Cin+ci, co)
        wk = jnp.transpose(lw, (2, 3, 4, 1, 0)).reshape(25, 5 * c, c)
        prepped["ops"].append((wk.astype(matmul_dtype),
                               lb.reshape(1, c).astype(jnp.float32),
                               lg.astype(jnp.float32),
                               lbeta.astype(jnp.float32)))
    return prepped


def init_params(key, in_chans, out_chans, n_convs):
    c2 = out_chans // 2
    keys = jax.random.split(key, 2 + 2 * n_convs)
    params = {
        "up_w": 0.1 * jax.random.normal(keys[0], (in_chans, c2, 2, 2, 2),
                                        jnp.float32),
        "up_b": 0.1 * jax.random.normal(keys[1], (c2,), jnp.float32),
        "bn1_w": jnp.ones((c2,), jnp.float32),   # ContBatchNorm3d affine init
        "bn1_b": jnp.zeros((c2,), jnp.float32),
        "ops": [],
    }
    for i in range(n_convs):
        lw = 0.05 * jax.random.normal(
            keys[2 + 2 * i], (out_chans, out_chans, 5, 5, 5), jnp.float32)
        lb = 0.05 * jax.random.normal(keys[3 + 2 * i], (out_chans,), jnp.float32)
        params["ops"].append((lw, lb, jnp.ones((out_chans,), jnp.float32),
                              jnp.zeros((out_chans,), jnp.float32)))
    return params


if __name__ == "__main__":
    in_chans, out_chans, n_convs = 8, 16, 2   # UpTransition(8, 16, 2, elu=True)
    N, D, H, W = 2, 8, 8, 8

    key = jax.random.PRNGKey(0)
    kx, ks, kp = jax.random.split(key, 3)
    x = jax.random.normal(kx, (N, in_chans, D, H, W), jnp.float32)
    skipx = jax.random.normal(ks, (N, out_chans // 2, 2 * D, 2 * H, 2 * W),
                              jnp.float32)
    params = init_params(kp, in_chans, out_chans, n_convs)
    prepped = prepare_params(params)          # layout + bf16 cast, once

    fwd = jax.jit(up_transition_forward)
    out = jax.block_until_ready(fwd(x, skipx, prepped))

    assert out.shape == (N, out_chans, 2 * D, 2 * H, 2 * W), out.shape
    assert bool(jnp.all(jnp.isfinite(out)))
    print("KERNEL_OK")
</pallas_src>

<mosaic_0001>
module attributes {stable_mosaic.version = 11 : i64} {
  func.func @_upconv_stats_kernel(%arg0: i32, %arg1: memref<256x8xbf16, #tpu.memory_space<vmem>>, %arg2: memref<8x64xbf16, #tpu.memory_space<vmem>>, %arg3: memref<1x64xf32, #tpu.memory_space<vmem>>, %arg4: memref<256x64xf32, #tpu.memory_space<vmem>>, %arg5: memref<1x1x64xf32, #tpu.memory_space<vmem>>, %arg6: memref<1x1x64xf32, #tpu.memory_space<vmem>>) attributes {dimension_semantics = [#tpu.dimension_semantics<parallel>], iteration_bounds = array<i64: 4>, scalar_prefetch = 0 : i64, scratch_operands = 0 : i64, tpu.core_type = #tpu.core_type<tc>, window_params = [{transform_indices = @transform_0, window_bounds = array<i64: 256, 8>}, {pipeline_mode = #tpu.pipeline_mode<synchronous>, transform_indices = @transform_1, window_bounds = array<i64: 8, 64>}, {pipeline_mode = #tpu.pipeline_mode<synchronous>, transform_indices = @transform_2, window_bounds = array<i64: 1, 64>}, {transform_indices = @transform_3, window_bounds = array<i64: 256, 64>}, {transform_indices = @transform_4, window_bounds = array<i64: 1, 1, 64>}, {transform_indices = @transform_5, window_bounds = array<i64: 1, 1, 64>}]} {
    %c0 = arith.constant 0 : index
    %c0_0 = arith.constant 0 : index
    %0 = vector.load %arg1[%c0, %c0_0] : memref<256x8xbf16, #tpu.memory_space<vmem>>, vector<256x8xbf16>
    %c0_1 = arith.constant 0 : index
    %c0_2 = arith.constant 0 : index
    %1 = vector.load %arg2[%c0_1, %c0_2] : memref<8x64xbf16, #tpu.memory_space<vmem>>, vector<8x64xbf16>
    %cst = arith.constant dense<0.000000e+00> : vector<256x64xf32>
    %2 = tpu.matmul %0, %1, %cst {dimension_numbers = #tpu.dot_dimension_numbers<[1], [0], [0], [1], [0, 0, 1, 1], [], []>} : vector<256x8xbf16>, vector<8x64xbf16>, vector<256x64xf32> -> vector<256x64xf32>
    %c0_3 = arith.constant 0 : index
    %c0_4 = arith.constant 0 : index
    %3 = vector.load %arg3[%c0_3, %c0_4] : memref<1x64xf32, #tpu.memory_space<vmem>>, vector<1x64xf32>
    %4 = vector.broadcast %3 : vector<1x64xf32> to vector<256x64xf32>
    %5 = arith.addf %2, %4 : vector<256x64xf32>
    %c0_5 = arith.constant 0 : index
    %c0_6 = arith.constant 0 : index
    %6 = vector.load %arg4[%c0_5, %c0_6] : memref<256x64xf32, #tpu.memory_space<vmem>>, vector<256x64xf32>
    tpu.vector_store %arg4[%c0_5, %c0_6], %5 {strides = array<i32>} : memref<256x64xf32, #tpu.memory_space<vmem>>, vector<256x64xf32>,
    %cst_7 = arith.constant dense<0.000000e+00> : vector<64xf32>
    %7 = vector.multi_reduction <add>, %5, %cst_7 [0] : vector<256x64xf32> to vector<64xf32>
    %8 = vector.shape_cast %7 : vector<64xf32> to vector<1x64xf32>
    %cst_8 = arith.constant 3.906250e-03 : f32
    %9 = vector.broadcast %cst_8 : f32 to vector<1x64xf32>
    %10 = arith.mulf %8, %9 : vector<1x64xf32>
    %11 = vector.broadcast %10 : vector<1x64xf32> to vector<256x64xf32>
    %12 = arith.subf %5, %11 : vector<256x64xf32>
    %c0_9 = arith.constant 0 : index
    %c0_10 = arith.constant 0 : index
    %c0_11 = arith.constant 0 : index
    %13 = vector.load %arg5[%c0_9, %c0_10, %c0_11] : memref<1x1x64xf32, #tpu.memory_space<vmem>>, vector<1x1x64xf32>
    %14 = vector.shape_cast %13 : vector<1x1x64xf32> to vector<1x64xf32>
    %15 = vector.shape_cast %8 : vector<1x64xf32> to vector<1x1x64xf32>
    tpu.vector_store %arg5[%c0_9, %c0_10, %c0_11], %15 {strides = array<i32>} : memref<1x1x64xf32, #tpu.memory_space<vmem>>, vector<1x1x64xf32>,
    %16 = arith.mulf %12, %12 : vector<256x64xf32>
    %cst_12 = arith.constant dense<0.000000e+00> : vector<64xf32>
    %17 = vector.multi_reduction <add>, %16, %cst_12 [0] : vector<256x64xf32> to vector<64xf32>
    %18 = vector.shape_cast %17 : vector<64xf32> to vector<1x64xf32>
    %c0_13 = arith.constant 0 : index
    %c0_14 = arith.constant 0 : index
    %c0_15 = arith.constant 0 : index
    %19 = vector.load %arg6[%c0_13, %c0_14, %c0_15] : memref<1x1x64xf32, #tpu.memory_space<vmem>>, vector<1x1x64xf32>
    %20 = vector.shape_cast %19 : vector<1x1x64xf32> to vector<1x64xf32>
    %21 = vector.shape_cast %18 : vector<1x64xf32> to vector<1x1x64xf32>
    tpu.vector_store %arg6[%c0_13, %c0_14, %c0_15], %21 {strides = array<i32>} : memref<1x1x64xf32, #tpu.memory_space<vmem>>, vector<1x1x64xf32>,
    return
  }
  func.func @transform_0(%arg0: i32) -> (i32, i32) {
    %c0_i32 = arith.constant 0 : i32
    %c0_i32_0 = arith.constant 0 : i32
    return %arg0, %c0_i32 : i32, i32
  }
  func.func @transform_1(%arg0: i32) -> (i32, i32) {
    %c0_i32 = arith.constant 0 : i32
    %c0_i32_0 = arith.constant 0 : i32
    %c0_i32_1 = arith.constant 0 : i32
    return %c0_i32, %c0_i32_0 : i32, i32
  }
  func.func @transform_2(%arg0: i32) -> (i32, i32) {
    %c0_i32 = arith.constant 0 : i32
    %c0_i32_0 = arith.constant 0 : i32
    %c0_i32_1 = arith.constant 0 : i32
    return %c0_i32, %c0_i32_0 : i32, i32
  }
  func.func @transform_3(%arg0: i32) -> (i32, i32) {
    %c0_i32 = arith.constant 0 : i32
    %c0_i32_0 = arith.constant 0 : i32
    return %arg0, %c0_i32 : i32, i32
  }
  func.func @transform_4(%arg0: i32) -> (i32, i32, i32) {
    %c0_i32 = arith.constant 0 : i32
    %c0_i32_0 = arith.constant 0 : i32
    %c0_i32_1 = arith.constant 0 : i32
    return %arg0, %c0_i32, %c0_i32_0 : i32, i32, i32
  }
  func.func @transform_5(%arg0: i32) -> (i32, i32, i32) {
    %c0_i32 = arith.constant 0 : i32
    %c0_i32_0 = arith.constant 0 : i32
    %c0_i32_1 = arith.constant 0 : i32
    return %arg0, %c0_i32, %c0_i32_0 : i32, i32, i32
  }
}

module attributes {stable_mosaic.version = 11 : i64} {
  func.func @_bn_elu_kernel(%arg0: i32, %arg1: memref<256x128xf32, #tpu.memory_space<vmem>>, %arg2: memref<1x128xf32, #tpu.memory_space<vmem>>, %arg3: memref<1x128xf32, #tpu.memory_space<vmem>>, %arg4: memref<256x128xf32, #tpu.memory_space<vmem>>) attributes {dimension_semantics = [#tpu.dimension_semantics<parallel>], iteration_bounds = array<i64: 2>, scalar_prefetch = 0 : i64, scratch_operands = 0 : i64, tpu.core_type = #tpu.core_type<tc>, window_params = [{transform_indices = @transform_0, window_bounds = array<i64: 256, 128>}, {pipeline_mode = #tpu.pipeline_mode<synchronous>, transform_indices = @transform_1, window_bounds = array<i64: 1, 128>}, {pipeline_mode = #tpu.pipeline_mode<synchronous>, transform_indices = @transform_2, window_bounds = array<i64: 1, 128>}, {transform_indices = @transform_3, window_bounds = array<i64: 256, 128>}]} {
    %c0 = arith.constant 0 : index
    %c0_0 = arith.constant 0 : index
    %0 = vector.load %arg1[%c0, %c0_0] : memref<256x128xf32, #tpu.memory_space<vmem>>, vector<256x128xf32>
    %c0_1 = arith.constant 0 : index
    %c0_2 = arith.constant 0 : index
    %1 = vector.load %arg2[%c0_1, %c0_2] : memref<1x128xf32, #tpu.memory_space<vmem>>, vector<1x128xf32>
    %2 = vector.broadcast %1 : vector<1x128xf32> to vector<256x128xf32>
    %3 = arith.mulf %0, %2 : vector<256x128xf32>
    %c0_3 = arith.constant 0 : index
    %c0_4 = arith.constant 0 : index
    %4 = vector.load %arg3[%c0_3, %c0_4] : memref<1x128xf32, #tpu.memory_space<vmem>>, vector<1x128xf32>
    %5 = vector.broadcast %4 : vector<1x128xf32> to vector<256x128xf32>
    %6 = arith.addf %3, %5 : vector<256x128xf32>
    %cst = arith.constant 0.000000e+00 : f32
    %7 = vector.broadcast %cst : f32 to vector<256x128xf32>
    %8 = arith.cmpf ogt, %6, %7 : vector<256x128xf32>
    %cst_5 = arith.constant 0.000000e+00 : f32
    %9 = vector.broadcast %cst_5 : f32 to vector<256x128xf32>
    %10 = arith.minimumf %6, %9 : vector<256x128xf32>
    %11 = math.exp %10 : vector<256x128xf32>
    %cst_6 = arith.constant 1.000000e+00 : f32
    %12 = vector.broadcast %cst_6 : f32 to vector<256x128xf32>
    %13 = arith.subf %11, %12 : vector<256x128xf32>
    %14 = arith.select %8, %6, %13 : vector<256x128xi1>, vector<256x128xf32>
    %c0_7 = arith.constant 0 : index
    %c0_8 = arith.constant 0 : index
    %15 = vector.load %arg4[%c0_7, %c0_8] : memref<256x128xf32, #tpu.memory_space<vmem>>, vector<256x128xf32>
    tpu.vector_store %arg4[%c0_7, %c0_8], %14 {strides = array<i32>} : memref<256x128xf32, #tpu.memory_space<vmem>>, vector<256x128xf32>,
    return
  }
  func.func @transform_0(%arg0: i32) -> (i32, i32) {
    %c0_i32 = arith.constant 0 : i32
    %c0_i32_0 = arith.constant 0 : i32
    return %arg0, %c0_i32 : i32, i32
  }
  func.func @transform_1(%arg0: i32) -> (i32, i32) {
    %c0_i32 = arith.constant 0 : i32
    %c0_i32_0 = arith.constant 0 : i32
    %c0_i32_1 = arith.constant 0 : i32
    return %c0_i32, %c0_i32_0 : i32, i32
  }
  func.func @transform_2(%arg0: i32) -> (i32, i32) {
    %c0_i32 = arith.constant 0 : i32
    %c0_i32_0 = arith.constant 0 : i32
    %c0_i32_1 = arith.constant 0 : i32
    return %c0_i32, %c0_i32_0 : i32, i32
  }
  func.func @transform_3(%arg0: i32) -> (i32, i32) {
    %c0_i32 = arith.constant 0 : i32
    %c0_i32_0 = arith.constant 0 : i32
    return %arg0, %c0_i32 : i32, i32
  }
}

module attributes {stable_mosaic.version = 11 : i64} {
  func.func @kernel(%arg0: i32, %arg1: i32, %arg2: memref<1x1x320x80xbf16, #tpu.memory_space<vmem>>, %arg3: memref<1x1x320x80xbf16, #tpu.memory_space<vmem>>, %arg4: memref<1x1x320x80xbf16, #tpu.memory_space<vmem>>, %arg5: memref<1x1x320x80xbf16, #tpu.memory_space<vmem>>, %arg6: memref<1x1x320x80xbf16, #tpu.memory_space<vmem>>, %arg7: memref<25x80x16xbf16, #tpu.memory_space<vmem>>, %arg8: memref<1x16xf32, #tpu.memory_space<vmem>>, %arg9: memref<1x1x256x16xf32, #tpu.memory_space<vmem>>, %arg10: memref<1x1x1x16xf32, #tpu.memory_space<vmem>>, %arg11: memref<1x1x1x16xf32, #tpu.memory_space<vmem>>) attributes {dimension_semantics = [#tpu.dimension_semantics<parallel>, #tpu.dimension_semantics<parallel>], iteration_bounds = array<i64: 2, 16>, scalar_prefetch = 0 : i64, scratch_operands = 0 : i64, tpu.core_type = #tpu.core_type<tc>, window_params = [{transform_indices = @transform_0, window_bounds = array<i64: 1, 1, 320, 80>}, {transform_indices = @transform_1, window_bounds = array<i64: 1, 1, 320, 80>}, {transform_indices = @transform_2, window_bounds = array<i64: 1, 1, 320, 80>}, {transform_indices = @transform_3, window_bounds = array<i64: 1, 1, 320, 80>}, {transform_indices = @transform_4, window_bounds = array<i64: 1, 1, 320, 80>}, {pipeline_mode = #tpu.pipeline_mode<synchronous>, transform_indices = @transform_5, window_bounds = array<i64: 25, 80, 16>}, {pipeline_mode = #tpu.pipeline_mode<synchronous>, transform_indices = @transform_6, window_bounds = array<i64: 1, 16>}, {transform_indices = @transform_7, window_bounds = array<i64: 1, 1, 256, 16>}, {transform_indices = @transform_8, window_bounds = array<i64: 1, 1, 1, 16>}, {transform_indices = @transform_9, window_bounds = array<i64: 1, 1, 1, 16>}]} {
    %cst = arith.constant 0.000000e+00 : f32
    %0 = vector.broadcast %cst : f32 to vector<256x16xf32>
    %c0 = arith.constant 0 : index
    %c0_0 = arith.constant 0 : index
    %c0_1 = arith.constant 0 : index
    %c0_2 = arith.constant 0 : index
    %1 = vector.load %arg2[%c0, %c0_0, %c0_1, %c0_2] : memref<1x1x320x80xbf16, #tpu.memory_space<vmem>>, vector<1x1x256x80xbf16>
    %2 = vector.shape_cast %1 : vector<1x1x256x80xbf16> to vector<256x80xbf16>
    %c0_3 = arith.constant 0 : index
    %c0_4 = arith.constant 0 : index
    %c0_5 = arith.constant 0 : index
    %3 = vector.load %arg7[%c0_3, %c0_4, %c0_5] : memref<25x80x16xbf16, #tpu.memory_space<vmem>>, vector<1x80x16xbf16>
    %4 = vector.shape_cast %3 : vector<1x80x16xbf16> to vector<80x16xbf16>
    %cst_6 = arith.constant dense<0.000000e+00> : vector<256x16xf32>
    %5 = tpu.matmul %2, %4, %cst_6 {dimension_numbers = #tpu.dot_dimension_numbers<[1], [0], [0], [1], [0, 0, 1, 1], [], []>} : vector<256x80xbf16>, vector<80x16xbf16>, vector<256x16xf32> -> vector<256x16xf32>
    %6 = arith.addf %0, %5 : vector<256x16xf32>
    %c0_7 = arith.constant 0 : index
    %c0_8 = arith.constant 0 : index
    %c16 = arith.constant 16 : index
    %c0_9 = arith.constant 0 : index
    %7 = vector.load %arg2[%c0_7, %c0_8, %c16, %c0_9] : memref<1x1x320x80xbf16, #tpu.memory_space<vmem>>, vector<1x1x256x80xbf16>
    %8 = vector.shape_cast %7 : vector<1x1x256x80xbf16> to vector<256x80xbf16>
    %c1 = arith.constant 1 : index
    %c0_10 = arith.constant 0 : index
    %c0_11 = arith.constant 0 : index
    %9 = vector.load %arg7[%c1, %c0_10, %c0_11] : memref<25x80x16xbf16, #tpu.memory_space<vmem>>, vector<1x80x16xbf16>
    %10 = vector.shape_cast %9 : vector<1x80x16xbf16> to vector<80x16xbf16>
    %cst_12 = arith.constant dense<0.000000e+00> : vector<256x16xf32>
    %11 = tpu.matmul %8, %10, %cst_12 {dimension_numbers = #tpu.dot_dimension_numbers<[1], [0], [0], [1], [0, 0, 1, 1], [], []>} : vector<256x80xbf16>, vector<80x16xbf16>, vector<256x16xf32> -> vector<256x16xf32>
    %12 = arith.addf %6, %11 : vector<256x16xf32>
    %c0_13 = arith.constant 0 : index
    %c0_14 = arith.constant 0 : index
    %c32 = arith.constant 32 : index
    %c0_15 = arith.constant 0 : index
    %13 = vector.load %arg2[%c0_13, %c0_14, %c32, %c0_15] : memref<1x1x320x80xbf16, #tpu.memory_space<vmem>>, vector<1x1x256x80xbf16>
    %14 = vector.shape_cast %13 : vector<1x1x256x80xbf16> to vector<256x80xbf16>
    %c2 = arith.constant 2 : index
    %c0_16 = arith.constant 0 : index
    %c0_17 = arith.constant 0 : index
    %15 = vector.load %arg7[%c2, %c0_16, %c0_17] : memref<25x80x16xbf16, #tpu.memory_space<vmem>>, vector<1x80x16xbf16>
    %16 = vector.shape_cast %15 : vector<1x80x16xbf16> to vector<80x16xbf16>
    %cst_18 = arith.constant dense<0.000000e+00> : vector<256x16xf32>
    %17 = tpu.matmul %14, %16, %cst_18 {dimension_numbers = #tpu.dot_dimension_numbers<[1], [0], [0], [1], [0, 0, 1, 1], [], []>} : vector<256x80xbf16>, vector<80x16xbf16>, vector<256x16xf32> -> vector<256x16xf32>
    %18 = arith.addf %12, %17 : vector<256x16xf32>
    %c0_19 = arith.constant 0 : index
    %c0_20 = arith.constant 0 : index
    %c48 = arith.constant 48 : index
    %c0_21 = arith.constant 0 : index
    %19 = vector.load %arg2[%c0_19, %c0_20, %c48, %c0_21] : memref<1x1x320x80xbf16, #tpu.memory_space<vmem>>, vector<1x1x256x80xbf16>
    %20 = vector.shape_cast %19 : vector<1x1x256x80xbf16> to vector<256x80xbf16>
    %c3 = arith.constant 3 : index
    %c0_22 = arith.constant 0 : index
    %c0_23 = arith.constant 0 : index
    %21 = vector.load %arg7[%c3, %c0_22, %c0_23] : memref<25x80x16xbf16, #tpu.memory_space<vmem>>, vector<1x80x16xbf16>
    %22 = vector.shape_cast %21 : vector<1x80x16xbf16> to vector<80x16xbf16>
    %cst_24 = arith.constant dense<0.000000e+00> : vector<256x16xf32>
    %23 = tpu.matmul %20, %22, %cst_24 {dimension_numbers = #tpu.dot_dimension_numbers<[1], [0], [0], [1], [0, 0, 1, 1], [], []>} : vector<256x80xbf16>, vector<80x16xbf16>, vector<256x16xf32> -> vector<256x16xf32>
    %24 = arith.addf %18, %23 : vector<256x16xf32>
    %c0_25 = arith.constant 0 : index
    %c0_26 = arith.constant 0 : index
    %c64 = arith.constant 64 : index
    %c0_27 = arith.constant 0 : index
    %25 = vector.load %arg2[%c0_25, %c0_26, %c64, %c0_27] : memref<1x1x320x80xbf16, #tpu.memory_space<vmem>>, vector<1x1x256x80xbf16>
    %26 = vector.shape_cast %25 : vector<1x1x256x80xbf16> to vector<256x80xbf16>
    %c4 = arith.constant 4 : index
    %c0_28 = arith.constant 0 : index
    %c0_29 = arith.constant 0 : index
    %27 = vector.load %arg7[%c4, %c0_28, %c0_29] : memref<25x80x16xbf16, #tpu.memory_space<vmem>>, vector<1x80x16xbf16>
    %28 = vector.shape_cast %27 : vector<1x80x16xbf16> to vector<80x16xbf16>
    %cst_30 = arith.constant dense<0.000000e+00> : vector<256x16xf32>
    %29 = tpu.matmul %26, %28, %cst_30 {dimension_numbers = #tpu.dot_dimension_numbers<[1], [0], [0], [1], [0, 0, 1, 1], [], []>} : vector<256x80xbf16>, vector<80x16xbf16>, vector<256x16xf32> -> vector<256x16xf32>
    %30 = arith.addf %24, %29 : vector<256x16xf32>
    %c0_31 = arith.constant 0 : index
    %c0_32 = arith.constant 0 : index
    %c0_33 = arith.constant 0 : index
    %c0_34 = arith.constant 0 : index
    %31 = vector.load %arg3[%c0_31, %c0_32, %c0_33, %c0_34] : memref<1x1x320x80xbf16, #tpu.memory_space<vmem>>, vector<1x1x256x80xbf16>
    %32 = vector.shape_cast %31 : vector<1x1x256x80xbf16> to vector<256x80xbf16>
    %c5 = arith.constant 5 : index
    %c0_35 = arith.constant 0 : index
    %c0_36 = arith.constant 0 : index
    %33 = vector.load %arg7[%c5, %c0_35, %c0_36] : memref<25x80x16xbf16, #tpu.memory_space<vmem>>, vector<1x80x16xbf16>
    %34 = vector.shape_cast %33 : vector<1x80x16xbf16> to vector<80x16xbf16>
    %cst_37 = arith.constant dense<0.000000e+00> : vector<256x16xf32>
    %35 = tpu.matmul %32, %34, %cst_37 {dimension_numbers = #tpu.dot_dimension_numbers<[1], [0], [0], [1], [0, 0, 1, 1], [], []>} : vector<256x80xbf16>, vector<80x16xbf16>, vector<256x16xf32> -> vector<256x16xf32>
    %36 = arith.addf %30, %35 : vector<256x16xf32>
    %c0_38 = arith.constant 0 : index
    %c0_39 = arith.constant 0 : index
    %c16_40 = arith.constant 16 : index
    %c0_41 = arith.constant 0 : index
    %37 = vector.load %arg3[%c0_38, %c0_39, %c16_40, %c0_41] : memref<1x1x320x80xbf16, #tpu.memory_space<vmem>>, vector<1x1x256x80xbf16>
    %38 = vector.shape_cast %37 : vector<1x1x256x80xbf16> to vector<256x80xbf16>
    %c6 = arith.constant 6 : index
    %c0_42 = arith.constant 0 : index
    %c0_43 = arith.constant 0 : index
    %39 = vector.load %arg7[%c6, %c0_42, %c0_43] : memref<25x80x16xbf16, #tpu.memory_space<vmem>>, vector<1x80x16xbf16>
    %40 = vector.shape_cast %39 : vector<1x80x16xbf16> to vector<80x16xbf16>
    %cst_44 = arith.constant dense<0.000000e+00> : vector<256x16xf32>
    %41 = tpu.matmul %38, %40, %cst_44 {dimension_numbers = #tpu.dot_dimension_numbers<[1], [0], [0], [1], [0, 0, 1, 1], [], []>} : vector<256x80xbf16>, vector<80x16xbf16>, vector<256x16xf32> -> vector<256x16xf32>
    %42 = arith.addf %36, %41 : vector<256x16xf32>
    %c0_45 = arith.constant 0 : index
    %c0_46 = arith.constant 0 : index
    %c32_47 = arith.constant 32 : index
    %c0_48 = arith.constant 0 : index
    %43 = vector.load %arg3[%c0_45, %c0_46, %c32_47, %c0_48] : memref<1x1x320x80xbf16, #tpu.memory_space<vmem>>, vector<1x1x256x80xbf16>
    %44 = vector.shape_cast %43 : vector<1x1x256x80xbf16> to vector<256x80xbf16>
    %c7 = arith.constant 7 : index
    %c0_49 = arith.constant 0 : index
    %c0_50 = arith.constant 0 : index
    %45 = vector.load %arg7[%c7, %c0_49, %c0_50] : memref<25x80x16xbf16, #tpu.memory_space<vmem>>, vector<1x80x16xbf16>
    %46 = vector.shape_cast %45 : vector<1x80x16xbf16> to vector<80x16xbf16>
    %cst_51 = arith.constant dense<0.000000e+00> : vector<256x16xf32>
    %47 = tpu.matmul %44, %46, %cst_51 {dimension_numbers = #tpu.dot_dimension_numbers<[1], [0], [0], [1], [0, 0, 1, 1], [], []>} : vector<256x80xbf16>, vector<80x16xbf16>, vector<256x16xf32> -> vector<256x16xf32>
    %48 = arith.addf %42, %47 : vector<256x16xf32>
    %c0_52 = arith.constant 0 : index
    %c0_53 = arith.constant 0 : index
    %c48_54 = arith.constant 48 : index
    %c0_55 = arith.constant 0 : index
    %49 = vector.load %arg3[%c0_52, %c0_53, %c48_54, %c0_55] : memref<1x1x320x80xbf16, #tpu.memory_space<vmem>>, vector<1x1x256x80xbf16>
    %50 = vector.shape_cast %49 : vector<1x1x256x80xbf16> to vector<256x80xbf16>
    %c8 = arith.constant 8 : index
    %c0_56 = arith.constant 0 : index
    %c0_57 = arith.constant 0 : index
    %51 = vector.load %arg7[%c8, %c0_56, %c0_57] : memref<25x80x16xbf16, #tpu.memory_space<vmem>>, vector<1x80x16xbf16>
    %52 = vector.shape_cast %51 : vector<1x80x16xbf16> to vector<80x16xbf16>
    %cst_58 = arith.constant dense<0.000000e+00> : vector<256x16xf32>
    %53 = tpu.matmul %50, %52, %cst_58 {dimension_numbers = #tpu.dot_dimension_numbers<[1], [0], [0], [1], [0, 0, 1, 1], [], []>} : vector<256x80xbf16>, vector<80x16xbf16>, vector<256x16xf32> -> vector<256x16xf32>
    %54 = arith.addf %48, %53 : vector<256x16xf32>
    %c0_59 = arith.constant 0 : index
    %c0_60 = arith.constant 0 : index
    %c64_61 = arith.constant 64 : index
    %c0_62 = arith.constant 0 : index
    %55 = vector.load %arg3[%c0_59, %c0_60, %c64_61, %c0_62] : memref<1x1x320x80xbf16, #tpu.memory_space<vmem>>, vector<1x1x256x80xbf16>
    %56 = vector.shape_cast %55 : vector<1x1x256x80xbf16> to vector<256x80xbf16>
    %c9 = arith.constant 9 : index
    %c0_63 = arith.constant 0 : index
    %c0_64 = arith.constant 0 : index
    %57 = vector.load %arg7[%c9, %c0_63, %c0_64] : memref<25x80x16xbf16, #tpu.memory_space<vmem>>, vector<1x80x16xbf16>
    %58 = vector.shape_cast %57 : vector<1x80x16xbf16> to vector<80x16xbf16>
    %cst_65 = arith.constant dense<0.000000e+00> : vector<256x16xf32>
    %59 = tpu.matmul %56, %58, %cst_65 {dimension_numbers = #tpu.dot_dimension_numbers<[1], [0], [0], [1], [0, 0, 1, 1], [], []>} : vector<256x80xbf16>, vector<80x16xbf16>, vector<256x16xf32> -> vector<256x16xf32>
    %60 = arith.addf %54, %59 : vector<256x16xf32>
    %c0_66 = arith.constant 0 : index
    %c0_67 = arith.constant 0 : index
    %c0_68 = arith.constant 0 : index
    %c0_69 = arith.constant 0 : index
    %61 = vector.load %arg4[%c0_66, %c0_67, %c0_68, %c0_69] : memref<1x1x320x80xbf16, #tpu.memory_space<vmem>>, vector<1x1x256x80xbf16>
    %62 = vector.shape_cast %61 : vector<1x1x256x80xbf16> to vector<256x80xbf16>
    %c10 = arith.constant 10 : index
    %c0_70 = arith.constant 0 : index
    %c0_71 = arith.constant 0 : index
    %63 = vector.load %arg7[%c10, %c0_70, %c0_71] : memref<25x80x16xbf16, #tpu.memory_space<vmem>>, vector<1x80x16xbf16>
    %64 = vector.shape_cast %63 : vector<1x80x16xbf16> to vector<80x16xbf16>
    %cst_72 = arith.constant dense<0.000000e+00> : vector<256x16xf32>
    %65 = tpu.matmul %62, %64, %cst_72 {dimension_numbers = #tpu.dot_dimension_numbers<[1], [0], [0], [1], [0, 0, 1, 1], [], []>} : vector<256x80xbf16>, vector<80x16xbf16>, vector<256x16xf32> -> vector<256x16xf32>
    %66 = arith.addf %60, %65 : vector<256x16xf32>
    %c0_73 = arith.constant 0 : index
    %c0_74 = arith.constant 0 : index
    %c16_75 = arith.constant 16 : index
    %c0_76 = arith.constant 0 : index
    %67 = vector.load %arg4[%c0_73, %c0_74, %c16_75, %c0_76] : memref<1x1x320x80xbf16, #tpu.memory_space<vmem>>, vector<1x1x256x80xbf16>
    %68 = vector.shape_cast %67 : vector<1x1x256x80xbf16> to vector<256x80xbf16>
    %c11 = arith.constant 11 : index
    %c0_77 = arith.constant 0 : index
    %c0_78 = arith.constant 0 : index
    %69 = vector.load %arg7[%c11, %c0_77, %c0_78] : memref<25x80x16xbf16, #tpu.memory_space<vmem>>, vector<1x80x16xbf16>
    %70 = vector.shape_cast %69 : vector<1x80x16xbf16> to vector<80x16xbf16>
    %cst_79 = arith.constant dense<0.000000e+00> : vector<256x16xf32>
    %71 = tpu.matmul %68, %70, %cst_79 {dimension_numbers = #tpu.dot_dimension_numbers<[1], [0], [0], [1], [0, 0, 1, 1], [], []>} : vector<256x80xbf16>, vector<80x16xbf16>, vector<256x16xf32> -> vector<256x16xf32>
    %72 = arith.addf %66, %71 : vector<256x16xf32>
    %c0_80 = arith.constant 0 : index
    %c0_81 = arith.constant 0 : index
    %c32_82 = arith.constant 32 : index
    %c0_83 = arith.constant 0 : index
    %73 = vector.load %arg4[%c0_80, %c0_81, %c32_82, %c0_83] : memref<1x1x320x80xbf16, #tpu.memory_space<vmem>>, vector<1x1x256x80xbf16>
    %74 = vector.shape_cast %73 : vector<1x1x256x80xbf16> to vector<256x80xbf16>
    %c12 = arith.constant 12 : index
    %c0_84 = arith.constant 0 : index
    %c0_85 = arith.constant 0 : index
    %75 = vector.load %arg7[%c12, %c0_84, %c0_85] : memref<25x80x16xbf16, #tpu.memory_space<vmem>>, vector<1x80x16xbf16>
    %76 = vector.shape_cast %75 : vector<1x80x16xbf16> to vector<80x16xbf16>
    %cst_86 = arith.constant dense<0.000000e+00> : vector<256x16xf32>
    %77 = tpu.matmul %74, %76, %cst_86 {dimension_numbers = #tpu.dot_dimension_numbers<[1], [0], [0], [1], [0, 0, 1, 1], [], []>} : vector<256x80xbf16>, vector<80x16xbf16>, vector<256x16xf32> -> vector<256x16xf32>
    %78 = arith.addf %72, %77 : vector<256x16xf32>
    %c0_87 = arith.constant 0 : index
    %c0_88 = arith.constant 0 : index
    %c48_89 = arith.constant 48 : index
    %c0_90 = arith.constant 0 : index
    %79 = vector.load %arg4[%c0_87, %c0_88, %c48_89, %c0_90] : memref<1x1x320x80xbf16, #tpu.memory_space<vmem>>, vector<1x1x256x80xbf16>
    %80 = vector.shape_cast %79 : vector<1x1x256x80xbf16> to vector<256x80xbf16>
    %c13 = arith.constant 13 : index
    %c0_91 = arith.constant 0 : index
    %c0_92 = arith.constant 0 : index
    %81 = vector.load %arg7[%c13, %c0_91, %c0_92] : memref<25x80x16xbf16, #tpu.memory_space<vmem>>, vector<1x80x16xbf16>
    %82 = vector.shape_cast %81 : vector<1x80x16xbf16> to vector<80x16xbf16>
    %cst_93 = arith.constant dense<0.000000e+00> : vector<256x16xf32>
    %83 = tpu.matmul %80, %82, %cst_93 {dimension_numbers = #tpu.dot_dimension_numbers<[1], [0], [0], [1], [0, 0, 1, 1], [], []>} : vector<256x80xbf16>, vector<80x16xbf16>, vector<256x16xf32> -> vector<256x16xf32>
    %84 = arith.addf %78, %83 : vector<256x16xf32>
    %c0_94 = arith.constant 0 : index
    %c0_95 = arith.constant 0 : index
    %c64_96 = arith.constant 64 : index
    %c0_97 = arith.constant 0 : index
    %85 = vector.load %arg4[%c0_94, %c0_95, %c64_96, %c0_97] : memref<1x1x320x80xbf16, #tpu.memory_space<vmem>>, vector<1x1x256x80xbf16>
    %86 = vector.shape_cast %85 : vector<1x1x256x80xbf16> to vector<256x80xbf16>
    %c14 = arith.constant 14 : index
    %c0_98 = arith.constant 0 : index
    %c0_99 = arith.constant 0 : index
    %87 = vector.load %arg7[%c14, %c0_98, %c0_99] : memref<25x80x16xbf16, #tpu.memory_space<vmem>>, vector<1x80x16xbf16>
    %88 = vector.shape_cast %87 : vector<1x80x16xbf16> to vector<80x16xbf16>
    %cst_100 = arith.constant dense<0.000000e+00> : vector<256x16xf32>
    %89 = tpu.matmul %86, %88, %cst_100 {dimension_numbers = #tpu.dot_dimension_numbers<[1], [0], [0], [1], [0, 0, 1, 1], [], []>} : vector<256x80xbf16>, vector<80x16xbf16>, vector<256x16xf32> -> vector<256x16xf32>
    %90 = arith.addf %84, %89 : vector<256x16xf32>
    %c0_101 = arith.constant 0 : index
    %c0_102 = arith.constant 0 : index
    %c0_103 = arith.constant 0 : index
    %c0_104 = arith.constant 0 : index
    %91 = vector.load %arg5[%c0_101, %c0_102, %c0_103, %c0_104] : memref<1x1x320x80xbf16, #tpu.memory_space<vmem>>, vector<1x1x256x80xbf16>
    %92 = vector.shape_cast %91 : vector<1x1x256x80xbf16> to vector<256x80xbf16>
    %c15 = arith.constant 15 : index
    %c0_105 = arith.constant 0 : index
    %c0_106 = arith.constant 0 : index
    %93 = vector.load %arg7[%c15, %c0_105, %c0_106] : memref<25x80x16xbf16, #tpu.memory_space<vmem>>, vector<1x80x16xbf16>
    %94 = vector.shape_cast %93 : vector<1x80x16xbf16> to vector<80x16xbf16>
    %cst_107 = arith.constant dense<0.000000e+00> : vector<256x16xf32>
    %95 = tpu.matmul %92, %94, %cst_107 {dimension_numbers = #tpu.dot_dimension_numbers<[1], [0], [0], [1], [0, 0, 1, 1], [], []>} : vector<256x80xbf16>, vector<80x16xbf16>, vector<256x16xf32> -> vector<256x16xf32>
    %96 = arith.addf %90, %95 : vector<256x16xf32>
    %c0_108 = arith.constant 0 : index
    %c0_109 = arith.constant 0 : index
    %c16_110 = arith.constant 16 : index
    %c0_111 = arith.constant 0 : index
    %97 = vector.load %arg5[%c0_108, %c0_109, %c16_110, %c0_111] : memref<1x1x320x80xbf16, #tpu.memory_space<vmem>>, vector<1x1x256x80xbf16>
    %98 = vector.shape_cast %97 : vector<1x1x256x80xbf16> to vector<256x80xbf16>
    %c16_112 = arith.constant 16 : index
    %c0_113 = arith.constant 0 : index
    %c0_114 = arith.constant 0 : index
    %99 = vector.load %arg7[%c16_112, %c0_113, %c0_114] : memref<25x80x16xbf16, #tpu.memory_space<vmem>>, vector<1x80x16xbf16>
    %100 = vector.shape_cast %99 : vector<1x80x16xbf16> to vector<80x16xbf16>
    %cst_115 = arith.constant dense<0.000000e+00> : vector<256x16xf32>
    %101 = tpu.matmul %98, %100, %cst_115 {dimension_numbers = #tpu.dot_dimension_numbers<[1], [0], [0], [1], [0, 0, 1, 1], [], []>} : vector<256x80xbf16>, vector<80x16xbf16>, vector<256x16xf32> -> vector<256x16xf32>
    %102 = arith.addf %96, %101 : vector<256x16xf32>
    %c0_116 = arith.constant 0 : index
    %c0_117 = arith.constant 0 : index
    %c32_118 = arith.constant 32 : index
    %c0_119 = arith.constant 0 : index
    %103 = vector.load %arg5[%c0_116, %c0_117, %c32_118, %c0_119] : memref<1x1x320x80xbf16, #tpu.memory_space<vmem>>, vector<1x1x256x80xbf16>
    %104 = vector.shape_cast %103 : vector<1x1x256x80xbf16> to vector<256x80xbf16>
    %c17 = arith.constant 17 : index
    %c0_120 = arith.constant 0 : index
    %c0_121 = arith.constant 0 : index
    %105 = vector.load %arg7[%c17, %c0_120, %c0_121] : memref<25x80x16xbf16, #tpu.memory_space<vmem>>, vector<1x80x16xbf16>
    %106 = vector.shape_cast %105 : vector<1x80x16xbf16> to vector<80x16xbf16>
    %cst_122 = arith.constant dense<0.000000e+00> : vector<256x16xf32>
    %107 = tpu.matmul %104, %106, %cst_122 {dimension_numbers = #tpu.dot_dimension_numbers<[1], [0], [0], [1], [0, 0, 1, 1], [], []>} : vector<256x80xbf16>, vector<80x16xbf16>, vector<256x16xf32> -> vector<256x16xf32>
    %108 = arith.addf %102, %107 : vector<256x16xf32>
    %c0_123 = arith.constant 0 : index
    %c0_124 = arith.constant 0 : index
    %c48_125 = arith.constant 48 : index
    %c0_126 = arith.constant 0 : index
    %109 = vector.load %arg5[%c0_123, %c0_124, %c48_125, %c0_126] : memref<1x1x320x80xbf16, #tpu.memory_space<vmem>>, vector<1x1x256x80xbf16>
    %110 = vector.shape_cast %109 : vector<1x1x256x80xbf16> to vector<256x80xbf16>
    %c18 = arith.constant 18 : index
    %c0_127 = arith.constant 0 : index
    %c0_128 = arith.constant 0 : index
    %111 = vector.load %arg7[%c18, %c0_127, %c0_128] : memref<25x80x16xbf16, #tpu.memory_space<vmem>>, vector<1x80x16xbf16>
    %112 = vector.shape_cast %111 : vector<1x80x16xbf16> to vector<80x16xbf16>
    %cst_129 = arith.constant dense<0.000000e+00> : vector<256x16xf32>
    %113 = tpu.matmul %110, %112, %cst_129 {dimension_numbers = #tpu.dot_dimension_numbers<[1], [0], [0], [1], [0, 0, 1, 1], [], []>} : vector<256x80xbf16>, vector<80x16xbf16>, vector<256x16xf32> -> vector<256x16xf32>
    %114 = arith.addf %108, %113 : vector<256x16xf32>
    %c0_130 = arith.constant 0 : index
    %c0_131 = arith.constant 0 : index
    %c64_132 = arith.constant 64 : index
    %c0_133 = arith.constant 0 : index
    %115 = vector.load %arg5[%c0_130, %c0_131, %c64_132, %c0_133] : memref<1x1x320x80xbf16, #tpu.memory_space<vmem>>, vector<1x1x256x80xbf16>
    %116 = vector.shape_cast %115 : vector<1x1x256x80xbf16> to vector<256x80xbf16>
    %c19 = arith.constant 19 : index
    %c0_134 = arith.constant 0 : index
    %c0_135 = arith.constant 0 : index
    %117 = vector.load %arg7[%c19, %c0_134, %c0_135] : memref<25x80x16xbf16, #tpu.memory_space<vmem>>, vector<1x80x16xbf16>
    %118 = vector.shape_cast %117 : vector<1x80x16xbf16> to vector<80x16xbf16>
    %cst_136 = arith.constant dense<0.000000e+00> : vector<256x16xf32>
    %119 = tpu.matmul %116, %118, %cst_136 {dimension_numbers = #tpu.dot_dimension_numbers<[1], [0], [0], [1], [0, 0, 1, 1], [], []>} : vector<256x80xbf16>, vector<80x16xbf16>, vector<256x16xf32> -> vector<256x16xf32>
    %120 = arith.addf %114, %119 : vector<256x16xf32>
    %c0_137 = arith.constant 0 : index
    %c0_138 = arith.constant 0 : index
    %c0_139 = arith.constant 0 : index
    %c0_140 = arith.constant 0 : index
    %121 = vector.load %arg6[%c0_137, %c0_138, %c0_139, %c0_140] : memref<1x1x320x80xbf16, #tpu.memory_space<vmem>>, vector<1x1x256x80xbf16>
    %122 = vector.shape_cast %121 : vector<1x1x256x80xbf16> to vector<256x80xbf16>
    %c20 = arith.constant 20 : index
    %c0_141 = arith.constant 0 : index
    %c0_142 = arith.constant 0 : index
    %123 = vector.load %arg7[%c20, %c0_141, %c0_142] : memref<25x80x16xbf16, #tpu.memory_space<vmem>>, vector<1x80x16xbf16>
    %124 = vector.shape_cast %123 : vector<1x80x16xbf16> to vector<80x16xbf16>
    %cst_143 = arith.constant dense<0.000000e+00> : vector<256x16xf32>
    %125 = tpu.matmul %122, %124, %cst_143 {dimension_numbers = #tpu.dot_dimension_numbers<[1], [0], [0], [1], [0, 0, 1, 1], [], []>} : vector<256x80xbf16>, vector<80x16xbf16>, vector<256x16xf32> -> vector<256x16xf32>
    %126 = arith.addf %120, %125 : vector<256x16xf32>
    %c0_144 = arith.constant 0 : index
    %c0_145 = arith.constant 0 : index
    %c16_146 = arith.constant 16 : index
    %c0_147 = arith.constant 0 : index
    %127 = vector.load %arg6[%c0_144, %c0_145, %c16_146, %c0_147] : memref<1x1x320x80xbf16, #tpu.memory_space<vmem>>, vector<1x1x256x80xbf16>
    %128 = vector.shape_cast %127 : vector<1x1x256x80xbf16> to vector<256x80xbf16>
    %c21 = arith.constant 21 : index
    %c0_148 = arith.constant 0 : index
    %c0_149 = arith.constant 0 : index
    %129 = vector.load %arg7[%c21, %c0_148, %c0_149] : memref<25x80x16xbf16, #tpu.memory_space<vmem>>, vector<1x80x16xbf16>
    %130 = vector.shape_cast %129 : vector<1x80x16xbf16> to vector<80x16xbf16>
    %cst_150 = arith.constant dense<0.000000e+00> : vector<256x16xf32>
    %131 = tpu.matmul %128, %130, %cst_150 {dimension_numbers = #tpu.dot_dimension_numbers<[1], [0], [0], [1], [0, 0, 1, 1], [], []>} : vector<256x80xbf16>, vector<80x16xbf16>, vector<256x16xf32> -> vector<256x16xf32>
    %132 = arith.addf %126, %131 : vector<256x16xf32>
    %c0_151 = arith.constant 0 : index
    %c0_152 = arith.constant 0 : index
    %c32_153 = arith.constant 32 : index
    %c0_154 = arith.constant 0 : index
    %133 = vector.load %arg6[%c0_151, %c0_152, %c32_153, %c0_154] : memref<1x1x320x80xbf16, #tpu.memory_space<vmem>>, vector<1x1x256x80xbf16>
    %134 = vector.shape_cast %133 : vector<1x1x256x80xbf16> to vector<256x80xbf16>
    %c22 = arith.constant 22 : index
    %c0_155 = arith.constant 0 : index
    %c0_156 = arith.constant 0 : index
    %135 = vector.load %arg7[%c22, %c0_155, %c0_156] : memref<25x80x16xbf16, #tpu.memory_space<vmem>>, vector<1x80x16xbf16>
    %136 = vector.shape_cast %135 : vector<1x80x16xbf16> to vector<80x16xbf16>
    %cst_157 = arith.constant dense<0.000000e+00> : vector<256x16xf32>
    %137 = tpu.matmul %134, %136, %cst_157 {dimension_numbers = #tpu.dot_dimension_numbers<[1], [0], [0], [1], [0, 0, 1, 1], [], []>} : vector<256x80xbf16>, vector<80x16xbf16>, vector<256x16xf32> -> vector<256x16xf32>
    %138 = arith.addf %132, %137 : vector<256x16xf32>
    %c0_158 = arith.constant 0 : index
    %c0_159 = arith.constant 0 : index
    %c48_160 = arith.constant 48 : index
    %c0_161 = arith.constant 0 : index
    %139 = vector.load %arg6[%c0_158, %c0_159, %c48_160, %c0_161] : memref<1x1x320x80xbf16, #tpu.memory_space<vmem>>, vector<1x1x256x80xbf16>
    %140 = vector.shape_cast %139 : vector<1x1x256x80xbf16> to vector<256x80xbf16>
    %c23 = arith.constant 23 : index
    %c0_162 = arith.constant 0 : index
    %c0_163 = arith.constant 0 : index
    %141 = vector.load %arg7[%c23, %c0_162, %c0_163] : memref<25x80x16xbf16, #tpu.memory_space<vmem>>, vector<1x80x16xbf16>
    %142 = vector.shape_cast %141 : vector<1x80x16xbf16> to vector<80x16xbf16>
    %cst_164 = arith.constant dense<0.000000e+00> : vector<256x16xf32>
    %143 = tpu.matmul %140, %142, %cst_164 {dimension_numbers = #tpu.dot_dimension_numbers<[1], [0], [0], [1], [0, 0, 1, 1], [], []>} : vector<256x80xbf16>, vector<80x16xbf16>, vector<256x16xf32> -> vector<256x16xf32>
    %144 = arith.addf %138, %143 : vector<256x16xf32>
    %c0_165 = arith.constant 0 : index
    %c0_166 = arith.constant 0 : index
    %c64_167 = arith.constant 64 : index
    %c0_168 = arith.constant 0 : index
    %145 = vector.load %arg6[%c0_165, %c0_166, %c64_167, %c0_168] : memref<1x1x320x80xbf16, #tpu.memory_space<vmem>>, vector<1x1x256x80xbf16>
    %146 = vector.shape_cast %145 : vector<1x1x256x80xbf16> to vector<256x80xbf16>
    %c24 = arith.constant 24 : index
    %c0_169 = arith.constant 0 : index
    %c0_170 = arith.constant 0 : index
    %147 = vector.load %arg7[%c24, %c0_169, %c0_170] : memref<25x80x16xbf16, #tpu.memory_space<vmem>>, vector<1x80x16xbf16>
    %148 = vector.shape_cast %147 : vector<1x80x16xbf16> to vector<80x16xbf16>
    %cst_171 = arith.constant dense<0.000000e+00> : vector<256x16xf32>
    %149 = tpu.matmul %146, %148, %cst_171 {dimension_numbers = #tpu.dot_dimension_numbers<[1], [0], [0], [1], [0, 0, 1, 1], [], []>} : vector<256x80xbf16>, vector<80x16xbf16>, vector<256x16xf32> -> vector<256x16xf32>
    %150 = arith.addf %144, %149 : vector<256x16xf32>
    %c0_172 = arith.constant 0 : index
    %c0_173 = arith.constant 0 : index
    %151 = vector.load %arg8[%c0_172, %c0_173] : memref<1x16xf32, #tpu.memory_space<vmem>>, vector<1x16xf32>
    %152 = vector.broadcast %151 : vector<1x16xf32> to vector<256x16xf32>
    %153 = arith.addf %150, %152 : vector<256x16xf32>
    %c0_174 = arith.constant 0 : index
    %c0_175 = arith.constant 0 : index
    %c0_176 = arith.constant 0 : index
    %c0_177 = arith.constant 0 : index
    %154 = vector.load %arg9[%c0_174, %c0_175, %c0_176, %c0_177] : memref<1x1x256x16xf32, #tpu.memory_space<vmem>>, vector<1x1x256x16xf32>
    %155 = vector.shape_cast %154 : vector<1x1x256x16xf32> to vector<256x16xf32>
    %156 = vector.shape_cast %153 : vector<256x16xf32> to vector<1x1x256x16xf32>
    tpu.vector_store %arg9[%c0_174, %c0_175, %c0_176, %c0_177], %156 {strides = array<i32>} : memref<1x1x256x16xf32, #tpu.memory_space<vmem>>, vector<1x1x256x16xf32>,
    %cst_178 = arith.constant dense<0.000000e+00> : vector<16xf32>
    %157 = vector.multi_reduction <add>, %153, %cst_178 [0] : vector<256x16xf32> to vector<16xf32>
    %158 = vector.shape_cast %157 : vector<16xf32> to vector<1x16xf32>
    %cst_179 = arith.constant 3.906250e-03 : f32
    %159 = vector.broadcast %cst_179 : f32 to vector<1x16xf32>
    %160 = arith.mulf %158, %159 : vector<1x16xf32>
    %161 = vector.broadcast %160 : vector<1x16xf32> to vector<256x16xf32>
    %162 = arith.subf %153, %161 : vector<256x16xf32>
    %c0_180 = arith.constant 0 : index
    %c0_181 = arith.constant 0 : index
    %c0_182 = arith.constant 0 : index
    %c0_183 = arith.constant 0 : index
    %163 = vector.load %arg10[%c0_180, %c0_181, %c0_182, %c0_183] : memref<1x1x1x16xf32, #tpu.memory_space<vmem>>, vector<1x1x1x16xf32>
    %164 = vector.shape_cast %163 : vector<1x1x1x16xf32> to vector<1x16xf32>
    %165 = vector.shape_cast %158 : vector<1x16xf32> to vector<1x1x1x16xf32>
    tpu.vector_store %arg10[%c0_180, %c0_181, %c0_182, %c0_183], %165 {strides = array<i32>} : memref<1x1x1x16xf32, #tpu.memory_space<vmem>>, vector<1x1x1x16xf32>,
    %166 = arith.mulf %162, %162 : vector<256x16xf32>
    %cst_184 = arith.constant dense<0.000000e+00> : vector<16xf32>
    %167 = vector.multi_reduction <add>, %166, %cst_184 [0] : vector<256x16xf32> to vector<16xf32>
    %168 = vector.shape_cast %167 : vector<16xf32> to vector<1x16xf32>
    %c0_185 = arith.constant 0 : index
    %c0_186 = arith.constant 0 : index
    %c0_187 = arith.constant 0 : index
    %c0_188 = arith.constant 0 : index
    %169 = vector.load %arg11[%c0_185, %c0_186, %c0_187, %c0_188] : memref<1x1x1x16xf32, #tpu.memory_space<vmem>>, vector<1x1x1x16xf32>
    %170 = vector.shape_cast %169 : vector<1x1x1x16xf32> to vector<1x16xf32>
    %171 = vector.shape_cast %168 : vector<1x16xf32> to vector<1x1x1x16xf32>
    tpu.vector_store %arg11[%c0_185, %c0_186, %c0_187, %c0_188], %171 {strides = array<i32>} : memref<1x1x1x16xf32, #tpu.memory_space<vmem>>, vector<1x1x1x16xf32>,
    return
  }
  func.func @transform_0(%arg0: i32, %arg1: i32) -> (i32, i32, i32, i32) {
    %c0_i32 = arith.constant 0 : i32
    %0 = arith.addi %arg1, %c0_i32 : i32
    %c0_i32_0 = arith.constant 0 : i32
    %c0_i32_1 = arith.constant 0 : i32
    %c0_i32_2 = arith.constant 0 : i32
    return %arg0, %0, %c0_i32_0, %c0_i32_1 : i32, i32, i32, i32
  }
  func.func @transform_1(%arg0: i32, %arg1: i32) -> (i32, i32, i32, i32) {
    %c1_i32 = arith.constant 1 : i32
    %0 = arith.addi %arg1, %c1_i32 : i32
    %c0_i32 = arith.constant 0 : i32
    %c0_i32_0 = arith.constant 0 : i32
    %c0_i32_1 = arith.constant 0 : i32
    return %arg0, %0, %c0_i32, %c0_i32_0 : i32, i32, i32, i32
  }
  func.func @transform_2(%arg0: i32, %arg1: i32) -> (i32, i32, i32, i32) {
    %c2_i32 = arith.constant 2 : i32
    %0 = arith.addi %arg1, %c2_i32 : i32
    %c0_i32 = arith.constant 0 : i32
    %c0_i32_0 = arith.constant 0 : i32
    %c0_i32_1 = arith.constant 0 : i32
    return %arg0, %0, %c0_i32, %c0_i32_0 : i32, i32, i32, i32
  }
  func.func @transform_3(%arg0: i32, %arg1: i32) -> (i32, i32, i32, i32) {
    %c3_i32 = arith.constant 3 : i32
    %0 = arith.addi %arg1, %c3_i32 : i32
    %c0_i32 = arith.constant 0 : i32
    %c0_i32_0 = arith.constant 0 : i32
    %c0_i32_1 = arith.constant 0 : i32
    return %arg0, %0, %c0_i32, %c0_i32_0 : i32, i32, i32, i32
  }
  func.func @transform_4(%arg0: i32, %arg1: i32) -> (i32, i32, i32, i32) {
    %c4_i32 = arith.constant 4 : i32
    %0 = arith.addi %arg1, %c4_i32 : i32
    %c0_i32 = arith.constant 0 : i32
    %c0_i32_0 = arith.constant 0 : i32
    %c0_i32_1 = arith.constant 0 : i32
    return %arg0, %0, %c0_i32, %c0_i32_0 : i32, i32, i32, i32
  }
  func.func @transform_5(%arg0: i32, %arg1: i32) -> (i32, i32, i32) {
    %c0_i32 = arith.constant 0 : i32
    %c0_i32_0 = arith.constant 0 : i32
    %c0_i32_1 = arith.constant 0 : i32
    %c0_i32_2 = arith.constant 0 : i32
    return %c0_i32, %c0_i32_0, %c0_i32_1 : i32, i32, i32
  }
  func.func @transform_6(%arg0: i32, %arg1: i32) -> (i32, i32) {
    %c0_i32 = arith.constant 0 : i32
    %c0_i32_0 = arith.constant 0 : i32
    %c0_i32_1 = arith.constant 0 : i32
    return %c0_i32, %c0_i32_0 : i32, i32
  }
  func.func @transform_7(%arg0: i32, %arg1: i32) -> (i32, i32, i32, i32) {
    %c0_i32 = arith.constant 0 : i32
    %c0_i32_0 = arith.constant 0 : i32
    %c0_i32_1 = arith.constant 0 : i32
    return %arg0, %arg1, %c0_i32, %c0_i32_0 : i32, i32, i32, i32
  }
  func.func @transform_8(%arg0: i32, %arg1: i32) -> (i32, i32, i32, i32) {
    %c0_i32 = arith.constant 0 : i32
    %c0_i32_0 = arith.constant 0 : i32
    %c0_i32_1 = arith.constant 0 : i32
    return %arg0, %arg1, %c0_i32, %c0_i32_0 : i32, i32, i32, i32
  }
  func.func @transform_9(%arg0: i32, %arg1: i32) -> (i32, i32, i32, i32) {
    %c0_i32 = arith.constant 0 : i32
    %c0_i32_0 = arith.constant 0 : i32
    %c0_i32_1 = arith.constant 0 : i32
    return %arg0, %arg1, %c0_i32, %c0_i32_0 : i32, i32, i32, i32
  }
}

module attributes {stable_mosaic.version = 11 : i64} {
  func.func @_bn_elu_kernel(%arg0: i32, %arg1: memref<256x128xf32, #tpu.memory_space<vmem>>, %arg2: memref<1x128xf32, #tpu.memory_space<vmem>>, %arg3: memref<1x128xf32, #tpu.memory_space<vmem>>, %arg4: memref<256x128xf32, #tpu.memory_space<vmem>>) attributes {dimension_semantics = [#tpu.dimension_semantics<parallel>], iteration_bounds = array<i64: 4>, scalar_prefetch = 0 : i64, scratch_operands = 0 : i64, tpu.core_type = #tpu.core_type<tc>, window_params = [{transform_indices = @transform_0, window_bounds = array<i64: 256, 128>}, {pipeline_mode = #tpu.pipeline_mode<synchronous>, transform_indices = @transform_1, window_bounds = array<i64: 1, 128>}, {pipeline_mode = #tpu.pipeline_mode<synchronous>, transform_indices = @transform_2, window_bounds = array<i64: 1, 128>}, {transform_indices = @transform_3, window_bounds = array<i64: 256, 128>}]} {
    %c0 = arith.constant 0 : index
    %c0_0 = arith.constant 0 : index
    %0 = vector.load %arg1[%c0, %c0_0] : memref<256x128xf32, #tpu.memory_space<vmem>>, vector<256x128xf32>
    %c0_1 = arith.constant 0 : index
    %c0_2 = arith.constant 0 : index
    %1 = vector.load %arg2[%c0_1, %c0_2] : memref<1x128xf32, #tpu.memory_space<vmem>>, vector<1x128xf32>
    %2 = vector.broadcast %1 : vector<1x128xf32> to vector<256x128xf32>
    %3 = arith.mulf %0, %2 : vector<256x128xf32>
    %c0_3 = arith.constant 0 : index
    %c0_4 = arith.constant 0 : index
    %4 = vector.load %arg3[%c0_3, %c0_4] : memref<1x128xf32, #tpu.memory_space<vmem>>, vector<1x128xf32>
    %5 = vector.broadcast %4 : vector<1x128xf32> to vector<256x128xf32>
    %6 = arith.addf %3, %5 : vector<256x128xf32>
    %cst = arith.constant 0.000000e+00 : f32
    %7 = vector.broadcast %cst : f32 to vector<256x128xf32>
    %8 = arith.cmpf ogt, %6, %7 : vector<256x128xf32>
    %cst_5 = arith.constant 0.000000e+00 : f32
    %9 = vector.broadcast %cst_5 : f32 to vector<256x128xf32>
    %10 = arith.minimumf %6, %9 : vector<256x128xf32>
    %11 = math.exp %10 : vector<256x128xf32>
    %cst_6 = arith.constant 1.000000e+00 : f32
    %12 = vector.broadcast %cst_6 : f32 to vector<256x128xf32>
    %13 = arith.subf %11, %12 : vector<256x128xf32>
    %14 = arith.select %8, %6, %13 : vector<256x128xi1>, vector<256x128xf32>
    %c0_7 = arith.constant 0 : index
    %c0_8 = arith.constant 0 : index
    %15 = vector.load %arg4[%c0_7, %c0_8] : memref<256x128xf32, #tpu.memory_space<vmem>>, vector<256x128xf32>
    tpu.vector_store %arg4[%c0_7, %c0_8], %14 {strides = array<i32>} : memref<256x128xf32, #tpu.memory_space<vmem>>, vector<256x128xf32>,
    return
  }
  func.func @transform_0(%arg0: i32) -> (i32, i32) {
    %c0_i32 = arith.constant 0 : i32
    %c0_i32_0 = arith.constant 0 : i32
    return %arg0, %c0_i32 : i32, i32
  }
  func.func @transform_1(%arg0: i32) -> (i32, i32) {
    %c0_i32 = arith.constant 0 : i32
    %c0_i32_0 = arith.constant 0 : i32
    %c0_i32_1 = arith.constant 0 : i32
    return %c0_i32, %c0_i32_0 : i32, i32
  }
  func.func @transform_2(%arg0: i32) -> (i32, i32) {
    %c0_i32 = arith.constant 0 : i32
    %c0_i32_0 = arith.constant 0 : i32
    %c0_i32_1 = arith.constant 0 : i32
    return %c0_i32, %c0_i32_0 : i32, i32
  }
  func.func @transform_3(%arg0: i32) -> (i32, i32) {
    %c0_i32 = arith.constant 0 : i32
    %c0_i32_0 = arith.constant 0 : i32
    return %arg0, %c0_i32 : i32, i32
  }
}

module attributes {stable_mosaic.version = 11 : i64} {
  func.func @_bn_elu_add_elu_kernel(%arg0: i32, %arg1: memref<256x128xf32, #tpu.memory_space<vmem>>, %arg2: memref<256x128xf32, #tpu.memory_space<vmem>>, %arg3: memref<1x128xf32, #tpu.memory_space<vmem>>, %arg4: memref<1x128xf32, #tpu.memory_space<vmem>>, %arg5: memref<256x128xf32, #tpu.memory_space<vmem>>) attributes {dimension_semantics = [#tpu.dimension_semantics<parallel>], iteration_bounds = array<i64: 4>, scalar_prefetch = 0 : i64, scratch_operands = 0 : i64, tpu.core_type = #tpu.core_type<tc>, window_params = [{transform_indices = @transform_0, window_bounds = array<i64: 256, 128>}, {transform_indices = @transform_1, window_bounds = array<i64: 256, 128>}, {pipeline_mode = #tpu.pipeline_mode<synchronous>, transform_indices = @transform_2, window_bounds = array<i64: 1, 128>}, {pipeline_mode = #tpu.pipeline_mode<synchronous>, transform_indices = @transform_3, window_bounds = array<i64: 1, 128>}, {transform_indices = @transform_4, window_bounds = array<i64: 256, 128>}]} {
    %c0 = arith.constant 0 : index
    %c0_0 = arith.constant 0 : index
    %0 = vector.load %arg1[%c0, %c0_0] : memref<256x128xf32, #tpu.memory_space<vmem>>, vector<256x128xf32>
    %c0_1 = arith.constant 0 : index
    %c0_2 = arith.constant 0 : index
    %1 = vector.load %arg3[%c0_1, %c0_2] : memref<1x128xf32, #tpu.memory_space<vmem>>, vector<1x128xf32>
    %2 = vector.broadcast %1 : vector<1x128xf32> to vector<256x128xf32>
    %3 = arith.mulf %0, %2 : vector<256x128xf32>
    %c0_3 = arith.constant 0 : index
    %c0_4 = arith.constant 0 : index
    %4 = vector.load %arg4[%c0_3, %c0_4] : memref<1x128xf32, #tpu.memory_space<vmem>>, vector<1x128xf32>
    %5 = vector.broadcast %4 : vector<1x128xf32> to vector<256x128xf32>
    %6 = arith.addf %3, %5 : vector<256x128xf32>
    %cst = arith.constant 0.000000e+00 : f32
    %7 = vector.broadcast %cst : f32 to vector<256x128xf32>
    %8 = arith.cmpf ogt, %6, %7 : vector<256x128xf32>
    %cst_5 = arith.constant 0.000000e+00 : f32
    %9 = vector.broadcast %cst_5 : f32 to vector<256x128xf32>
    %10 = arith.minimumf %6, %9 : vector<256x128xf32>
    %11 = math.exp %10 : vector<256x128xf32>
    %cst_6 = arith.constant 1.000000e+00 : f32
    %12 = vector.broadcast %cst_6 : f32 to vector<256x128xf32>
    %13 = arith.subf %11, %12 : vector<256x128xf32>
    %14 = arith.select %8, %6, %13 : vector<256x128xi1>, vector<256x128xf32>
    %c0_7 = arith.constant 0 : index
    %c0_8 = arith.constant 0 : index
    %15 = vector.load %arg2[%c0_7, %c0_8] : memref<256x128xf32, #tpu.memory_space<vmem>>, vector<256x128xf32>
    %16 = arith.addf %14, %15 : vector<256x128xf32>
    %cst_9 = arith.constant 0.000000e+00 : f32
    %17 = vector.broadcast %cst_9 : f32 to vector<256x128xf32>
    %18 = arith.cmpf ogt, %16, %17 : vector<256x128xf32>
    %cst_10 = arith.constant 0.000000e+00 : f32
    %19 = vector.broadcast %cst_10 : f32 to vector<256x128xf32>
    %20 = arith.minimumf %16, %19 : vector<256x128xf32>
    %21 = math.exp %20 : vector<256x128xf32>
    %cst_11 = arith.constant 1.000000e+00 : f32
    %22 = vector.broadcast %cst_11 : f32 to vector<256x128xf32>
    %23 = arith.subf %21, %22 : vector<256x128xf32>
    %24 = arith.select %18, %16, %23 : vector<256x128xi1>, vector<256x128xf32>
    %c0_12 = arith.constant 0 : index
    %c0_13 = arith.constant 0 : index
    %25 = vector.load %arg5[%c0_12, %c0_13] : memref<256x128xf32, #tpu.memory_space<vmem>>, vector<256x128xf32>
    tpu.vector_store %arg5[%c0_12, %c0_13], %24 {strides = array<i32>} : memref<256x128xf32, #tpu.memory_space<vmem>>, vector<256x128xf32>,
    return
  }
  func.func @transform_0(%arg0: i32) -> (i32, i32) {
    %c0_i32 = arith.constant 0 : i32
    %c0_i32_0 = arith.constant 0 : i32
    return %arg0, %c0_i32 : i32, i32
  }
  func.func @transform_1(%arg0: i32) -> (i32, i32) {
    %c0_i32 = arith.constant 0 : i32
    %c0_i32_0 = arith.constant 0 : i32
    return %arg0, %c0_i32 : i32, i32
  }
  func.func @transform_2(%arg0: i32) -> (i32, i32) {
    %c0_i32 = arith.constant 0 : i32
    %c0_i32_0 = arith.constant 0 : i32
    %c0_i32_1 = arith.constant 0 : i32
    return %c0_i32, %c0_i32_0 : i32, i32
  }
  func.func @transform_3(%arg0: i32) -> (i32, i32) {
    %c0_i32 = arith.constant 0 : i32
    %c0_i32_0 = arith.constant 0 : i32
    %c0_i32_1 = arith.constant 0 : i32
    return %c0_i32, %c0_i32_0 : i32, i32
  }
  func.func @transform_4(%arg0: i32) -> (i32, i32) {
    %c0_i32 = arith.constant 0 : i32
    %c0_i32_0 = arith.constant 0 : i32
    return %arg0, %c0_i32 : i32, i32
  }
}

</mosaic_0001>

<bundles_post_ra>
// kernel: tile.45
= control target key start
LH: loop header
LB: loop body
LE: loop exit
PB: predicated region body
PF: predicated region fallthrough
CT: control target
= control target key end

     0   :  { %s22_s0 = inlined_call_operand.vmem [shape: f32[8], index: 0, kind: input, shape index: {}]   ;;  %s23_s1 = inlined_call_operand.vmem [shape: f32[8,8], index: 1, kind: output, shape index: {}]  }
   0x1   :  { %v4_v0 = vld [vmem:[%s22_s0] ss:$0 sm:$0xff] }
   0x2   :  { %5 = vst [vmem:[%s23_s1] sm:$0xff] %v4_v0 }

// kernel: tile.53
= control target key start
LH: loop header
LB: loop body
LE: loop exit
PB: predicated region body
PF: predicated region fallthrough
CT: control target
= control target key end

     0   :  { %s69_s10 = smov 56   ;;  %s70_s11 = smov 40   ;;  %vm3_vm0 = vcmask 64512   ;;  %vm9_vm1 = vcmask 523712   ;;  %vm15_vm2 = vcmask 458112   ;;  %vm21_vm3 = vcmask 392512   ;;  %s113_s0 = inlined_call_operand.vmem [shape: f32[8,8], index: 0, kind: input, shape index: {}]   ;;  %s114_s1 = inlined_call_operand.vmem [shape: f32[64], index: 1, kind: output, shape index: {}]  }
   0x1   :  { %v55_v0 = vld [vmem:[%s113_s0 + $0x7] sm:$0x1]   ;;  %v57_v1 = vld [vmem:[%s113_s0 + $0x5] sm:$0x1]   ;;  %v56_v2 = vld [vmem:[%s113_s0 + $0x6] sm:$0x1]  }
   0x2   :  { %7 = vrot.lane.b32.xlu0 %v55_v0, %s69_s10  ;;  %19 = vrot.lane.b32.xlu1 %v57_v1, %s70_s11  ;;  %v58_v3 = vld [vmem:[%s113_s0 + $0x4] sm:$0x1]   ;;  %v2_v4 = vld [vmem:[%s113_s0] sm:$0x1]   ;;  %s71_s18 = smov 48   ;;  %s72_s19 = smov 32  }
   0x3   :  { %4 = vst.msk [vmem:[#allocation0] sm:$0x1] %vm3_vm0, %v2_v4   ;;  %v59_v5 = vld [vmem:[%s113_s0 + $0x3] sm:$0x1]   ;;  %v60_v6 = vld [vmem:[%s113_s0 + $0x2] sm:$0x1]  }
   0x4   :  { %s73_s24 = smov 24   ;;  %s74_s25 = smov 16   ;;  %v61_v7 = vld [vmem:[%s113_s0 + $0x1] sm:$0x1]   ;;  %vm27_vm4 = vcmask 326912   ;;  %vm33_vm5 = vcmask 261312  }
   0x5   :  { %s75_s0 = smov 8   ;;  %vm39_vm6 = vcmask 195712   ;;  %vm45_vm7 = vcmask 130112  }
   0x6   :  { %13 = vrot.lane.b32.xlu0 %v56_v2, %s71_s18  ;;  %25 = vrot.lane.b32.xlu1 %v58_v3, %s72_s19 }
   0xa   :  { %31 = vrot.lane.b32.xlu0 %v59_v5, %s73_s24  ;;  %37 = vrot.lane.b32.xlu1 %v60_v6, %s74_s25 }
   0xe   :  { %43 = vrot.lane.b32.xlu0 %v61_v7, %s75_s0 }
  0x74   :  { %v8_v8 = vpop.permute.xlu0 %7   ;;  %v20_v9 = vpop.permute.xlu1 %19  }
  0x75   :  { %10 = vst.msk [vmem:[#allocation0] sm:$0x1] %vm9_vm1, %v8_v8  }
  0x78   :  { %v14_v10 = vpop.permute.xlu0 %13   ;;  %v26_v11 = vpop.permute.xlu1 %25  }
  0x79   :  { %16 = vst.msk [vmem:[#allocation0] sm:$0x1] %vm15_vm2, %v14_v10  }
  0x7a   :  { %22 = vst.msk [vmem:[#allocation0] sm:$0x1] %vm21_vm3, %v20_v9  }
  0x7b   :  { %28 = vst.msk [vmem:[#allocation0] sm:$0x1] %vm27_vm4, %v26_v11  }
  0x7c   :  { %v32_v12 = vpop.permute.xlu0 %31   ;;  %v38_v13 = vpop.permute.xlu1 %37  }
  0x7d   :  { %34 = vst.msk [vmem:[#allocation0] sm:$0x1] %vm33_vm5, %v32_v12  }
  0x7e   :  { %40 = vst.msk [vmem:[#allocation0] sm:$0x1] %vm39_vm6, %v38_v13  }
  0x80   :  { %v44_v14 = vpop.permute.xlu0 %43  }
  0x81   :  { %46 = vst.msk [vmem:[#allocation0] sm:$0x1] %vm45_vm7, %v44_v14  }
  0x88   :  { %v51_v15 = vld [vmem:[#allocation0] sm:$0x1] }
  0x89   :  { %54 = vst [vmem:[%s114_s1] sm:$0x1] %v51_v15 }

// kernel: tile.54
= control target key start
LH: loop header
LB: loop body
LE: loop exit
PB: predicated region body
PF: predicated region fallthrough
CT: control target
= control target key end

     0   :  { %s22_s0 = inlined_call_operand.vmem [shape: f32[64], index: 0, kind: input, shape index: {}]   ;;  %s23_s1 = inlined_call_operand.vmem [shape: f32[2,64], index: 1, kind: output, shape index: {}]  }
   0x1   :  { %v4_v0 = vld [vmem:[%s22_s0] ss:$0 sm:$0xff] }
   0x2   :  { %5 = vst [vmem:[%s23_s1] sm:$0x3] %v4_v0 }

// kernel: tile.55
= control target key start
LH: loop header
LB: loop body
LE: loop exit
PB: predicated region body
PF: predicated region fallthrough
CT: control target
= control target key end

     0   :  { %vm8_vm0 = vcmask 523264   ;;  %vm14_vm1 = vcmask 1048064   ;;  %s42_s0 = inlined_call_operand.vmem [shape: f32[2,64], index: 0, kind: input, shape index: {}]   ;;  %s43_s1 = inlined_call_operand.vmem [shape: f32[1,128], index: 1, kind: output, shape index: {}]  }
   0x1   :  { %v5_v0 = vld [vmem:[%s42_s0] sm:$0x3]  ;;  %s25_s0 = smov 64  }
   0x2   :  { %6 = vst [vmem:[#allocation1] sm:$0x3] %v5_v0 }
   0x9   :  { %v11_v1 = vld [vmem:[#allocation1 + $0x1] sm:$0x1]   ;;  %v7_v2 = vld [vmem:[#allocation1] sm:$0x1]  }
   0xa   :  { %12 = vrot.lane.b32.xlu0 %v11_v1, %s25_s0  ;;  %9 = vst.msk [vmem:[#allocation0] sm:$0x1] %vm8_vm0, %v7_v2  }
  0x7c   :  { %v13_v3 = vpop.permute.xlu0 %12  }
  0x7d   :  { %15 = vst.msk [vmem:[#allocation0] sm:$0x1] %vm14_vm1, %v13_v3  }
  0x84   :  { %v20_v4 = vld [vmem:[#allocation0] sm:$0x1] }
  0x85   :  { %23 = vst [vmem:[%s43_s1] sm:$0x1] %v20_v4 }

// kernel: up_transition_forward.6
= control target key start
LH: loop header
LB: loop body
LE: loop exit
PB: predicated region body
PF: predicated region fallthrough
CT: control target
= control target key end

     0   :  { %11 = vsyncpa [#allocation3], 0  ;;  %s1692_s0 = inlined_call_operand.vmem [shape: bf16[1024,8], index: 0, kind: input, shape index: {}]   ;;  %s1693_s1 = inlined_call_operand.hbm [shape: bf16[8,64], index: 1, kind: input, shape index: {}]   ;;  %s1694_s2 = inlined_call_operand.hbm [shape: f32[1,64], index: 2, kind: input, shape index: {}]   ;;  %s1695_s3 = inlined_call_operand.vmem [shape: f32[1024,64], index: 3, kind: output, shape index: {0}]   ;;  %s1696_s4 = inlined_call_operand.vmem [shape: f32[4,1,64], index: 4, kind: output, shape index: {1}]   ;;  %s1697_s5 = inlined_call_operand.vmem [shape: f32[4,1,64], index: 5, kind: output, shape index: {2}]  }
   0x1   :  { %12 = vsyncpa [#allocation5], 0  ;;  %s1221_s18 = smov 0  }
   0x2 LB: > { %s1227_s19 = sadd.s32 4294967295, %s1187_s18   ;;  %p975_p0 = scmp.ge.s32.totalorder %s1187_s18, 1  ;;  %s1187_s18 = sphi %s1221_s18, %s18_s18  }
   0x3   : > { %p169_p1 = scmp.lt.s32.totalorder %s1187_s18, 5  ;;  %p1698_p2 = scmp.eq.s32.totalorder %s1227_s19, 0 }
   0x4   : > { %s1189_s21 = smov [#allocation2]   ;;  %s1190_s23 = smov [#allocation4]  }
   0x5   : > { %p1232_p3 = pnand %p975_p0, %p169_p1  ;;  %s182_s22 = sshll.u32 %s1189_s21, 4  ;;  %s183_s22 = int_to_ptr.vmem [resolvable:$true] %s182_s22 }
   0x6   : > { %s193_s24 = sshll.u32 %s1190_s23, 4  ;;  %s1132_s26 = scalar_lea.vmem %s183_s22, 64  ;;  %s194_s24 = int_to_ptr.vmem [resolvable:$true] %s193_s24 }
   0x7   : > { %p1084_p4 = pneg %p1232_p3  ;;  %p1133_p7 = scmp.ne.s32.totalorder %s183_s22, %s1132_s26 }
   0x8   : > { %p1140_p10 = scmp.lt.s32.totalorder %s183_s22, %s183_s22  ;;  %p1141_p11 = scmp.lt.s32.totalorder %s1132_s26, %s1132_s26 }
   0x9   : > { %p1240_p5 = pnand %p1698_p2, %p1084_p4 }
   0xa   : > { %p1142_p12 = por %p1141_p11, %p1140_p10 }
   0xb   : > { %p1123_p6 = pneg %p1240_p5 }
   0xd   : > { %p1135_p8 = pnand %p1133_p7, %p1123_p6 }
   0xf   : > { %p1136_p9 = pneg %p1135_p8 }
  0x11   : > { %p1143_p13 = pnand %p1142_p12, %p1136_p9 }
  0x13   : > { %1146 = shalt.err (!%p1143_p13)
}
  0x14   : > { %1087 = dma.hbm_to_vmem [thread:$0]  (!%p1240_p5), %s1693_s1, 64, %s183_s22, [#allocation3]  }
  0x15   : > { %s1158_s29 = scalar_lea.vmem %s194_s24, 16  ;;  %s1165_s30 = scalar_lea.vmem %s194_s24, 32 }
  0x16   : > { %p1159_p0 = scmp.ne.s32.totalorder %s194_s24, %s1158_s29  ;;  %p1166_p7 = scmp.lt.s32.totalorder %s194_s24, %s194_s24 }
  0x17   : > { %p1167_p8 = scmp.lt.s32.totalorder %s1165_s30, %s1158_s29 }
  0x18   : > { %p1161_p1 = pnand %p1159_p0, %p1123_p6 }
  0x19   : > { %p1168_p2 = por %p1167_p8, %p1166_p7 }
  0x1a   : > { %p1162_p4 = pneg %p1161_p1 }
  0x1c   : > { %p1169_p10 = pnand %p1168_p2, %p1162_p4 }
  0x1e   : > { %1172 = shalt.err (!%p1169_p10)
}
  0x1f   : > { %1090 = dma.hbm_to_vmem [thread:$0]  (!%p1240_p5), %s1694_s2, 16, %s194_s24, [#allocation5]  }
  0x20   : > { %215 = sbr.rel (%p1232_p3) target bundleno = 408 (0x198), region = 32  ;;  %p1701_p9 = scmp.eq.s32.totalorder (!%p1232_p3), %s1227_s19, 0 }
  0x25   : > { %1178 = dma.done.wait (%p1701_p9), [#allocation3], 64   ;;  %p1702_p6 = pmov %p1701_p9 }
  0x27   : > { %1180 = vsyncadd (%p1702_p6), [#allocation3], 4294967232  ;;  %p1703_p11 = pmov %p1702_p6 }
  0x28   : > { %p1704_p2 = pmov %p1702_p6 }
  0x29   : > { %1182 = dma.done.wait (%p1703_p11), [#allocation5], 16  }
  0x2a   : > { %1184 = vsyncadd (%p1704_p2), [#allocation5], 4294967280  ;;  %s982_s8 = sshll.u32 %s1227_s19, 5  ;;  %vm441_vm0 = vcmask 1043456   ;;  %vm392_vm1 = vcmask 64512   ;;  %vm606_vm2 = vcmask 523264  }
  0x2b   : > { %p254_p12 = scmp.lt.s32.totalorder %s982_s8, 127  ;;  %v304_v0 = vld [vmem:[#allocation2] sm:$0xf]  ;;  %v1314_v18 = vld [vmem:[#allocation4] ss:$0 sm:$0xff]  ;;  %p265_p3 = scmp.lt.s32.totalorder %s1227_s19, 3 }
  0x2c   : > { %1074 = vmatprep.subr.msk.bf16.mxu0 %vm441_vm0, %v304_v0  ;;  %v443_v1 = vsel %vm441_vm0, %v304_v0, 0  ;;  %1075 = vmatprep.subr.msk.bf16.mxu1 %vm441_vm0, %v304_v0  ;;  %vm741_vm3 = vcmask 516096  }
  0x2d   : > { %s1706_s8 = smov (!%p254_p12, %s982_s8), 127  ;;  %1039 = vmatpush3.bf16.msra.mxu0 %v443_v1  ;;  %1073 = vmatpush3.bf16.msra.mxu1 %v443_v1  ;;  %s1708_s19 = smov (!%p265_p3, %s1227_s19), 3 }
  0x2e   : > { %s983_s9 = sshll.u32 %s1706_s8, 2  ;;  %s985_s13 = sshll.u32 %s1706_s8, 3 }
  0x2f   : > { %s1279_s12 = scalar_lea.vmem %s1692_s0, %s983_s9  ;;  %s1319_s16 = scalar_lea.vmem %s1695_s3, %s985_s13 }
  0x30   : > { %v1105_v2 = vld [vmem:[%s1279_s12] sm:$0xff]   ;;  %v1106_v3 = vld [vmem:[%s1279_s12 + $0x8] sm:$0xff]   ;;  %v1107_v4 = vld [vmem:[%s1279_s12 + $0x10] sm:$0xff]   ;;  %s267_s21 = scalar_lea.vmem %s1696_s4, %s1708_s19  ;;  %s270_s24 = scalar_lea.vmem %s1697_s5, %s1708_s19 }
  0x31   : > { %1040 = vmatprep.mubr.msk.bf16.mxu0 %vm392_vm1, %v1105_v2  ;;  %v1108_v5 = vld [vmem:[%s1279_s12 + $0x18] sm:$0xff]   ;;  %v1109_v6 = vld [vmem:[%s1279_s12 + $0x20] sm:$0xff]   ;;  %v1114_v8 = vld [vmem:[%s1279_s12 + $0x48] sm:$0xff]  }
  0x32   : > { %1041 = vmatmul.mubr.msk.bf16.vlgmr.msra.gmra.mxu0 %vm392_vm1, %v1106_v3  ;;  %v1113_v7 = vld [vmem:[%s1279_s12 + $0x40] sm:$0xff]   ;;  %v1115_v9 = vld [vmem:[%s1279_s12 + $0x50] sm:$0xff]   ;;  %v1116_v10 = vld [vmem:[%s1279_s12 + $0x58] sm:$0xff]  }
  0x33   : > { %1044 = vmatprep.mubr.msk.bf16.mxu0 %vm392_vm1, %v1107_v4  ;;  %1056 = vmatprep.mubr.msk.bf16.mxu1 %vm392_vm1, %v1113_v7  ;;  %v1110_v11 = vld [vmem:[%s1279_s12 + $0x28] sm:$0xff]   ;;  %v1117_v12 = vld [vmem:[%s1279_s12 + $0x60] sm:$0xff]   ;;  %v1111_v13 = vld [vmem:[%s1279_s12 + $0x30] sm:$0xff]  }
  0x34   : > { %1057 = vmatmul.mubr.msk.bf16.vlgmr.msra.gmra.mxu1 %vm392_vm1, %v1114_v8  ;;  %v1118_v14 = vld [vmem:[%s1279_s12 + $0x68] sm:$0xff]   ;;  %v1112_v15 = vld [vmem:[%s1279_s12 + $0x38] sm:$0xff]   ;;  %v1119_v16 = vld [vmem:[%s1279_s12 + $0x70] sm:$0xff]  }
  0x35   : > { %1060 = vmatprep.mubr.msk.bf16.mxu1 %vm392_vm1, %v1115_v9  ;;  %v1120_v17 = vld [vmem:[%s1279_s12 + $0x78] sm:$0xff]  }
  0x3a   : > { %1045 = vmatmul.mubr.msk.bf16.gmra.mxu0 %vm392_vm1, %v1108_v5 }
  0x3b   : > { %1048 = vmatprep.mubr.msk.bf16.mxu0 %vm392_vm1, %v1109_v6 }
  0x3c   : > { %1061 = vmatmul.mubr.msk.bf16.gmra.mxu1 %vm392_vm1, %v1116_v10 }
  0x3d   : > { %1064 = vmatprep.mubr.msk.bf16.mxu1 %vm392_vm1, %v1117_v12 }
  0x42   : > { %1049 = vmatmul.mubr.msk.bf16.gmra.mxu0 %vm392_vm1, %v1110_v11 }
  0x43   : > { %1052 = vmatprep.mubr.msk.bf16.mxu0 %vm392_vm1, %v1111_v13 }
  0x44   : > { %1065 = vmatmul.mubr.msk.bf16.gmra.mxu1 %vm392_vm1, %v1118_v14 }
  0x45   : > { %1068 = vmatprep.mubr.msk.bf16.mxu1 %vm392_vm1, %v1119_v16 }
  0x4a   : > { %1053 = vmatmul.mubr.msk.bf16.gmra.mxu0 %vm392_vm1, %v1112_v15 }
  0x4c   : > { %1069 = vmatmul.mubr.msk.bf16.gmra.mxu1 %vm392_vm1, %v1120_v17 }
  0xf2   : > { %v1042_v19 = vpop.f32.mrf.mxu0 }
  0xf3   : > { %v1322_v20 = vadd.f32 %v1042_v19, %v1314_v18 }
  0xf4   : > { %v479_v21 = vpop.f32.mrf.mxu0  ;;  %v1058_v27 = vpop.f32.mrf.mxu1 }
  0xf5   : > { %609 = vst.msk [vmem:[%s1319_s16 + $0x10] sm:$0xff] %vm606_vm2, %v1322_v20  ;;  %v1328_v22 = vadd.f32 %v1314_v18, %v479_v21  ;;  %v1343_v29 = vadd.f32 %v1058_v27, %v1314_v18  ;;  %v642_v37 = vsel %vm606_vm2, %v1322_v20, 0.0 }
  0xf6   : > { %v1043_v23 = vpop.f32.mrf.mxu0  ;;  %v543_v33 = vpop.f32.mrf.mxu1 }
  0xf7   : > { %607 = vst.msk [vmem:[%s1319_s16] sm:$0xff] %vm606_vm2, %v1328_v22  ;;  %v1334_v24 = vadd.f32 %v1043_v23, %v1314_v18  ;;  %v639_v30 = vsel %vm606_vm2, %v1328_v22, 0.0  ;;  %625 = vst.msk [vmem:[%s1319_s16 + $0x90] sm:$0xff] %vm606_vm2, %v1343_v29  ;;  %v1359_v36 = vadd.f32 %v1314_v18, %v543_v33 }
  0xf8   : > { %v482_v25 = vpop.f32.mrf.mxu0  ;;  %v1059_v39 = vpop.f32.mrf.mxu1 }
  0xf9   : > { %610 = vst.msk [vmem:[%s1319_s16 + $0x18] sm:$0xff] %vm606_vm2, %v1334_v24  ;;  %v1340_v26 = vadd.f32 %v1314_v18, %v482_v25  ;;  %623 = vst.msk [vmem:[%s1319_s16 + $0x80] sm:$0xff] %vm606_vm2, %v1359_v36  ;;  %v1373_v42 = vadd.f32 %v1059_v39, %v1314_v18  ;;  %v644_v43 = vsel %vm606_vm2, %v1334_v24, 0.0 }
  0xfa   : > { %v1046_v28 = vpop.f32.mrf.mxu0  ;;  %v546_v45 = vpop.f32.mrf.mxu1 }
  0xfb   : > { %608 = vst.msk [vmem:[%s1319_s16 + $0x8] sm:$0xff] %vm606_vm2, %v1340_v26  ;;  %v640_v31 = vsel %vm606_vm2, %v1340_v26, 0.0  ;;  %v1353_v32 = vadd.f32 %v1046_v28, %v1314_v18  ;;  %626 = vst.msk [vmem:[%s1319_s16 + $0x98] sm:$0xff] %vm606_vm2, %v1373_v42  ;;  %v1387_v48 = vadd.f32 %v1314_v18, %v546_v45 }
  0xfc   : > { %v641_v34 = vadd.f32 %v640_v31, %v639_v30  ;;  %v495_v35 = vpop.f32.mrf.mxu0  ;;  %v1062_v51 = vpop.f32.mrf.mxu1 }
  0xfd   : > { %613 = vst.msk [vmem:[%s1319_s16 + $0x30] sm:$0xff] %vm606_vm2, %v1353_v32  ;;  %v1367_v38 = vadd.f32 %v1314_v18, %v495_v35  ;;  %624 = vst.msk [vmem:[%s1319_s16 + $0x88] sm:$0xff] %vm606_vm2, %v1387_v48  ;;  %v1401_v54 = vadd.f32 %v1062_v51, %v1314_v18  ;;  %v650_v61 = vsel %vm606_vm2, %v1353_v32, 0.0 }
  0xfe   : > { %v643_v40 = vadd.f32 %v642_v37, %v641_v34  ;;  %v1047_v41 = vpop.f32.mrf.mxu0  ;;  %v559_v57 = vpop.f32.mrf.mxu1 }
  0xff   : > { %611 = vst.msk [vmem:[%s1319_s16 + $0x20] sm:$0xff] %vm606_vm2, %v1367_v38  ;;  %v1381_v44 = vadd.f32 %v1047_v41, %v1314_v18  ;;  %v646_v49 = vsel %vm606_vm2, %v1367_v38, 0.0  ;;  %629 = vst.msk [vmem:[%s1319_s16 + $0xb0] sm:$0xff] %vm606_vm2, %v1401_v54  ;;  %v1415_v60 = vadd.f32 %v1314_v18, %v559_v57 }
 0x100   : > { %v645_v46 = vadd.f32 %v644_v43, %v643_v40  ;;  %v498_v47 = vpop.f32.mrf.mxu0  ;;  %v1063_v63 = vpop.f32.mrf.mxu1 }
 0x101   : > { %614 = vst.msk [vmem:[%s1319_s16 + $0x38] sm:$0xff] %vm606_vm2, %v1381_v44  ;;  %v1395_v50 = vadd.f32 %v1314_v18, %v498_v47  ;;  %627 = vst.msk [vmem:[%s1319_s16 + $0xa0] sm:$0xff] %vm606_vm2, %v1415_v60  ;;  %v1429_v2 = vadd.f32 %v1063_v63, %v1314_v18  ;;  %v652_v3 = vsel %vm606_vm2, %v1381_v44, 0.0 }
 0x102   : > { %v647_v52 = vadd.f32 %v646_v49, %v645_v46  ;;  %v1050_v53 = vpop.f32.mrf.mxu0  ;;  %v562_v5 = vpop.f32.mrf.mxu1 }
 0x103   : > { %612 = vst.msk [vmem:[%s1319_s16 + $0x28] sm:$0xff] %vm606_vm2, %v1395_v50  ;;  %v648_v55 = vsel %vm606_vm2, %v1395_v50, 0.0  ;;  %v1409_v56 = vadd.f32 %v1050_v53, %v1314_v18  ;;  %630 = vst.msk [vmem:[%s1319_s16 + $0xb8] sm:$0xff] %vm606_vm2, %v1429_v2  ;;  %v1443_v8 = vadd.f32 %v1314_v18, %v562_v5  ;;  %v670_v5 = vsel %vm606_vm2, %v1359_v36, 0.0 }
 0x104   : > { %v649_v58 = vadd.f32 %v648_v55, %v647_v52  ;;  %v511_v59 = vpop.f32.mrf.mxu0  ;;  %v1066_v11 = vpop.f32.mrf.mxu1 }
 0x105   : > { %617 = vst.msk [vmem:[%s1319_s16 + $0x50] sm:$0xff] %vm606_vm2, %v1409_v56  ;;  %v1423_v62 = vadd.f32 %v1314_v18, %v511_v59  ;;  %628 = vst.msk [vmem:[%s1319_s16 + $0xa8] sm:$0xff] %vm606_vm2, %v1443_v8  ;;  %v1457_v14 = vadd.f32 %v1066_v11, %v1314_v18  ;;  %v658_v25 = vsel %vm606_vm2, %v1409_v56, 0.0  ;;  %v674_v11 = vsel %vm606_vm2, %v1343_v29, 0.0 }
 0x106   : > { %v651_v0 = vadd.f32 %v650_v61, %v649_v58  ;;  %v1051_v1 = vpop.f32.mrf.mxu0  ;;  %v575_v17 = vpop.f32.mrf.mxu1 }
 0x107   : > { %615 = vst.msk [vmem:[%s1319_s16 + $0x40] sm:$0xff] %vm606_vm2, %v1423_v62  ;;  %v1437_v4 = vadd.f32 %v1051_v1, %v1314_v18  ;;  %v654_v9 = vsel %vm606_vm2, %v1423_v62, 0.0  ;;  %633 = vst.msk [vmem:[%s1319_s16 + $0xd0] sm:$0xff] %vm606_vm2, %v1457_v14  ;;  %v1471_v23 = vadd.f32 %v1314_v18, %v575_v17 }
 0x108   : > { %v653_v6 = vadd.f32 %v652_v3, %v651_v0  ;;  %v514_v7 = vpop.f32.mrf.mxu0  ;;  %v1067_v28 = vpop.f32.mrf.mxu1 }
 0x109   : > { %618 = vst.msk [vmem:[%s1319_s16 + $0x58] sm:$0xff] %vm606_vm2, %v1437_v4  ;;  %v1451_v10 = vadd.f32 %v1314_v18, %v514_v7  ;;  %631 = vst.msk [vmem:[%s1319_s16 + $0xc0] sm:$0xff] %vm606_vm2, %v1471_v23  ;;  %v1485_v33 = vadd.f32 %v1067_v28, %v1314_v18  ;;  %v660_v34 = vsel %vm606_vm2, %v1437_v4, 0.0  ;;  %v672_v7 = vsel %vm606_vm2, %v1387_v48, 0.0 }
 0x10a   : > { %v655_v12 = vadd.f32 %v654_v9, %v653_v6  ;;  %v1054_v13 = vpop.f32.mrf.mxu0  ;;  %v578_v37 = vpop.f32.mrf.mxu1 }
 0x10b   : > { %616 = vst.msk [vmem:[%s1319_s16 + $0x48] sm:$0xff] %vm606_vm2, %v1451_v10  ;;  %v656_v15 = vsel %vm606_vm2, %v1451_v10, 0.0  ;;  %v1465_v16 = vadd.f32 %v1054_v13, %v1314_v18  ;;  %634 = vst.msk [vmem:[%s1319_s16 + $0xd8] sm:$0xff] %vm606_vm2, %v1485_v33  ;;  %v1499_v41 = vadd.f32 %v1314_v18, %v578_v37  ;;  %v676_v13 = vsel %vm606_vm2, %v1373_v42, 0.0 }
 0x10c   : > { %v657_v19 = vadd.f32 %v656_v15, %v655_v12  ;;  %v527_v21 = vpop.f32.mrf.mxu0  ;;  %v1070_v46 = vpop.f32.mrf.mxu1  ;;  %v678_v15 = vsel %vm606_vm2, %v1415_v60, 0.0 }
 0x10d   : > { %621 = vst.msk [vmem:[%s1319_s16 + $0x70] sm:$0xff] %vm606_vm2, %v1465_v16  ;;  %v1479_v27 = vadd.f32 %v1314_v18, %v527_v21  ;;  %632 = vst.msk [vmem:[%s1319_s16 + $0xc8] sm:$0xff] %vm606_vm2, %v1499_v41  ;;  %v1513_v49 = vadd.f32 %v1070_v46, %v1314_v18  ;;  %v666_v57 = vsel %vm606_vm2, %v1465_v16, 0.0 }
 0x10e   : > { %v659_v30 = vadd.f32 %v658_v25, %v657_v19  ;;  %v1055_v31 = vpop.f32.mrf.mxu0  ;;  %v591_v52 = vpop.f32.mrf.mxu1  ;;  %v680_v19 = vsel %vm606_vm2, %v1443_v8, 0.0  ;;  %v682_v25 = vsel %vm606_vm2, %v1401_v54, 0.0 }
 0x10f   : > { %619 = vst.msk [vmem:[%s1319_s16 + $0x60] sm:$0xff] %vm606_vm2, %v1479_v27  ;;  %v1493_v35 = vadd.f32 %v1055_v31, %v1314_v18  ;;  %v662_v43 = vsel %vm606_vm2, %v1479_v27, 0.0  ;;  %637 = vst.msk [vmem:[%s1319_s16 + $0xf0] sm:$0xff] %vm606_vm2, %v1513_v49  ;;  %v1524_v55 = vadd.f32 %v1314_v18, %v591_v52 }
 0x110   : > { %v661_v39 = vadd.f32 %v660_v34, %v659_v30  ;;  %v530_v40 = vpop.f32.mrf.mxu0  ;;  %v1071_v58 = vpop.f32.mrf.mxu1  ;;  %v684_v30 = vsel %vm606_vm2, %v1429_v2, 0.0  ;;  %v686_v34 = vsel %vm606_vm2, %v1471_v23, 0.0 }
 0x111   : > { %622 = vst.msk [vmem:[%s1319_s16 + $0x78] sm:$0xff] %vm606_vm2, %v1493_v35  ;;  %v1507_v45 = vadd.f32 %v1314_v18, %v530_v40  ;;  %635 = vst.msk [vmem:[%s1319_s16 + $0xe0] sm:$0xff] %vm606_vm2, %v1524_v55  ;;  %v1532_v61 = vadd.f32 %v1071_v58, %v1314_v18  ;;  %v668_v63 = vsel %vm606_vm2, %v1493_v35, 0.0  ;;  %v694_v52 = vsel %vm606_vm2, %v1524_v55, 0.0 }
 0x112   : > { %v663_v47 = vadd.f32 %v662_v43, %v661_v39  ;;  %v594_v0 = vpop.f32.mrf.mxu1  ;;  %v688_v39 = vsel %vm606_vm2, %v1499_v41, 0.0  ;;  %v690_v43 = vsel %vm606_vm2, %v1457_v14, 0.0 }
 0x113   : > { %620 = vst.msk [vmem:[%s1319_s16 + $0x68] sm:$0xff] %vm606_vm2, %v1507_v45  ;;  %v664_v51 = vsel %vm606_vm2, %v1507_v45, 0.0  ;;  %638 = vst.msk [vmem:[%s1319_s16 + $0xf8] sm:$0xff] %vm606_vm2, %v1532_v61  ;;  %v1540_v3 = vadd.f32 %v1314_v18, %v594_v0  ;;  %v700_v0 = vsel %vm606_vm2, %v1532_v61, 0.0 }
 0x114   : > { %v665_v53 = vadd.f32 %v664_v51, %v663_v47  ;;  %v692_v47 = vsel %vm606_vm2, %v1485_v33, 0.0 }
 0x115   : > { %636 = vst.msk [vmem:[%s1319_s16 + $0xe8] sm:$0xff] %vm606_vm2, %v1540_v3 }
 0x116   : > { %v667_v59 = vadd.f32 %v666_v57, %v665_v53  ;;  %v696_v57 = vsel %vm606_vm2, %v1540_v3, 0.0 }
 0x118   : > { %v669_v1 = vadd.f32 %v668_v63, %v667_v59  ;;  %v698_v59 = vsel %vm606_vm2, %v1513_v49, 0.0 }
 0x11a   : > { %v671_v6 = vadd.f32 %v670_v5, %v669_v1 }
 0x11c   : > { %v673_v9 = vadd.f32 %v672_v7, %v671_v6 }
 0x11e   : > { %v675_v12 = vadd.f32 %v674_v11, %v673_v9 }
 0x120   : > { %v677_v18 = vadd.f32 %v676_v13, %v675_v12 }
 0x122   : > { %v679_v17 = vadd.f32 %v678_v15, %v677_v18 }
 0x124   : > { %v681_v21 = vadd.f32 %v680_v19, %v679_v17 }
 0x126   : > { %v683_v28 = vadd.f32 %v682_v25, %v681_v21 }
 0x128   : > { %v685_v31 = vadd.f32 %v684_v30, %v683_v28 }
 0x12a   : > { %v687_v37 = vadd.f32 %v686_v34, %v685_v31 }
 0x12c   : > { %v689_v40 = vadd.f32 %v688_v39, %v687_v37 }
 0x12e   : > { %v691_v46 = vadd.f32 %v690_v43, %v689_v40 }
 0x130   : > { %v693_v51 = vadd.f32 %v692_v47, %v691_v46 }
 0x132   : > { %v695_v53 = vadd.f32 %v694_v52, %v693_v51 }
 0x134   : > { %v697_v58 = vadd.f32 %v696_v57, %v695_v53 }
 0x136   : > { %v699_v63 = vadd.f32 %v698_v59, %v697_v58 }
 0x138   : > { %v701_v1 = vadd.f32 %v700_v0, %v699_v63 }
 0x13a   : > { %v702_v5 = vrot.slane %v701_v1, 4 }
 0x13c   : > { %v703_v6 = vadd.f32 %v702_v5, %v701_v1 }
 0x13e   : > { %v704_v7 = vrot.slane %v703_v6, 2 }
 0x140   : > { %v705_v9 = vadd.f32 %v704_v7, %v703_v6 }
 0x142   : > { %v706_v11 = vrot.slane %v705_v9, 1 }
 0x144   : > { %v707_v12 = vadd.f32 %v706_v11, %v705_v9 }
 0x146   : > { %742 = vst.msk [vmem:[%s267_s21] sm:$0x1] %vm741_vm3, %v707_v12  ;;  %v1586_v13 = vmul.f32 0.00390625, %v707_v12 }
 0x148   : > { %v709_v18 = vsub.f32 %v1328_v22, %v1586_v13  ;;  %v710_v15 = vsub.f32 %v1340_v26, %v1586_v13  ;;  %v711_v17 = vsub.f32 %v1322_v20, %v1586_v13  ;;  %v712_v19 = vsub.f32 %v1334_v24, %v1586_v13 }
 0x149   : > { %v713_v28 = vsub.f32 %v1367_v38, %v1586_v13  ;;  %v714_v31 = vsub.f32 %v1395_v50, %v1586_v13  ;;  %v715_v20 = vsub.f32 %v1353_v32, %v1586_v13  ;;  %v716_v38 = vsub.f32 %v1381_v44, %v1586_v13 }
 0x14a   : > { %v743_v21 = vmul.f32 %v709_v18, %v709_v18  ;;  %v744_v25 = vmul.f32 %v710_v15, %v710_v15  ;;  %v745_v30 = vmul.f32 %v711_v17, %v711_v17  ;;  %v746_v34 = vmul.f32 %v712_v19, %v712_v19 }
 0x14b   : > { %v747_v39 = vmul.f32 %v713_v28, %v713_v28  ;;  %v748_v43 = vmul.f32 %v714_v31, %v714_v31  ;;  %v717_v47 = vsub.f32 %v1423_v62, %v1586_v13  ;;  %v749_v51 = vmul.f32 %v715_v20, %v715_v20 }
 0x14c   : > { %v775_v22 = vsel %vm606_vm2, %v743_v21, 0.0  ;;  %v776_v26 = vsel %vm606_vm2, %v744_v25, 0.0  ;;  %v778_v24 = vsel %vm606_vm2, %v745_v30, 0.0  ;;  %v780_v46 = vsel %vm606_vm2, %v746_v34, 0.0 }
 0x14d   : > { %v777_v37 = vadd.f32 %v776_v26, %v775_v22  ;;  %v782_v52 = vsel %vm606_vm2, %v747_v39, 0.0  ;;  %v718_v32 = vsub.f32 %v1451_v10, %v1586_v13  ;;  %v750_v57 = vmul.f32 %v716_v38, %v716_v38 }
 0x14e   : > { %v784_v58 = vsel %vm606_vm2, %v748_v43, 0.0  ;;  %v719_v44 = vsub.f32 %v1409_v56, %v1586_v13  ;;  %v751_v63 = vmul.f32 %v717_v47, %v717_v47  ;;  %v786_v0 = vsel %vm606_vm2, %v749_v51, 0.0 }
 0x14f   : > { %v779_v40 = vadd.f32 %v778_v24, %v777_v37  ;;  %v720_v62 = vsub.f32 %v1437_v4, %v1586_v13  ;;  %v752_v5 = vmul.f32 %v718_v32, %v718_v32  ;;  %v788_v6 = vsel %vm606_vm2, %v750_v57, 0.0 }
 0x150   : > { %v721_v10 = vsub.f32 %v1479_v27, %v1586_v13  ;;  %v753_v9 = vmul.f32 %v719_v44, %v719_v44  ;;  %v790_v11 = vsel %vm606_vm2, %v751_v63, 0.0  ;;  %v722_v56 = vsub.f32 %v1507_v45, %v1586_v13 }
 0x151   : > { %v781_v50 = vadd.f32 %v780_v46, %v779_v40  ;;  %v754_v18 = vmul.f32 %v720_v62, %v720_v62  ;;  %v792_v15 = vsel %vm606_vm2, %v752_v5, 0.0  ;;  %v723_v4 = vsub.f32 %v1465_v16, %v1586_v13 }
 0x152   : > { %v755_v19 = vmul.f32 %v721_v10, %v721_v10  ;;  %v794_v21 = vsel %vm606_vm2, %v753_v9, 0.0  ;;  %v724_v27 = vsub.f32 %v1493_v35, %v1586_v13  ;;  %v756_v28 = vmul.f32 %v722_v56, %v722_v56 }
 0x153   : > { %v783_v53 = vadd.f32 %v782_v52, %v781_v50  ;;  %v796_v30 = vsel %vm606_vm2, %v754_v18, 0.0  ;;  %v725_v45 = vsub.f32 %v1359_v36, %v1586_v13  ;;  %v757_v34 = vmul.f32 %v723_v4, %v723_v4 }
 0x154   : > { %v798_v22 = vsel %vm606_vm2, %v755_v19, 0.0  ;;  %v726_v16 = vsub.f32 %v1387_v48, %v1586_v13  ;;  %v758_v37 = vmul.f32 %v724_v27, %v724_v27  ;;  %v800_v20 = vsel %vm606_vm2, %v756_v28, 0.0 }
 0x155   : > { %v785_v59 = vadd.f32 %v784_v58, %v783_v53  ;;  %v727_v35 = vsub.f32 %v1343_v29, %v1586_v13  ;;  %v759_v24 = vmul.f32 %v725_v45, %v725_v45  ;;  %v802_v40 = vsel %vm606_vm2, %v757_v34, 0.0 }
 0x156   : > { %v728_v36 = vsub.f32 %v1373_v42, %v1586_v13  ;;  %v760_v43 = vmul.f32 %v726_v16, %v726_v16  ;;  %v804_v46 = vsel %vm606_vm2, %v758_v37, 0.0  ;;  %v729_v48 = vsub.f32 %v1415_v60, %v1586_v13 }
 0x157   : > { %v787_v1 = vadd.f32 %v786_v0, %v785_v59  ;;  %v761_v47 = vmul.f32 %v727_v35, %v727_v35  ;;  %v806_v51 = vsel %vm606_vm2, %v759_v24, 0.0  ;;  %v730_v29 = vsub.f32 %v1443_v8, %v1586_v13 }
 0x158   : > { %v762_v53 = vmul.f32 %v728_v36, %v728_v36  ;;  %v808_v32 = vsel %vm606_vm2, %v760_v43, 0.0  ;;  %v731_v42 = vsub.f32 %v1401_v54, %v1586_v13  ;;  %v763_v58 = vmul.f32 %v729_v48, %v729_v48 }
 0x159   : > { %v789_v7 = vadd.f32 %v788_v6, %v787_v1  ;;  %v810_v59 = vsel %vm606_vm2, %v761_v47, 0.0  ;;  %v732_v60 = vsub.f32 %v1429_v2, %v1586_v13  ;;  %v764_v63 = vmul.f32 %v730_v29, %v730_v29 }
 0x15a   : > { %v812_v0 = vsel %vm606_vm2, %v762_v53, 0.0  ;;  %v733_v8 = vsub.f32 %v1471_v23, %v1586_v13  ;;  %v765_v62 = vmul.f32 %v731_v42, %v731_v42  ;;  %v814_v5 = vsel %vm606_vm2, %v763_v58, 0.0 }
 0x15b   : > { %v791_v12 = vadd.f32 %v790_v11, %v789_v7  ;;  %v734_v54 = vsub.f32 %v1499_v41, %v1586_v13  ;;  %v766_v7 = vmul.f32 %v732_v60, %v732_v60  ;;  %v816_v10 = vsel %vm606_vm2, %v764_v63, 0.0 }
 0x15c   : > { %v735_v2 = vsub.f32 %v1457_v14, %v1586_v13  ;;  %v767_v11 = vmul.f32 %v733_v8, %v733_v8  ;;  %v736_v23 = vsub.f32 %v1485_v33, %v1586_v13  ;;  %v737_v41 = vsub.f32 %v1524_v55, %v1586_v13 }
 0x15d   : > { %v793_v17 = vadd.f32 %v792_v15, %v791_v12  ;;  %v818_v12 = vsel %vm606_vm2, %v765_v62, 0.0  ;;  %v768_v18 = vmul.f32 %v734_v54, %v734_v54  ;;  %v820_v15 = vsel %vm606_vm2, %v766_v7, 0.0 }
 0x15e   : > { %v769_v4 = vmul.f32 %v735_v2, %v735_v2  ;;  %v822_v19 = vsel %vm606_vm2, %v767_v11, 0.0  ;;  %v738_v14 = vsub.f32 %v1540_v3, %v1586_v13  ;;  %v739_v33 = vsub.f32 %v1513_v49, %v1586_v13 }
 0x15f   : > { %v795_v25 = vadd.f32 %v794_v21, %v793_v17  ;;  %v824_v27 = vsel %vm606_vm2, %v768_v18, 0.0  ;;  %v740_v55 = vsub.f32 %v1532_v61, %v1586_v13 }
 0x160   : > { %v772_v34 = vmul.f32 %v738_v14, %v738_v14  ;;  %v773_v3 = vmul.f32 %v739_v33, %v739_v33 }
 0x161   : > { %v797_v31 = vadd.f32 %v796_v30, %v795_v25  ;;  %v770_v25 = vmul.f32 %v736_v23, %v736_v23  ;;  %v771_v30 = vmul.f32 %v737_v41, %v737_v41 }
 0x162   : > { %v834_v35 = vsel %vm606_vm2, %v773_v3, 0.0 }
 0x163   : > { %v799_v26 = vadd.f32 %v798_v22, %v797_v31  ;;  %v826_v31 = vsel %vm606_vm2, %v769_v4, 0.0  ;;  %v828_v22 = vsel %vm606_vm2, %v770_v25, 0.0  ;;  %v830_v16 = vsel %vm606_vm2, %v771_v30, 0.0 }
 0x165   : > { %v801_v39 = vadd.f32 %v800_v20, %v799_v26  ;;  %v774_v20 = vmul.f32 %v740_v55, %v740_v55 }
 0x167   : > { %v803_v38 = vadd.f32 %v802_v40, %v801_v39  ;;  %v832_v39 = vsel %vm606_vm2, %v772_v34, 0.0  ;;  %v836_v40 = vsel %vm606_vm2, %v774_v20, 0.0 }
 0x169   : > { %v805_v50 = vadd.f32 %v804_v46, %v803_v38 }
 0x16b   : > { %v807_v52 = vadd.f32 %v806_v51, %v805_v50 }
 0x16d   : > { %v809_v57 = vadd.f32 %v808_v32, %v807_v52 }
 0x16f   : > { %v811_v44 = vadd.f32 %v810_v59, %v809_v57 }
 0x171   : > { %v813_v1 = vadd.f32 %v812_v0, %v811_v44 }
 0x173   : > { %v815_v6 = vadd.f32 %v814_v5, %v813_v1 }
 0x175   : > { %v817_v9 = vadd.f32 %v816_v10, %v815_v6 }
 0x177   : > { %v819_v56 = vadd.f32 %v818_v12, %v817_v9 }
 0x179   : > { %v821_v17 = vadd.f32 %v820_v15, %v819_v56 }
 0x17b   : > { %v823_v21 = vadd.f32 %v822_v19, %v821_v17 }
 0x17d   : > { %v825_v28 = vadd.f32 %v824_v27, %v823_v21 }
 0x17f   : > { %v827_v45 = vadd.f32 %v826_v31, %v825_v28 }
 0x181   : > { %v829_v26 = vadd.f32 %v828_v22, %v827_v45 }
 0x183   : > { %v831_v37 = vadd.f32 %v830_v16, %v829_v26 }
 0x185   : > { %v833_v49 = vadd.f32 %v832_v39, %v831_v37 }
 0x187   : > { %v835_v24 = vadd.f32 %v834_v35, %v833_v49 }
 0x189   : > { %v837_v38 = vadd.f32 %v836_v40, %v835_v24 }
 0x18b   : > { %v838_v61 = vrot.slane %v837_v38, 4 }
 0x18d   : > { %v839_v13 = vadd.f32 %v838_v61, %v837_v38 }
 0x18f   : > { %v840_v36 = vrot.slane %v839_v13, 2 }
 0x191   : > { %v841_v43 = vadd.f32 %v840_v36, %v839_v13 }
 0x193   : > { %v842_v46 = vrot.slane %v841_v43, 1 }
 0x195   : > { %v843_v50 = vadd.f32 %v842_v46, %v841_v43 }
 0x197   : > { %844 = vst.msk [vmem:[%s270_s24] sm:$0x1] %vm741_vm3, %v843_v50 }
 0x198 PF: > { %s18_s18 = sadd.s32 1, %s1187_s18  }
 0x199   : > { %p15_p5 = scmp.ge.s32.totalorder %s18_s18, 6  }
 0x19b   :  { %17 = sbr.rel (!%p15_p5) target bundleno = 2 (0x2), region = 95 }
 0x1a0   :  { %891 = vsyncpa [#allocation3], 1 }
 0x1a1   :  { %893 = vsyncpa [#allocation3 + $0x1], 1 }
 0x1a2   :  { %894 = vsyncpa [#allocation5], 1 }

// kernel: up_transition_forward.7
= control target key start
LH: loop header
LB: loop body
LE: loop exit
PB: predicated region body
PF: predicated region fallthrough
CT: control target
= control target key end

     0   :  { %s709_s12 = smov 0   ;;  %s1097_s0 = inlined_call_operand.vmem [shape: f32[512,128], index: 0, kind: input, shape index: {}, may-alias: {0,3}]   ;;  %s1098_s1 = inlined_call_operand.vmem [shape: f32[1,128], index: 1, kind: input, shape index: {}]   ;;  %s1099_s2 = inlined_call_operand.vmem [shape: f32[1,128], index: 2, kind: input, shape index: {}]   ;;  %s1100_s3 = inlined_call_operand.vmem [shape: f32[512,128], index: 3, kind: output, shape index: {}, may-alias: {0,3}]  }
   0x1 LB: > { %s564_s13 = sadd.s32 4294967295, %s687_s12   ;;  %p568_p0 = scmp.ge.s32.totalorder %s687_s12, 1  ;;  %s687_s12 = sphi %s709_s12, %s13_s12  }
   0x2   : > { %p138_p1 = scmp.lt.s32.totalorder %s687_s12, 3 }
   0x4   : > { %p139_p2 = pnand %p568_p0, %p138_p1 }
   0x5   : > { %s569_s14 = sshll.u32 (!%p139_p2), %s564_s13, 5 }
   0x6   : > { %142 = sbr.rel (%p139_p2) target bundleno = 93 (0x5d), region = 32  ;;  %p163_p3 = scmp.lt.s32.totalorder (!%p139_p2), %s569_s14, 63 }
   0xb   : > { %s1102_s14 = smov (!%p163_p3, %s569_s14), 63  ;;  %v723_v0 = vld [vmem:[%s1098_s1] ss:$0 sm:$0xff] }
   0xc   : > { %s570_s15 = sshll.u32 %s1102_s14, 3  ;;  %v735_v1 = vld [vmem:[%s1099_s2] ss:$0 sm:$0xff] }
   0xd   : > { %s730_s20 = scalar_lea.vmem %s1097_s0, %s570_s15  ;;  %s845_s25 = scalar_lea.vmem %s1100_s3, %s570_s15 }
   0xe   : > { %v174_v2 = vld [vmem:[%s730_s20] sm:$0xff]  ;;  %v175_v3 = vld [vmem:[%s730_s20 + $0x8] sm:$0xff]  ;;  %v176_v4 = vld [vmem:[%s730_s20 + $0x10] sm:$0xff] }
   0xf   : > { %v177_v5 = vld [vmem:[%s730_s20 + $0x18] sm:$0xff]  ;;  %v178_v6 = vld [vmem:[%s730_s20 + $0x20] sm:$0xff]  ;;  %v179_v7 = vld [vmem:[%s730_s20 + $0x28] sm:$0xff]  ;;  %v213_v8 = vmul.f32 %v723_v0, %v174_v2  ;;  %v214_v9 = vmul.f32 %v723_v0, %v175_v3  ;;  %v215_v10 = vmul.f32 %v723_v0, %v176_v4 }
  0x10   : > { %v180_v11 = vld [vmem:[%s730_s20 + $0x30] sm:$0xff]  ;;  %v181_v12 = vld [vmem:[%s730_s20 + $0x38] sm:$0xff]  ;;  %v216_v13 = vmul.f32 %v723_v0, %v177_v5  ;;  %v217_v14 = vmul.f32 %v723_v0, %v178_v6  ;;  %v218_v15 = vmul.f32 %v723_v0, %v179_v7  ;;  %v182_v20 = vld [vmem:[%s730_s20 + $0x40] sm:$0xff] }
  0x11   : > { %v752_v16 = vadd.f32 %v735_v1, %v213_v8  ;;  %v755_v17 = vadd.f32 %v735_v1, %v214_v9  ;;  %v758_v18 = vadd.f32 %v735_v1, %v215_v10  ;;  %v219_v19 = vmul.f32 %v723_v0, %v180_v11  ;;  %v183_v24 = vld [vmem:[%s730_s20 + $0x48] sm:$0xff]  ;;  %v184_v28 = vld [vmem:[%s730_s20 + $0x50] sm:$0xff]  ;;  %v185_v33 = vld [vmem:[%s730_s20 + $0x58] sm:$0xff] }
  0x12   : > { %v763_v21 = vadd.f32 %v735_v1, %v216_v13  ;;  %v220_v22 = vmul.f32 %v723_v0, %v181_v12  ;;  %v771_v27 = vadd.f32 %v735_v1, %v217_v14  ;;  %v775_v30 = vadd.f32 %v735_v1, %v218_v15  ;;  %v186_v46 = vld [vmem:[%s730_s20 + $0x60] sm:$0xff]  ;;  %v187_v55 = vld [vmem:[%s730_s20 + $0x68] sm:$0xff]  ;;  %v188_v59 = vld [vmem:[%s730_s20 + $0x70] sm:$0xff] }
  0x13   : > { %v316_v23 = vmin.f32 %v752_v16, 0.0  ;;  %v317_v25 = vmin.f32 %v755_v17, 0.0  ;;  %v318_v26 = vmin.f32 %v758_v18, 0.0  ;;  %v778_v31 = vadd.f32 %v735_v1, %v219_v19  ;;  %v189_v60 = vld [vmem:[%s730_s20 + $0x78] sm:$0xff]  ;;  %v190_v2 = vld [vmem:[%s730_s20 + $0x80] sm:$0xff] }
  0x14   : > { %v221_v32 = vmul.f32 %v723_v0, %v182_v20  ;;  %v319_v35 = vmin.f32 %v763_v21, 0.0  ;;  %v784_v36 = vadd.f32 %v735_v1, %v220_v22  ;;  %v222_v39 = vmul.f32 %v723_v0, %v183_v24  ;;  %v192_v24 = vld [vmem:[%s730_s20 + $0x90] sm:$0xff] }
  0x15   : > { %v348_v29 = vmul.f32 1.442695, %v316_v23  ;;  %v350_v34 = vmul.f32 1.442695, %v317_v25  ;;  %v352_v37 = vmul.f32 1.442695, %v318_v26  ;;  %v223_v42 = vmul.f32 %v723_v0, %v184_v28 }
  0x16   : > { %v787_v38 = vadd.f32 %v735_v1, %v221_v32  ;;  %v354_v40 = vmul.f32 1.442695, %v319_v35  ;;  %v320_v41 = vmin.f32 %v771_v27, 0.0  ;;  %v321_v43 = vmin.f32 %v775_v30, 0.0  ;;  %v191_v23 = vld [vmem:[%s730_s20 + $0x88] sm:$0xff]  ;;  %v193_v25 = vld [vmem:[%s730_s20 + $0x98] sm:$0xff] }
  0x17   : > { %617 = vpow2.f32 %v348_v29  ;;  %v322_v44 = vmin.f32 %v778_v31, 0.0  ;;  %v224_v45 = vmul.f32 %v723_v0, %v185_v33  ;;  %v323_v48 = vmin.f32 %v784_v36, 0.0  ;;  %v194_v26 = vld [vmem:[%s730_s20 + $0xa0] sm:$0xff]  ;;  %v852_v28 = vld [vmem:[%s730_s20 + $0xa8] sm:$0xff]  ;;  %v855_v29 = vld [vmem:[%s730_s20 + $0xb0] sm:$0xff] }
  0x18   : > { %619 = vpow2.f32 %v350_v34  ;;  %v356_v47 = vmul.f32 1.442695, %v320_v41  ;;  %v358_v49 = vmul.f32 1.442695, %v321_v43  ;;  %v324_v51 = vmin.f32 %v787_v38, 0.0  ;;  %v858_v32 = vld [vmem:[%s730_s20 + $0xb8] sm:$0xff] }
  0x19   : > { %621 = vpow2.f32 %v352_v37  ;;  %v360_v50 = vmul.f32 1.442695, %v322_v44  ;;  %vm284_vm0 = vcmp.gt.f32.partialorder %v752_v16, 0.0  ;;  %v362_v52 = vmul.f32 1.442695, %v323_v48  ;;  %v861_v33 = vld [vmem:[%s730_s20 + $0xc0] sm:$0xff] }
  0x1a   : > { %623 = vpow2.f32 %v354_v40  ;;  %v800_v53 = vadd.f32 %v735_v1, %v222_v39  ;;  %v803_v54 = vadd.f32 %v735_v1, %v223_v42  ;;  %v364_v56 = vmul.f32 1.442695, %v324_v51  ;;  %v864_v34 = vld [vmem:[%s730_s20 + $0xc8] sm:$0xff]  ;;  %v867_v35 = vld [vmem:[%s730_s20 + $0xd0] sm:$0xff]  ;;  %v873_v41 = vld [vmem:[%s730_s20 + $0xd8] sm:$0xff] }
  0x1b   : > { %625 = vpow2.f32 %v356_v47  ;;  %v807_v57 = vadd.f32 %v735_v1, %v224_v45  ;;  %v225_v58 = vmul.f32 %v723_v0, %v186_v46  ;;  %vm285_vm1 = vcmp.gt.f32.partialorder %v755_v17, 0.0  ;;  %v876_v42 = vld [vmem:[%s730_s20 + $0xe0] sm:$0xff]  ;;  %v880_v47 = vld [vmem:[%s730_s20 + $0xe8] sm:$0xff]  ;;  %v883_v48 = vld [vmem:[%s730_s20 + $0xf0] sm:$0xff] }
  0x1c   : > { %627 = vpow2.f32 %v358_v49  ;;  %vm286_vm2 = vcmp.gt.f32.partialorder %v758_v18, 0.0  ;;  %v325_v61 = vmin.f32 %v800_v53, 0.0  ;;  %vm287_vm3 = vcmp.gt.f32.partialorder %v763_v21, 0.0  ;;  %v886_v49 = vld [vmem:[%s730_s20 + $0xf8] sm:$0xff] }
  0x1d   : > { %629 = vpow2.f32 %v360_v50  ;;  %v326_v62 = vmin.f32 %v803_v54, 0.0  ;;  %v327_v63 = vmin.f32 %v807_v57, 0.0  ;;  %v820_v4 = vadd.f32 %v735_v1, %v225_v58 }
  0x1e   : > { %631 = vpow2.f32 %v362_v52  ;;  %v366_v3 = vmul.f32 1.442695, %v325_v61  ;;  %v226_v5 = vmul.f32 %v723_v0, %v187_v55  ;;  %vm288_vm4 = vcmp.gt.f32.partialorder %v771_v27, 0.0 }
  0x1f   : > { %633 = vpow2.f32 %v364_v56  ;;  %v368_v6 = vmul.f32 1.442695, %v326_v62  ;;  %v370_v7 = vmul.f32 1.442695, %v327_v63  ;;  %v227_v8 = vmul.f32 %v723_v0, %v188_v59 }
  0x20   : > { %v228_v9 = vmul.f32 %v723_v0, %v189_v60  ;;  %vm289_vm5 = vcmp.gt.f32.partialorder %v775_v30, 0.0  ;;  %635 = vpow2.f32 %v366_v3  ;;  %v328_v10 = vmin.f32 %v820_v4, 0.0 }
  0x21   : > { %v829_v11 = vadd.f32 %v735_v1, %v226_v5  ;;  %637 = vpow2.f32 %v368_v6  ;;  %v832_v12 = vadd.f32 %v735_v1, %v227_v8  ;;  %v229_v14 = vmul.f32 %v723_v0, %v190_v2 }
  0x22   : > { %v835_v13 = vadd.f32 %v735_v1, %v228_v9  ;;  %vm290_vm6 = vcmp.gt.f32.partialorder %v778_v31, 0.0  ;;  %639 = vpow2.f32 %v370_v7  ;;  %v372_v19 = vmul.f32 1.442695, %v328_v10 }
  0x23   : > { %v329_v20 = vmin.f32 %v829_v11, 0.0  ;;  %vm291_vm7 = vcmp.gt.f32.partialorder %v784_v36, 0.0  ;;  %vm292_vm8 = vcmp.gt.f32.partialorder %v787_v38, 0.0  ;;  %v330_v39 = vmin.f32 %v832_v12, 0.0 }
  0x24   : > { %v618_v15 = vpop.eup %617  ;;  %641 = vpow2.f32 %v372_v19  ;;  %v331_v45 = vmin.f32 %v835_v13, 0.0  ;;  %vm293_vm9 = vcmp.gt.f32.partialorder %v800_v53, 0.0  ;;  %v893_v55 = vadd.f32 %v735_v1, %v229_v14 }
  0x25   : > { %v620_v22 = vpop.eup %619  ;;  %v575_v37 = vadd.f32 -1.0, %v618_v15  ;;  %v374_v44 = vmul.f32 1.442695, %v329_v20  ;;  %v376_v52 = vmul.f32 1.442695, %v330_v39  ;;  %vm294_vm10 = vcmp.gt.f32.partialorder %v803_v54, 0.0 }
  0x26   : > { %v622_v40 = vpop.eup %621  ;;  %v576_v43 = vadd.f32 -1.0, %v620_v22  ;;  %v378_v59 = vmul.f32 1.442695, %v331_v45  ;;  %vm295_vm11 = vcmp.gt.f32.partialorder %v807_v57, 0.0  ;;  %v332_v61 = vmin.f32 %v893_v55, 0.0 }
  0x27   : > { %v624_v46 = vpop.eup %623  ;;  %v444_v50 = vsel %vm284_vm0, %v752_v16, %v575_v37  ;;  %v577_v51 = vadd.f32 -1.0, %v622_v40  ;;  %643 = vpow2.f32 %v374_v44  ;;  %v230_v2 = vmul.f32 %v723_v0, %v191_v23 }
  0x28   : > { %476 = vst [vmem:[%s845_s25] sm:$0xff] %v444_v50  ;;  %v445_v56 = vsel %vm285_vm1, %v755_v17, %v576_v43  ;;  %v578_v58 = vadd.f32 -1.0, %v624_v46  ;;  %v626_v16 = vpop.eup %625  ;;  %645 = vpow2.f32 %v376_v52  ;;  %v380_v5 = vmul.f32 1.442695, %v332_v61 }
  0x29   : > { %477 = vst [vmem:[%s845_s25 + $0x8] sm:$0xff] %v445_v56  ;;  %v446_v60 = vsel %vm286_vm2, %v758_v18, %v577_v51  ;;  %v628_v62 = vpop.eup %627  ;;  %v579_v63 = vadd.f32 -1.0, %v626_v16  ;;  %647 = vpow2.f32 %v378_v59  ;;  %v231_v6 = vmul.f32 %v723_v0, %v192_v24 }
  0x2a   : > { %478 = vst [vmem:[%s845_s25 + $0x10] sm:$0xff] %v446_v60  ;;  %v447_v17 = vsel %vm287_vm3, %v763_v21, %v578_v58  ;;  %v630_v3 = vpop.eup %629  ;;  %v580_v18 = vadd.f32 -1.0, %v628_v62  ;;  %v232_v7 = vmul.f32 %v723_v0, %v193_v25  ;;  %v918_v10 = vadd.f32 %v735_v1, %v230_v2 }
  0x2b   : > { %479 = vst [vmem:[%s845_s25 + $0x18] sm:$0xff] %v447_v17  ;;  %v632_v8 = vpop.eup %631  ;;  %v448_v9 = vsel %vm288_vm4, %v771_v27, %v579_v63  ;;  %v581_v21 = vadd.f32 -1.0, %v630_v3  ;;  %v233_v14 = vmul.f32 %v723_v0, %v194_v26  ;;  %649 = vpow2.f32 %v380_v5 }
  0x2c   : > { %v634_v15 = vpop.eup %633  ;;  %480 = vst [vmem:[%s845_s25 + $0x20] sm:$0xff] %v448_v9  ;;  %v449_v19 = vsel %vm289_vm5, %v775_v30, %v580_v18  ;;  %v582_v20 = vadd.f32 -1.0, %v632_v8  ;;  %v926_v22 = vadd.f32 %v735_v1, %v231_v6  ;;  %vm296_vm12 = vcmp.gt.f32.partialorder %v820_v4, 0.0 }
  0x2d   : > { %481 = vst [vmem:[%s845_s25 + $0x28] sm:$0xff] %v449_v19  ;;  %v450_v27 = vsel %vm290_vm6, %v778_v31, %v581_v21  ;;  %v583_v23 = vadd.f32 -1.0, %v634_v15  ;;  %v333_v24 = vmin.f32 %v918_v10, 0.0  ;;  %v636_v25 = vpop.eup %635  ;;  %vm297_vm13 = vcmp.gt.f32.partialorder %v829_v11, 0.0 }
  0x2e   : > { %482 = vst [vmem:[%s845_s25 + $0x30] sm:$0xff] %v450_v27  ;;  %v451_v30 = vsel %vm291_vm7, %v784_v36, %v582_v20  ;;  %v334_v26 = vmin.f32 %v926_v22, 0.0  ;;  %v941_v37 = vadd.f32 %v735_v1, %v232_v7  ;;  %v638_v31 = vpop.eup %637  ;;  %v584_v40 = vadd.f32 -1.0, %v636_v25 }
  0x2f   : > { %483 = vst [vmem:[%s845_s25 + $0x38] sm:$0xff] %v451_v30  ;;  %v452_v39 = vsel %vm292_vm8, %v787_v38, %v583_v23  ;;  %v382_v43 = vmul.f32 1.442695, %v333_v24  ;;  %v948_v44 = vadd.f32 %v735_v1, %v233_v14  ;;  %v640_v36 = vpop.eup %639  ;;  %v585_v45 = vadd.f32 -1.0, %v638_v31 }
  0x30   : > { %484 = vst [vmem:[%s845_s25 + $0x40] sm:$0xff] %v452_v39  ;;  %vm298_vm14 = vcmp.gt.f32.partialorder %v832_v12, 0.0  ;;  %v384_v46 = vmul.f32 1.442695, %v334_v26  ;;  %v335_v50 = vmin.f32 %v941_v37, 0.0  ;;  %v453_v51 = vsel %vm293_vm9, %v800_v53, %v584_v40 }
  0x31   : > { %v586_v38 = vadd.f32 -1.0, %v640_v36  ;;  %vm299_vm15 = vcmp.gt.f32.partialorder %v835_v13, 0.0  ;;  %651 = vpow2.f32 %v382_v43  ;;  %v642_v52 = vpop.eup %641  ;;  %485 = vst [vmem:[%s845_s25 + $0x48] sm:$0xff] %v453_v51  ;;  %v454_v56 = vsel %vm294_vm10, %v803_v54, %v585_v45 }
  0x32   : > { %653 = vpow2.f32 %v384_v46  ;;  %v386_v58 = vmul.f32 1.442695, %v335_v50  ;;  %v336_v59 = vmin.f32 %v948_v44, 0.0  ;;  %486 = vst [vmem:[%s845_s25 + $0x50] sm:$0xff] %v454_v56  ;;  %v587_v16 = vadd.f32 -1.0, %v642_v52 }
  0x33   : > { %v455_v53 = vsel %vm295_vm11, %v807_v57, %v586_v38  ;;  %v234_v60 = vmul.f32 %v723_v0, %v852_v28  ;;  %v235_v61 = vmul.f32 %v723_v0, %v855_v29  ;;  %v236_v17 = vmul.f32 %v723_v0, %v858_v32 }
  0x34   : > { %v644_v62 = vpop.eup %643  ;;  %487 = vst [vmem:[%s845_s25 + $0x58] sm:$0xff] %v455_v53  ;;  %655 = vpow2.f32 %v386_v58  ;;  %v388_v54 = vmul.f32 1.442695, %v336_v59  ;;  %v237_v63 = vmul.f32 %v723_v0, %v861_v33  ;;  %v456_v2 = vsel %vm296_vm12, %v820_v4, %v587_v16 }
  0x35   : > { %v646_v57 = vpop.eup %645  ;;  %v588_v28 = vadd.f32 -1.0, %v644_v62  ;;  %v979_v29 = vadd.f32 %v735_v1, %v234_v60  ;;  %v982_v3 = vadd.f32 %v735_v1, %v235_v61  ;;  %488 = vst [vmem:[%s845_s25 + $0x60] sm:$0xff] %v456_v2  ;;  %v986_v33 = vadd.f32 %v735_v1, %v236_v17 }
  0x36   : > { %v648_v18 = vpop.eup %647  ;;  %v589_v32 = vadd.f32 -1.0, %v646_v57  ;;  %657 = vpow2.f32 %v388_v54  ;;  %v989_v5 = vadd.f32 %v735_v1, %v237_v63  ;;  %vm300_vm0 = vcmp.gt.f32.partialorder %v893_v55, 0.0 }
  0x37   : > { %v457_v4 = vsel %vm297_vm13, %v829_v11, %v588_v28  ;;  %v590_v6 = vadd.f32 -1.0, %v648_v18  ;;  %v337_v7 = vmin.f32 %v979_v29, 0.0  ;;  %v338_v9 = vmin.f32 %v982_v3, 0.0 }
  0x38   : > { %489 = vst [vmem:[%s845_s25 + $0x68] sm:$0xff] %v457_v4  ;;  %v458_v8 = vsel %vm298_vm14, %v832_v12, %v589_v32  ;;  %v650_v21 = vpop.eup %649  ;;  %v339_v15 = vmin.f32 %v986_v33, 0.0  ;;  %v340_v27 = vmin.f32 %v989_v5, 0.0  ;;  %v238_v12 = vmul.f32 %v723_v0, %v864_v34 }
  0x39   : > { %490 = vst [vmem:[%s845_s25 + $0x70] sm:$0xff] %v458_v8  ;;  %v459_v14 = vsel %vm299_vm15, %v835_v13, %v590_v6  ;;  %v390_v11 = vmul.f32 1.442695, %v337_v7  ;;  %v591_v19 = vadd.f32 -1.0, %v650_v21  ;;  %v392_v20 = vmul.f32 1.442695, %v338_v9 }
  0x3a   : > { %491 = vst [vmem:[%s845_s25 + $0x78] sm:$0xff] %v459_v14  ;;  %v394_v23 = vmul.f32 1.442695, %v339_v15  ;;  %v239_v24 = vmul.f32 %v723_v0, %v867_v35  ;;  %v240_v13 = vmul.f32 %v723_v0, %v873_v41  ;;  %v396_v30 = vmul.f32 1.442695, %v340_v27 }
  0x3b   : > { %659 = vpow2.f32 %v390_v11  ;;  %v460_v25 = vsel %vm300_vm0, %v893_v55, %v591_v19  ;;  %v1016_v26 = vadd.f32 %v735_v1, %v238_v12  ;;  %v241_v35 = vmul.f32 %v723_v0, %v876_v42 }
  0x3c   : > { %661 = vpow2.f32 %v392_v20  ;;  %492 = vst [vmem:[%s845_s25 + $0x80] sm:$0xff] %v460_v25  ;;  %v1020_v31 = vadd.f32 %v735_v1, %v239_v24  ;;  %v1023_v34 = vadd.f32 %v735_v1, %v240_v13  ;;  %vm301_vm1 = vcmp.gt.f32.partialorder %v918_v10, 0.0 }
  0x3d   : > { %663 = vpow2.f32 %v394_v23  ;;  %v341_v41 = vmin.f32 %v1016_v26, 0.0  ;;  %v242_v55 = vmul.f32 %v723_v0, %v880_v47  ;;  %vm302_vm2 = vcmp.gt.f32.partialorder %v926_v22, 0.0 }
  0x3e   : > { %v652_v39 = vpop.eup %651  ;;  %665 = vpow2.f32 %v396_v30  ;;  %vm303_vm3 = vcmp.gt.f32.partialorder %v941_v37, 0.0  ;;  %v342_v36 = vmin.f32 %v1020_v31, 0.0  ;;  %v343_v46 = vmin.f32 %v1023_v34, 0.0 }
  0x3f   : > { %v654_v40 = vpop.eup %653  ;;  %v592_v43 = vadd.f32 -1.0, %v652_v39  ;;  %v398_v45 = vmul.f32 1.442695, %v341_v41  ;;  %v1036_v50 = vadd.f32 %v735_v1, %v241_v35  ;;  %v1040_v52 = vadd.f32 %v735_v1, %v242_v55 }
  0x40   : > { %v593_v42 = vadd.f32 -1.0, %v654_v40  ;;  %v400_v47 = vmul.f32 1.442695, %v342_v36  ;;  %v243_v56 = vmul.f32 %v723_v0, %v883_v48  ;;  %v402_v53 = vmul.f32 1.442695, %v343_v46 }
  0x41   : > { %v656_v51 = vpop.eup %655  ;;  %v461_v38 = vsel %vm301_vm1, %v918_v10, %v592_v43  ;;  %667 = vpow2.f32 %v398_v45  ;;  %vm304_vm4 = vcmp.gt.f32.partialorder %v948_v44, 0.0  ;;  %v344_v10 = vmin.f32 %v1036_v50, 0.0 }
  0x42   : > { %493 = vst [vmem:[%s845_s25 + $0x88] sm:$0xff] %v461_v38  ;;  %v462_v58 = vsel %vm302_vm2, %v926_v22, %v593_v42  ;;  %v594_v59 = vadd.f32 -1.0, %v656_v51  ;;  %669 = vpow2.f32 %v400_v47  ;;  %v345_v48 = vmin.f32 %v1040_v52, 0.0 }
  0x43   : > { %v658_v16 = vpop.eup %657  ;;  %494 = vst [vmem:[%s845_s25 + $0x90] sm:$0xff] %v462_v58  ;;  %671 = vpow2.f32 %v402_v53  ;;  %v404_v22 = vmul.f32 1.442695, %v344_v10  ;;  %v1055_v62 = vadd.f32 %v735_v1, %v243_v56  ;;  %v244_v54 = vmul.f32 %v723_v0, %v886_v49 }
  0x44   : > { %v463_v60 = vsel %vm303_vm3, %v941_v37, %v594_v59  ;;  %v595_v61 = vadd.f32 -1.0, %v658_v16  ;;  %v406_v63 = vmul.f32 1.442695, %v345_v48  ;;  %vm305_vm5 = vcmp.gt.f32.partialorder %v979_v29, 0.0 }
  0x45   : > { %495 = vst [vmem:[%s845_s25 + $0x98] sm:$0xff] %v463_v60  ;;  %673 = vpow2.f32 %v404_v22  ;;  %v346_v57 = vmin.f32 %v1055_v62, 0.0  ;;  %v283_v37 = vadd.f32 %v735_v1, %v244_v54  ;;  %vm306_vm6 = vcmp.gt.f32.partialorder %v982_v3, 0.0 }
  0x46   : > { %v464_v17 = vsel %vm304_vm4, %v948_v44, %v595_v61  ;;  %675 = vpow2.f32 %v406_v63  ;;  %vm307_vm7 = vcmp.gt.f32.partialorder %v986_v33, 0.0  ;;  %vm308_vm8 = vcmp.gt.f32.partialorder %v989_v5, 0.0 }
  0x47   : > { %496 = vst [vmem:[%s845_s25 + $0xa0] sm:$0xff] %v464_v17  ;;  %v408_v0 = vmul.f32 1.442695, %v346_v57  ;;  %v347_v49 = vmin.f32 %v283_v37, 0.0  ;;  %vm309_vm9 = vcmp.gt.f32.partialorder %v1016_v26, 0.0  ;;  %vm310_vm10 = vcmp.gt.f32.partialorder %v1020_v31, 0.0 }
  0x48   : > { %v660_v2 = vpop.eup %659  ;;  %vm311_vm11 = vcmp.gt.f32.partialorder %v1023_v34, 0.0  ;;  %vm312_vm12 = vcmp.gt.f32.partialorder %v1036_v50, 0.0  ;;  %vm313_vm13 = vcmp.gt.f32.partialorder %v1040_v52, 0.0  ;;  %vm314_vm14 = vcmp.gt.f32.partialorder %v1055_v62, 0.0 }
  0x49   : > { %v662_v28 = vpop.eup %661  ;;  %v596_v18 = vadd.f32 -1.0, %v660_v2  ;;  %677 = vpow2.f32 %v408_v0  ;;  %v410_v7 = vmul.f32 1.442695, %v347_v49  ;;  %vm315_vm15 = vcmp.gt.f32.partialorder %v283_v37, 0.0 }
  0x4a   : > { %v664_v44 = vpop.eup %663  ;;  %v597_v32 = vadd.f32 -1.0, %v662_v28 }
  0x4b   : > { %v666_v1 = vpop.eup %665  ;;  %v465_v4 = vsel %vm305_vm5, %v979_v29, %v596_v18  ;;  %v598_v6 = vadd.f32 -1.0, %v664_v44  ;;  %679 = vpow2.f32 %v410_v7 }
  0x4c   : > { %497 = vst [vmem:[%s845_s25 + $0xa8] sm:$0xff] %v465_v4  ;;  %v466_v8 = vsel %vm306_vm6, %v982_v3, %v597_v32  ;;  %v599_v9 = vadd.f32 -1.0, %v666_v1 }
  0x4d   : > { %498 = vst [vmem:[%s845_s25 + $0xb0] sm:$0xff] %v466_v8  ;;  %v467_v21 = vsel %vm307_vm7, %v986_v33, %v598_v6 }
  0x4e   : > { %499 = vst [vmem:[%s845_s25 + $0xb8] sm:$0xff] %v467_v21  ;;  %v468_v14 = vsel %vm308_vm8, %v989_v5, %v599_v9  ;;  %v668_v11 = vpop.eup %667 }
  0x4f   : > { %500 = vst [vmem:[%s845_s25 + $0xc0] sm:$0xff] %v468_v14  ;;  %v670_v29 = vpop.eup %669  ;;  %v600_v15 = vadd.f32 -1.0, %v668_v11 }
  0x50   : > { %v672_v3 = vpop.eup %671  ;;  %v601_v19 = vadd.f32 -1.0, %v670_v29 }
  0x51   : > { %v469_v33 = vsel %vm309_vm9, %v1016_v26, %v600_v15  ;;  %v602_v20 = vadd.f32 -1.0, %v672_v3 }
  0x52   : > { %501 = vst [vmem:[%s845_s25 + $0xc8] sm:$0xff] %v469_v33  ;;  %v470_v5 = vsel %vm310_vm10, %v1020_v31, %v601_v19  ;;  %v674_v27 = vpop.eup %673 }
  0x53   : > { %502 = vst [vmem:[%s845_s25 + $0xd0] sm:$0xff] %v470_v5  ;;  %v471_v12 = vsel %vm311_vm11, %v1023_v34, %v602_v20  ;;  %v676_v23 = vpop.eup %675  ;;  %v603_v24 = vadd.f32 -1.0, %v674_v27 }
  0x54   : > { %503 = vst [vmem:[%s845_s25 + $0xd8] sm:$0xff] %v471_v12  ;;  %v604_v13 = vadd.f32 -1.0, %v676_v23 }
  0x55   : > { %v472_v25 = vsel %vm312_vm12, %v1036_v50, %v603_v24 }
  0x56   : > { %v678_v30 = vpop.eup %677  ;;  %504 = vst [vmem:[%s845_s25 + $0xe0] sm:$0xff] %v472_v25  ;;  %v473_v26 = vsel %vm313_vm13, %v1040_v52, %v604_v13 }
  0x57   : > { %505 = vst [vmem:[%s845_s25 + $0xe8] sm:$0xff] %v473_v26  ;;  %v605_v31 = vadd.f32 -1.0, %v678_v30 }
  0x58   : > { %v680_v34 = vpop.eup %679 }
  0x59   : > { %v474_v35 = vsel %vm314_vm14, %v1055_v62, %v605_v31  ;;  %v606_v39 = vadd.f32 -1.0, %v680_v34 }
  0x5a   : > { %506 = vst [vmem:[%s845_s25 + $0xf0] sm:$0xff] %v474_v35 }
  0x5b   : > { %v475_v41 = vsel %vm315_vm15, %v283_v37, %v606_v39 }
  0x5c   : > { %507 = vst [vmem:[%s845_s25 + $0xf8] sm:$0xff] %v475_v41 }
  0x5d PF: > { %s13_s12 = sadd.s32 1, %s687_s12  }
  0x5e   : > { %p10_p4 = scmp.ge.s32.totalorder %s13_s12, 4  }
  0x60   :  { %12 = sbr.rel (!%p10_p4) target bundleno = 1 (0x1), region = 62 }

// kernel: tile.64
= control target key start
LH: loop header
LB: loop body
LE: loop exit
PB: predicated region body
PF: predicated region fallthrough
CT: control target
= control target key end

     0   :  { %s22_s0 = inlined_call_operand.vmem [shape: f32[16], index: 0, kind: input, shape index: {}]   ;;  %s23_s1 = inlined_call_operand.vmem [shape: f32[8,16], index: 1, kind: output, shape index: {}]  }
   0x1   :  { %v4_v0 = vld [vmem:[%s22_s0] ss:$0 sm:$0xff] }
   0x2   :  { %5 = vst [vmem:[%s23_s1] sm:$0xff] %v4_v0 }

// kernel: tile.65
= control target key start
LH: loop header
LB: loop body
LE: loop exit
PB: predicated region body
PF: predicated region fallthrough
CT: control target
= control target key end

     0   :  { %s69_s10 = smov 112   ;;  %s70_s11 = smov 80   ;;  %vm3_vm0 = vcmask 130048   ;;  %vm9_vm1 = vcmask 1048448   ;;  %vm15_vm2 = vcmask 917248   ;;  %vm21_vm3 = vcmask 786048   ;;  %s113_s0 = inlined_call_operand.vmem [shape: f32[8,16], index: 0, kind: input, shape index: {}]   ;;  %s114_s1 = inlined_call_operand.vmem [shape: f32[1,128], index: 1, kind: output, shape index: {}]  }
   0x1   :  { %v55_v0 = vld [vmem:[%s113_s0 + $0x7] sm:$0x1]   ;;  %v57_v1 = vld [vmem:[%s113_s0 + $0x5] sm:$0x1]   ;;  %v56_v2 = vld [vmem:[%s113_s0 + $0x6] sm:$0x1]  }
   0x2   :  { %7 = vrot.lane.b32.xlu0 %v55_v0, %s69_s10  ;;  %19 = vrot.lane.b32.xlu1 %v57_v1, %s70_s11  ;;  %v58_v3 = vld [vmem:[%s113_s0 + $0x4] sm:$0x1]   ;;  %v2_v4 = vld [vmem:[%s113_s0] sm:$0x1]   ;;  %s71_s18 = smov 96   ;;  %s72_s19 = smov 64  }
   0x3   :  { %4 = vst.msk [vmem:[#allocation0] sm:$0x1] %vm3_vm0, %v2_v4   ;;  %v59_v5 = vld [vmem:[%s113_s0 + $0x3] sm:$0x1]   ;;  %v60_v6 = vld [vmem:[%s113_s0 + $0x2] sm:$0x1]  }
   0x4   :  { %s73_s24 = smov 48   ;;  %s74_s25 = smov 32   ;;  %v61_v7 = vld [vmem:[%s113_s0 + $0x1] sm:$0x1]   ;;  %vm27_vm4 = vcmask 654848   ;;  %vm33_vm5 = vcmask 523648  }
   0x5   :  { %s75_s0 = smov 16   ;;  %vm39_vm6 = vcmask 392448   ;;  %vm45_vm7 = vcmask 261248  }
   0x6   :  { %13 = vrot.lane.b32.xlu0 %v56_v2, %s71_s18  ;;  %25 = vrot.lane.b32.xlu1 %v58_v3, %s72_s19 }
   0xa   :  { %31 = vrot.lane.b32.xlu0 %v59_v5, %s73_s24  ;;  %37 = vrot.lane.b32.xlu1 %v60_v6, %s74_s25 }
   0xe   :  { %43 = vrot.lane.b32.xlu0 %v61_v7, %s75_s0 }
  0x74   :  { %v8_v8 = vpop.permute.xlu0 %7   ;;  %v20_v9 = vpop.permute.xlu1 %19  }
  0x75   :  { %10 = vst.msk [vmem:[#allocation0] sm:$0x1] %vm9_vm1, %v8_v8  }
  0x78   :  { %v14_v10 = vpop.permute.xlu0 %13   ;;  %v26_v11 = vpop.permute.xlu1 %25  }
  0x79   :  { %16 = vst.msk [vmem:[#allocation0] sm:$0x1] %vm15_vm2, %v14_v10  }
  0x7a   :  { %22 = vst.msk [vmem:[#allocation0] sm:$0x1] %vm21_vm3, %v20_v9  }
  0x7b   :  { %28 = vst.msk [vmem:[#allocation0] sm:$0x1] %vm27_vm4, %v26_v11  }
  0x7c   :  { %v32_v12 = vpop.permute.xlu0 %31   ;;  %v38_v13 = vpop.permute.xlu1 %37  }
  0x7d   :  { %34 = vst.msk [vmem:[#allocation0] sm:$0x1] %vm33_vm5, %v32_v12  }
  0x7e   :  { %40 = vst.msk [vmem:[#allocation0] sm:$0x1] %vm39_vm6, %v38_v13  }
  0x80   :  { %v44_v14 = vpop.permute.xlu0 %43  }
  0x81   :  { %46 = vst.msk [vmem:[#allocation0] sm:$0x1] %vm45_vm7, %v44_v14  }
  0x88   :  { %v51_v15 = vld [vmem:[#allocation0] sm:$0x1] }
  0x89   :  { %54 = vst [vmem:[%s114_s1] sm:$0x1] %v51_v15 }

// kernel: up_transition_forward.9
= control target key start
LH: loop header
LB: loop body
LE: loop exit
PB: predicated region body
PF: predicated region fallthrough
CT: control target
= control target key end

     0   :  { %s709_s12 = smov 0   ;;  %s1097_s0 = inlined_call_operand.vmem [shape: f32[1024,128], index: 0, kind: input, shape index: {}, may-alias: {0,3}]   ;;  %s1098_s1 = inlined_call_operand.vmem [shape: f32[1,128], index: 1, kind: input, shape index: {}]   ;;  %s1099_s2 = inlined_call_operand.vmem [shape: f32[1,128], index: 2, kind: input, shape index: {}]   ;;  %s1100_s3 = inlined_call_operand.vmem [shape: f32[1024,128], index: 3, kind: output, shape index: {}, may-alias: {0,3}]  }
   0x1 LB: > { %s564_s13 = sadd.s32 4294967295, %s687_s12   ;;  %p568_p0 = scmp.ge.s32.totalorder %s687_s12, 1  ;;  %s687_s12 = sphi %s709_s12, %s13_s12  }
   0x2   : > { %p138_p1 = scmp.lt.s32.totalorder %s687_s12, 5 }
   0x4   : > { %p139_p2 = pnand %p568_p0, %p138_p1 }
   0x5   : > { %s569_s14 = sshll.u32 (!%p139_p2), %s564_s13, 5 }
   0x6   : > { %142 = sbr.rel (%p139_p2) target bundleno = 93 (0x5d), region = 32  ;;  %p163_p3 = scmp.lt.s32.totalorder (!%p139_p2), %s569_s14, 127 }
   0xb   : > { %s1102_s14 = smov (!%p163_p3, %s569_s14), 127  ;;  %v723_v0 = vld [vmem:[%s1098_s1] ss:$0 sm:$0xff] }
   0xc   : > { %s570_s15 = sshll.u32 %s1102_s14, 3  ;;  %v735_v1 = vld [vmem:[%s1099_s2] ss:$0 sm:$0xff] }
   0xd   : > { %s730_s20 = scalar_lea.vmem %s1097_s0, %s570_s15  ;;  %s845_s25 = scalar_lea.vmem %s1100_s3, %s570_s15 }
   0xe   : > { %v174_v2 = vld [vmem:[%s730_s20] sm:$0xff]  ;;  %v175_v3 = vld [vmem:[%s730_s20 + $0x8] sm:$0xff]  ;;  %v176_v4 = vld [vmem:[%s730_s20 + $0x10] sm:$0xff] }
   0xf   : > { %v177_v5 = vld [vmem:[%s730_s20 + $0x18] sm:$0xff]  ;;  %v178_v6 = vld [vmem:[%s730_s20 + $0x20] sm:$0xff]  ;;  %v179_v7 = vld [vmem:[%s730_s20 + $0x28] sm:$0xff]  ;;  %v213_v8 = vmul.f32 %v723_v0, %v174_v2  ;;  %v214_v9 = vmul.f32 %v723_v0, %v175_v3  ;;  %v215_v10 = vmul.f32 %v723_v0, %v176_v4 }
  0x10   : > { %v180_v11 = vld [vmem:[%s730_s20 + $0x30] sm:$0xff]  ;;  %v181_v12 = vld [vmem:[%s730_s20 + $0x38] sm:$0xff]  ;;  %v216_v13 = vmul.f32 %v723_v0, %v177_v5  ;;  %v217_v14 = vmul.f32 %v723_v0, %v178_v6  ;;  %v218_v15 = vmul.f32 %v723_v0, %v179_v7  ;;  %v182_v20 = vld [vmem:[%s730_s20 + $0x40] sm:$0xff] }
  0x11   : > { %v752_v16 = vadd.f32 %v735_v1, %v213_v8  ;;  %v755_v17 = vadd.f32 %v735_v1, %v214_v9  ;;  %v758_v18 = vadd.f32 %v735_v1, %v215_v10  ;;  %v219_v19 = vmul.f32 %v723_v0, %v180_v11  ;;  %v183_v24 = vld [vmem:[%s730_s20 + $0x48] sm:$0xff]  ;;  %v184_v28 = vld [vmem:[%s730_s20 + $0x50] sm:$0xff]  ;;  %v185_v33 = vld [vmem:[%s730_s20 + $0x58] sm:$0xff] }
  0x12   : > { %v763_v21 = vadd.f32 %v735_v1, %v216_v13  ;;  %v220_v22 = vmul.f32 %v723_v0, %v181_v12  ;;  %v771_v27 = vadd.f32 %v735_v1, %v217_v14  ;;  %v775_v30 = vadd.f32 %v735_v1, %v218_v15  ;;  %v186_v46 = vld [vmem:[%s730_s20 + $0x60] sm:$0xff]  ;;  %v187_v55 = vld [vmem:[%s730_s20 + $0x68] sm:$0xff]  ;;  %v188_v59 = vld [vmem:[%s730_s20 + $0x70] sm:$0xff] }
  0x13   : > { %v316_v23 = vmin.f32 %v752_v16, 0.0  ;;  %v317_v25 = vmin.f32 %v755_v17, 0.0  ;;  %v318_v26 = vmin.f32 %v758_v18, 0.0  ;;  %v778_v31 = vadd.f32 %v735_v1, %v219_v19  ;;  %v189_v60 = vld [vmem:[%s730_s20 + $0x78] sm:$0xff]  ;;  %v190_v2 = vld [vmem:[%s730_s20 + $0x80] sm:$0xff] }
  0x14   : > { %v221_v32 = vmul.f32 %v723_v0, %v182_v20  ;;  %v319_v35 = vmin.f32 %v763_v21, 0.0  ;;  %v784_v36 = vadd.f32 %v735_v1, %v220_v22  ;;  %v222_v39 = vmul.f32 %v723_v0, %v183_v24  ;;  %v192_v24 = vld [vmem:[%s730_s20 + $0x90] sm:$0xff] }
  0x15   : > { %v348_v29 = vmul.f32 1.442695, %v316_v23  ;;  %v350_v34 = vmul.f32 1.442695, %v317_v25  ;;  %v352_v37 = vmul.f32 1.442695, %v318_v26  ;;  %v223_v42 = vmul.f32 %v723_v0, %v184_v28 }
  0x16   : > { %v787_v38 = vadd.f32 %v735_v1, %v221_v32  ;;  %v354_v40 = vmul.f32 1.442695, %v319_v35  ;;  %v320_v41 = vmin.f32 %v771_v27, 0.0  ;;  %v321_v43 = vmin.f32 %v775_v30, 0.0  ;;  %v191_v23 = vld [vmem:[%s730_s20 + $0x88] sm:$0xff]  ;;  %v193_v25 = vld [vmem:[%s730_s20 + $0x98] sm:$0xff] }
  0x17   : > { %617 = vpow2.f32 %v348_v29  ;;  %v322_v44 = vmin.f32 %v778_v31, 0.0  ;;  %v224_v45 = vmul.f32 %v723_v0, %v185_v33  ;;  %v323_v48 = vmin.f32 %v784_v36, 0.0  ;;  %v194_v26 = vld [vmem:[%s730_s20 + $0xa0] sm:$0xff]  ;;  %v852_v28 = vld [vmem:[%s730_s20 + $0xa8] sm:$0xff]  ;;  %v855_v29 = vld [vmem:[%s730_s20 + $0xb0] sm:$0xff] }
  0x18   : > { %619 = vpow2.f32 %v350_v34  ;;  %v356_v47 = vmul.f32 1.442695, %v320_v41  ;;  %v358_v49 = vmul.f32 1.442695, %v321_v43  ;;  %v324_v51 = vmin.f32 %v787_v38, 0.0  ;;  %v858_v32 = vld [vmem:[%s730_s20 + $0xb8] sm:$0xff] }
  0x19   : > { %621 = vpow2.f32 %v352_v37  ;;  %v360_v50 = vmul.f32 1.442695, %v322_v44  ;;  %vm284_vm0 = vcmp.gt.f32.partialorder %v752_v16, 0.0  ;;  %v362_v52 = vmul.f32 1.442695, %v323_v48  ;;  %v861_v33 = vld [vmem:[%s730_s20 + $0xc0] sm:$0xff] }
  0x1a   : > { %623 = vpow2.f32 %v354_v40  ;;  %v800_v53 = vadd.f32 %v735_v1, %v222_v39  ;;  %v803_v54 = vadd.f32 %v735_v1, %v223_v42  ;;  %v364_v56 = vmul.f32 1.442695, %v324_v51  ;;  %v864_v34 = vld [vmem:[%s730_s20 + $0xc8] sm:$0xff]  ;;  %v867_v35 = vld [vmem:[%s730_s20 + $0xd0] sm:$0xff]  ;;  %v873_v41 = vld [vmem:[%s730_s20 + $0xd8] sm:$0xff] }
  0x1b   : > { %625 = vpow2.f32 %v356_v47  ;;  %v807_v57 = vadd.f32 %v735_v1, %v224_v45  ;;  %v225_v58 = vmul.f32 %v723_v0, %v186_v46  ;;  %vm285_vm1 = vcmp.gt.f32.partialorder %v755_v17, 0.0  ;;  %v876_v42 = vld [vmem:[%s730_s20 + $0xe0] sm:$0xff]  ;;  %v880_v47 = vld [vmem:[%s730_s20 + $0xe8] sm:$0xff]  ;;  %v883_v48 = vld [vmem:[%s730_s20 + $0xf0] sm:$0xff] }
  0x1c   : > { %627 = vpow2.f32 %v358_v49  ;;  %vm286_vm2 = vcmp.gt.f32.partialorder %v758_v18, 0.0  ;;  %v325_v61 = vmin.f32 %v800_v53, 0.0  ;;  %vm287_vm3 = vcmp.gt.f32.partialorder %v763_v21, 0.0  ;;  %v886_v49 = vld [vmem:[%s730_s20 + $0xf8] sm:$0xff] }
  0x1d   : > { %629 = vpow2.f32 %v360_v50  ;;  %v326_v62 = vmin.f32 %v803_v54, 0.0  ;;  %v327_v63 = vmin.f32 %v807_v57, 0.0  ;;  %v820_v4 = vadd.f32 %v735_v1, %v225_v58 }
  0x1e   : > { %631 = vpow2.f32 %v362_v52  ;;  %v366_v3 = vmul.f32 1.442695, %v325_v61  ;;  %v226_v5 = vmul.f32 %v723_v0, %v187_v55  ;;  %vm288_vm4 = vcmp.gt.f32.partialorder %v771_v27, 0.0 }
  0x1f   : > { %633 = vpow2.f32 %v364_v56  ;;  %v368_v6 = vmul.f32 1.442695, %v326_v62  ;;  %v370_v7 = vmul.f32 1.442695, %v327_v63  ;;  %v227_v8 = vmul.f32 %v723_v0, %v188_v59 }
  0x20   : > { %v228_v9 = vmul.f32 %v723_v0, %v189_v60  ;;  %vm289_vm5 = vcmp.gt.f32.partialorder %v775_v30, 0.0  ;;  %635 = vpow2.f32 %v366_v3  ;;  %v328_v10 = vmin.f32 %v820_v4, 0.0 }
  0x21   : > { %v829_v11 = vadd.f32 %v735_v1, %v226_v5  ;;  %637 = vpow2.f32 %v368_v6  ;;  %v832_v12 = vadd.f32 %v735_v1, %v227_v8  ;;  %v229_v14 = vmul.f32 %v723_v0, %v190_v2 }
  0x22   : > { %v835_v13 = vadd.f32 %v735_v1, %v228_v9  ;;  %vm290_vm6 = vcmp.gt.f32.partialorder %v778_v31, 0.0  ;;  %639 = vpow2.f32 %v370_v7  ;;  %v372_v19 = vmul.f32 1.442695, %v328_v10 }
  0x23   : > { %v329_v20 = vmin.f32 %v829_v11, 0.0  ;;  %vm291_vm7 = vcmp.gt.f32.partialorder %v784_v36, 0.0  ;;  %vm292_vm8 = vcmp.gt.f32.partialorder %v787_v38, 0.0  ;;  %v330_v39 = vmin.f32 %v832_v12, 0.0 }
  0x24   : > { %v618_v15 = vpop.eup %617  ;;  %641 = vpow2.f32 %v372_v19  ;;  %v331_v45 = vmin.f32 %v835_v13, 0.0  ;;  %vm293_vm9 = vcmp.gt.f32.partialorder %v800_v53, 0.0  ;;  %v893_v55 = vadd.f32 %v735_v1, %v229_v14 }
  0x25   : > { %v620_v22 = vpop.eup %619  ;;  %v575_v37 = vadd.f32 -1.0, %v618_v15  ;;  %v374_v44 = vmul.f32 1.442695, %v329_v20  ;;  %v376_v52 = vmul.f32 1.442695, %v330_v39  ;;  %vm294_vm10 = vcmp.gt.f32.partialorder %v803_v54, 0.0 }
  0x26   : > { %v622_v40 = vpop.eup %621  ;;  %v576_v43 = vadd.f32 -1.0, %v620_v22  ;;  %v378_v59 = vmul.f32 1.442695, %v331_v45  ;;  %vm295_vm11 = vcmp.gt.f32.partialorder %v807_v57, 0.0  ;;  %v332_v61 = vmin.f32 %v893_v55, 0.0 }
  0x27   : > { %v624_v46 = vpop.eup %623  ;;  %v444_v50 = vsel %vm284_vm0, %v752_v16, %v575_v37  ;;  %v577_v51 = vadd.f32 -1.0, %v622_v40  ;;  %643 = vpow2.f32 %v374_v44  ;;  %v230_v2 = vmul.f32 %v723_v0, %v191_v23 }
  0x28   : > { %476 = vst [vmem:[%s845_s25] sm:$0xff] %v444_v50  ;;  %v445_v56 = vsel %vm285_vm1, %v755_v17, %v576_v43  ;;  %v578_v58 = vadd.f32 -1.0, %v624_v46  ;;  %v626_v16 = vpop.eup %625  ;;  %645 = vpow2.f32 %v376_v52  ;;  %v380_v5 = vmul.f32 1.442695, %v332_v61 }
  0x29   : > { %477 = vst [vmem:[%s845_s25 + $0x8] sm:$0xff] %v445_v56  ;;  %v446_v60 = vsel %vm286_vm2, %v758_v18, %v577_v51  ;;  %v628_v62 = vpop.eup %627  ;;  %v579_v63 = vadd.f32 -1.0, %v626_v16  ;;  %647 = vpow2.f32 %v378_v59  ;;  %v231_v6 = vmul.f32 %v723_v0, %v192_v24 }
  0x2a   : > { %478 = vst [vmem:[%s845_s25 + $0x10] sm:$0xff] %v446_v60  ;;  %v447_v17 = vsel %vm287_vm3, %v763_v21, %v578_v58  ;;  %v630_v3 = vpop.eup %629  ;;  %v580_v18 = vadd.f32 -1.0, %v628_v62  ;;  %v232_v7 = vmul.f32 %v723_v0, %v193_v25  ;;  %v918_v10 = vadd.f32 %v735_v1, %v230_v2 }
  0x2b   : > { %479 = vst [vmem:[%s845_s25 + $0x18] sm:$0xff] %v447_v17  ;;  %v632_v8 = vpop.eup %631  ;;  %v448_v9 = vsel %vm288_vm4, %v771_v27, %v579_v63  ;;  %v581_v21 = vadd.f32 -1.0, %v630_v3  ;;  %v233_v14 = vmul.f32 %v723_v0, %v194_v26  ;;  %649 = vpow2.f32 %v380_v5 }
  0x2c   : > { %v634_v15 = vpop.eup %633  ;;  %480 = vst [vmem:[%s845_s25 + $0x20] sm:$0xff] %v448_v9  ;;  %v449_v19 = vsel %vm289_vm5, %v775_v30, %v580_v18  ;;  %v582_v20 = vadd.f32 -1.0, %v632_v8  ;;  %v926_v22 = vadd.f32 %v735_v1, %v231_v6  ;;  %vm296_vm12 = vcmp.gt.f32.partialorder %v820_v4, 0.0 }
  0x2d   : > { %481 = vst [vmem:[%s845_s25 + $0x28] sm:$0xff] %v449_v19  ;;  %v450_v27 = vsel %vm290_vm6, %v778_v31, %v581_v21  ;;  %v583_v23 = vadd.f32 -1.0, %v634_v15  ;;  %v333_v24 = vmin.f32 %v918_v10, 0.0  ;;  %v636_v25 = vpop.eup %635  ;;  %vm297_vm13 = vcmp.gt.f32.partialorder %v829_v11, 0.0 }
  0x2e   : > { %482 = vst [vmem:[%s845_s25 + $0x30] sm:$0xff] %v450_v27  ;;  %v451_v30 = vsel %vm291_vm7, %v784_v36, %v582_v20  ;;  %v334_v26 = vmin.f32 %v926_v22, 0.0  ;;  %v941_v37 = vadd.f32 %v735_v1, %v232_v7  ;;  %v638_v31 = vpop.eup %637  ;;  %v584_v40 = vadd.f32 -1.0, %v636_v25 }
  0x2f   : > { %483 = vst [vmem:[%s845_s25 + $0x38] sm:$0xff] %v451_v30  ;;  %v452_v39 = vsel %vm292_vm8, %v787_v38, %v583_v23  ;;  %v382_v43 = vmul.f32 1.442695, %v333_v24  ;;  %v948_v44 = vadd.f32 %v735_v1, %v233_v14  ;;  %v640_v36 = vpop.eup %639  ;;  %v585_v45 = vadd.f32 -1.0, %v638_v31 }
  0x30   : > { %484 = vst [vmem:[%s845_s25 + $0x40] sm:$0xff] %v452_v39  ;;  %vm298_vm14 = vcmp.gt.f32.partialorder %v832_v12, 0.0  ;;  %v384_v46 = vmul.f32 1.442695, %v334_v26  ;;  %v335_v50 = vmin.f32 %v941_v37, 0.0  ;;  %v453_v51 = vsel %vm293_vm9, %v800_v53, %v584_v40 }
  0x31   : > { %v586_v38 = vadd.f32 -1.0, %v640_v36  ;;  %vm299_vm15 = vcmp.gt.f32.partialorder %v835_v13, 0.0  ;;  %651 = vpow2.f32 %v382_v43  ;;  %v642_v52 = vpop.eup %641  ;;  %485 = vst [vmem:[%s845_s25 + $0x48] sm:$0xff] %v453_v51  ;;  %v454_v56 = vsel %vm294_vm10, %v803_v54, %v585_v45 }
  0x32   : > { %653 = vpow2.f32 %v384_v46  ;;  %v386_v58 = vmul.f32 1.442695, %v335_v50  ;;  %v336_v59 = vmin.f32 %v948_v44, 0.0  ;;  %486 = vst [vmem:[%s845_s25 + $0x50] sm:$0xff] %v454_v56  ;;  %v587_v16 = vadd.f32 -1.0, %v642_v52 }
  0x33   : > { %v455_v53 = vsel %vm295_vm11, %v807_v57, %v586_v38  ;;  %v234_v60 = vmul.f32 %v723_v0, %v852_v28  ;;  %v235_v61 = vmul.f32 %v723_v0, %v855_v29  ;;  %v236_v17 = vmul.f32 %v723_v0, %v858_v32 }
  0x34   : > { %v644_v62 = vpop.eup %643  ;;  %487 = vst [vmem:[%s845_s25 + $0x58] sm:$0xff] %v455_v53  ;;  %655 = vpow2.f32 %v386_v58  ;;  %v388_v54 = vmul.f32 1.442695, %v336_v59  ;;  %v237_v63 = vmul.f32 %v723_v0, %v861_v33  ;;  %v456_v2 = vsel %vm296_vm12, %v820_v4, %v587_v16 }
  0x35   : > { %v646_v57 = vpop.eup %645  ;;  %v588_v28 = vadd.f32 -1.0, %v644_v62  ;;  %v979_v29 = vadd.f32 %v735_v1, %v234_v60  ;;  %v982_v3 = vadd.f32 %v735_v1, %v235_v61  ;;  %488 = vst [vmem:[%s845_s25 + $0x60] sm:$0xff] %v456_v2  ;;  %v986_v33 = vadd.f32 %v735_v1, %v236_v17 }
  0x36   : > { %v648_v18 = vpop.eup %647  ;;  %v589_v32 = vadd.f32 -1.0, %v646_v57  ;;  %657 = vpow2.f32 %v388_v54  ;;  %v989_v5 = vadd.f32 %v735_v1, %v237_v63  ;;  %vm300_vm0 = vcmp.gt.f32.partialorder %v893_v55, 0.0 }
  0x37   : > { %v457_v4 = vsel %vm297_vm13, %v829_v11, %v588_v28  ;;  %v590_v6 = vadd.f32 -1.0, %v648_v18  ;;  %v337_v7 = vmin.f32 %v979_v29, 0.0  ;;  %v338_v9 = vmin.f32 %v982_v3, 0.0 }
  0x38   : > { %489 = vst [vmem:[%s845_s25 + $0x68] sm:$0xff] %v457_v4  ;;  %v458_v8 = vsel %vm298_vm14, %v832_v12, %v589_v32  ;;  %v650_v21 = vpop.eup %649  ;;  %v339_v15 = vmin.f32 %v986_v33, 0.0  ;;  %v340_v27 = vmin.f32 %v989_v5, 0.0  ;;  %v238_v12 = vmul.f32 %v723_v0, %v864_v34 }
  0x39   : > { %490 = vst [vmem:[%s845_s25 + $0x70] sm:$0xff] %v458_v8  ;;  %v459_v14 = vsel %vm299_vm15, %v835_v13, %v590_v6  ;;  %v390_v11 = vmul.f32 1.442695, %v337_v7  ;;  %v591_v19 = vadd.f32 -1.0, %v650_v21  ;;  %v392_v20 = vmul.f32 1.442695, %v338_v9 }
  0x3a   : > { %491 = vst [vmem:[%s845_s25 + $0x78] sm:$0xff] %v459_v14  ;;  %v394_v23 = vmul.f32 1.442695, %v339_v15  ;;  %v239_v24 = vmul.f32 %v723_v0, %v867_v35  ;;  %v240_v13 = vmul.f32 %v723_v0, %v873_v41  ;;  %v396_v30 = vmul.f32 1.442695, %v340_v27 }
  0x3b   : > { %659 = vpow2.f32 %v390_v11  ;;  %v460_v25 = vsel %vm300_vm0, %v893_v55, %v591_v19  ;;  %v1016_v26 = vadd.f32 %v735_v1, %v238_v12  ;;  %v241_v35 = vmul.f32 %v723_v0, %v876_v42 }
  0x3c   : > { %661 = vpow2.f32 %v392_v20  ;;  %492 = vst [vmem:[%s845_s25 + $0x80] sm:$0xff] %v460_v25  ;;  %v1020_v31 = vadd.f32 %v735_v1, %v239_v24  ;;  %v1023_v34 = vadd.f32 %v735_v1, %v240_v13  ;;  %vm301_vm1 = vcmp.gt.f32.partialorder %v918_v10, 0.0 }
  0x3d   : > { %663 = vpow2.f32 %v394_v23  ;;  %v341_v41 = vmin.f32 %v1016_v26, 0.0  ;;  %v242_v55 = vmul.f32 %v723_v0, %v880_v47  ;;  %vm302_vm2 = vcmp.gt.f32.partialorder %v926_v22, 0.0 }
  0x3e   : > { %v652_v39 = vpop.eup %651  ;;  %665 = vpow2.f32 %v396_v30  ;;  %vm303_vm3 = vcmp.gt.f32.partialorder %v941_v37, 0.0  ;;  %v342_v36 = vmin.f32 %v1020_v31, 0.0  ;;  %v343_v46 = vmin.f32 %v1023_v34, 0.0 }
  0x3f   : > { %v654_v40 = vpop.eup %653  ;;  %v592_v43 = vadd.f32 -1.0, %v652_v39  ;;  %v398_v45 = vmul.f32 1.442695, %v341_v41  ;;  %v1036_v50 = vadd.f32 %v735_v1, %v241_v35  ;;  %v1040_v52 = vadd.f32 %v735_v1, %v242_v55 }
  0x40   : > { %v593_v42 = vadd.f32 -1.0, %v654_v40  ;;  %v400_v47 = vmul.f32 1.442695, %v342_v36  ;;  %v243_v56 = vmul.f32 %v723_v0, %v883_v48  ;;  %v402_v53 = vmul.f32 1.442695, %v343_v46 }
  0x41   : > { %v656_v51 = vpop.eup %655  ;;  %v461_v38 = vsel %vm301_vm1, %v918_v10, %v592_v43  ;;  %667 = vpow2.f32 %v398_v45  ;;  %vm304_vm4 = vcmp.gt.f32.partialorder %v948_v44, 0.0  ;;  %v344_v10 = vmin.f32 %v1036_v50, 0.0 }
  0x42   : > { %493 = vst [vmem:[%s845_s25 + $0x88] sm:$0xff] %v461_v38  ;;  %v462_v58 = vsel %vm302_vm2, %v926_v22, %v593_v42  ;;  %v594_v59 = vadd.f32 -1.0, %v656_v51  ;;  %669 = vpow2.f32 %v400_v47  ;;  %v345_v48 = vmin.f32 %v1040_v52, 0.0 }
  0x43   : > { %v658_v16 = vpop.eup %657  ;;  %494 = vst [vmem:[%s845_s25 + $0x90] sm:$0xff] %v462_v58  ;;  %671 = vpow2.f32 %v402_v53  ;;  %v404_v22 = vmul.f32 1.442695, %v344_v10  ;;  %v1055_v62 = vadd.f32 %v735_v1, %v243_v56  ;;  %v244_v54 = vmul.f32 %v723_v0, %v886_v49 }
  0x44   : > { %v463_v60 = vsel %vm303_vm3, %v941_v37, %v594_v59  ;;  %v595_v61 = vadd.f32 -1.0, %v658_v16  ;;  %v406_v63 = vmul.f32 1.442695, %v345_v48  ;;  %vm305_vm5 = vcmp.gt.f32.partialorder %v979_v29, 0.0 }
  0x45   : > { %495 = vst [vmem:[%s845_s25 + $0x98] sm:$0xff] %v463_v60  ;;  %673 = vpow2.f32 %v404_v22  ;;  %v346_v57 = vmin.f32 %v1055_v62, 0.0  ;;  %v283_v37 = vadd.f32 %v735_v1, %v244_v54  ;;  %vm306_vm6 = vcmp.gt.f32.partialorder %v982_v3, 0.0 }
  0x46   : > { %v464_v17 = vsel %vm304_vm4, %v948_v44, %v595_v61  ;;  %675 = vpow2.f32 %v406_v63  ;;  %vm307_vm7 = vcmp.gt.f32.partialorder %v986_v33, 0.0  ;;  %vm308_vm8 = vcmp.gt.f32.partialorder %v989_v5, 0.0 }
  0x47   : > { %496 = vst [vmem:[%s845_s25 + $0xa0] sm:$0xff] %v464_v17  ;;  %v408_v0 = vmul.f32 1.442695, %v346_v57  ;;  %v347_v49 = vmin.f32 %v283_v37, 0.0  ;;  %vm309_vm9 = vcmp.gt.f32.partialorder %v1016_v26, 0.0  ;;  %vm310_vm10 = vcmp.gt.f32.partialorder %v1020_v31, 0.0 }
  0x48   : > { %v660_v2 = vpop.eup %659  ;;  %vm311_vm11 = vcmp.gt.f32.partialorder %v1023_v34, 0.0  ;;  %vm312_vm12 = vcmp.gt.f32.partialorder %v1036_v50, 0.0  ;;  %vm313_vm13 = vcmp.gt.f32.partialorder %v1040_v52, 0.0  ;;  %vm314_vm14 = vcmp.gt.f32.partialorder %v1055_v62, 0.0 }
  0x49   : > { %v662_v28 = vpop.eup %661  ;;  %v596_v18 = vadd.f32 -1.0, %v660_v2  ;;  %677 = vpow2.f32 %v408_v0  ;;  %v410_v7 = vmul.f32 1.442695, %v347_v49  ;;  %vm315_vm15 = vcmp.gt.f32.partialorder %v283_v37, 0.0 }
  0x4a   : > { %v664_v44 = vpop.eup %663  ;;  %v597_v32 = vadd.f32 -1.0, %v662_v28 }
  0x4b   : > { %v666_v1 = vpop.eup %665  ;;  %v465_v4 = vsel %vm305_vm5, %v979_v29, %v596_v18  ;;  %v598_v6 = vadd.f32 -1.0, %v664_v44  ;;  %679 = vpow2.f32 %v410_v7 }
  0x4c   : > { %497 = vst [vmem:[%s845_s25 + $0xa8] sm:$0xff] %v465_v4  ;;  %v466_v8 = vsel %vm306_vm6, %v982_v3, %v597_v32  ;;  %v599_v9 = vadd.f32 -1.0, %v666_v1 }
  0x4d   : > { %498 = vst [vmem:[%s845_s25 + $0xb0] sm:$0xff] %v466_v8  ;;  %v467_v21 = vsel %vm307_vm7, %v986_v33, %v598_v6 }
  0x4e   : > { %499 = vst [vmem:[%s845_s25 + $0xb8] sm:$0xff] %v467_v21  ;;  %v468_v14 = vsel %vm308_vm8, %v989_v5, %v599_v9  ;;  %v668_v11 = vpop.eup %667 }
  0x4f   : > { %500 = vst [vmem:[%s845_s25 + $0xc0] sm:$0xff] %v468_v14  ;;  %v670_v29 = vpop.eup %669  ;;  %v600_v15 = vadd.f32 -1.0, %v668_v11 }
  0x50   : > { %v672_v3 = vpop.eup %671  ;;  %v601_v19 = vadd.f32 -1.0, %v670_v29 }
  0x51   : > { %v469_v33 = vsel %vm309_vm9, %v1016_v26, %v600_v15  ;;  %v602_v20 = vadd.f32 -1.0, %v672_v3 }
  0x52   : > { %501 = vst [vmem:[%s845_s25 + $0xc8] sm:$0xff] %v469_v33  ;;  %v470_v5 = vsel %vm310_vm10, %v1020_v31, %v601_v19  ;;  %v674_v27 = vpop.eup %673 }
  0x53   : > { %502 = vst [vmem:[%s845_s25 + $0xd0] sm:$0xff] %v470_v5  ;;  %v471_v12 = vsel %vm311_vm11, %v1023_v34, %v602_v20  ;;  %v676_v23 = vpop.eup %675  ;;  %v603_v24 = vadd.f32 -1.0, %v674_v27 }
  0x54   : > { %503 = vst [vmem:[%s845_s25 + $0xd8] sm:$0xff] %v471_v12  ;;  %v604_v13 = vadd.f32 -1.0, %v676_v23 }
  0x55   : > { %v472_v25 = vsel %vm312_vm12, %v1036_v50, %v603_v24 }
  0x56   : > { %v678_v30 = vpop.eup %677  ;;  %504 = vst [vmem:[%s845_s25 + $0xe0] sm:$0xff] %v472_v25  ;;  %v473_v26 = vsel %vm313_vm13, %v1040_v52, %v604_v13 }
  0x57   : > { %505 = vst [vmem:[%s845_s25 + $0xe8] sm:$0xff] %v473_v26  ;;  %v605_v31 = vadd.f32 -1.0, %v678_v30 }
  0x58   : > { %v680_v34 = vpop.eup %679 }
  0x59   : > { %v474_v35 = vsel %vm314_vm14, %v1055_v62, %v605_v31  ;;  %v606_v39 = vadd.f32 -1.0, %v680_v34 }
  0x5a   : > { %506 = vst [vmem:[%s845_s25 + $0xf0] sm:$0xff] %v474_v35 }
  0x5b   : > { %v475_v41 = vsel %vm315_vm15, %v283_v37, %v606_v39 }
  0x5c   : > { %507 = vst [vmem:[%s845_s25 + $0xf8] sm:$0xff] %v475_v41 }
  0x5d PF: > { %s13_s12 = sadd.s32 1, %s687_s12  }
  0x5e   : > { %p10_p4 = scmp.ge.s32.totalorder %s13_s12, 6  }
  0x60   :  { %12 = sbr.rel (!%p10_p4) target bundleno = 1 (0x1), region = 62 }

// kernel: up_transition_forward.8
= control target key start
LH: loop header
LB: loop body
LE: loop exit
PB: predicated region body
PF: predicated region fallthrough
CT: control target
= control target key end

     0   :  { %s14145_s30 = smov 0   ;;  %s14147_s10 = smov 0   ;;  %s17199_s0 = inlined_call_operand.vmem [shape: bf16[2,20,320,80], index: 0, kind: input, shape index: {}, may-alias: {0,1,2,3,4}]   ;;  %s17200_s1 = inlined_call_operand.vmem [shape: bf16[2,20,320,80], index: 1, kind: input, shape index: {}, may-alias: {0,1,2,3,4}]   ;;  %s17201_s2 = inlined_call_operand.vmem [shape: bf16[2,20,320,80], index: 2, kind: input, shape index: {}, may-alias: {0,1,2,3,4}]   ;;  %s17202_s3 = inlined_call_operand.vmem [shape: bf16[2,20,320,80], index: 3, kind: input, shape index: {}, may-alias: {0,1,2,3,4}]   ;;  %s17203_s4 = inlined_call_operand.vmem [shape: bf16[2,20,320,80], index: 4, kind: input, shape index: {}, may-alias: {0,1,2,3,4}]   ;;  %s17204_s5 = inlined_call_operand.vmem [shape: bf16[25,80,16], index: 5, kind: input, shape index: {}]   ;;  %s17205_s6 = inlined_call_operand.vmem [shape: f32[1,16], index: 6, kind: input, shape index: {}]   ;;  %s17206_s7 = inlined_call_operand.vmem [shape: f32[2,16,256,16], index: 7, kind: output, shape index: {0}]   ;;  %s17207_s8 = inlined_call_operand.vmem [shape: f32[2,16,1,16], index: 8, kind: output, shape index: {1}]   ;;  %s17208_s9 = inlined_call_operand.vmem [shape: f32[2,16,1,16], index: 9, kind: output, shape index: {2}]  }
   0x1   :  { %s14149_s11 = smov 0   ;;  %s14151_s12 = smov 0  }
   0x2   :  { %s14153_s13 = smov 0  }
   0x3 LB: > { %s29_s14 = sadd.s32 1, %s14085_s11  ;;  %s32_s15 = sadd.s32 1, %s14089_s12  ;;  %s14093_s13 = sphi %s14153_s13, %s20_s13   ;;  %s14089_s12 = sphi %s14151_s12, %s17291_s12   ;;  %s14085_s11 = sphi %s14149_s11, %s17290_s11   ;;  %s14081_s10 = sphi %s14147_s10, %s17289_s10   ;;  %s14077_s30 = sphi %s14145_s30, %s17288_s30  }
   0x4   : > { %p30_p0 = scmp.ge.s32.totalorder %s29_s14, 16  ;;  %p10750_p1 = scmp.ge.s32.totalorder %s14093_s13, 1 }
   0x5   : > { %p396_p2 = scmp.lt.s32.totalorder %s14093_s13, 33 }
   0x6   : > { %s17293_s14 = smov (%p30_p0, %s29_s14), 0  ;;  %s17295_s15 = smov (!%p30_p0, %s32_s15), %s14089_s12 }
   0x7   : > { %p397_p3 = pnand %p10750_p1, %p396_p2  ;;  %p34_p4 = scmp.ge.s32.totalorder %s17295_s15, 2 }
   0x9   : > { %s17297_s15 = smov (%p34_p4, %s17295_s15), 0  ;;  %400 = sbr.rel (%p397_p3) target bundleno = 1138 (0x472), region = 48 }
   0xe   : > { %v13545_v0 = vld [vmem:[%s17204_s5 + $0x48] sm:$0xff]   ;;  %p494_p5 = scmp.lt.s32.totalorder %s14081_s10, 1  ;;  %v13546_v1 = vld [vmem:[%s17204_s5 + $0x40] sm:$0xff]   ;;  %p496_p6 = scmp.lt.s32.totalorder %s14077_s30, 19  ;;  %v13547_v2 = vld [vmem:[%s17204_s5 + $0x38] sm:$0xff]   ;;  %vm736_vm0 = vcmask 654336  }
   0xf   : > { %12439 = vmatprep.subr.bf16.mxu0 %v13545_v0  ;;  %13489 = vmatprep.subr.bf16.mxu1 %v13545_v0  ;;  %v13548_v3 = vld [vmem:[%s17204_s5 + $0x30] sm:$0xff]   ;;  %v13549_v6 = vld [vmem:[%s17204_s5 + $0x28] sm:$0xff]   ;;  %v13554_v7 = vld [vmem:[%s17204_s5 + $0x20] sm:$0xff]   ;;  %s503_s29 = sadd.s32 1, %s14077_s30  ;;  %p549_p11 = scmp.lt.s32.totalorder %s14077_s30, 15  ;;  %vm10246_vm1 = vcmask 130048  }
  0x10   : > { %s17299_s10 = smov (!%p494_p5, %s14081_s10), 1  ;;  %12440 = vmatpush3.bf16.msra.mxu0 %v13545_v0  ;;  %13494 = vmatpush3.bf16.msra.mxu1 %v13545_v0  ;;  %v13555_v8 = vld [vmem:[%s17204_s5 + $0x70] sm:$0xff]   ;;  %v13558_v12 = vld [vmem:[%s17204_s5 + $0x18] sm:$0xff]   ;;  %v13561_v14 = vld [vmem:[%s17204_s5 + $0x68] sm:$0xff]   ;;  %p506_p7 = scmp.lt.s32.totalorder %s503_s29, 19  ;;  %vm10381_vm2 = vcmask 122880  }
  0x11   : > { %s497_s20 = scalar_select %p496_p6, %s14077_s30, 19  ;;  %12441 = vmatprep.subr.bf16.mxu0 %v13546_v1  ;;  %13490 = vmatprep.subr.bf16.mxu1 %v13546_v1  ;;  %v13562_v15 = vld [vmem:[%s17204_s5 + $0x10] sm:$0xff]   ;;  %v13565_v17 = vld [vmem:[%s17204_s5 + $0x60] sm:$0xff]   ;;  %v13568_v21 = vld [vmem:[%s17204_s5 + $0x8] sm:$0xff]  }
  0x12   : > { %s14191_s23 = smul.u32 800, %s17299_s10  ;;  %v13569_v22 = vld [vmem:[%s17204_s5 + $0x58] sm:$0xff]   ;;  %v13574_v25 = vld [vmem:[%s17204_s5] sm:$0xff]   ;;  %v13575_v26 = vld [vmem:[%s17204_s5 + $0x50] sm:$0xff]   ;;  %s17301_s29 = smov (!%p506_p7, %s503_s29), 19 }
  0x13   : > { %s13499_s24 = smul.u32 40, %s497_s20  ;;  %v13579_v29 = vld [vmem:[%s17204_s5 + $0x98] sm:$0xff]   ;;  %v13580_v30 = vld [vmem:[%s17204_s5 + $0xc0] sm:$0xff]   ;;  %v13583_v37 = vld [vmem:[%s17204_s5 + $0x90] sm:$0xff]   ;;  %s514_s20 = sadd.s32 2, %s14077_s30 }
  0x14   : > { %12442 = vmatpush3.bf16.msra.mxu0 %v13546_v1  ;;  %13495 = vmatpush3.bf16.msra.mxu1 %v13546_v1  ;;  %v13585_v38 = vld [vmem:[%s17204_s5 + $0xb8] sm:$0xff]   ;;  %v13589_v39 = vld [vmem:[%s17204_s5 + $0x88] sm:$0xff]   ;;  %v13590_v40 = vld [vmem:[%s17204_s5 + $0xb0] sm:$0xff]   ;;  %s13501_s16 = smul.u32 40, %s17301_s29  ;;  %p517_p8 = scmp.lt.s32.totalorder %s514_s20, 19 }
  0x15   : > { %s500_s25 = sadd.s32 %s14191_s23, %s13499_s24  ;;  %12443 = vmatprep.subr.bf16.mxu0 %v13547_v2  ;;  %13491 = vmatprep.subr.bf16.mxu1 %v13547_v2  ;;  %v13594_v43 = vld [vmem:[%s17204_s5 + $0x80] sm:$0xff]   ;;  %v13596_v44 = vld [vmem:[%s17204_s5 + $0xa8] sm:$0xff]   ;;  %v13599_v45 = vld [vmem:[%s17204_s5 + $0x78] sm:$0xff]  }
  0x16   : > { %s10751_s28 = sshll.u32 %s500_s25, 2  ;;  %v13600_v46 = vld [vmem:[%s17204_s5 + $0xa0] sm:$0xff]   ;;  %v13607_v49 = vld [vmem:[%s17204_s5 + $0xe8] sm:$0xff]   ;;  %v13608_v50 = vld [vmem:[%s17204_s5 + $0x110] sm:$0xff]   ;;  %s510_s18 = sadd.s32 %s13501_s16, %s14191_s23 }
  0x17   : > { %s14200_s17 = scalar_lea.vmem %s17199_s0, %s10751_s28  ;;  %s10752_s19 = sshll.u32 %s510_s18, 2 }
  0x18   : > { %v14203_v4 = vld [vmem:[%s14200_s17 + $0x8] sm:$0xff]   ;;  %12444 = vmatpush3.bf16.msra.mxu0 %v13547_v2  ;;  %13496 = vmatpush3.bf16.msra.mxu1 %v13547_v2  ;;  %v14222_v9 = vld [vmem:[%s14200_s17 + $0x10] sm:$0xff]   ;;  %v14228_v11 = vld [vmem:[%s14200_s17 + $0x18] sm:$0xff]   ;;  %s14407_s22 = scalar_lea.vmem %s17200_s1, %s10752_s19  ;;  %s17303_s20 = smov (!%p517_p8, %s514_s20), 19 }
  0x19   : > { %v14206_v5 = vld [vmem:[%s14200_s17 + $0x48] sm:$0xff]   ;;  %12445 = vmatprep.subr.bf16.mxu0 %v13548_v3  ;;  %13492 = vmatprep.subr.bf16.mxu1 %v13548_v3  ;;  %v14225_v10 = vld [vmem:[%s14200_s17 + $0x50] sm:$0xff]   ;;  %v14234_v13 = vld [vmem:[%s14200_s17 + $0x58] sm:$0xff]   ;;  %s13502_s21 = smul.u32 40, %s17303_s20  ;;  %s536_s18 = sadd.s32 4, %s14077_s30 }
  0x1a   : > { %12449 = vmatprep.mubr.msk.bf16.mxu0 %vm736_vm0, %v14203_v4  ;;  %12465 = vmatprep.mubr.msk.bf16.mxu1 %vm736_vm0, %v14206_v5  ;;  %v14251_v16 = vld [vmem:[%s14200_s17 + $0x20] sm:$0xff]   ;;  %v14260_v19 = vld [vmem:[%s14200_s17 + $0x28] sm:$0xff]   ;;  %v14280_v23 = vld [vmem:[%s14200_s17 + $0x30] sm:$0xff]   ;;  %p539_p10 = scmp.lt.s32.totalorder %s536_s18, 19 }
  0x1b   : > { %v14257_v18 = vld [vmem:[%s14200_s17 + $0x60] sm:$0xff]   ;;  %v14263_v20 = vld [vmem:[%s14200_s17 + $0x68] sm:$0xff]   ;;  %v14283_v24 = vld [vmem:[%s14200_s17 + $0x70] sm:$0xff]   ;;  %s521_s24 = sadd.s32 %s13502_s21, %s14191_s23  ;;  %s525_s21 = sadd.s32 3, %s14077_s30 }
  0x1c   : > { %12446 = vmatpush3.bf16.msra.mxu0 %v13548_v3  ;;  %13497 = vmatpush3.bf16.msra.mxu1 %v13548_v3  ;;  %v14292_v27 = vld [vmem:[%s14200_s17 + $0x38] sm:$0xff]   ;;  %v14312_v31 = vld [vmem:[%s14200_s17 + $0x40] sm:$0xff]   ;;  %v13577_v34 = vld [vmem:[%s14200_s17 + $0x10] sm:$0xff]   ;;  %s10753_s28 = sshll.u32 %s521_s24, 2  ;;  %p14796_p9 = scmp.lt.s32.totalorder %s525_s21, 19 }
  0x1d   : > { %12447 = vmatprep.subr.bf16.mxu0 %v13549_v6  ;;  %13493 = vmatprep.subr.bf16.mxu1 %v13549_v6  ;;  %v14295_v28 = vld [vmem:[%s14200_s17 + $0x78] sm:$0xff]   ;;  %v13573_v32 = vld [vmem:[%s14200_s17 + $0x80] sm:$0xff]   ;;  %v13582_v41 = vld [vmem:[%s14200_s17 + $0x28] sm:$0xff]   ;;  %s14551_s24 = scalar_lea.vmem %s17201_s2, %s10753_s28  ;;  %s17307_s18 = smov (!%p539_p10, %s536_s18), 19 }
  0x1e   : > { %v13576_v33 = vld [vmem:[%s14200_s17] sm:$0xff]   ;;  %v13578_v35 = vld [vmem:[%s14200_s17 + $0x18] sm:$0xff]   ;;  %v13584_v42 = vld [vmem:[%s14200_s17 + $0x30] sm:$0xff]   ;;  %s17305_s21 = smov (!%p14796_p9, %s525_s21), 19  ;;  %s13504_s19 = smul.u32 40, %s17307_s18 }
  0x1f   : > { %v13581_v36 = vld [vmem:[%s14200_s17 + $0x20] sm:$0xff]   ;;  %v13586_v47 = vld [vmem:[%s14200_s17 + $0x38] sm:$0xff]   ;;  %v13588_v51 = vld [vmem:[%s14200_s17 + $0x48] sm:$0xff]   ;;  %s13503_s25 = smul.u32 40, %s17305_s21  ;;  %s17309_s30 = smov (!%p549_p11, %s14077_s30), 15 }
  0x20   : > { %12448 = vmatpush3.bf16.msra.mxu0 %v13549_v6  ;;  %13498 = vmatpush3.bf16.msra.mxu1 %v13549_v6  ;;  %v13587_v48 = vld [vmem:[%s14200_s17 + $0x40] sm:$0xff]   ;;  %v13591_v52 = vld [vmem:[%s14200_s17 + $0x50] sm:$0xff]   ;;  %v13592_v53 = vld [vmem:[%s14200_s17 + $0x58] sm:$0xff]   ;;  %s543_s20 = sadd.s32 %s13504_s19, %s14191_s23  ;;  %s10759_s18 = sshll.u32 %s17299_s10, 4 }
  0x21   : > { %12481 = vmatprep.subr.bf16.mxu1 %v13554_v7  ;;  %12523 = vmatprep.subr.bf16.mxu0 %v13555_v8  ;;  %v13593_v54 = vld [vmem:[%s14200_s17 + $0x60] sm:$0xff]   ;;  %v13595_v55 = vld [vmem:[%s14200_s17 + $0x68] sm:$0xff]   ;;  %v13597_v56 = vld [vmem:[%s14200_s17 + $0x70] sm:$0xff]   ;;  %s532_s26 = sadd.s32 %s13503_s25, %s14191_s23  ;;  %s10755_s21 = sshll.u32 %s543_s20, 2 }
  0x22   : > { %v13598_v57 = vld [vmem:[%s14200_s17 + $0x78] sm:$0xff]   ;;  %v13601_v58 = vld [vmem:[%s14200_s17 + $0x80] sm:$0xff]   ;;  %v13602_v59 = vld [vmem:[%s14200_s17 + $0x88] sm:$0xff]   ;;  %s10754_s27 = sshll.u32 %s532_s26, 2  ;;  %s17036_s19 = sadd.s32 %s10759_s18, %s17309_s30 }
  0x23   : > { %12450 = vmatmul.mubr.msk.bf16.vlgmr.msra.gmra.mxu0 %vm736_vm0, %v14222_v9  ;;  %12466 = vmatmul.mubr.msk.bf16.vlgmr.msra.gmra.mxu1 %vm736_vm0, %v14225_v10  ;;  %v13603_v60 = vld [vmem:[%s14200_s17 + $0x18] sm:$0xff]   ;;  %v13604_v61 = vld [vmem:[%s14200_s17 + $0x20] sm:$0xff]   ;;  %v13606_v63 = vld [vmem:[%s14200_s17 + $0x28] sm:$0xff]   ;;  %s14874_s16 = scalar_lea.vmem %s17202_s3, %s10754_s27  ;;  %s562_s20 = scalar_lea.vmem %s17207_s8, %s17036_s19 }
  0x24   : > { %12482 = vmatpush3.bf16.msra.mxu1 %v13554_v7  ;;  %12524 = vmatpush3.bf16.msra.mxu0 %v13555_v8  ;;  %v13605_v62 = vld [vmem:[%s14200_s17 + $0x20] sm:$0xff]   ;;  %v13609_v0 = vld [vmem:[%s14200_s17 + $0x28] sm:$0xff]   ;;  %v13610_v1 = vld [vmem:[%s14200_s17 + $0x30] sm:$0xff]  }
  0x25   : > { %12453 = vmatprep.mubr.msk.bf16.mxu0 %vm736_vm0, %v14228_v11  ;;  %12469 = vmatprep.mubr.msk.bf16.mxu1 %vm736_vm0, %v14234_v13  ;;  %v13613_v2 = vld [vmem:[%s17204_s5 + $0xe0] sm:$0xff]   ;;  %v13616_v3 = vld [vmem:[%s17204_s5 + $0x108] sm:$0xff]   ;;  %v13612_v7 = vld [vmem:[%s14200_s17 + $0x38] sm:$0xff]  }
  0x26   : > { %12483 = vmatprep.subr.bf16.mxu1 %v13558_v12  ;;  %12525 = vmatprep.subr.bf16.mxu0 %v13561_v14  ;;  %v13624_v6 = vld [vmem:[%s17204_s5 + $0x100] sm:$0xff]   ;;  %v13614_v8 = vld [vmem:[%s14200_s17 + $0x38] sm:$0xff]  }
  0x28   : > { %12484 = vmatpush3.bf16.msra.mxu1 %v13558_v12  ;;  %12526 = vmatpush3.bf16.msra.mxu0 %v13561_v14  ;;  %v13617_v12 = vld [vmem:[%s14200_s17 + $0x40] sm:$0xff]   ;;  %v13639_v14 = vld [vmem:[%s17204_s5 + $0xc8] sm:$0xff]  }
  0x29   : > { %12485 = vmatprep.subr.bf16.mxu1 %v13562_v15  ;;  %12527 = vmatprep.subr.bf16.mxu0 %v13565_v17 }
  0x2b   : > { %12454 = vmatmul.mubr.msk.bf16.gmra.mxu0 %vm736_vm0, %v14251_v16  ;;  %12470 = vmatmul.mubr.msk.bf16.gmra.mxu1 %vm736_vm0, %v14257_v18 }
  0x2c   : > { %12486 = vmatpush3.bf16.msra.mxu1 %v13562_v15  ;;  %12457 = vmatprep.mubr.msk.bf16.mxu0 %vm736_vm0, %v14260_v19  ;;  %v13640_v15 = vld [vmem:[%s17204_s5 + $0xf0] sm:$0xff]  }
  0x2d   : > { %12473 = vmatprep.mubr.msk.bf16.mxu1 %vm736_vm0, %v14263_v20  ;;  %12528 = vmatpush3.bf16.msra.mxu0 %v13565_v17  ;;  %v13620_v17 = vld [vmem:[%s14200_s17 + $0x50] sm:$0xff]  }
  0x2e   : > { %12487 = vmatprep.subr.bf16.mxu1 %v13568_v21  ;;  %12529 = vmatprep.subr.bf16.mxu0 %v13569_v22 }
  0x30   : > { %12488 = vmatpush3.bf16.msra.mxu1 %v13568_v21  ;;  %v13622_v21 = vld [vmem:[%s14200_s17 + $0x58] sm:$0xff]  }
  0x31   : > { %12530 = vmatpush3.bf16.msra.mxu0 %v13569_v22  ;;  %12489 = vmatprep.subr.bf16.mxu1 %v13574_v25  ;;  %v13625_v22 = vld [vmem:[%s14200_s17 + $0x58] sm:$0xff]  }
  0x32   : > { %12531 = vmatprep.subr.bf16.mxu0 %v13575_v26 }
  0x33   : > { %12458 = vmatmul.mubr.msk.bf16.gmra.mxu0 %vm736_vm0, %v14280_v23  ;;  %12474 = vmatmul.mubr.msk.bf16.gmra.mxu1 %vm736_vm0, %v14283_v24 }
  0x34   : > { %12461 = vmatprep.mubr.msk.bf16.mxu0 %vm736_vm0, %v14292_v27  ;;  %12477 = vmatprep.mubr.msk.bf16.mxu1 %vm736_vm0, %v14295_v28 }
  0x35   : > { %12490 = vmatpush3.bf16.msra.mxu1 %v13574_v25  ;;  %12532 = vmatpush3.bf16.msra.mxu0 %v13575_v26  ;;  %v13628_v25 = vld [vmem:[%s14200_s17 + $0x68] sm:$0xff]  }
  0x36   : > { %12565 = vmatprep.subr.bf16.mxu1 %v13579_v29  ;;  %12607 = vmatprep.subr.bf16.mxu0 %v13580_v30  ;;  %v13629_v26 = vld [vmem:[%s14200_s17 + $0x68] sm:$0xff]  }
  0x3b   : > { %12462 = vmatmul.mubr.msk.bf16.gmra.mxu0 %vm736_vm0, %v14312_v31  ;;  %12478 = vmatmul.mubr.msk.bf16.gmra.mxu1 %vm736_vm0, %v13573_v32  ;;  %v13637_v32 = vld [vmem:[%s14200_s17 + $0x80] sm:$0xff]  }
  0x3c   : > { %12491 = vmatprep.mubr.msk.bf16.mxu1 %vm736_vm0, %v13576_v33  ;;  %12533 = vmatprep.mubr.msk.bf16.mxu0 %vm736_vm0, %v13577_v34  ;;  %v13638_v33 = vld [vmem:[%s14200_s17 + $0x88] sm:$0xff]  }
  0x3d   : > { %v13641_v34 = vld [vmem:[%s14200_s17 + $0x88] sm:$0xff]  }
  0x43   : > { %12492 = vmatmul.mubr.msk.bf16.vlgmr.msra.gmra.mxu1 %vm736_vm0, %v14203_v4  ;;  %12534 = vmatmul.mubr.msk.bf16.vlgmr.msra.gmra.mxu0 %vm736_vm0, %v13578_v35  ;;  %v13623_v4 = vld [vmem:[%s17204_s5 + $0xd8] sm:$0xff]   ;;  %v13642_v35 = vld [vmem:[%s14200_s17 + $0x90] sm:$0xff]  }
  0x44   : > { %12566 = vmatpush3.bf16.msra.mxu1 %v13579_v29  ;;  %12608 = vmatpush3.bf16.msra.mxu0 %v13580_v30  ;;  %v13633_v29 = vld [vmem:[%s14200_s17 + $0x78] sm:$0xff]  }
  0x45   : > { %12495 = vmatprep.mubr.msk.bf16.mxu1 %vm736_vm0, %v14222_v9  ;;  %12537 = vmatprep.mubr.msk.bf16.mxu0 %vm736_vm0, %v13581_v36  ;;  %v13615_v9 = vld [vmem:[%s14200_s17 + $0x40] sm:$0xff]   ;;  %v13635_v30 = vld [vmem:[%s14200_s17 + $0x78] sm:$0xff]   ;;  %v13643_v36 = vld [vmem:[%s14200_s17 + $0x90] sm:$0xff]  }
  0x46   : > { %12567 = vmatprep.subr.bf16.mxu1 %v13583_v37  ;;  %12609 = vmatprep.subr.bf16.mxu0 %v13585_v38 }
  0x48   : > { %12568 = vmatpush3.bf16.msra.mxu1 %v13583_v37  ;;  %12610 = vmatpush3.bf16.msra.mxu0 %v13585_v38  ;;  %v13644_v37 = vld [vmem:[%s14200_s17 + $0x98] sm:$0xff]   ;;  %v13645_v38 = vld [vmem:[%s14407_s22] sm:$0xff]  }
  0x49   : > { %12569 = vmatprep.subr.bf16.mxu1 %v13589_v39  ;;  %12611 = vmatprep.subr.bf16.mxu0 %v13590_v40 }
  0x4b   : > { %12496 = vmatmul.mubr.msk.bf16.gmra.mxu1 %vm736_vm0, %v14228_v11  ;;  %12538 = vmatmul.mubr.msk.bf16.gmra.mxu0 %vm736_vm0, %v13582_v41  ;;  %v13634_v11 = vld [vmem:[%s17204_s5 + $0xf8] sm:$0xff]   ;;  %v13648_v41 = vld [vmem:[%s14407_s22 + $0x10] sm:$0xff]  }
  0x4c   : > { %12499 = vmatprep.mubr.msk.bf16.mxu1 %vm736_vm0, %v14251_v16  ;;  %12541 = vmatprep.mubr.msk.bf16.mxu0 %vm736_vm0, %v13584_v42  ;;  %v13619_v16 = vld [vmem:[%s14200_s17 + $0x48] sm:$0xff]   ;;  %v13651_v42 = vld [vmem:[%s14407_s22 + $0x10] sm:$0xff]  }
  0x4d   : > { %12570 = vmatpush3.bf16.msra.mxu1 %v13589_v39  ;;  %12612 = vmatpush3.bf16.msra.mxu0 %v13590_v40  ;;  %v13646_v39 = vld [vmem:[%s14407_s22 + $0x8] sm:$0xff]  }
  0x4e   : > { %12571 = vmatprep.subr.bf16.mxu1 %v13594_v43  ;;  %12613 = vmatprep.subr.bf16.mxu0 %v13596_v44  ;;  %v13647_v40 = vld [vmem:[%s14407_s22 + $0x8] sm:$0xff]  }
  0x51   : > { %12572 = vmatpush3.bf16.msra.mxu1 %v13594_v43  ;;  %12614 = vmatpush3.bf16.msra.mxu0 %v13596_v44  ;;  %v13652_v43 = vld [vmem:[%s14407_s22 + $0x18] sm:$0xff]   ;;  %v13655_v44 = vld [vmem:[%s17204_s5 + $0x130] sm:$0xff]  }
  0x52   : > { %12573 = vmatprep.subr.bf16.mxu1 %v13599_v45  ;;  %12615 = vmatprep.subr.bf16.mxu0 %v13600_v46 }
  0x53   : > { %12500 = vmatmul.mubr.msk.bf16.gmra.mxu1 %vm736_vm0, %v14260_v19  ;;  %12542 = vmatmul.mubr.msk.bf16.gmra.mxu0 %vm736_vm0, %v13586_v47  ;;  %v14475_v19 = vld [vmem:[%s17204_s5 + $0x160] sm:$0xff]   ;;  %v13653_v47 = vld [vmem:[%s14407_s22 + $0x18] sm:$0xff]  }
  0x54   : > { %12503 = vmatprep.mubr.msk.bf16.mxu1 %vm736_vm0, %v14280_v23  ;;  %12545 = vmatprep.mubr.msk.bf16.mxu0 %vm736_vm0, %v13587_v48  ;;  %v13626_v23 = vld [vmem:[%s14200_s17 + $0x60] sm:$0xff]   ;;  %v13666_v48 = vld [vmem:[%s17204_s5 + $0x150] sm:$0xff]  }
  0x55   : > { %12574 = vmatpush3.bf16.msra.mxu1 %v13599_v45  ;;  %12616 = vmatpush3.bf16.msra.mxu0 %v13600_v46  ;;  %v13658_v45 = vld [vmem:[%s17204_s5 + $0x158] sm:$0xff]   ;;  %v13665_v46 = vld [vmem:[%s17204_s5 + $0x128] sm:$0xff]  }
  0x56   : > { %12649 = vmatprep.subr.bf16.mxu1 %v13607_v49  ;;  %12691 = vmatprep.subr.bf16.mxu0 %v13608_v50 }
  0x5b   : > { %12504 = vmatmul.mubr.msk.bf16.gmra.mxu1 %vm736_vm0, %v14292_v27  ;;  %12546 = vmatmul.mubr.msk.bf16.gmra.mxu0 %vm736_vm0, %v13588_v51  ;;  %v13630_v27 = vld [vmem:[%s14200_s17 + $0x70] sm:$0xff]   ;;  %v13657_v51 = vld [vmem:[%s14407_s22 + $0x28] sm:$0xff]  }
  0x5c   : > { %12507 = vmatprep.mubr.msk.bf16.mxu1 %vm736_vm0, %v14312_v31  ;;  %12549 = vmatprep.mubr.msk.bf16.mxu0 %vm736_vm0, %v13591_v52  ;;  %v13636_v31 = vld [vmem:[%s14200_s17 + $0x80] sm:$0xff]  }
  0x5d   : > { %v13673_v52 = vld [vmem:[%s17204_s5 + $0x120] sm:$0xff]  }
  0x63   : > { %12508 = vmatmul.mubr.msk.bf16.gmra.mxu1 %vm736_vm0, %v14206_v5  ;;  %12550 = vmatmul.mubr.msk.bf16.gmra.mxu0 %vm736_vm0, %v13592_v53  ;;  %v13611_v5 = vld [vmem:[%s14200_s17 + $0x30] sm:$0xff]   ;;  %v13676_v53 = vld [vmem:[%s17204_s5 + $0x148] sm:$0xff]  }
  0x64   : > { %12511 = vmatprep.mubr.msk.bf16.mxu1 %vm736_vm0, %v14225_v10  ;;  %12553 = vmatprep.mubr.msk.bf16.mxu0 %vm736_vm0, %v13593_v54  ;;  %v13631_v10 = vld [vmem:[%s17204_s5 + $0xd0] sm:$0xff]   ;;  %v13659_v54 = vld [vmem:[%s14407_s22 + $0x28] sm:$0xff]  }
  0x6b   : > { %12512 = vmatmul.mubr.msk.bf16.gmra.mxu1 %vm736_vm0, %v14234_v13  ;;  %12554 = vmatmul.mubr.msk.bf16.gmra.mxu0 %vm736_vm0, %v13595_v55  ;;  %v13618_v13 = vld [vmem:[%s14200_s17 + $0x48] sm:$0xff]   ;;  %v13660_v55 = vld [vmem:[%s14407_s22 + $0x30] sm:$0xff]  }
  0x6c   : > { %12515 = vmatprep.mubr.msk.bf16.mxu1 %vm736_vm0, %v14257_v18  ;;  %12557 = vmatprep.mubr.msk.bf16.mxu0 %vm736_vm0, %v13597_v56  ;;  %v14470_v18 = vld [vmem:[%s17204_s5 + $0x138] sm:$0xff]  }
  0x6d   : > { %v13681_v56 = vld [vmem:[%s17204_s5 + $0x118] sm:$0xff]  }
  0x73   : > { %12516 = vmatmul.mubr.msk.bf16.gmra.mxu1 %vm736_vm0, %v14263_v20  ;;  %12558 = vmatmul.mubr.msk.bf16.gmra.mxu0 %vm736_vm0, %v13598_v57  ;;  %v13621_v20 = vld [vmem:[%s14200_s17 + $0x50] sm:$0xff]  }
  0x74   : > { %12519 = vmatprep.mubr.msk.bf16.mxu1 %vm736_vm0, %v14283_v24  ;;  %12561 = vmatprep.mubr.msk.bf16.mxu0 %vm736_vm0, %v13601_v58  ;;  %v13627_v24 = vld [vmem:[%s14200_s17 + $0x60] sm:$0xff]   ;;  %v13661_v57 = vld [vmem:[%s14407_s22 + $0x30] sm:$0xff]  }
  0x75   : > { %v13682_v58 = vld [vmem:[%s17204_s5 + $0x140] sm:$0xff]  }
  0x7b   : > { %12520 = vmatmul.mubr.msk.bf16.gmra.mxu1 %vm736_vm0, %v14295_v28  ;;  %12562 = vmatmul.mubr.msk.bf16.gmra.mxu0 %vm736_vm0, %v13602_v59  ;;  %v13632_v28 = vld [vmem:[%s14200_s17 + $0x70] sm:$0xff]   ;;  %v13662_v59 = vld [vmem:[%s14407_s22 + $0x38] sm:$0xff]   ;;  %s15106_s17 = scalar_lea.vmem %s17203_s4, %s10755_s21  ;;  %s10757_s21 = sshll.u32 %s17299_s10, 9 }
  0x7c   : > { %12575 = vmatprep.mubr.msk.bf16.mxu1 %vm736_vm0, %v13603_v60  ;;  %12617 = vmatprep.mubr.msk.bf16.mxu0 %vm736_vm0, %v13604_v61  ;;  %v14579_v60 = vld [vmem:[%s17204_s5 + $0x188] sm:$0xff]   ;;  %v14584_v61 = vld [vmem:[%s17204_s5 + $0x1b0] sm:$0xff]  }
  0x83   : > { %12576 = vmatmul.mubr.msk.bf16.vlgmr.msra.gmra.mxu1 %vm736_vm0, %v13605_v62  ;;  %12618 = vmatmul.mubr.msk.bf16.vlgmr.msra.gmra.mxu0 %vm736_vm0, %v13606_v63  ;;  %v13663_v62 = vld [vmem:[%s14407_s22 + $0x38] sm:$0xff]   ;;  %v13664_v63 = vld [vmem:[%s14407_s22 + $0x40] sm:$0xff]  }
  0x84   : > { %12650 = vmatpush3.bf16.msra.mxu1 %v13607_v49  ;;  %12692 = vmatpush3.bf16.msra.mxu0 %v13608_v50  ;;  %v13654_v49 = vld [vmem:[%s14407_s22 + $0x20] sm:$0xff]  }
  0x85   : > { %12579 = vmatprep.mubr.msk.bf16.mxu1 %vm736_vm0, %v13609_v0  ;;  %12621 = vmatprep.mubr.msk.bf16.mxu0 %vm736_vm0, %v13610_v1  ;;  %v13656_v50 = vld [vmem:[%s14407_s22 + $0x20] sm:$0xff]   ;;  %v13668_v1 = vld [vmem:[%s14407_s22 + $0x48] sm:$0xff]  }
  0x86   : > { %12651 = vmatprep.subr.bf16.mxu1 %v13613_v2  ;;  %12693 = vmatprep.subr.bf16.mxu0 %v13616_v3  ;;  %v13667_v0 = vld [vmem:[%s14407_s22 + $0x40] sm:$0xff]  }
  0x88   : > { %12652 = vmatpush3.bf16.msra.mxu1 %v13613_v2  ;;  %12694 = vmatpush3.bf16.msra.mxu0 %v13616_v3  ;;  %v13669_v2 = vld [vmem:[%s14407_s22 + $0x48] sm:$0xff]   ;;  %v13670_v3 = vld [vmem:[%s14407_s22 + $0x50] sm:$0xff]  }
  0x89   : > { %12653 = vmatprep.subr.bf16.mxu1 %v13623_v4  ;;  %12695 = vmatprep.subr.bf16.mxu0 %v13624_v6 }
  0x8b   : > { %12580 = vmatmul.mubr.msk.bf16.gmra.mxu1 %vm736_vm0, %v13611_v5  ;;  %12622 = vmatmul.mubr.msk.bf16.gmra.mxu0 %vm736_vm0, %v13612_v7  ;;  %v13672_v5 = vld [vmem:[%s14407_s22 + $0x58] sm:$0xff]  }
  0x8c   : > { %12583 = vmatprep.mubr.msk.bf16.mxu1 %vm736_vm0, %v13614_v8  ;;  %12625 = vmatprep.mubr.msk.bf16.mxu0 %vm736_vm0, %v13615_v9 }
  0x8d   : > { %12654 = vmatpush3.bf16.msra.mxu1 %v13623_v4  ;;  %12696 = vmatpush3.bf16.msra.mxu0 %v13624_v6  ;;  %v13671_v4 = vld [vmem:[%s14407_s22 + $0x50] sm:$0xff]  }
  0x8e   : > { %12655 = vmatprep.subr.bf16.mxu1 %v13631_v10  ;;  %12697 = vmatprep.subr.bf16.mxu0 %v13634_v11 }
  0x91   : > { %12656 = vmatpush3.bf16.msra.mxu1 %v13631_v10  ;;  %12698 = vmatpush3.bf16.msra.mxu0 %v13634_v11  ;;  %v13674_v10 = vld [vmem:[%s14407_s22 + $0x58] sm:$0xff]   ;;  %v13675_v11 = vld [vmem:[%s14407_s22 + $0x60] sm:$0xff]  }
  0x92   : > { %12657 = vmatprep.subr.bf16.mxu1 %v13639_v14  ;;  %12699 = vmatprep.subr.bf16.mxu0 %v13640_v15 }
  0x93   : > { %12584 = vmatmul.mubr.msk.bf16.gmra.mxu1 %vm736_vm0, %v13617_v12  ;;  %12626 = vmatmul.mubr.msk.bf16.gmra.mxu0 %vm736_vm0, %v13618_v13 }
  0x94   : > { %12587 = vmatprep.mubr.msk.bf16.mxu1 %vm736_vm0, %v13619_v16  ;;  %12629 = vmatprep.mubr.msk.bf16.mxu0 %vm736_vm0, %v13620_v17 }
  0x95   : > { %12658 = vmatpush3.bf16.msra.mxu1 %v13639_v14  ;;  %12700 = vmatpush3.bf16.msra.mxu0 %v13640_v15  ;;  %v13677_v14 = vld [vmem:[%s14407_s22 + $0x60] sm:$0xff]   ;;  %v13678_v15 = vld [vmem:[%s14407_s22 + $0x68] sm:$0xff]  }
  0x96   : > { %12733 = vmatprep.subr.bf16.mxu1 %v14470_v18  ;;  %12775 = vmatprep.subr.bf16.mxu0 %v14475_v19 }
  0x9b   : > { %12588 = vmatmul.mubr.msk.bf16.gmra.mxu1 %vm736_vm0, %v13621_v20  ;;  %12630 = vmatmul.mubr.msk.bf16.gmra.mxu0 %vm736_vm0, %v13622_v21 }
  0x9c   : > { %12591 = vmatprep.mubr.msk.bf16.mxu1 %vm736_vm0, %v13625_v22  ;;  %12633 = vmatprep.mubr.msk.bf16.mxu0 %vm736_vm0, %v13626_v23  ;;  %v13679_v22 = vld [vmem:[%s14407_s22 + $0x68] sm:$0xff]   ;;  %v13680_v23 = vld [vmem:[%s14407_s22 + $0x70] sm:$0xff]  }
  0xa3   : > { %12592 = vmatmul.mubr.msk.bf16.gmra.mxu1 %vm736_vm0, %v13627_v24  ;;  %12634 = vmatmul.mubr.msk.bf16.gmra.mxu0 %vm736_vm0, %v13628_v25 }
  0xa4   : > { %12595 = vmatprep.mubr.msk.bf16.mxu1 %vm736_vm0, %v13629_v26  ;;  %12637 = vmatprep.mubr.msk.bf16.mxu0 %vm736_vm0, %v13630_v27  ;;  %v13683_v26 = vld [vmem:[%s14407_s22 + $0x70] sm:$0xff]   ;;  %v13684_v27 = vld [vmem:[%s14407_s22 + $0x78] sm:$0xff]  }
  0xab   : > { %12596 = vmatmul.mubr.msk.bf16.gmra.mxu1 %vm736_vm0, %v13632_v28  ;;  %12638 = vmatmul.mubr.msk.bf16.gmra.mxu0 %vm736_vm0, %v13633_v29 }
  0xac   : > { %12599 = vmatprep.mubr.msk.bf16.mxu1 %vm736_vm0, %v13635_v30  ;;  %12641 = vmatprep.mubr.msk.bf16.mxu0 %vm736_vm0, %v13636_v31 }
  0xb3   : > { %12600 = vmatmul.mubr.msk.bf16.gmra.mxu1 %vm736_vm0, %v13637_v32  ;;  %12642 = vmatmul.mubr.msk.bf16.gmra.mxu0 %vm736_vm0, %v13638_v33 }
  0xb4   : > { %12603 = vmatprep.mubr.msk.bf16.mxu1 %vm736_vm0, %v13641_v34  ;;  %12645 = vmatprep.mubr.msk.bf16.mxu0 %vm736_vm0, %v13642_v35  ;;  %v13685_v34 = vld [vmem:[%s14407_s22 + $0x78] sm:$0xff]   ;;  %v13686_v35 = vld [vmem:[%s14407_s22 + $0x80] sm:$0xff]  }
  0xbb   : > { %12604 = vmatmul.mubr.msk.bf16.gmra.mxu1 %vm736_vm0, %v13643_v36  ;;  %12646 = vmatmul.mubr.msk.bf16.gmra.mxu0 %vm736_vm0, %v13644_v37 }
  0xbc   : > { %12659 = vmatprep.mubr.msk.bf16.mxu1 %vm736_vm0, %v13645_v38  ;;  %12701 = vmatprep.mubr.msk.bf16.mxu0 %vm736_vm0, %v13646_v39  ;;  %v13687_v38 = vld [vmem:[%s14407_s22 + $0x10] sm:$0xff]   ;;  %v13688_v39 = vld [vmem:[%s14407_s22 + $0x18] sm:$0xff]  }
  0xc3   : > { %12660 = vmatmul.mubr.msk.bf16.vlgmr.msra.gmra.mxu1 %vm736_vm0, %v13647_v40  ;;  %12702 = vmatmul.mubr.msk.bf16.vlgmr.msra.gmra.mxu0 %vm736_vm0, %v13648_v41 }
  0xc4   : > { %12734 = vmatpush3.bf16.msra.mxu1 %v14470_v18  ;;  %12776 = vmatpush3.bf16.msra.mxu0 %v14475_v19 }
  0xc5   : > { %12663 = vmatprep.mubr.msk.bf16.mxu1 %vm736_vm0, %v13651_v42  ;;  %12705 = vmatprep.mubr.msk.bf16.mxu0 %vm736_vm0, %v13652_v43 }
  0xc6   : > { %12735 = vmatprep.subr.bf16.mxu1 %v13655_v44  ;;  %12777 = vmatprep.subr.bf16.mxu0 %v13658_v45 }
  0xc8   : > { %12736 = vmatpush3.bf16.msra.mxu1 %v13655_v44  ;;  %12778 = vmatpush3.bf16.msra.mxu0 %v13658_v45 }
  0xc9   : > { %12737 = vmatprep.subr.bf16.mxu1 %v13665_v46  ;;  %12779 = vmatprep.subr.bf16.mxu0 %v13666_v48 }
  0xcb   : > { %12664 = vmatmul.mubr.msk.bf16.gmra.mxu1 %vm736_vm0, %v13653_v47  ;;  %12706 = vmatmul.mubr.msk.bf16.gmra.mxu0 %vm736_vm0, %v13654_v49  ;;  %v13690_v47 = vld [vmem:[%s14407_s22 + $0x20] sm:$0xff]  }
  0xcc   : > { %12667 = vmatprep.mubr.msk.bf16.mxu1 %vm736_vm0, %v13656_v50  ;;  %12709 = vmatprep.mubr.msk.bf16.mxu0 %vm736_vm0, %v13657_v51  ;;  %v13693_v50 = vld [vmem:[%s14407_s22 + $0x20] sm:$0xff]   ;;  %v13694_v51 = vld [vmem:[%s14407_s22 + $0x28] sm:$0xff]  }
  0xcd   : > { %12738 = vmatpush3.bf16.msra.mxu1 %v13665_v46  ;;  %12780 = vmatpush3.bf16.msra.mxu0 %v13666_v48  ;;  %v13689_v46 = vld [vmem:[%s14407_s22 + $0x18] sm:$0xff]  }
  0xce   : > { %12739 = vmatprep.subr.bf16.mxu1 %v13673_v52  ;;  %12781 = vmatprep.subr.bf16.mxu0 %v13676_v53 }
  0xd1   : > { %12740 = vmatpush3.bf16.msra.mxu1 %v13673_v52  ;;  %12782 = vmatpush3.bf16.msra.mxu0 %v13676_v53 }
  0xd2   : > { %12741 = vmatprep.subr.bf16.mxu1 %v13681_v56  ;;  %12783 = vmatprep.subr.bf16.mxu0 %v13682_v58 }
  0xd3   : > { %12668 = vmatmul.mubr.msk.bf16.gmra.mxu1 %vm736_vm0, %v13659_v54  ;;  %12710 = vmatmul.mubr.msk.bf16.gmra.mxu0 %vm736_vm0, %v13660_v55  ;;  %v13697_v54 = vld [vmem:[%s17204_s5 + $0x180] sm:$0xff]   ;;  %v13700_v55 = vld [vmem:[%s17204_s5 + $0x1a8] sm:$0xff]  }
  0xd4   : > { %12671 = vmatprep.mubr.msk.bf16.mxu1 %vm736_vm0, %v13661_v57  ;;  %12713 = vmatprep.mubr.msk.bf16.mxu0 %vm736_vm0, %v13662_v59  ;;  %v13708_v59 = vld [vmem:[%s17204_s5 + $0x1a0] sm:$0xff]  }
  0xd5   : > { %12742 = vmatpush3.bf16.msra.mxu1 %v13681_v56  ;;  %12784 = vmatpush3.bf16.msra.mxu0 %v13682_v58  ;;  %v13707_v58 = vld [vmem:[%s17204_s5 + $0x178] sm:$0xff]  }
  0xd6   : > { %12817 = vmatprep.subr.bf16.mxu1 %v14579_v60  ;;  %12859 = vmatprep.subr.bf16.mxu0 %v14584_v61 }
  0xdb   : > { %12672 = vmatmul.mubr.msk.bf16.gmra.mxu1 %vm736_vm0, %v13663_v62  ;;  %12714 = vmatmul.mubr.msk.bf16.gmra.mxu0 %vm736_vm0, %v13664_v63 }
  0xdc   : > { %12675 = vmatprep.mubr.msk.bf16.mxu1 %vm736_vm0, %v13667_v0  ;;  %12717 = vmatprep.mubr.msk.bf16.mxu0 %vm736_vm0, %v13668_v1  ;;  %v13695_v1 = vld [vmem:[%s14407_s22 + $0x28] sm:$0xff]  }
  0xe3   : > { %v14604_v6 = vpop.f32.mrf.mxu0  ;;  %v14606_v7 = vpop.f32.mrf.mxu1  ;;  %12676 = vmatmul.mubr.msk.bf16.gmra.mxu1 %vm736_vm0, %v13669_v2  ;;  %12718 = vmatmul.mubr.msk.bf16.gmra.mxu0 %vm736_vm0, %v13670_v3 }
  0xe4   : > { %12679 = vmatprep.mubr.msk.bf16.mxu1 %vm736_vm0, %v13671_v4  ;;  %12721 = vmatprep.mubr.msk.bf16.mxu0 %vm736_vm0, %v13672_v5  ;;  %v13696_v4 = vld [vmem:[%s14407_s22 + $0x30] sm:$0xff]  }
  0xe5   : > { %v14612_v8 = vpop.f32.mrf.mxu0  ;;  %v14614_v9 = vpop.f32.mrf.mxu1 }
  0xe7   : > { %v14618_v12 = vpop.f32.mrf.mxu0  ;;  %v14620_v13 = vpop.f32.mrf.mxu1 }
  0xe9   : > { %v14624_v16 = vpop.f32.mrf.mxu0  ;;  %v14626_v17 = vpop.f32.mrf.mxu1 }
  0xeb   : > { %v14628_v18 = vpop.f32.mrf.mxu0  ;;  %v14630_v19 = vpop.f32.mrf.mxu1  ;;  %12680 = vmatmul.mubr.msk.bf16.gmra.mxu1 %vm736_vm0, %v13674_v10  ;;  %12722 = vmatmul.mubr.msk.bf16.gmra.mxu0 %vm736_vm0, %v13675_v11  ;;  %v13698_v10 = vld [vmem:[%s14407_s22 + $0x30] sm:$0xff]   ;;  %v13699_v11 = vld [vmem:[%s14407_s22 + $0x38] sm:$0xff]  }
  0xec   : > { %12683 = vmatprep.mubr.msk.bf16.mxu1 %vm736_vm0, %v13677_v14  ;;  %12725 = vmatprep.mubr.msk.bf16.mxu0 %vm736_vm0, %v13678_v15 }
  0xed   : > { %v14636_v20 = vpop.f32.mrf.mxu0  ;;  %v14638_v21 = vpop.f32.mrf.mxu1 }
  0xef   : > { %v14642_v24 = vpop.f32.mrf.mxu0  ;;  %v14644_v25 = vpop.f32.mrf.mxu1 }
  0xf1   : > { %v14648_v28 = vpop.f32.mrf.mxu0  ;;  %v14650_v29 = vpop.f32.mrf.mxu1 }
  0xf3   : > { %v14652_v30 = vpop.f32.mrf.mxu0  ;;  %v14654_v31 = vpop.f32.mrf.mxu1  ;;  %12684 = vmatmul.mubr.msk.bf16.gmra.mxu1 %vm736_vm0, %v13679_v22  ;;  %12726 = vmatmul.mubr.msk.bf16.gmra.mxu0 %vm736_vm0, %v13680_v23  ;;  %v13718_v22 = vld [vmem:[%s17204_s5 + $0x198] sm:$0xff]  }
  0xf4   : > { %12687 = vmatprep.mubr.msk.bf16.mxu1 %vm736_vm0, %v13683_v26  ;;  %12729 = vmatprep.mubr.msk.bf16.mxu0 %vm736_vm0, %v13684_v27 }
  0xf5   : > { %v14660_v32 = vpop.f32.mrf.mxu0  ;;  %v14662_v33 = vpop.f32.mrf.mxu1 }
  0xf7   : > { %v14666_v36 = vpop.f32.mrf.mxu0  ;;  %v14668_v37 = vpop.f32.mrf.mxu1 }
  0xf9   : > { %v14672_v40 = vpop.f32.mrf.mxu0  ;;  %v14674_v41 = vpop.f32.mrf.mxu1 }
  0xfb   : > { %v14676_v42 = vpop.f32.mrf.mxu0  ;;  %v14678_v43 = vpop.f32.mrf.mxu1  ;;  %12688 = vmatmul.mubr.msk.bf16.gmra.mxu1 %vm736_vm0, %v13685_v34  ;;  %12730 = vmatmul.mubr.msk.bf16.gmra.mxu0 %vm736_vm0, %v13686_v35 }
  0xfc   : > { %12743 = vmatprep.mubr.msk.bf16.mxu1 %vm736_vm0, %v13687_v38  ;;  %12785 = vmatprep.mubr.msk.bf16.mxu0 %vm736_vm0, %v13688_v39  ;;  %v13723_v38 = vld [vmem:[%s17204_s5 + $0x168] sm:$0xff]  }
  0xfd   : > { %v14684_v44 = vpop.f32.mrf.mxu0  ;;  %v14686_v45 = vpop.f32.mrf.mxu1 }
  0xff   : > { %v14690_v48 = vpop.f32.mrf.mxu0  ;;  %v14692_v49 = vpop.f32.mrf.mxu1 }
 0x101   : > { %v14696_v52 = vpop.f32.mrf.mxu0  ;;  %v14698_v53 = vpop.f32.mrf.mxu1 }
 0x103   : > { %v12493_v56 = vpop.f32.mrf.mxu1  ;;  %v12535_v57 = vpop.f32.mrf.mxu0  ;;  %12744 = vmatmul.mubr.msk.bf16.vlgmr.msra.gmra.mxu1 %vm736_vm0, %v13689_v46  ;;  %12786 = vmatmul.mubr.msk.bf16.vlgmr.msra.gmra.mxu0 %vm736_vm0, %v13690_v47  ;;  %v13701_v47 = vld [vmem:[%s14407_s22 + $0x38] sm:$0xff]  }
 0x104   : > { %v1027_v62 = vadd.f32 %v12493_v56, %v14604_v6  ;;  %12818 = vmatpush3.bf16.msra.mxu1 %v14579_v60  ;;  %12860 = vmatpush3.bf16.msra.mxu0 %v14584_v61 }
 0x105   : > { %v1018_v63 = vpop.f32.mrf.mxu1  ;;  %v1380_v0 = vpop.f32.mrf.mxu0  ;;  %12747 = vmatprep.mubr.msk.bf16.mxu1 %vm736_vm0, %v13693_v50  ;;  %12789 = vmatprep.mubr.msk.bf16.mxu0 %vm736_vm0, %v13694_v51  ;;  %v13702_v50 = vld [vmem:[%s14407_s22 + $0x40] sm:$0xff]  }
 0x106   : > { %v14720_v2 = vadd.f32 %v12535_v57, %v1027_v62  ;;  %v1019_v3 = vadd.f32 %v1018_v63, %v14612_v8  ;;  %12819 = vmatprep.subr.bf16.mxu1 %v13697_v54  ;;  %12861 = vmatprep.subr.bf16.mxu0 %v13700_v55  ;;  %v13715_v8 = vld [vmem:[%s17204_s5 + $0x170] sm:$0xff]   ;;  %v13703_v62 = vld [vmem:[%s14407_s22 + $0x40] sm:$0xff]   ;;  %v13704_v63 = vld [vmem:[%s14407_s22 + $0x48] sm:$0xff]  }
 0x107   : > { %v12494_v5 = vpop.f32.mrf.mxu1  ;;  %v12536_v60 = vpop.f32.mrf.mxu0 }
 0x108   : > { %v14724_v6 = vadd.f32 %v1380_v0, %v1019_v3  ;;  %v1030_v61 = vadd.f32 %v12494_v5, %v14618_v12  ;;  %12820 = vmatpush3.bf16.msra.mxu1 %v13697_v54  ;;  %12862 = vmatpush3.bf16.msra.mxu0 %v13700_v55 }
 0x109   : > { %v1021_v14 = vpop.f32.mrf.mxu1  ;;  %v1383_v15 = vpop.f32.mrf.mxu0  ;;  %12821 = vmatprep.subr.bf16.mxu1 %v13707_v58  ;;  %12863 = vmatprep.subr.bf16.mxu0 %v13708_v59 }
 0x10a   : > { %v14735_v23 = vadd.f32 %v12536_v60, %v1030_v61  ;;  %v1022_v12 = vadd.f32 %v1021_v14, %v14624_v16  ;;  %v13724_v16 = vld [vmem:[%s17204_s5 + $0x190] sm:$0xff]  }
 0x10b   : > { %v12497_v26 = vpop.f32.mrf.mxu1  ;;  %v12539_v27 = vpop.f32.mrf.mxu0  ;;  %12748 = vmatmul.mubr.msk.bf16.gmra.mxu1 %vm736_vm0, %v13695_v1  ;;  %12790 = vmatmul.mubr.msk.bf16.gmra.mxu0 %vm736_vm0, %v13696_v4 }
 0x10c   : > { %v14740_v34 = vadd.f32 %v1383_v15, %v1022_v12  ;;  %v1043_v35 = vadd.f32 %v12497_v26, %v14628_v18  ;;  %12751 = vmatprep.mubr.msk.bf16.mxu1 %vm736_vm0, %v13698_v10  ;;  %12793 = vmatprep.mubr.msk.bf16.mxu0 %vm736_vm0, %v13699_v11  ;;  %v13705_v10 = vld [vmem:[%s14407_s22 + $0x48] sm:$0xff]   ;;  %v13706_v11 = vld [vmem:[%s14407_s22 + $0x50] sm:$0xff]  }
 0x10d   : > { %v1034_v39 = vpop.f32.mrf.mxu1  ;;  %v1396_v46 = vpop.f32.mrf.mxu0  ;;  %12822 = vmatpush3.bf16.msra.mxu1 %v13707_v58  ;;  %12864 = vmatpush3.bf16.msra.mxu0 %v13708_v59  ;;  %v14764_v58 = vld [vmem:[%s17204_s5 + $0x1d8] sm:$0xff]   ;;  %v13709_v26 = vld [vmem:[%s14407_s22 + $0x50] sm:$0xff]  }
 0x10e   : > { %v14753_v18 = vadd.f32 %v12539_v27, %v1043_v35  ;;  %v1035_v51 = vadd.f32 %v1034_v39, %v14636_v20  ;;  %12823 = vmatprep.subr.bf16.mxu1 %v13715_v8  ;;  %12865 = vmatprep.subr.bf16.mxu0 %v13718_v22  ;;  %v13710_v27 = vld [vmem:[%s14407_s22 + $0x58] sm:$0xff]  }
 0x10f   : > { %v12498_v54 = vpop.f32.mrf.mxu1  ;;  %v12540_v55 = vpop.f32.mrf.mxu0 }
 0x110   : > { %v14756_v56 = vadd.f32 %v1396_v46, %v1035_v51  ;;  %v1046_v57 = vadd.f32 %v12498_v54, %v14642_v24  ;;  %v14772_v24 = vld [vmem:[%s17204_s5 + $0x200] sm:$0xff]   ;;  %v13711_v51 = vld [vmem:[%s14407_s22 + $0x58] sm:$0xff]  }
 0x111   : > { %v1037_v0 = vpop.f32.mrf.mxu1  ;;  %v1399_v1 = vpop.f32.mrf.mxu0  ;;  %12824 = vmatpush3.bf16.msra.mxu1 %v13715_v8  ;;  %12866 = vmatpush3.bf16.msra.mxu0 %v13718_v22  ;;  %v13712_v54 = vld [vmem:[%s14407_s22 + $0x60] sm:$0xff]  }
 0x112   : > { %v14766_v20 = vadd.f32 %v12540_v55, %v1046_v57  ;;  %v1038_v59 = vadd.f32 %v1037_v0, %v14648_v28  ;;  %12825 = vmatprep.subr.bf16.mxu1 %v13723_v38  ;;  %12867 = vmatprep.subr.bf16.mxu0 %v13724_v16 }
 0x113   : > { %v12501_v3 = vpop.f32.mrf.mxu1  ;;  %v12543_v4 = vpop.f32.mrf.mxu0  ;;  %12752 = vmatmul.mubr.msk.bf16.gmra.mxu1 %vm736_vm0, %v13701_v47  ;;  %12794 = vmatmul.mubr.msk.bf16.gmra.mxu0 %vm736_vm0, %v13702_v50 }
 0x114   : > { %v14777_v5 = vadd.f32 %v1399_v1, %v1038_v59  ;;  %v1059_v60 = vadd.f32 %v12501_v3, %v14652_v30  ;;  %12755 = vmatprep.mubr.msk.bf16.mxu1 %vm736_vm0, %v13703_v62  ;;  %12797 = vmatprep.mubr.msk.bf16.mxu0 %vm736_vm0, %v13704_v63  ;;  %v13713_v1 = vld [vmem:[%s14407_s22 + $0x60] sm:$0xff]   ;;  %v13714_v59 = vld [vmem:[%s14407_s22 + $0x68] sm:$0xff]  }
 0x115   : > { %v1050_v28 = vpop.f32.mrf.mxu1  ;;  %v1412_v61 = vpop.f32.mrf.mxu0  ;;  %12826 = vmatpush3.bf16.msra.mxu1 %v13723_v38  ;;  %12868 = vmatpush3.bf16.msra.mxu0 %v13724_v16 }
 0x116   : > { %v14784_v14 = vadd.f32 %v12543_v4, %v1059_v60  ;;  %v1051_v15 = vadd.f32 %v1050_v28, %v14660_v32  ;;  %12901 = vmatprep.subr.bf16.mxu1 %v14764_v58  ;;  %12943 = vmatprep.subr.bf16.mxu0 %v14772_v24 }
 0x117   : > { %v12502_v30 = vpop.f32.mrf.mxu1  ;;  %v12544_v8 = vpop.f32.mrf.mxu0 }
 0x118   : > { %v14789_v22 = vadd.f32 %v1412_v61, %v1051_v15  ;;  %v1062_v12 = vadd.f32 %v12502_v30, %v14666_v36  ;;  %v13717_v30 = vld [vmem:[%s14407_s22 + $0x70] sm:$0xff]  }
 0x119   : > { %v1053_v32 = vpop.f32.mrf.mxu1  ;;  %v1415_v35 = vpop.f32.mrf.mxu0 }
 0x11a   : > { %v14800_v38 = vadd.f32 %v12544_v8, %v1062_v12  ;;  %v1054_v16 = vadd.f32 %v1053_v32, %v14672_v40 }
 0x11b   : > { %v12505_v39 = vpop.f32.mrf.mxu1  ;;  %v12547_v46 = vpop.f32.mrf.mxu0  ;;  %12756 = vmatmul.mubr.msk.bf16.gmra.mxu1 %vm736_vm0, %v13705_v10  ;;  %12798 = vmatmul.mubr.msk.bf16.gmra.mxu0 %vm736_vm0, %v13706_v11 }
 0x11c   : > { %v14805_v36 = vadd.f32 %v1415_v35, %v1054_v16  ;;  %v1075_v47 = vadd.f32 %v12505_v39, %v14676_v42  ;;  %12759 = vmatprep.mubr.msk.bf16.mxu1 %vm736_vm0, %v13709_v26  ;;  %12801 = vmatprep.mubr.msk.bf16.mxu0 %vm736_vm0, %v13710_v27  ;;  %v13720_v16 = vld [vmem:[%s14407_s22 + $0x78] sm:$0xff]  }
 0x11d   : > { %v1066_v50 = vpop.f32.mrf.mxu1  ;;  %v1428_v40 = vpop.f32.mrf.mxu0 }
 0x11e   : > { %v14812_v55 = vadd.f32 %v12547_v46, %v1075_v47  ;;  %v1067_v57 = vadd.f32 %v1066_v50, %v14684_v44 }
 0x11f   : > { %v12506_v62 = vpop.f32.mrf.mxu1  ;;  %v12548_v63 = vpop.f32.mrf.mxu0 }
 0x120   : > { %v14815_v0 = vadd.f32 %v1428_v40, %v1067_v57  ;;  %v1078_v42 = vadd.f32 %v12506_v62, %v14690_v48 }
 0x121   : > { %v1069_v3 = vpop.f32.mrf.mxu1  ;;  %v1431_v4 = vpop.f32.mrf.mxu0 }
 0x122   : > { %v14826_v60 = vadd.f32 %v12548_v63, %v1078_v42  ;;  %v1070_v44 = vadd.f32 %v1069_v3, %v14696_v52  ;;  %v13716_v52 = vld [vmem:[%s14407_s22 + $0x68] sm:$0xff]   ;;  %v13722_v42 = vld [vmem:[%s14407_s22 + $0x80] sm:$0xff]  }
 0x123   : > { %v12509_v28 = vpop.f32.mrf.mxu1  ;;  %v12551_v61 = vpop.f32.mrf.mxu0  ;;  %12760 = vmatmul.mubr.msk.bf16.gmra.mxu1 %vm736_vm0, %v13711_v51  ;;  %12802 = vmatmul.mubr.msk.bf16.gmra.mxu0 %vm736_vm0, %v13712_v54 }
 0x124   : > { %v14831_v48 = vadd.f32 %v1431_v4, %v1070_v44  ;;  %v1091_v10 = vadd.f32 %v12509_v28, %v14606_v7  ;;  %12763 = vmatprep.mubr.msk.bf16.mxu1 %vm736_vm0, %v13713_v1  ;;  %12805 = vmatprep.mubr.msk.bf16.mxu0 %vm736_vm0, %v13714_v59  ;;  %v13719_v7 = vld [vmem:[%s14407_s22 + $0x70] sm:$0xff]   ;;  %v13725_v4 = vld [vmem:[%s14407_s22 + $0x80] sm:$0xff]   ;;  %v13726_v44 = vld [vmem:[%s14407_s22 + $0x88] sm:$0xff]  }
 0x125   : > { %v1082_v11 = vpop.f32.mrf.mxu1  ;;  %v1444_v15 = vpop.f32.mrf.mxu0 }
 0x126   : > { %v14838_v8 = vadd.f32 %v12551_v61, %v1091_v10  ;;  %v1083_v12 = vadd.f32 %v1082_v11, %v14614_v9 }
 0x127   : > { %v12510_v26 = vpop.f32.mrf.mxu1  ;;  %v12552_v27 = vpop.f32.mrf.mxu0 }
 0x128   : > { %v14841_v32 = vadd.f32 %v1444_v15, %v1083_v12  ;;  %v1094_v35 = vadd.f32 %v12510_v26, %v14620_v13  ;;  %v13727_v12 = vld [vmem:[%s14407_s22 + $0x88] sm:$0xff]   ;;  %v13728_v26 = vld [vmem:[%s14407_s22 + $0x90] sm:$0xff]  }
 0x129   : > { %v1085_v39 = vpop.f32.mrf.mxu1  ;;  %v1447_v46 = vpop.f32.mrf.mxu0 }
 0x12a   : > { %v14847_v47 = vadd.f32 %v12552_v27, %v1094_v35  ;;  %v1086_v50 = vadd.f32 %v1085_v39, %v14626_v17  ;;  %v13721_v17 = vld [vmem:[%s14407_s22 + $0x78] sm:$0xff]  }
 0x12b   : > { %v12513_v40 = vpop.f32.mrf.mxu1  ;;  %v12555_v9 = vpop.f32.mrf.mxu0  ;;  %12764 = vmatmul.mubr.msk.bf16.gmra.mxu1 %vm736_vm0, %v13716_v52  ;;  %12806 = vmatmul.mubr.msk.bf16.gmra.mxu0 %vm736_vm0, %v13717_v30 }
 0x12c   : > { %v14852_v51 = vadd.f32 %v1447_v46, %v1086_v50  ;;  %v1107_v13 = vadd.f32 %v12513_v40, %v14630_v19  ;;  %12767 = vmatprep.mubr.msk.bf16.mxu1 %vm736_vm0, %v13719_v7  ;;  %12809 = vmatprep.mubr.msk.bf16.mxu0 %vm736_vm0, %v13720_v16  ;;  %v13729_v50 = vld [vmem:[%s14407_s22 + $0x20] sm:$0xff]  }
 0x12d   : > { %v1098_v54 = vpop.f32.mrf.mxu1  ;;  %v1460_v57 = vpop.f32.mrf.mxu0 }
 0x12e   : > { %v14859_v62 = vadd.f32 %v12555_v9, %v1107_v13  ;;  %v1099_v63 = vadd.f32 %v1098_v54, %v14638_v21 }
 0x12f   : > { %v12514_v1 = vpop.f32.mrf.mxu1  ;;  %v12556_v59 = vpop.f32.mrf.mxu0 }
 0x130   : > { %v14863_v3 = vadd.f32 %v1460_v57, %v1099_v63  ;;  %v1110_v19 = vadd.f32 %v12514_v1, %v14644_v25  ;;  %v13731_v1 = vld [vmem:[%s14407_s22 + $0x28] sm:$0xff]  }
 0x131   : > { %v1101_v28 = vpop.f32.mrf.mxu1  ;;  %v1463_v61 = vpop.f32.mrf.mxu0 }
 0x132   : > { %v14868_v10 = vadd.f32 %v12556_v59, %v1110_v19  ;;  %v1102_v11 = vadd.f32 %v1101_v28, %v14650_v29 }
 0x133   : > { %v12517_v21 = vpop.f32.mrf.mxu1  ;;  %v12559_v15 = vpop.f32.mrf.mxu0  ;;  %12768 = vmatmul.mubr.msk.bf16.gmra.mxu1 %vm736_vm0, %v13721_v17  ;;  %12810 = vmatmul.mubr.msk.bf16.gmra.mxu0 %vm736_vm0, %v13722_v42 }
 0x134   : > { %v14878_v25 = vadd.f32 %v1463_v61, %v1102_v11  ;;  %v1123_v52 = vadd.f32 %v12517_v21, %v14654_v31  ;;  %12771 = vmatprep.mubr.msk.bf16.mxu1 %vm736_vm0, %v13725_v4  ;;  %12813 = vmatprep.mubr.msk.bf16.mxu0 %vm736_vm0, %v13726_v44  ;;  %v13730_v31 = vld [vmem:[%s14551_s24] sm:$0xff]   ;;  %v13735_v11 = vld [vmem:[%s14407_s22 + $0x30] sm:$0xff]  }
 0x135   : > { %v1114_v29 = vpop.f32.mrf.mxu1  ;;  %v1476_v30 = vpop.f32.mrf.mxu0 }
 0x136   : > { %v14885_v27 = vadd.f32 %v12559_v15, %v1123_v52  ;;  %v1115_v35 = vadd.f32 %v1114_v29, %v14662_v33  ;;  %v13739_v52 = vld [vmem:[%s17204_s5 + $0x1d0] sm:$0xff]   ;;  %v13742_v29 = vld [vmem:[%s17204_s5 + $0x1f8] sm:$0xff]  }
 0x137   : > { %v12518_v7 = vpop.f32.mrf.mxu1  ;;  %v12560_v16 = vpop.f32.mrf.mxu0 }
 0x138   : > { %v14888_v39 = vadd.f32 %v1476_v30, %v1115_v35  ;;  %v1126_v46 = vadd.f32 %v12518_v7, %v14668_v37  ;;  %v13750_v35 = vld [vmem:[%s17204_s5 + $0x1f0] sm:$0xff]  }
 0x139   : > { %v1117_v40 = vpop.f32.mrf.mxu1  ;;  %v1479_v9 = vpop.f32.mrf.mxu0 }
 0x13a   : > { %v14893_v13 = vadd.f32 %v12560_v16, %v1126_v46  ;;  %v1118_v54 = vadd.f32 %v1117_v40, %v14674_v41  ;;  %v13732_v41 = vld [vmem:[%s14551_s24 + $0x8] sm:$0xff]  }
 0x13b   : > { %v12521_v57 = vpop.f32.mrf.mxu1  ;;  %v12563_v17 = vpop.f32.mrf.mxu0  ;;  %12772 = vmatmul.mubr.msk.bf16.gmra.mxu1 %vm736_vm0, %v13727_v12  ;;  %12814 = vmatmul.mubr.msk.bf16.gmra.mxu0 %vm736_vm0, %v13728_v26 }
 0x13c   : > { %v14898_v33 = vadd.f32 %v1479_v9, %v1118_v54  ;;  %v1139_v37 = vadd.f32 %v12521_v57, %v14678_v43  ;;  %12827 = vmatprep.mubr.msk.bf16.mxu1 %vm736_vm0, %v13729_v50  ;;  %12869 = vmatprep.mubr.msk.bf16.mxu0 %vm736_vm0, %v13730_v31  ;;  %v13736_v43 = vld [vmem:[%s14551_s24 + $0x10] sm:$0xff]   ;;  %v13737_v50 = vld [vmem:[%s14407_s22 + $0x38] sm:$0xff]   ;;  %v13740_v57 = vld [vmem:[%s14407_s22 + $0x40] sm:$0xff]  }
 0x13d   : > { %v1130_v63 = vpop.f32.mrf.mxu1  ;;  %v1492_v42 = vpop.f32.mrf.mxu0  ;;  %v13738_v9 = vld [vmem:[%s14551_s24 + $0x18] sm:$0xff]  }
 0x13e   : > { %v14905_v59 = vadd.f32 %v12563_v17, %v1139_v37  ;;  %v1131_v19 = vadd.f32 %v1130_v63, %v14686_v45  ;;  %v13741_v17 = vld [vmem:[%s14551_s24 + $0x20] sm:$0xff]  }
 0x13f   : > { %v12522_v4 = vpop.f32.mrf.mxu1  ;;  %v12564_v44 = vpop.f32.mrf.mxu0 }
 0x140   : > { %v14908_v28 = vadd.f32 %v1492_v42, %v1131_v19  ;;  %v1142_v61 = vadd.f32 %v12522_v4, %v14692_v49  ;;  %v13749_v49 = vld [vmem:[%s17204_s5 + $0x1c8] sm:$0xff]  }
 0x141   : > { %v1133_v21 = vpop.f32.mrf.mxu1  ;;  %v1495_v15 = vpop.f32.mrf.mxu0  ;;  %v13760_v42 = vld [vmem:[%s17204_s5 + $0x1e8] sm:$0xff]  }
 0x142   : > { %v14919_v30 = vadd.f32 %v12564_v44, %v1142_v61  ;;  %v1134_v45 = vadd.f32 %v1133_v21, %v14698_v53  ;;  %v13765_v61 = vld [vmem:[%s17204_s5 + $0x1b8] sm:$0xff]   ;;  %v13743_v21 = vld [vmem:[%s14407_s22 + $0x48] sm:$0xff]  }
 0x143   : > { %v12577_v12 = vpop.f32.mrf.mxu1  ;;  %v12619_v26 = vpop.f32.mrf.mxu0  ;;  %12828 = vmatmul.mubr.msk.bf16.vlgmr.msra.gmra.mxu1 %vm736_vm0, %v13731_v1  ;;  %12870 = vmatmul.mubr.msk.bf16.vlgmr.msra.gmra.mxu0 %vm736_vm0, %v13732_v41 }
 0x144   : > { %v14930_v7 = vadd.f32 %v1495_v15, %v1134_v45  ;;  %v1903_v16 = vadd.f32 %v12577_v12, %v14720_v2  ;;  %12902 = vmatpush3.bf16.msra.mxu1 %v14764_v58  ;;  %12944 = vmatpush3.bf16.msra.mxu0 %v14772_v24  ;;  %v13744_v15 = vld [vmem:[%s14551_s24 + $0x28] sm:$0xff]  }
 0x145   : > { %v1774_v53 = vpop.f32.mrf.mxu1  ;;  %v2168_v46 = vpop.f32.mrf.mxu0  ;;  %12831 = vmatprep.mubr.msk.bf16.mxu1 %vm736_vm0, %v13735_v11  ;;  %12873 = vmatprep.mubr.msk.bf16.mxu0 %vm736_vm0, %v13736_v43 }
 0x146   : > { %v14938_v31 = vadd.f32 %v12619_v26, %v1903_v16  ;;  %v1901_v40 = vadd.f32 %v1774_v53, %v14724_v6  ;;  %12903 = vmatprep.subr.bf16.mxu1 %v13739_v52  ;;  %12945 = vmatprep.subr.bf16.mxu0 %v13742_v29  ;;  %v13757_v6 = vld [vmem:[%s17204_s5 + $0x1c0] sm:$0xff]   ;;  %v13745_v16 = vld [vmem:[%s14407_s22 + $0x50] sm:$0xff]  }
 0x147   : > { %v12578_v2 = vpop.f32.mrf.mxu1  ;;  %v12620_v58 = vpop.f32.mrf.mxu0  ;;  %v13746_v53 = vld [vmem:[%s14551_s24 + $0x30] sm:$0xff]  }
 0x148   : > { %v14942_v54 = vadd.f32 %v2168_v46, %v1901_v40  ;;  %v1904_v24 = vadd.f32 %v12578_v2, %v14735_v23  ;;  %12904 = vmatpush3.bf16.msra.mxu1 %v13739_v52  ;;  %12946 = vmatpush3.bf16.msra.mxu0 %v13742_v29 }
 0x149   : > { %v1777_v37 = vpop.f32.mrf.mxu1  ;;  %v2171_v63 = vpop.f32.mrf.mxu0  ;;  %12905 = vmatprep.subr.bf16.mxu1 %v13749_v49  ;;  %12947 = vmatprep.subr.bf16.mxu0 %v13750_v35 }
 0x14a   : > { %v14953_v1 = vadd.f32 %v12620_v58, %v1904_v24  ;;  %v1902_v23 = vadd.f32 %v1777_v37, %v14740_v34  ;;  %v13766_v34 = vld [vmem:[%s17204_s5 + $0x1e0] sm:$0xff]  }
 0x14b   : > { %v12581_v41 = vpop.f32.mrf.mxu1  ;;  %v12623_v19 = vpop.f32.mrf.mxu0  ;;  %12832 = vmatmul.mubr.msk.bf16.gmra.mxu1 %vm736_vm0, %v13737_v50  ;;  %12874 = vmatmul.mubr.msk.bf16.gmra.mxu0 %vm736_vm0, %v13738_v9 }
 0x14c   : > { %v14958_v4 = vadd.f32 %v2171_v63, %v1902_v23  ;;  %v1907_v44 = vadd.f32 %v12581_v41, %v14753_v18  ;;  %12835 = vmatprep.mubr.msk.bf16.mxu1 %vm736_vm0, %v13740_v57  ;;  %12877 = vmatprep.mubr.msk.bf16.mxu0 %vm736_vm0, %v13741_v17  ;;  %v13747_v57 = vld [vmem:[%s14407_s22 + $0x58] sm:$0xff]   ;;  %v13751_v41 = vld [vmem:[%s14407_s22 + $0x60] sm:$0xff]  }
 0x14d   : > { %v1790_v11 = vpop.f32.mrf.mxu1  ;;  %v2184_v43 = vpop.f32.mrf.mxu0  ;;  %12906 = vmatpush3.bf16.msra.mxu1 %v13749_v49  ;;  %12948 = vmatpush3.bf16.msra.mxu0 %v13750_v35  ;;  %v14982_v49 = vld [vmem:[%s17204_s5 + $0x228] sm:$0xff]   ;;  %v13748_v17 = vld [vmem:[%s14551_s24 + $0x38] sm:$0xff]  }
 0x14e   : > { %v14971_v18 = vadd.f32 %v12623_v19, %v1907_v44  ;;  %v1905_v52 = vadd.f32 %v1790_v11, %v14756_v56  ;;  %12907 = vmatprep.subr.bf16.mxu1 %v13757_v6  ;;  %12949 = vmatprep.subr.bf16.mxu0 %v13760_v42  ;;  %v13752_v19 = vld [vmem:[%s14551_s24 + $0x40] sm:$0xff]  }
 0x14f   : > { %v12582_v29 = vpop.f32.mrf.mxu1  ;;  %v12624_v45 = vpop.f32.mrf.mxu0 }
 0x150   : > { %v14974_v12 = vadd.f32 %v2184_v43, %v1905_v52  ;;  %v1908_v26 = vadd.f32 %v12582_v29, %v14766_v20  ;;  %v14990_v20 = vld [vmem:[%s17204_s5 + $0x250] sm:$0xff]   ;;  %v13754_v29 = vld [vmem:[%s14551_s24 + $0x48] sm:$0xff]  }
 0x151   : > { %v1793_v46 = vpop.f32.mrf.mxu1  ;;  %v2187_v50 = vpop.f32.mrf.mxu0  ;;  %12908 = vmatpush3.bf16.msra.mxu1 %v13757_v6  ;;  %12950 = vmatpush3.bf16.msra.mxu0 %v13760_v42 }
 0x152   : > { %v14984_v56 = vadd.f32 %v12624_v45, %v1908_v26  ;;  %v1906_v35 = vadd.f32 %v1793_v46, %v14777_v5  ;;  %12909 = vmatprep.subr.bf16.mxu1 %v13765_v61  ;;  %12951 = vmatprep.subr.bf16.mxu0 %v13766_v34 }
 0x153   : > { %v12585_v40 = vpop.f32.mrf.mxu1  ;;  %v12627_v9 = vpop.f32.mrf.mxu0  ;;  %12836 = vmatmul.mubr.msk.bf16.gmra.mxu1 %vm736_vm0, %v13743_v21  ;;  %12878 = vmatmul.mubr.msk.bf16.gmra.mxu0 %vm736_vm0, %v13744_v15 }
 0x154   : > { %v14994_v2 = vadd.f32 %v2187_v50, %v1906_v35  ;;  %v1911_v58 = vadd.f32 %v12585_v40, %v14784_v14  ;;  %12839 = vmatprep.mubr.msk.bf16.mxu1 %vm736_vm0, %v13745_v16  ;;  %12881 = vmatprep.mubr.msk.bf16.mxu0 %vm736_vm0, %v13746_v53  ;;  %v13756_v35 = vld [vmem:[%s14551_s24 + $0x50] sm:$0xff]  }
 0x155   : > { %v1806_v5 = vpop.f32.mrf.mxu1  ;;  %v2200_v24 = vpop.f32.mrf.mxu0  ;;  %12910 = vmatpush3.bf16.msra.mxu1 %v13765_v61  ;;  %12952 = vmatpush3.bf16.msra.mxu0 %v13766_v34 }
 0x156   : > { %v15001_v37 = vadd.f32 %v12627_v9, %v1911_v58  ;;  %v1909_v63 = vadd.f32 %v1806_v5, %v14789_v22  ;;  %12985 = vmatprep.subr.bf16.mxu1 %v14982_v49  ;;  %13027 = vmatprep.subr.bf16.mxu0 %v14990_v20 }
 0x157   : > { %v12586_v14 = vpop.f32.mrf.mxu1  ;;  %v12628_v6 = vpop.f32.mrf.mxu0 }
 0x158   : > { %v15006_v42 = vadd.f32 %v2200_v24, %v1909_v63  ;;  %v1912_v23 = vadd.f32 %v12586_v14, %v14800_v38  ;;  %v13759_v14 = vld [vmem:[%s14551_s24 + $0x58] sm:$0xff]  }
 0x159   : > { %v1809_v44 = vpop.f32.mrf.mxu1  ;;  %v2203_v61 = vpop.f32.mrf.mxu0 }
 0x15a   : > { %v15011_v34 = vadd.f32 %v12628_v6, %v1912_v23  ;;  %v1910_v22 = vadd.f32 %v1809_v44, %v14805_v36  ;;  %v13753_v36 = vld [vmem:[%s14407_s22 + $0x68] sm:$0xff]  }
 0x15b   : > { %v12589_v11 = vpop.f32.mrf.mxu1  ;;  %v12631_v43 = vpop.f32.mrf.mxu0  ;;  %12840 = vmatmul.mubr.msk.bf16.gmra.mxu1 %vm736_vm0, %v13747_v57  ;;  %12882 = vmatmul.mubr.msk.bf16.gmra.mxu0 %vm736_vm0, %v13748_v17 }
 0x15c   : > { %v15016_v21 = vadd.f32 %v2203_v61, %v1910_v22  ;;  %v1915_v38 = vadd.f32 %v12589_v11, %v14812_v55  ;;  %12843 = vmatprep.mubr.msk.bf16.mxu1 %vm736_vm0, %v13751_v41  ;;  %12885 = vmatprep.mubr.msk.bf16.mxu0 %vm736_vm0, %v13752_v19  ;;  %v13755_v55 = vld [vmem:[%s14407_s22 + $0x70] sm:$0xff]   ;;  %v13761_v61 = vld [vmem:[%s14407_s22 + $0x80] sm:$0xff]  }
 0x15d   : > { %v1822_v15 = vpop.f32.mrf.mxu1  ;;  %v2216_v52 = vpop.f32.mrf.mxu0  ;;  %v13762_v22 = vld [vmem:[%s14551_s24 + $0x60] sm:$0xff]  }
 0x15e   : > { %v15023_v45 = vadd.f32 %v12631_v43, %v1915_v38  ;;  %v1913_v26 = vadd.f32 %v1822_v15, %v14815_v0 }
 0x15f   : > { %v12590_v16 = vpop.f32.mrf.mxu1  ;;  %v12632_v53 = vpop.f32.mrf.mxu0 }
 0x160   : > { %v15026_v46 = vadd.f32 %v2216_v52, %v1913_v26  ;;  %v1916_v50 = vadd.f32 %v12590_v16, %v14826_v60  ;;  %v13763_v26 = vld [vmem:[%s14407_s22 + $0x88] sm:$0xff]  }
 0x161   : > { %v1825_v40 = vpop.f32.mrf.mxu1  ;;  %v2219_v9 = vpop.f32.mrf.mxu0 }
 0x162   : > { %v15032_v58 = vadd.f32 %v12632_v53, %v1916_v50  ;;  %v1914_v5 = vadd.f32 %v1825_v40, %v14831_v48  ;;  %v13758_v48 = vld [vmem:[%s14407_s22 + $0x78] sm:$0xff]   ;;  %v13764_v50 = vld [vmem:[%s14551_s24 + $0x68] sm:$0xff]  }
 0x163   : > { %v12593_v24 = vpop.f32.mrf.mxu1  ;;  %v12635_v0 = vpop.f32.mrf.mxu0  ;;  %12844 = vmatmul.mubr.msk.bf16.gmra.mxu1 %vm736_vm0, %v13753_v36  ;;  %12886 = vmatmul.mubr.msk.bf16.gmra.mxu0 %vm736_vm0, %v13754_v29 }
 0x164   : > { %v15037_v60 = vadd.f32 %v2219_v9, %v1914_v5  ;;  %v1919_v57 = vadd.f32 %v12593_v24, %v14838_v8  ;;  %12847 = vmatprep.mubr.msk.bf16.mxu1 %vm736_vm0, %v13755_v55  ;;  %12889 = vmatprep.mubr.msk.bf16.mxu0 %vm736_vm0, %v13756_v35  ;;  %v13768_v5 = vld [vmem:[%s14551_s24 + $0x70] sm:$0xff]  }
 0x165   : > { %v1838_v17 = vpop.f32.mrf.mxu1  ;;  %v2232_v63 = vpop.f32.mrf.mxu0 }
 0x166   : > { %v15044_v6 = vadd.f32 %v12635_v0, %v1919_v57  ;;  %v1917_v23 = vadd.f32 %v1838_v17, %v14841_v32 }
 0x167   : > { %v12594_v41 = vpop.f32.mrf.mxu1  ;;  %v12636_v19 = vpop.f32.mrf.mxu0 }
 0x168   : > { %v15049_v44 = vadd.f32 %v2232_v63, %v1917_v23  ;;  %v1920_v8 = vadd.f32 %v12594_v41, %v14847_v47  ;;  %v13770_v41 = vld [vmem:[%s14551_s24 + $0x78] sm:$0xff]  }
 0x169   : > { %v1841_v11 = vpop.f32.mrf.mxu1  ;;  %v2235_v43 = vpop.f32.mrf.mxu0 }
 0x16a   : > { %v15054_v38 = vadd.f32 %v12636_v19, %v1920_v8  ;;  %v1918_v15 = vadd.f32 %v1841_v11, %v14852_v51 }
 0x16b   : > { %v12597_v32 = vpop.f32.mrf.mxu1  ;;  %v12639_v52 = vpop.f32.mrf.mxu0  ;;  %12848 = vmatmul.mubr.msk.bf16.gmra.mxu1 %vm736_vm0, %v13758_v48  ;;  %12890 = vmatmul.mubr.msk.bf16.gmra.mxu0 %vm736_vm0, %v13759_v14 }
 0x16c   : > { %v15063_v47 = vadd.f32 %v2235_v43, %v1918_v15  ;;  %v1923_v36 = vadd.f32 %v12597_v32, %v14859_v62  ;;  %12851 = vmatprep.mubr.msk.bf16.mxu1 %vm736_vm0, %v13761_v61  ;;  %12893 = vmatprep.mubr.msk.bf16.mxu0 %vm736_vm0, %v13762_v22  ;;  %v13767_v62 = vld [vmem:[%s14407_s22 + $0x90] sm:$0xff]   ;;  %v13771_v43 = vld [vmem:[%s14551_s24 + $0x8] sm:$0xff]  }
 0x16d   : > { %v1854_v51 = vpop.f32.mrf.mxu1  ;;  %v2248_v29 = vpop.f32.mrf.mxu0  ;;  %v13772_v15 = vld [vmem:[%s14551_s24 + $0x10] sm:$0xff]  }
 0x16e   : > { %v15069_v16 = vadd.f32 %v12639_v52, %v1923_v36  ;;  %v1921_v53 = vadd.f32 %v1854_v51, %v14863_v3 }
 0x16f   : > { %v12598_v55 = vpop.f32.mrf.mxu1  ;;  %v12640_v35 = vpop.f32.mrf.mxu0 }
 0x170   : > { %v15073_v40 = vadd.f32 %v2248_v29, %v1921_v53  ;;  %v1924_v9 = vadd.f32 %v12598_v55, %v14868_v10  ;;  %v13774_v55 = vld [vmem:[%s14551_s24 + $0x18] sm:$0xff]  }
 0x171   : > { %v1857_v24 = vpop.f32.mrf.mxu1  ;;  %v2251_v0 = vpop.f32.mrf.mxu0 }
 0x172   : > { %v15079_v57 = vadd.f32 %v12640_v35, %v1924_v9  ;;  %v1922_v17 = vadd.f32 %v1857_v24, %v14878_v25  ;;  %v13769_v25 = vld [vmem:[%s14407_s22 + $0x98] sm:$0xff]  }
 0x173   : > { %v12601_v3 = vpop.f32.mrf.mxu1  ;;  %v12643_v63 = vpop.f32.mrf.mxu0  ;;  %12852 = vmatmul.mubr.msk.bf16.gmra.mxu1 %vm736_vm0, %v13763_v26  ;;  %12894 = vmatmul.mubr.msk.bf16.gmra.mxu0 %vm736_vm0, %v13764_v50  ;;  %v13773_v50 = vld [vmem:[%s14551_s24 + $0x10] sm:$0xff]  }
 0x174   : > { %v15084_v48 = vadd.f32 %v2251_v0, %v1922_v17  ;;  %v1927_v10 = vadd.f32 %v12601_v3, %v14885_v27  ;;  %12855 = vmatprep.mubr.msk.bf16.mxu1 %vm736_vm0, %v13767_v62  ;;  %12897 = vmatprep.mubr.msk.bf16.mxu0 %vm736_vm0, %v13768_v5  ;;  %v13777_v17 = vld [vmem:[%s14551_s24 + $0x18] sm:$0xff]  }
 0x175   : > { %v1870_v14 = vpop.f32.mrf.mxu1  ;;  %v2264_v23 = vpop.f32.mrf.mxu0 }
 0x176   : > { %v15092_v19 = vadd.f32 %v12643_v63, %v1927_v10  ;;  %v1925_v8 = vadd.f32 %v1870_v14, %v14888_v39  ;;  %v13781_v10 = vld [vmem:[%s17204_s5 + $0x220] sm:$0xff]   ;;  %v13784_v14 = vld [vmem:[%s17204_s5 + $0x248] sm:$0xff]  }
 0x177   : > { %v12602_v61 = vpop.f32.mrf.mxu1  ;;  %v12644_v22 = vpop.f32.mrf.mxu0 }
 0x178   : > { %v15095_v11 = vadd.f32 %v2264_v23, %v1925_v8  ;;  %v1928_v27 = vadd.f32 %v12602_v61, %v14893_v13  ;;  %v13792_v8 = vld [vmem:[%s17204_s5 + $0x240] sm:$0xff]  }
 0x179   : > { %v1873_v32 = vpop.f32.mrf.mxu1  ;;  %v2267_v52 = vpop.f32.mrf.mxu0 }
 0x17a   : > { %v15100_v36 = vadd.f32 %v12644_v22, %v1928_v27  ;;  %v1926_v51 = vadd.f32 %v1873_v32, %v14898_v33 }
 0x17b   : > { %v12605_v39 = vpop.f32.mrf.mxu1  ;;  %v12647_v29 = vpop.f32.mrf.mxu0  ;;  %12856 = vmatmul.mubr.msk.bf16.gmra.mxu1 %vm736_vm0, %v13769_v25  ;;  %12898 = vmatmul.mubr.msk.bf16.gmra.mxu0 %vm736_vm0, %v13770_v41 }
 0x17c   : > { %v15110_v13 = vadd.f32 %v2267_v52, %v1926_v51  ;;  %v1931_v26 = vadd.f32 %v12605_v39, %v14905_v59  ;;  %12911 = vmatprep.mubr.msk.bf16.mxu1 %vm736_vm0, %v13771_v43  ;;  %12953 = vmatprep.mubr.msk.bf16.mxu0 %vm736_vm0, %v13772_v15  ;;  %v13778_v59 = vld [vmem:[%s14551_s24 + $0x20] sm:$0xff]   ;;  %v13780_v52 = vld [vmem:[%s14551_s24 + $0x28] sm:$0xff]  }
 0x17d   : > { %v1886_v33 = vpop.f32.mrf.mxu1  ;;  %v2280_v53 = vpop.f32.mrf.mxu0  ;;  %v13779_v43 = vld [vmem:[%s14551_s24 + $0x20] sm:$0xff]   ;;  %v13782_v39 = vld [vmem:[%s14551_s24 + $0x28] sm:$0xff]  }
 0x17e   : > { %v15117_v35 = vadd.f32 %v12647_v29, %v1931_v26  ;;  %v1929_v9 = vadd.f32 %v1886_v33, %v14908_v28  ;;  %v13783_v29 = vld [vmem:[%s14551_s24 + $0x30] sm:$0xff]  }
 0x17f   : > { %v12606_v62 = vpop.f32.mrf.mxu1  ;;  %v12648_v5 = vpop.f32.mrf.mxu0 }
 0x180   : > { %v15120_v24 = vadd.f32 %v2280_v53, %v1929_v9  ;;  %v1932_v0 = vadd.f32 %v12606_v62, %v14919_v30  ;;  %v13791_v30 = vld [vmem:[%s17204_s5 + $0x218] sm:$0xff]  }
 0x181   : > { %v1889_v3 = vpop.f32.mrf.mxu1  ;;  %v2283_v63 = vpop.f32.mrf.mxu0  ;;  %v13802_v53 = vld [vmem:[%s17204_s5 + $0x238] sm:$0xff]  }
 0x182   : > { %v15131_v23 = vadd.f32 %v12648_v5, %v1932_v0  ;;  %v1930_v28 = vadd.f32 %v1889_v3, %v14930_v7  ;;  %v13807_v0 = vld [vmem:[%s17204_s5 + $0x208] sm:$0xff]   ;;  %v13785_v3 = vld [vmem:[%s14551_s24 + $0x30] sm:$0xff]  }
 0x183   : > { %v12661_v25 = vpop.f32.mrf.mxu1  ;;  %v12703_v41 = vpop.f32.mrf.mxu0  ;;  %12912 = vmatmul.mubr.msk.bf16.vlgmr.msra.gmra.mxu1 %vm736_vm0, %v13773_v50  ;;  %12954 = vmatmul.mubr.msk.bf16.vlgmr.msra.gmra.mxu0 %vm736_vm0, %v13774_v55 }
 0x184   : > { %v15142_v61 = vadd.f32 %v2283_v63, %v1930_v28  ;;  %v2691_v22 = vadd.f32 %v12661_v25, %v14938_v31  ;;  %12986 = vmatpush3.bf16.msra.mxu1 %v14982_v49  ;;  %13028 = vmatpush3.bf16.msra.mxu0 %v14990_v20  ;;  %v13786_v63 = vld [vmem:[%s14551_s24 + $0x38] sm:$0xff]  }
 0x185   : > { %v2562_v7 = vpop.f32.mrf.mxu1  ;;  %v2956_v27 = vpop.f32.mrf.mxu0  ;;  %12915 = vmatprep.mubr.msk.bf16.mxu1 %vm736_vm0, %v13777_v17  ;;  %12957 = vmatprep.mubr.msk.bf16.mxu0 %vm736_vm0, %v13778_v59 }
 0x186   : > { %v15150_v15 = vadd.f32 %v12703_v41, %v2691_v22  ;;  %v2689_v32 = vadd.f32 %v2562_v7, %v14942_v54  ;;  %12987 = vmatprep.subr.bf16.mxu1 %v13781_v10  ;;  %13029 = vmatprep.subr.bf16.mxu0 %v13784_v14  ;;  %v13799_v54 = vld [vmem:[%s17204_s5 + $0x210] sm:$0xff]   ;;  %v13787_v22 = vld [vmem:[%s14551_s24 + $0x38] sm:$0xff]   ;;  %v13788_v7 = vld [vmem:[%s14551_s24 + $0x40] sm:$0xff]  }
 0x187   : > { %v12662_v31 = vpop.f32.mrf.mxu1  ;;  %v12704_v49 = vpop.f32.mrf.mxu0 }
 0x188   : > { %v15154_v51 = vadd.f32 %v2956_v27, %v2689_v32  ;;  %v2692_v20 = vadd.f32 %v12662_v31, %v14953_v1  ;;  %12988 = vmatpush3.bf16.msra.mxu1 %v13781_v10  ;;  %13030 = vmatpush3.bf16.msra.mxu0 %v13784_v14 }
 0x189   : > { %v2565_v26 = vpop.f32.mrf.mxu1  ;;  %v2959_v33 = vpop.f32.mrf.mxu0  ;;  %12989 = vmatprep.subr.bf16.mxu1 %v13791_v30  ;;  %13031 = vmatprep.subr.bf16.mxu0 %v13792_v8 }
 0x18a   : > { %v15165_v50 = vadd.f32 %v12704_v49, %v2692_v20  ;;  %v2690_v1 = vadd.f32 %v2565_v26, %v14958_v4  ;;  %v13808_v4 = vld [vmem:[%s17204_s5 + $0x230] sm:$0xff]  }
 0x18b   : > { %v12665_v55 = vpop.f32.mrf.mxu1  ;;  %v12707_v9 = vpop.f32.mrf.mxu0  ;;  %12916 = vmatmul.mubr.msk.bf16.gmra.mxu1 %vm736_vm0, %v13779_v43  ;;  %12958 = vmatmul.mubr.msk.bf16.gmra.mxu0 %vm736_vm0, %v13780_v52 }
 0x18c   : > { %v15170_v62 = vadd.f32 %v2959_v33, %v2690_v1  ;;  %v2695_v5 = vadd.f32 %v12665_v55, %v14971_v18  ;;  %12919 = vmatprep.mubr.msk.bf16.mxu1 %vm736_vm0, %v13782_v39  ;;  %12961 = vmatprep.mubr.msk.bf16.mxu0 %vm736_vm0, %v13783_v29  ;;  %v13789_v39 = vld [vmem:[%s14551_s24 + $0x40] sm:$0xff]   ;;  %v13790_v29 = vld [vmem:[%s14551_s24 + $0x48] sm:$0xff]  }
 0x18d   : > { %v2578_v17 = vpop.f32.mrf.mxu1  ;;  %v2972_v59 = vpop.f32.mrf.mxu0  ;;  %12990 = vmatpush3.bf16.msra.mxu1 %v13791_v30  ;;  %13032 = vmatpush3.bf16.msra.mxu0 %v13792_v8  ;;  %v15194_v30 = vld [vmem:[%s17204_s5 + $0x278] sm:$0xff]   ;;  %v13793_v55 = vld [vmem:[%s14551_s24 + $0x48] sm:$0xff]  }
 0x18e   : > { %v15183_v18 = vadd.f32 %v12707_v9, %v2695_v5  ;;  %v2693_v10 = vadd.f32 %v2578_v17, %v14974_v12  ;;  %12991 = vmatprep.subr.bf16.mxu1 %v13799_v54  ;;  %13033 = vmatprep.subr.bf16.mxu0 %v13802_v53  ;;  %v13794_v9 = vld [vmem:[%s14551_s24 + $0x50] sm:$0xff]  }
 0x18f   : > { %v12666_v14 = vpop.f32.mrf.mxu1  ;;  %v12708_v28 = vpop.f32.mrf.mxu0 }
 0x190   : > { %v15186_v25 = vadd.f32 %v2972_v59, %v2693_v10  ;;  %v2696_v41 = vadd.f32 %v12666_v14, %v14984_v56  ;;  %v15202_v56 = vld [vmem:[%s17204_s5 + $0x2a0] sm:$0xff]   ;;  %v13795_v14 = vld [vmem:[%s14551_s24 + $0x50] sm:$0xff]  }
 0x191   : > { %v2581_v27 = vpop.f32.mrf.mxu1  ;;  %v2975_v43 = vpop.f32.mrf.mxu0  ;;  %12992 = vmatpush3.bf16.msra.mxu1 %v13799_v54  ;;  %13034 = vmatpush3.bf16.msra.mxu0 %v13802_v53 }
 0x192   : > { %v15196_v12 = vadd.f32 %v12708_v28, %v2696_v41  ;;  %v2694_v8 = vadd.f32 %v2581_v27, %v14994_v2  ;;  %12993 = vmatprep.subr.bf16.mxu1 %v13807_v0  ;;  %13035 = vmatprep.subr.bf16.mxu0 %v13808_v4 }
 0x193   : > { %v12669_v32 = vpop.f32.mrf.mxu1  ;;  %v12711_v52 = vpop.f32.mrf.mxu0  ;;  %12920 = vmatmul.mubr.msk.bf16.gmra.mxu1 %vm736_vm0, %v13785_v3  ;;  %12962 = vmatmul.mubr.msk.bf16.gmra.mxu0 %vm736_vm0, %v13786_v63 }
 0x194   : > { %v15206_v31 = vadd.f32 %v2975_v43, %v2694_v8  ;;  %v2699_v49 = vadd.f32 %v12669_v32, %v15001_v37  ;;  %12923 = vmatprep.mubr.msk.bf16.mxu1 %vm736_vm0, %v13787_v22  ;;  %12965 = vmatprep.mubr.msk.bf16.mxu0 %vm736_vm0, %v13788_v7  ;;  %v13797_v8 = vld [vmem:[%s14551_s24 + $0x58] sm:$0xff]  }
 0x195   : > { %v2594_v2 = vpop.f32.mrf.mxu1  ;;  %v2988_v20 = vpop.f32.mrf.mxu0  ;;  %12994 = vmatpush3.bf16.msra.mxu1 %v13807_v0  ;;  %13036 = vmatpush3.bf16.msra.mxu0 %v13808_v4 }
 0x196   : > { %v15213_v26 = vadd.f32 %v12711_v52, %v2699_v49  ;;  %v2697_v33 = vadd.f32 %v2594_v2, %v15006_v42  ;;  %13069 = vmatprep.subr.bf16.mxu1 %v15194_v30  ;;  %13111 = vmatprep.subr.bf16.mxu0 %v15202_v56 }
 0x197   : > { %v12670_v37 = vpop.f32.mrf.mxu1  ;;  %v12712_v54 = vpop.f32.mrf.mxu0 }
 0x198   : > { %v15218_v53 = vadd.f32 %v2988_v20, %v2697_v33  ;;  %v2700_v1 = vadd.f32 %v12670_v37, %v15011_v34  ;;  %v13800_v37 = vld [vmem:[%s14551_s24 + $0x60] sm:$0xff]  }
 0x199   : > { %v2597_v5 = vpop.f32.mrf.mxu1  ;;  %v2991_v0 = vpop.f32.mrf.mxu0 }
 0x19a   : > { %v15223_v4 = vadd.f32 %v12712_v54, %v2700_v1  ;;  %v2698_v42 = vadd.f32 %v2597_v5, %v15016_v21  ;;  %v13796_v21 = vld [vmem:[%s14551_s24 + $0x58] sm:$0xff]  }
 0x19b   : > { %v12673_v17 = vpop.f32.mrf.mxu1  ;;  %v12715_v59 = vpop.f32.mrf.mxu0  ;;  %12924 = vmatmul.mubr.msk.bf16.gmra.mxu1 %vm736_vm0, %v13789_v39  ;;  %12966 = vmatmul.mubr.msk.bf16.gmra.mxu0 %vm736_vm0, %v13790_v29 }
 0x19c   : > { %v15228_v3 = vadd.f32 %v2991_v0, %v2698_v42  ;;  %v2703_v34 = vadd.f32 %v12673_v17, %v15023_v45  ;;  %12927 = vmatprep.mubr.msk.bf16.mxu1 %vm736_vm0, %v13793_v55  ;;  %12969 = vmatprep.mubr.msk.bf16.mxu0 %vm736_vm0, %v13794_v9  ;;  %v13798_v45 = vld [vmem:[%s14551_s24 + $0x60] sm:$0xff]   ;;  %v13803_v42 = vld [vmem:[%s14551_s24 + $0x68] sm:$0xff]  }
 0x19d   : > { %v2610_v63 = vpop.f32.mrf.mxu1  ;;  %v3004_v10 = vpop.f32.mrf.mxu0 }
 0x19e   : > { %v15235_v28 = vadd.f32 %v12715_v59, %v2703_v34  ;;  %v2701_v41 = vadd.f32 %v2610_v63, %v15026_v46 }
 0x19f   : > { %v12674_v22 = vpop.f32.mrf.mxu1  ;;  %v12716_v7 = vpop.f32.mrf.mxu0 }
 0x1a0   : > { %v15238_v27 = vadd.f32 %v3004_v10, %v2701_v41  ;;  %v2704_v43 = vadd.f32 %v12674_v22, %v15032_v58  ;;  %v13805_v22 = vld [vmem:[%s14551_s24 + $0x70] sm:$0xff]  }
 0x1a1   : > { %v2613_v32 = vpop.f32.mrf.mxu1  ;;  %v3007_v52 = vpop.f32.mrf.mxu0 }
 0x1a2   : > { %v15243_v49 = vadd.f32 %v12716_v7, %v2704_v43  ;;  %v2702_v2 = vadd.f32 %v2613_v32, %v15037_v60  ;;  %v13801_v60 = vld [vmem:[%s14551_s24 + $0x68] sm:$0xff]   ;;  %v13806_v43 = vld [vmem:[%s14551_s24 + $0x78] sm:$0xff]  }
 0x1a3   : > { %v12677_v20 = vpop.f32.mrf.mxu1  ;;  %v12719_v39 = vpop.f32.mrf.mxu0  ;;  %12928 = vmatmul.mubr.msk.bf16.gmra.mxu1 %vm736_vm0, %v13795_v14  ;;  %12970 = vmatmul.mubr.msk.bf16.gmra.mxu0 %vm736_vm0, %v13796_v21 }
 0x1a4   : > { %v15248_v46 = vadd.f32 %v3007_v52, %v2702_v2  ;;  %v2707_v58 = vadd.f32 %v12677_v20, %v15044_v6  ;;  %12931 = vmatprep.mubr.msk.bf16.mxu1 %vm736_vm0, %v13797_v8  ;;  %12973 = vmatprep.mubr.msk.bf16.mxu0 %vm736_vm0, %v13798_v45  ;;  %v13804_v6 = vld [vmem:[%s14551_s24 + $0x70] sm:$0xff]   ;;  %v13809_v2 = vld [vmem:[%s14551_s24 + $0x78] sm:$0xff]  }
 0x1a5   : > { %v2626_v29 = vpop.f32.mrf.mxu1  ;;  %v3020_v33 = vpop.f32.mrf.mxu0 }
 0x1a6   : > { %v15255_v54 = vadd.f32 %v12719_v39, %v2707_v58  ;;  %v2705_v1 = vadd.f32 %v2626_v29, %v15049_v44 }
 0x1a7   : > { %v12678_v55 = vpop.f32.mrf.mxu1  ;;  %v12720_v9 = vpop.f32.mrf.mxu0 }
 0x1a8   : > { %v15258_v5 = vadd.f32 %v3020_v33, %v2705_v1  ;;  %v2708_v0 = vadd.f32 %v12678_v55, %v15054_v38  ;;  %v13811_v55 = vld [vmem:[%s14551_s24 + $0x80] sm:$0xff]  }
 0x1a9   : > { %v2629_v17 = vpop.f32.mrf.mxu1  ;;  %v3023_v59 = vpop.f32.mrf.mxu0 }
 0x1aa   : > { %v15263_v34 = vadd.f32 %v12720_v9, %v2708_v0  ;;  %v2706_v63 = vadd.f32 %v2629_v17, %v15063_v47 }
 0x1ab   : > { %v12681_v10 = vpop.f32.mrf.mxu1  ;;  %v12723_v14 = vpop.f32.mrf.mxu0  ;;  %12932 = vmatmul.mubr.msk.bf16.gmra.mxu1 %vm736_vm0, %v13800_v37  ;;  %12974 = vmatmul.mubr.msk.bf16.gmra.mxu0 %vm736_vm0, %v13801_v60 }
 0x1ac   : > { %v15268_v44 = vadd.f32 %v3023_v59, %v2706_v63  ;;  %v2711_v38 = vadd.f32 %v12681_v10, %v15069_v16  ;;  %12935 = vmatprep.mubr.msk.bf16.mxu1 %vm736_vm0, %v13803_v42  ;;  %12977 = vmatprep.mubr.msk.bf16.mxu0 %vm736_vm0, %v13804_v6  ;;  %v13810_v16 = vld [vmem:[%s14551_s24 + $0x80] sm:$0xff]   ;;  %v13813_v63 = vld [vmem:[%s14551_s24 + $0x18] sm:$0xff]  }
 0x1ad   : > { %v2642_v21 = vpop.f32.mrf.mxu1  ;;  %v3036_v41 = vpop.f32.mrf.mxu0 }
 0x1ae   : > { %v15274_v47 = vadd.f32 %v12723_v14, %v2711_v38  ;;  %v2709_v7 = vadd.f32 %v2642_v21, %v15073_v40 }
 0x1af   : > { %v12682_v8 = vpop.f32.mrf.mxu1  ;;  %v12724_v45 = vpop.f32.mrf.mxu0 }
 0x1b0   : > { %v15278_v32 = vadd.f32 %v3036_v41, %v2709_v7  ;;  %v2712_v52 = vadd.f32 %v12682_v8, %v15079_v57  ;;  %v13815_v8 = vld [vmem:[%s14551_s24 + $0x20] sm:$0xff]  }
 0x1b1   : > { %v2645_v20 = vpop.f32.mrf.mxu1  ;;  %v3039_v39 = vpop.f32.mrf.mxu0 }
 0x1b2   : > { %v15283_v58 = vadd.f32 %v12724_v45, %v2712_v52  ;;  %v2710_v29 = vadd.f32 %v2645_v20, %v15084_v48  ;;  %v13812_v48 = vld [vmem:[%s14551_s24 + $0x88] sm:$0xff]  }
 0x1b3   : > { %v12685_v33 = vpop.f32.mrf.mxu1  ;;  %v12727_v37 = vpop.f32.mrf.mxu0  ;;  %12936 = vmatmul.mubr.msk.bf16.gmra.mxu1 %vm736_vm0, %v13805_v22  ;;  %12978 = vmatmul.mubr.msk.bf16.gmra.mxu0 %vm736_vm0, %v13806_v43 }
 0x1b4   : > { %v15288_v40 = vadd.f32 %v3039_v39, %v2710_v29  ;;  %v2715_v57 = vadd.f32 %v12685_v33, %v15092_v19  ;;  %12939 = vmatprep.mubr.msk.bf16.mxu1 %vm736_vm0, %v13809_v2  ;;  %12981 = vmatprep.mubr.msk.bf16.mxu0 %vm736_vm0, %v13810_v16  ;;  %v13814_v19 = vld [vmem:[%s14551_s24 + $0x20] sm:$0xff]   ;;  %v13819_v29 = vld [vmem:[%s14551_s24 + $0x28] sm:$0xff]  }
 0x1b5   : > { %v2658_v60 = vpop.f32.mrf.mxu1  ;;  %v3052_v1 = vpop.f32.mrf.mxu0 }
 0x1b6   : > { %v15295_v9 = vadd.f32 %v12727_v37, %v2715_v57  ;;  %v2713_v0 = vadd.f32 %v2658_v60, %v15095_v11  ;;  %v13823_v57 = vld [vmem:[%s17204_s5 + $0x270] sm:$0xff]   ;;  %v13826_v60 = vld [vmem:[%s17204_s5 + $0x298] sm:$0xff]  }
 0x1b7   : > { %v12686_v42 = vpop.f32.mrf.mxu1  ;;  %v12728_v6 = vpop.f32.mrf.mxu0 }
 0x1b8   : > { %v15298_v17 = vadd.f32 %v3052_v1, %v2713_v0  ;;  %v2716_v59 = vadd.f32 %v12686_v42, %v15100_v36  ;;  %v13834_v0 = vld [vmem:[%s17204_s5 + $0x290] sm:$0xff]  }
 0x1b9   : > { %v2661_v10 = vpop.f32.mrf.mxu1  ;;  %v3055_v14 = vpop.f32.mrf.mxu0 }
 0x1ba   : > { %v15303_v38 = vadd.f32 %v12728_v6, %v2716_v59  ;;  %v2714_v21 = vadd.f32 %v2661_v10, %v15110_v13  ;;  %v13816_v13 = vld [vmem:[%s14551_s24 + $0x28] sm:$0xff]  }
 0x1bb   : > { %v12689_v41 = vpop.f32.mrf.mxu1  ;;  %v12731_v22 = vpop.f32.mrf.mxu0  ;;  %12940 = vmatmul.mubr.msk.bf16.gmra.mxu1 %vm736_vm0, %v13811_v55  ;;  %12982 = vmatmul.mubr.msk.bf16.gmra.mxu0 %vm736_vm0, %v13812_v48 }
 0x1bc   : > { %v15308_v11 = vadd.f32 %v3055_v14, %v2714_v21  ;;  %v2719_v36 = vadd.f32 %v12689_v41, %v15117_v35  ;;  %12995 = vmatprep.mubr.msk.bf16.mxu1 %vm736_vm0, %v13813_v63  ;;  %13037 = vmatprep.mubr.msk.bf16.mxu0 %vm736_vm0, %v13814_v19  ;;  %v13820_v35 = vld [vmem:[%s14551_s24 + $0x30] sm:$0xff]   ;;  %v13822_v14 = vld [vmem:[%s14551_s24 + $0x38] sm:$0xff]  }
 0x1bd   : > { %v2674_v7 = vpop.f32.mrf.mxu1  ;;  %v3068_v43 = vpop.f32.mrf.mxu0  ;;  %v13821_v63 = vld [vmem:[%s14551_s24 + $0x30] sm:$0xff]   ;;  %v13824_v41 = vld [vmem:[%s14551_s24 + $0x38] sm:$0xff]  }
 0x1be   : > { %v15315_v45 = vadd.f32 %v12731_v22, %v2719_v36  ;;  %v2717_v52 = vadd.f32 %v2674_v7, %v15120_v24  ;;  %v13825_v22 = vld [vmem:[%s14551_s24 + $0x40] sm:$0xff]  }
 0x1bf   : > { %v12690_v2 = vpop.f32.mrf.mxu1  ;;  %v12732_v16 = vpop.f32.mrf.mxu0 }
 0x1c0   : > { %v15318_v20 = vadd.f32 %v3068_v43, %v2717_v52  ;;  %v2720_v39 = vadd.f32 %v12690_v2, %v15131_v23  ;;  %v13833_v23 = vld [vmem:[%s17204_s5 + $0x268] sm:$0xff]  }
 0x1c1   : > { %v2677_v33 = vpop.f32.mrf.mxu1  ;;  %v3071_v37 = vpop.f32.mrf.mxu0  ;;  %v13844_v43 = vld [vmem:[%s17204_s5 + $0x288] sm:$0xff]  }
 0x1c2   : > { %v15329_v1 = vadd.f32 %v12732_v16, %v2720_v39  ;;  %v2718_v24 = vadd.f32 %v2677_v33, %v15142_v61  ;;  %v13849_v39 = vld [vmem:[%s17204_s5 + $0x258] sm:$0xff]   ;;  %v13827_v33 = vld [vmem:[%s14551_s24 + $0x40] sm:$0xff]  }
 0x1c3   : > { %v12745_v55 = vpop.f32.mrf.mxu1  ;;  %v12787_v48 = vpop.f32.mrf.mxu0  ;;  %12996 = vmatmul.mubr.msk.bf16.vlgmr.msra.gmra.mxu1 %vm736_vm0, %v13815_v8  ;;  %13038 = vmatmul.mubr.msk.bf16.vlgmr.msra.gmra.mxu0 %vm736_vm0, %v13816_v13 }
 0x1c4   : > { %v15340_v42 = vadd.f32 %v3071_v37, %v2718_v24  ;;  %v3479_v6 = vadd.f32 %v12745_v55, %v15150_v15  ;;  %13070 = vmatpush3.bf16.msra.mxu1 %v15194_v30  ;;  %13112 = vmatpush3.bf16.msra.mxu0 %v15202_v56  ;;  %v13828_v37 = vld [vmem:[%s14551_s24 + $0x48] sm:$0xff]  }
 0x1c5   : > { %v3350_v61 = vpop.f32.mrf.mxu1  ;;  %v3744_v59 = vpop.f32.mrf.mxu0  ;;  %12999 = vmatprep.mubr.msk.bf16.mxu1 %vm736_vm0, %v13819_v29  ;;  %13041 = vmatprep.mubr.msk.bf16.mxu0 %vm736_vm0, %v13820_v35 }
 0x1c6   : > { %v15348_v19 = vadd.f32 %v12787_v48, %v3479_v6  ;;  %v3477_v10 = vadd.f32 %v3350_v61, %v15154_v51  ;;  %13071 = vmatprep.subr.bf16.mxu1 %v13823_v57  ;;  %13113 = vmatprep.subr.bf16.mxu0 %v13826_v60  ;;  %v13841_v51 = vld [vmem:[%s17204_s5 + $0x260] sm:$0xff]   ;;  %v13829_v6 = vld [vmem:[%s14551_s24 + $0x48] sm:$0xff]   ;;  %v13830_v61 = vld [vmem:[%s14551_s24 + $0x50] sm:$0xff]  }
 0x1c7   : > { %v12746_v15 = vpop.f32.mrf.mxu1  ;;  %v12788_v30 = vpop.f32.mrf.mxu0 }
 0x1c8   : > { %v15352_v21 = vadd.f32 %v3744_v59, %v3477_v10  ;;  %v3480_v56 = vadd.f32 %v12746_v15, %v15165_v50  ;;  %13072 = vmatpush3.bf16.msra.mxu1 %v13823_v57  ;;  %13114 = vmatpush3.bf16.msra.mxu0 %v13826_v60 }
 0x1c9   : > { %v3353_v36 = vpop.f32.mrf.mxu1  ;;  %v3747_v7 = vpop.f32.mrf.mxu0  ;;  %13073 = vmatprep.subr.bf16.mxu1 %v13833_v23  ;;  %13115 = vmatprep.subr.bf16.mxu0 %v13834_v0 }
 0x1ca   : > { %v15363_v8 = vadd.f32 %v12788_v30, %v3480_v56  ;;  %v3478_v50 = vadd.f32 %v3353_v36, %v15170_v62  ;;  %v13850_v62 = vld [vmem:[%s17204_s5 + $0x280] sm:$0xff]  }
 0x1cb   : > { %v12749_v13 = vpop.f32.mrf.mxu1  ;;  %v12791_v52 = vpop.f32.mrf.mxu0  ;;  %13000 = vmatmul.mubr.msk.bf16.gmra.mxu1 %vm736_vm0, %v13821_v63  ;;  %13042 = vmatmul.mubr.msk.bf16.gmra.mxu0 %vm736_vm0, %v13822_v14 }
 0x1cc   : > { %v15368_v2 = vadd.f32 %v3747_v7, %v3478_v50  ;;  %v3483_v16 = vadd.f32 %v12749_v13, %v15183_v18  ;;  %13003 = vmatprep.mubr.msk.bf16.mxu1 %vm736_vm0, %v13824_v41  ;;  %13045 = vmatprep.mubr.msk.bf16.mxu0 %vm736_vm0, %v13825_v22  ;;  %v13831_v41 = vld [vmem:[%s14551_s24 + $0x50] sm:$0xff]   ;;  %v13832_v22 = vld [vmem:[%s14551_s24 + $0x58] sm:$0xff]  }
 0x1cd   : > { %v3366_v29 = vpop.f32.mrf.mxu1  ;;  %v3760_v35 = vpop.f32.mrf.mxu0  ;;  %13074 = vmatpush3.bf16.msra.mxu1 %v13833_v23  ;;  %13116 = vmatpush3.bf16.msra.mxu0 %v13834_v0  ;;  %v15392_v23 = vld [vmem:[%s17204_s5 + $0x2c8] sm:$0xff]   ;;  %v13835_v13 = vld [vmem:[%s14551_s24 + $0x58] sm:$0xff]  }
 0x1ce   : > { %v15381_v18 = vadd.f32 %v12791_v52, %v3483_v16  ;;  %v3481_v57 = vadd.f32 %v3366_v29, %v15186_v25  ;;  %13075 = vmatprep.subr.bf16.mxu1 %v13841_v51  ;;  %13117 = vmatprep.subr.bf16.mxu0 %v13844_v43  ;;  %v13836_v52 = vld [vmem:[%s14551_s24 + $0x60] sm:$0xff]  }
 0x1cf   : > { %v12750_v60 = vpop.f32.mrf.mxu1  ;;  %v12792_v24 = vpop.f32.mrf.mxu0 }
 0x1d0   : > { %v15384_v55 = vadd.f32 %v3760_v35, %v3481_v57  ;;  %v3484_v48 = vadd.f32 %v12750_v60, %v15196_v12  ;;  %v15400_v12 = vld [vmem:[%s17204_s5 + $0x2f0] sm:$0xff]  }
 0x1d1   : > { %v3369_v59 = vpop.f32.mrf.mxu1  ;;  %v3763_v63 = vpop.f32.mrf.mxu0  ;;  %13076 = vmatpush3.bf16.msra.mxu1 %v13841_v51  ;;  %13118 = vmatpush3.bf16.msra.mxu0 %v13844_v43 }
 0x1d2   : > { %v15394_v25 = vadd.f32 %v12792_v24, %v3484_v48  ;;  %v3482_v0 = vadd.f32 %v3369_v59, %v15206_v31  ;;  %13077 = vmatprep.subr.bf16.mxu1 %v13849_v39  ;;  %13119 = vmatprep.subr.bf16.mxu0 %v13850_v62 }
 0x1d3   : > { %v12753_v10 = vpop.f32.mrf.mxu1  ;;  %v12795_v14 = vpop.f32.mrf.mxu0  ;;  %13004 = vmatmul.mubr.msk.bf16.gmra.mxu1 %vm736_vm0, %v13827_v33  ;;  %13046 = vmatmul.mubr.msk.bf16.gmra.mxu0 %vm736_vm0, %v13828_v37 }
 0x1d4   : > { %v15404_v15 = vadd.f32 %v3763_v63, %v3482_v0  ;;  %v3487_v30 = vadd.f32 %v12753_v10, %v15213_v26  ;;  %13007 = vmatprep.mubr.msk.bf16.mxu1 %vm736_vm0, %v13829_v6  ;;  %13049 = vmatprep.mubr.msk.bf16.mxu0 %vm736_vm0, %v13830_v61  ;;  %v13837_v6 = vld [vmem:[%s14551_s24 + $0x60] sm:$0xff]   ;;  %v13838_v61 = vld [vmem:[%s14551_s24 + $0x68] sm:$0xff]  }
 0x1d5   : > { %v3382_v31 = vpop.f32.mrf.mxu1  ;;  %v3776_v56 = vpop.f32.mrf.mxu0  ;;  %13078 = vmatpush3.bf16.msra.mxu1 %v13849_v39  ;;  %13120 = vmatpush3.bf16.msra.mxu0 %v13850_v62  ;;  %v13839_v0 = vld [vmem:[%s14551_s24 + $0x68] sm:$0xff]  }
 0x1d6   : > { %v15411_v36 = vadd.f32 %v12795_v14, %v3487_v30  ;;  %v3485_v7 = vadd.f32 %v3382_v31, %v15218_v53  ;;  %13153 = vmatprep.subr.bf16.mxu1 %v15392_v23  ;;  %13195 = vmatprep.subr.bf16.mxu0 %v15400_v12 }
 0x1d7   : > { %v12754_v26 = vpop.f32.mrf.mxu1  ;;  %v12796_v51 = vpop.f32.mrf.mxu0 }
 0x1d8   : > { %v15416_v43 = vadd.f32 %v3776_v56, %v3485_v7  ;;  %v3488_v50 = vadd.f32 %v12754_v26, %v15223_v4 }
 0x1d9   : > { %v3385_v16 = vpop.f32.mrf.mxu1  ;;  %v3779_v29 = vpop.f32.mrf.mxu0 }
 0x1da   : > { %v15421_v39 = vadd.f32 %v12796_v51, %v3488_v50  ;;  %v3486_v62 = vadd.f32 %v3385_v16, %v15228_v3 }
 0x1db   : > { %v12757_v53 = vpop.f32.mrf.mxu1  ;;  %v12799_v35 = vpop.f32.mrf.mxu0  ;;  %13008 = vmatmul.mubr.msk.bf16.gmra.mxu1 %vm736_vm0, %v13831_v41  ;;  %13050 = vmatmul.mubr.msk.bf16.gmra.mxu0 %vm736_vm0, %v13832_v22 }
 0x1dc   : > { %v15426_v33 = vadd.f32 %v3779_v29, %v3486_v62  ;;  %v3491_v4 = vadd.f32 %v12757_v53, %v15235_v28  ;;  %13011 = vmatprep.mubr.msk.bf16.mxu1 %vm736_vm0, %v13835_v13  ;;  %13053 = vmatprep.mubr.msk.bf16.mxu0 %vm736_vm0, %v13836_v52  ;;  %v13840_v28 = vld [vmem:[%s14551_s24 + $0x70] sm:$0xff]   ;;  %v13843_v52 = vld [vmem:[%s14551_s24 + $0x78] sm:$0xff]  }
 0x1dd   : > { %v3398_v37 = vpop.f32.mrf.mxu1  ;;  %v3792_v57 = vpop.f32.mrf.mxu0  ;;  %v13842_v13 = vld [vmem:[%s14551_s24 + $0x70] sm:$0xff]   ;;  %v13845_v62 = vld [vmem:[%s14551_s24 + $0x78] sm:$0xff]  }
 0x1de   : > { %v15431_v3 = vadd.f32 %v12799_v35, %v3491_v4  ;;  %v3489_v60 = vadd.f32 %v3398_v37, %v15238_v27 }
 0x1df   : > { %v12758_v24 = vpop.f32.mrf.mxu1  ;;  %v12800_v48 = vpop.f32.mrf.mxu0 }
 0x1e0   : > { %v15436_v59 = vadd.f32 %v3792_v57, %v3489_v60  ;;  %v3492_v63 = vadd.f32 %v12758_v24, %v15243_v49 }
 0x1e1   : > { %v3401_v10 = vpop.f32.mrf.mxu1  ;;  %v3795_v14 = vpop.f32.mrf.mxu0 }
 0x1e2   : > { %v15441_v30 = vadd.f32 %v12800_v48, %v3492_v63  ;;  %v3490_v31 = vadd.f32 %v3401_v10, %v15248_v46 }
 0x1e3   : > { %v12761_v56 = vpop.f32.mrf.mxu1  ;;  %v12803_v27 = vpop.f32.mrf.mxu0  ;;  %13012 = vmatmul.mubr.msk.bf16.gmra.mxu1 %vm736_vm0, %v13837_v6  ;;  %13054 = vmatmul.mubr.msk.bf16.gmra.mxu0 %vm736_vm0, %v13838_v61 }
 0x1e4   : > { %v15446_v41 = vadd.f32 %v3795_v14, %v3490_v31  ;;  %v3495_v49 = vadd.f32 %v12761_v56, %v15255_v54  ;;  %13015 = vmatprep.mubr.msk.bf16.mxu1 %vm736_vm0, %v13839_v0  ;;  %13057 = vmatprep.mubr.msk.bf16.mxu0 %vm736_vm0, %v13840_v28  ;;  %v13846_v54 = vld [vmem:[%s14551_s24 + $0x80] sm:$0xff]   ;;  %v13848_v28 = vld [vmem:[%s14551_s24 + $0x88] sm:$0xff]  }
 0x1e5   : > { %v3414_v22 = vpop.f32.mrf.mxu1  ;;  %v3808_v7 = vpop.f32.mrf.mxu0  ;;  %v13847_v0 = vld [vmem:[%s14551_s24 + $0x80] sm:$0xff]   ;;  %v13851_v31 = vld [vmem:[%s14551_s24 + $0x88] sm:$0xff]  }
 0x1e6   : > { %v15451_v46 = vadd.f32 %v12803_v27, %v3495_v49  ;;  %v3493_v26 = vadd.f32 %v3414_v22, %v15258_v5 }
 0x1e7   : > { %v12762_v51 = vpop.f32.mrf.mxu1  ;;  %v12804_v50 = vpop.f32.mrf.mxu0 }
 0x1e8   : > { %v15456_v16 = vadd.f32 %v3808_v7, %v3493_v26  ;;  %v3496_v29 = vadd.f32 %v12762_v51, %v15263_v34 }
 0x1e9   : > { %v3417_v53 = vpop.f32.mrf.mxu1  ;;  %v3811_v35 = vpop.f32.mrf.mxu0 }
 0x1ea   : > { %v15461_v4 = vadd.f32 %v12804_v50, %v3496_v29  ;;  %v3494_v37 = vadd.f32 %v3417_v53, %v15268_v44 }
 0x1eb   : > { %v12765_v57 = vpop.f32.mrf.mxu1  ;;  %v12807_v5 = vpop.f32.mrf.mxu0  ;;  %13016 = vmatmul.mubr.msk.bf16.gmra.mxu1 %vm736_vm0, %v13842_v13  ;;  %13058 = vmatmul.mubr.msk.bf16.gmra.mxu0 %vm736_vm0, %v13843_v52 }
 0x1ec   : > { %v15466_v60 = vadd.f32 %v3811_v35, %v3494_v37  ;;  %v3499_v34 = vadd.f32 %v12765_v57, %v15274_v47  ;;  %13019 = vmatprep.mubr.msk.bf16.mxu1 %vm736_vm0, %v13845_v62  ;;  %13061 = vmatprep.mubr.msk.bf16.mxu0 %vm736_vm0, %v13846_v54  ;;  %v13852_v47 = vld [vmem:[%s14551_s24 + $0x90] sm:$0xff]   ;;  %v13854_v54 = vld [vmem:[%s14551_s24 + $0x98] sm:$0xff]   ;;  %v13855_v37 = vld [vmem:[%s14874_s16] sm:$0xff]  }
 0x1ed   : > { %v3430_v24 = vpop.f32.mrf.mxu1  ;;  %v3824_v48 = vpop.f32.mrf.mxu0  ;;  %v13853_v62 = vld [vmem:[%s14551_s24 + $0x90] sm:$0xff]  }
 0x1ee   : > { %v15471_v44 = vadd.f32 %v12807_v5, %v3499_v34  ;;  %v3497_v6 = vadd.f32 %v3430_v24, %v15278_v32 }
 0x1ef   : > { %v12766_v61 = vpop.f32.mrf.mxu1  ;;  %v12808_v63 = vpop.f32.mrf.mxu0 }
 0x1f0   : > { %v15476_v10 = vadd.f32 %v3824_v48, %v3497_v6  ;;  %v3500_v14 = vadd.f32 %v12766_v61, %v15283_v58 }
 0x1f1   : > { %v3433_v56 = vpop.f32.mrf.mxu1  ;;  %v3827_v27 = vpop.f32.mrf.mxu0 }
 0x1f2   : > { %v15481_v49 = vadd.f32 %v12808_v63, %v3500_v14  ;;  %v3498_v22 = vadd.f32 %v3433_v56, %v15288_v40 }
 0x1f3   : > { %v12769_v7 = vpop.f32.mrf.mxu1  ;;  %v12811_v32 = vpop.f32.mrf.mxu0  ;;  %13020 = vmatmul.mubr.msk.bf16.gmra.mxu1 %vm736_vm0, %v13847_v0  ;;  %13062 = vmatmul.mubr.msk.bf16.gmra.mxu0 %vm736_vm0, %v13848_v28 }
 0x1f4   : > { %v15486_v26 = vadd.f32 %v3827_v27, %v3498_v22  ;;  %v3503_v58 = vadd.f32 %v12769_v7, %v15295_v9  ;;  %13023 = vmatprep.mubr.msk.bf16.mxu1 %vm736_vm0, %v13851_v31  ;;  %13065 = vmatprep.mubr.msk.bf16.mxu0 %vm736_vm0, %v13852_v47  ;;  %v13856_v9 = vld [vmem:[%s14874_s16 + $0x8] sm:$0xff]   ;;  %v13858_v47 = vld [vmem:[%s14874_s16 + $0x10] sm:$0xff]  }
 0x1f5   : > { %v3446_v51 = vpop.f32.mrf.mxu1  ;;  %v3840_v50 = vpop.f32.mrf.mxu0  ;;  %v13857_v31 = vld [vmem:[%s14874_s16 + $0x8] sm:$0xff]   ;;  %v13861_v7 = vld [vmem:[%s14874_s16 + $0x10] sm:$0xff]  }
 0x1f6   : > { %v15491_v40 = vadd.f32 %v12811_v32, %v3503_v58  ;;  %v3501_v13 = vadd.f32 %v3446_v51, %v15298_v17  ;;  %v13862_v32 = vld [vmem:[%s14874_s16 + $0x18] sm:$0xff]  }
 0x1f7   : > { %v12770_v52 = vpop.f32.mrf.mxu1  ;;  %v12812_v29 = vpop.f32.mrf.mxu0 }
 0x1f8   : > { %v15496_v53 = vadd.f32 %v3840_v50, %v3501_v13  ;;  %v3504_v35 = vadd.f32 %v12770_v52, %v15303_v38  ;;  %v13868_v50 = vld [vmem:[%s17204_s5 + $0x2e8] sm:$0xff]  }
 0x1f9   : > { %v3449_v57 = vpop.f32.mrf.mxu1  ;;  %v3843_v5 = vpop.f32.mrf.mxu0 }
 0x1fa   : > { %v15501_v34 = vadd.f32 %v12812_v29, %v3504_v35  ;;  %v3502_v24 = vadd.f32 %v3449_v57, %v15308_v11  ;;  %v13864_v57 = vld [vmem:[%s14874_s16 + $0x20] sm:$0xff]  }
 0x1fb   : > { %v12773_v48 = vpop.f32.mrf.mxu1  ;;  %v12815_v17 = vpop.f32.mrf.mxu0  ;;  %13024 = vmatmul.mubr.msk.bf16.gmra.mxu1 %vm736_vm0, %v13853_v62  ;;  %13066 = vmatmul.mubr.msk.bf16.gmra.mxu0 %vm736_vm0, %v13854_v54  ;;  %v13875_v54 = vld [vmem:[%s17204_s5 + $0x2b8] sm:$0xff]  }
 0x1fc   : > { %v15506_v6 = vadd.f32 %v3843_v5, %v3502_v24  ;;  %v3507_v38 = vadd.f32 %v12773_v48, %v15315_v45  ;;  %13079 = vmatprep.mubr.msk.bf16.mxu1 %vm736_vm0, %v13855_v37  ;;  %13121 = vmatprep.mubr.msk.bf16.mxu0 %vm736_vm0, %v13856_v9  ;;  %v13863_v9 = vld [vmem:[%s14874_s16 + $0x18] sm:$0xff]   ;;  %v13866_v48 = vld [vmem:[%s14874_s16 + $0x20] sm:$0xff]  }
 0x1fd   : > { %v3462_v61 = vpop.f32.mrf.mxu1  ;;  %v3856_v63 = vpop.f32.mrf.mxu0 }
 0x1fe   : > { %v15511_v11 = vadd.f32 %v12815_v17, %v3507_v38  ;;  %v3505_v0 = vadd.f32 %v3462_v61, %v15318_v20  ;;  %v13865_v20 = vld [vmem:[%s17204_s5 + $0x2c0] sm:$0xff]   ;;  %v13867_v17 = vld [vmem:[%s14874_s16 + $0x28] sm:$0xff]  }
 0x1ff   : > { %v12774_v28 = vpop.f32.mrf.mxu1  ;;  %v12816_v14 = vpop.f32.mrf.mxu0 }
 0x200   : > { %v15516_v56 = vadd.f32 %v3856_v63, %v3505_v0  ;;  %v3508_v27 = vadd.f32 %v12774_v28, %v15329_v1  ;;  %v13883_v0 = vld [vmem:[%s17204_s5 + $0x2b0] sm:$0xff]  }
 0x201   : > { %v3465_v45 = vpop.f32.mrf.mxu1  ;;  %v3859_v22 = vpop.f32.mrf.mxu0 }
 0x202   : > { %v15521_v58 = vadd.f32 %v12816_v14, %v3508_v27  ;;  %v3506_v51 = vadd.f32 %v3465_v45, %v15340_v42 }
 0x203   : > { %v12829_v13 = vpop.f32.mrf.mxu1  ;;  %v12871_v52 = vpop.f32.mrf.mxu0  ;;  %13080 = vmatmul.mubr.msk.bf16.vlgmr.msra.gmra.mxu1 %vm736_vm0, %v13857_v31  ;;  %13122 = vmatmul.mubr.msk.bf16.vlgmr.msra.gmra.mxu0 %vm736_vm0, %v13858_v47 }
 0x204   : > { %v15532_v1 = vadd.f32 %v3859_v22, %v3506_v51  ;;  %v4267_v29 = vadd.f32 %v12829_v13, %v15348_v19  ;;  %13154 = vmatpush3.bf16.msra.mxu1 %v15392_v23  ;;  %13196 = vmatpush3.bf16.msra.mxu0 %v15400_v12  ;;  %v13876_v19 = vld [vmem:[%s17204_s5 + $0x2e0] sm:$0xff]  }
 0x205   : > { %v4138_v42 = vpop.f32.mrf.mxu1  ;;  %v4532_v62 = vpop.f32.mrf.mxu0  ;;  %13083 = vmatprep.mubr.msk.bf16.mxu1 %vm736_vm0, %v13861_v7  ;;  %13125 = vmatprep.mubr.msk.bf16.mxu0 %vm736_vm0, %v13862_v32  ;;  %v13892_v7 = vld [vmem:[%s17204_s5 + $0x2d0] sm:$0xff]  }
 0x206   : > { %v15545_v35 = vadd.f32 %v12871_v52, %v4267_v29  ;;  %v4265_v23 = vadd.f32 %v4138_v42, %v15352_v21  ;;  %13155 = vmatprep.subr.bf16.mxu1 %v13865_v20  ;;  %13197 = vmatprep.subr.bf16.mxu0 %v13868_v50  ;;  %v13871_v29 = vld [vmem:[%s14874_s16 + $0x30] sm:$0xff]  }
 0x207   : > { %v12830_v12 = vpop.f32.mrf.mxu1  ;;  %v12872_v37 = vpop.f32.mrf.mxu0 }
 0x208   : > { %v15550_v5 = vadd.f32 %v4532_v62, %v4265_v23  ;;  %v4268_v24 = vadd.f32 %v12830_v12, %v15363_v8  ;;  %13156 = vmatpush3.bf16.msra.mxu1 %v13865_v20  ;;  %13198 = vmatpush3.bf16.msra.mxu0 %v13868_v50  ;;  %v13886_v8 = vld [vmem:[%s17204_s5 + $0x2d8] sm:$0xff]   ;;  %v13869_v20 = vld [vmem:[%s14874_s16 + $0x28] sm:$0xff]   ;;  %v13870_v50 = vld [vmem:[%s14874_s16 + $0x30] sm:$0xff]  }
 0x209   : > { %v4141_v38 = vpop.f32.mrf.mxu1  ;;  %v4535_v61 = vpop.f32.mrf.mxu0  ;;  %13157 = vmatprep.subr.bf16.mxu1 %v13875_v54  ;;  %13199 = vmatprep.subr.bf16.mxu0 %v13876_v19  ;;  %v15593_v23 = vld [vmem:[%s17204_s5 + $0x318] sm:$0xff]  }
 0x20a   : > { %v15555_v63 = vadd.f32 %v12872_v37, %v4268_v24  ;;  %v4266_v21 = vadd.f32 %v4141_v38, %v15368_v2 }
 0x20b   : > { %v12833_v28 = vpop.f32.mrf.mxu1  ;;  %v12875_v14 = vpop.f32.mrf.mxu0  ;;  %13084 = vmatmul.mubr.msk.bf16.gmra.mxu1 %vm736_vm0, %v13863_v9  ;;  %13126 = vmatmul.mubr.msk.bf16.gmra.mxu0 %vm736_vm0, %v13864_v57 }
 0x20c   : > { %v15566_v31 = vadd.f32 %v4535_v61, %v4266_v21  ;;  %v4271_v47 = vadd.f32 %v12833_v28, %v15381_v18  ;;  %13087 = vmatprep.mubr.msk.bf16.mxu1 %vm736_vm0, %v13866_v48  ;;  %13129 = vmatprep.mubr.msk.bf16.mxu0 %vm736_vm0, %v13867_v17  ;;  %v13891_v18 = vld [vmem:[%s17204_s5 + $0x2a8] sm:$0xff]   ;;  %v13873_v61 = vld [vmem:[%s14874_s16 + $0x38] sm:$0xff]   ;;  %v13874_v21 = vld [vmem:[%s14874_s16 + $0x40] sm:$0xff]  }
 0x20d   : > { %v4154_v2 = vpop.f32.mrf.mxu1  ;;  %v4548_v27 = vpop.f32.mrf.mxu0  ;;  %13158 = vmatpush3.bf16.msra.mxu1 %v13875_v54  ;;  %13200 = vmatpush3.bf16.msra.mxu0 %v13876_v19  ;;  %v13877_v28 = vld [vmem:[%s14874_s16 + $0x40] sm:$0xff]  }
 0x20e   : > { %v15571_v45 = vadd.f32 %v12875_v14, %v4271_v47  ;;  %v4269_v22 = vadd.f32 %v4154_v2, %v15384_v55  ;;  %13159 = vmatprep.subr.bf16.mxu1 %v13883_v0  ;;  %13201 = vmatprep.subr.bf16.mxu0 %v13886_v8  ;;  %v13872_v55 = vld [vmem:[%s14874_s16 + $0x38] sm:$0xff]   ;;  %v13878_v14 = vld [vmem:[%s14874_s16 + $0x48] sm:$0xff]  }
 0x20f   : > { %v12834_v32 = vpop.f32.mrf.mxu1  ;;  %v12876_v51 = vpop.f32.mrf.mxu0 }
 0x210   : > { %v15582_v13 = vadd.f32 %v4548_v27, %v4269_v22  ;;  %v4272_v52 = vadd.f32 %v12834_v32, %v15394_v25  ;;  %v15598_v25 = vld [vmem:[%s17204_s5 + $0x340] sm:$0xff]  }
 0x211   : > { %v4157_v42 = vpop.f32.mrf.mxu1  ;;  %v4551_v62 = vpop.f32.mrf.mxu0  ;;  %13160 = vmatpush3.bf16.msra.mxu1 %v13883_v0  ;;  %13202 = vmatpush3.bf16.msra.mxu0 %v13886_v8 }
 0x212   : > { %v15587_v54 = vadd.f32 %v12876_v51, %v4272_v52  ;;  %v4270_v19 = vadd.f32 %v4157_v42, %v15404_v15  ;;  %13161 = vmatprep.subr.bf16.mxu1 %v13891_v18  ;;  %13203 = vmatprep.subr.bf16.mxu0 %v13892_v7 }
 0x213   : > { %v12837_v12 = vpop.f32.mrf.mxu1  ;;  %v12879_v37 = vpop.f32.mrf.mxu0  ;;  %13088 = vmatmul.mubr.msk.bf16.gmra.mxu1 %vm736_vm0, %v13869_v20  ;;  %13130 = vmatmul.mubr.msk.bf16.gmra.mxu0 %vm736_vm0, %v13870_v50 }
 0x214   : > { %v15602_v15 = vadd.f32 %v4551_v62, %v4270_v19  ;;  %v4275_v9 = vadd.f32 %v12837_v12, %v15411_v36  ;;  %13091 = vmatprep.mubr.msk.bf16.mxu1 %vm736_vm0, %v13871_v29  ;;  %13133 = vmatprep.mubr.msk.bf16.mxu0 %vm736_vm0, %v13872_v55  ;;  %v13879_v29 = vld [vmem:[%s14874_s16 + $0x48] sm:$0xff]   ;;  %v13880_v55 = vld [vmem:[%s14874_s16 + $0x50] sm:$0xff]  }
 0x215   : > { %v4170_v57 = vpop.f32.mrf.mxu1  ;;  %v4564_v24 = vpop.f32.mrf.mxu0  ;;  %13162 = vmatpush3.bf16.msra.mxu1 %v13891_v18  ;;  %13204 = vmatpush3.bf16.msra.mxu0 %v13892_v7  ;;  %v13881_v19 = vld [vmem:[%s14874_s16 + $0x50] sm:$0xff]  }
 0x216   : > { %v15607_v48 = vadd.f32 %v12879_v37, %v4275_v9  ;;  %v4273_v17 = vadd.f32 %v4170_v57, %v15416_v43  ;;  %13237 = vmatprep.subr.bf16.mxu1 %v15593_v23  ;;  %13279 = vmatprep.subr.bf16.mxu0 %v15598_v25 }
 0x217   : > { %v12838_v38 = vpop.f32.mrf.mxu1  ;;  %v12880_v36 = vpop.f32.mrf.mxu0 }
 0x218   : > { %v15614_v0 = vadd.f32 %v4564_v24, %v4273_v17  ;;  %v4276_v8 = vadd.f32 %v12838_v38, %v15421_v39 }
 0x219   : > { %v4173_v47 = vpop.f32.mrf.mxu1  ;;  %v4567_v2 = vpop.f32.mrf.mxu0 }
 0x21a   : > { %v15619_v27 = vadd.f32 %v12880_v36, %v4276_v8  ;;  %v4274_v43 = vadd.f32 %v4173_v47, %v15426_v33 }
 0x21b   : > { %v12841_v22 = vpop.f32.mrf.mxu1  ;;  %v12883_v18 = vpop.f32.mrf.mxu0  ;;  %13092 = vmatmul.mubr.msk.bf16.gmra.mxu1 %vm736_vm0, %v13873_v61  ;;  %13134 = vmatmul.mubr.msk.bf16.gmra.mxu0 %vm736_vm0, %v13874_v21 }
 0x21c   : > { %v15624_v7 = vadd.f32 %v4567_v2, %v4274_v43  ;;  %v4279_v39 = vadd.f32 %v12841_v22, %v15431_v3  ;;  %13095 = vmatprep.mubr.msk.bf16.mxu1 %vm736_vm0, %v13877_v28  ;;  %13137 = vmatprep.mubr.msk.bf16.mxu0 %vm736_vm0, %v13878_v14  ;;  %v13882_v3 = vld [vmem:[%s14874_s16 + $0x58] sm:$0xff]   ;;  %v13885_v14 = vld [vmem:[%s14874_s16 + $0x60] sm:$0xff]  }
 0x21d   : > { %v4186_v32 = vpop.f32.mrf.mxu1  ;;  %v4580_v51 = vpop.f32.mrf.mxu0  ;;  %v13884_v28 = vld [vmem:[%s14874_s16 + $0x58] sm:$0xff]   ;;  %v13887_v43 = vld [vmem:[%s14874_s16 + $0x60] sm:$0xff]  }
 0x21e   : > { %v15629_v33 = vadd.f32 %v12883_v18, %v4279_v39  ;;  %v4277_v20 = vadd.f32 %v4186_v32, %v15436_v59 }
 0x21f   : > { %v12842_v50 = vpop.f32.mrf.mxu1  ;;  %v12884_v52 = vpop.f32.mrf.mxu0 }
 0x220   : > { %v15634_v42 = vadd.f32 %v4580_v51, %v4277_v20  ;;  %v4280_v62 = vadd.f32 %v12842_v50, %v15441_v30 }
 0x221   : > { %v4189_v12 = vpop.f32.mrf.mxu1  ;;  %v4583_v37 = vpop.f32.mrf.mxu0 }
 0x222   : > { %v15639_v9 = vadd.f32 %v12884_v52, %v4280_v62  ;;  %v4278_v57 = vadd.f32 %v4189_v12, %v15446_v41 }
 0x223   : > { %v12845_v24 = vpop.f32.mrf.mxu1  ;;  %v12887_v59 = vpop.f32.mrf.mxu0  ;;  %13096 = vmatmul.mubr.msk.bf16.gmra.mxu1 %vm736_vm0, %v13879_v29  ;;  %13138 = vmatmul.mubr.msk.bf16.gmra.mxu0 %vm736_vm0, %v13880_v55 }
 0x224   : > { %v15644_v17 = vadd.f32 %v4583_v37, %v4278_v57  ;;  %v4283_v30 = vadd.f32 %v12845_v24, %v15451_v46  ;;  %13099 = vmatprep.mubr.msk.bf16.mxu1 %vm736_vm0, %v13881_v19  ;;  %13141 = vmatprep.mubr.msk.bf16.mxu0 %vm736_vm0, %v13882_v3  ;;  %v13888_v46 = vld [vmem:[%s14874_s16 + $0x68] sm:$0xff]   ;;  %v13890_v3 = vld [vmem:[%s14874_s16 + $0x70] sm:$0xff]  }
 0x225   : > { %v4202_v38 = vpop.f32.mrf.mxu1  ;;  %v4596_v36 = vpop.f32.mrf.mxu0  ;;  %v13889_v19 = vld [vmem:[%s14874_s16 + $0x68] sm:$0xff]   ;;  %v13893_v57 = vld [vmem:[%s14874_s16 + $0x70] sm:$0xff]  }
 0x226   : > { %v15649_v41 = vadd.f32 %v12887_v59, %v4283_v30  ;;  %v4281_v61 = vadd.f32 %v4202_v38, %v15456_v16 }
 0x227   : > { %v12846_v21 = vpop.f32.mrf.mxu1  ;;  %v12888_v8 = vpop.f32.mrf.mxu0 }
 0x228   : > { %v15654_v47 = vadd.f32 %v4596_v36, %v4281_v61  ;;  %v4284_v2 = vadd.f32 %v12846_v21, %v15461_v4 }
 0x229   : > { %v4205_v22 = vpop.f32.mrf.mxu1  ;;  %v4599_v18 = vpop.f32.mrf.mxu0 }
 0x22a   : > { %v15659_v39 = vadd.f32 %v12888_v8, %v4284_v2  ;;  %v4282_v32 = vadd.f32 %v4205_v22, %v15466_v60 }
 0x22b   : > { %v12849_v51 = vpop.f32.mrf.mxu1  ;;  %v12891_v16 = vpop.f32.mrf.mxu0  ;;  %13100 = vmatmul.mubr.msk.bf16.gmra.mxu1 %vm736_vm0, %v13884_v28  ;;  %13142 = vmatmul.mubr.msk.bf16.gmra.mxu0 %vm736_vm0, %v13885_v14 }
 0x22c   : > { %v15664_v20 = vadd.f32 %v4599_v18, %v4282_v32  ;;  %v4287_v4 = vadd.f32 %v12849_v51, %v15471_v44  ;;  %13103 = vmatprep.mubr.msk.bf16.mxu1 %vm736_vm0, %v13887_v43  ;;  %13145 = vmatprep.mubr.msk.bf16.mxu0 %vm736_vm0, %v13888_v46  ;;  %v13894_v44 = vld [vmem:[%s14874_s16 + $0x78] sm:$0xff]   ;;  %v13896_v46 = vld [vmem:[%s14874_s16 + $0x80] sm:$0xff]   ;;  %v13897_v32 = vld [vmem:[%s14874_s16 + $0x10] sm:$0xff]  }
 0x22d   : > { %v4218_v50 = vpop.f32.mrf.mxu1  ;;  %v4612_v52 = vpop.f32.mrf.mxu0  ;;  %v13895_v43 = vld [vmem:[%s14874_s16 + $0x78] sm:$0xff]  }
 0x22e   : > { %v15669_v60 = vadd.f32 %v12891_v16, %v4287_v4  ;;  %v4285_v29 = vadd.f32 %v4218_v50, %v15476_v10 }
 0x22f   : > { %v12850_v55 = vpop.f32.mrf.mxu1  ;;  %v12892_v62 = vpop.f32.mrf.mxu0 }
 0x230   : > { %v15674_v12 = vadd.f32 %v4612_v52, %v4285_v29  ;;  %v4288_v37 = vadd.f32 %v12850_v55, %v15481_v49 }
 0x231   : > { %v4221_v24 = vpop.f32.mrf.mxu1  ;;  %v4615_v59 = vpop.f32.mrf.mxu0 }
 0x232   : > { %v15679_v30 = vadd.f32 %v12892_v62, %v4288_v37  ;;  %v4286_v38 = vadd.f32 %v4221_v24, %v15486_v26 }
 0x233   : > { %v12853_v36 = vpop.f32.mrf.mxu1  ;;  %v12895_v10 = vpop.f32.mrf.mxu0  ;;  %13104 = vmatmul.mubr.msk.bf16.gmra.mxu1 %vm736_vm0, %v13889_v19  ;;  %13146 = vmatmul.mubr.msk.bf16.gmra.mxu0 %vm736_vm0, %v13890_v3 }
 0x234   : > { %v15684_v61 = vadd.f32 %v4615_v59, %v4286_v38  ;;  %v4291_v49 = vadd.f32 %v12853_v36, %v15491_v40  ;;  %13107 = vmatprep.mubr.msk.bf16.mxu1 %vm736_vm0, %v13893_v57  ;;  %13149 = vmatprep.mubr.msk.bf16.mxu0 %vm736_vm0, %v13894_v44  ;;  %v13898_v40 = vld [vmem:[%s14874_s16 + $0x18] sm:$0xff]   ;;  %v13900_v44 = vld [vmem:[%s14874_s16 + $0x20] sm:$0xff]  }
 0x235   : > { %v4234_v21 = vpop.f32.mrf.mxu1  ;;  %v4628_v8 = vpop.f32.mrf.mxu0  ;;  %v13899_v57 = vld [vmem:[%s14874_s16 + $0x18] sm:$0xff]   ;;  %v13903_v36 = vld [vmem:[%s14874_s16 + $0x20] sm:$0xff]  }
 0x236   : > { %v15689_v26 = vadd.f32 %v12895_v10, %v4291_v49  ;;  %v4289_v28 = vadd.f32 %v4234_v21, %v15496_v53  ;;  %v13904_v10 = vld [vmem:[%s14874_s16 + $0x28] sm:$0xff]  }
 0x237   : > { %v12854_v14 = vpop.f32.mrf.mxu1  ;;  %v12896_v2 = vpop.f32.mrf.mxu0 }
 0x238   : > { %v15694_v22 = vadd.f32 %v4628_v8, %v4289_v28  ;;  %v4292_v18 = vadd.f32 %v12854_v14, %v15501_v34  ;;  %v13910_v8 = vld [vmem:[%s17204_s5 + $0x338] sm:$0xff]  }
 0x239   : > { %v4237_v51 = vpop.f32.mrf.mxu1  ;;  %v4631_v16 = vpop.f32.mrf.mxu0 }
 0x23a   : > { %v15699_v4 = vadd.f32 %v12896_v2, %v4292_v18  ;;  %v4290_v50 = vadd.f32 %v4237_v51, %v15506_v6  ;;  %v13906_v51 = vld [vmem:[%s14874_s16 + $0x30] sm:$0xff]  }
 0x23b   : > { %v12857_v52 = vpop.f32.mrf.mxu1  ;;  %v12899_v53 = vpop.f32.mrf.mxu0  ;;  %13108 = vmatmul.mubr.msk.bf16.gmra.mxu1 %vm736_vm0, %v13895_v43  ;;  %13150 = vmatmul.mubr.msk.bf16.gmra.mxu0 %vm736_vm0, %v13896_v46  ;;  %v13917_v46 = vld [vmem:[%s17204_s5 + $0x308] sm:$0xff]  }
 0x23c   : > { %v15704_v29 = vadd.f32 %v4631_v16, %v4290_v50  ;;  %v4295_v34 = vadd.f32 %v12857_v52, %v15511_v11  ;;  %13163 = vmatprep.mubr.msk.bf16.mxu1 %vm736_vm0, %v13897_v32  ;;  %13205 = vmatprep.mubr.msk.bf16.mxu0 %vm736_vm0, %v13898_v40  ;;  %v13905_v40 = vld [vmem:[%s14874_s16 + $0x28] sm:$0xff]   ;;  %v13908_v52 = vld [vmem:[%s14874_s16 + $0x30] sm:$0xff]  }
 0x23d   : > { %v4250_v55 = vpop.f32.mrf.mxu1  ;;  %v4644_v62 = vpop.f32.mrf.mxu0 }
 0x23e   : > { %v15709_v6 = vadd.f32 %v12899_v53, %v4295_v34  ;;  %v4293_v19 = vadd.f32 %v4250_v55, %v15516_v56  ;;  %v13907_v56 = vld [vmem:[%s17204_s5 + $0x310] sm:$0xff]   ;;  %v13909_v53 = vld [vmem:[%s14874_s16 + $0x38] sm:$0xff]  }
 0x23f   : > { %v12858_v3 = vpop.f32.mrf.mxu1  ;;  %v12900_v37 = vpop.f32.mrf.mxu0 }
 0x240   : > { %v15714_v24 = vadd.f32 %v4644_v62, %v4293_v19  ;;  %v4296_v59 = vadd.f32 %v12858_v3, %v15521_v58  ;;  %v13925_v19 = vld [vmem:[%s17204_s5 + $0x300] sm:$0xff]  }
 0x241   : > { %v4253_v11 = vpop.f32.mrf.mxu1  ;;  %v4647_v38 = vpop.f32.mrf.mxu0 }
 0x242   : > { %v15719_v49 = vadd.f32 %v12900_v37, %v4296_v59  ;;  %v4294_v21 = vadd.f32 %v4253_v11, %v15532_v1 }
 0x243   : > { %v12913_v28 = vpop.f32.mrf.mxu1  ;;  %v12955_v14 = vpop.f32.mrf.mxu0  ;;  %13164 = vmatmul.mubr.msk.bf16.vlgmr.msra.gmra.mxu1 %vm736_vm0, %v13899_v57  ;;  %13206 = vmatmul.mubr.msk.bf16.vlgmr.msra.gmra.mxu0 %vm736_vm0, %v13900_v44 }
 0x244   : > { %v15730_v58 = vadd.f32 %v4647_v38, %v4294_v21  ;;  %v5055_v2 = vadd.f32 %v12913_v28, %v15545_v35  ;;  %13238 = vmatpush3.bf16.msra.mxu1 %v15593_v23  ;;  %13280 = vmatpush3.bf16.msra.mxu0 %v15598_v25  ;;  %v13918_v35 = vld [vmem:[%s17204_s5 + $0x330] sm:$0xff]  }
 0x245   : > { %v4926_v1 = vpop.f32.mrf.mxu1  ;;  %v5320_v43 = vpop.f32.mrf.mxu0  ;;  %13167 = vmatprep.mubr.msk.bf16.mxu1 %vm736_vm0, %v13903_v36  ;;  %13209 = vmatprep.mubr.msk.bf16.mxu0 %vm736_vm0, %v13904_v10  ;;  %v13934_v36 = vld [vmem:[%s17204_s5 + $0x320] sm:$0xff]  }
 0x246   : > { %v15743_v18 = vadd.f32 %v12955_v14, %v5055_v2  ;;  %v5053_v23 = vadd.f32 %v4926_v1, %v15550_v5  ;;  %13239 = vmatprep.subr.bf16.mxu1 %v13907_v56  ;;  %13281 = vmatprep.subr.bf16.mxu0 %v13910_v8  ;;  %v13913_v2 = vld [vmem:[%s14874_s16 + $0x40] sm:$0xff]  }
 0x247   : > { %v12914_v25 = vpop.f32.mrf.mxu1  ;;  %v12956_v32 = vpop.f32.mrf.mxu0 }
 0x248   : > { %v15748_v16 = vadd.f32 %v5320_v43, %v5053_v23  ;;  %v5056_v50 = vadd.f32 %v12914_v25, %v15555_v63  ;;  %13240 = vmatpush3.bf16.msra.mxu1 %v13907_v56  ;;  %13282 = vmatpush3.bf16.msra.mxu0 %v13910_v8  ;;  %v13928_v63 = vld [vmem:[%s17204_s5 + $0x328] sm:$0xff]   ;;  %v13911_v56 = vld [vmem:[%s14874_s16 + $0x38] sm:$0xff]   ;;  %v13912_v8 = vld [vmem:[%s14874_s16 + $0x40] sm:$0xff]  }
 0x249   : > { %v4929_v34 = vpop.f32.mrf.mxu1  ;;  %v5323_v55 = vpop.f32.mrf.mxu0  ;;  %13241 = vmatprep.subr.bf16.mxu1 %v13917_v46  ;;  %13283 = vmatprep.subr.bf16.mxu0 %v13918_v35  ;;  %v15791_v23 = vld [vmem:[%s17204_s5 + $0x368] sm:$0xff]  }
 0x24a   : > { %v15753_v62 = vadd.f32 %v12956_v32, %v5056_v50  ;;  %v5054_v5 = vadd.f32 %v4929_v34, %v15566_v31 }
 0x24b   : > { %v12917_v3 = vpop.f32.mrf.mxu1  ;;  %v12959_v37 = vpop.f32.mrf.mxu0  ;;  %13168 = vmatmul.mubr.msk.bf16.gmra.mxu1 %vm736_vm0, %v13905_v40  ;;  %13210 = vmatmul.mubr.msk.bf16.gmra.mxu0 %vm736_vm0, %v13906_v51 }
 0x24c   : > { %v15764_v57 = vadd.f32 %v5323_v55, %v5054_v5  ;;  %v5059_v44 = vadd.f32 %v12917_v3, %v15571_v45  ;;  %13171 = vmatprep.mubr.msk.bf16.mxu1 %vm736_vm0, %v13908_v52  ;;  %13213 = vmatprep.mubr.msk.bf16.mxu0 %vm736_vm0, %v13909_v53  ;;  %v13933_v45 = vld [vmem:[%s17204_s5 + $0x2f8] sm:$0xff]   ;;  %v13915_v55 = vld [vmem:[%s14874_s16 + $0x48] sm:$0xff]   ;;  %v13916_v5 = vld [vmem:[%s14874_s16 + $0x50] sm:$0xff]  }
 0x24d   : > { %v4942_v31 = vpop.f32.mrf.mxu1  ;;  %v5336_v59 = vpop.f32.mrf.mxu0  ;;  %13242 = vmatpush3.bf16.msra.mxu1 %v13917_v46  ;;  %13284 = vmatpush3.bf16.msra.mxu0 %v13918_v35  ;;  %v13919_v3 = vld [vmem:[%s14874_s16 + $0x50] sm:$0xff]  }
 0x24e   : > { %v15769_v11 = vadd.f32 %v12959_v37, %v5059_v44  ;;  %v5057_v38 = vadd.f32 %v4942_v31, %v15582_v13  ;;  %13243 = vmatprep.subr.bf16.mxu1 %v13925_v19  ;;  %13285 = vmatprep.subr.bf16.mxu0 %v13928_v63  ;;  %v13914_v13 = vld [vmem:[%s14874_s16 + $0x48] sm:$0xff]   ;;  %v13920_v37 = vld [vmem:[%s14874_s16 + $0x58] sm:$0xff]  }
 0x24f   : > { %v12918_v10 = vpop.f32.mrf.mxu1  ;;  %v12960_v21 = vpop.f32.mrf.mxu0 }
 0x250   : > { %v15780_v28 = vadd.f32 %v5336_v59, %v5057_v38  ;;  %v5060_v14 = vadd.f32 %v12918_v10, %v15587_v54  ;;  %v15796_v54 = vld [vmem:[%s17204_s5 + $0x390] sm:$0xff]  }
 0x251   : > { %v4945_v1 = vpop.f32.mrf.mxu1  ;;  %v5339_v43 = vpop.f32.mrf.mxu0  ;;  %13244 = vmatpush3.bf16.msra.mxu1 %v13925_v19  ;;  %13286 = vmatpush3.bf16.msra.mxu0 %v13928_v63 }
 0x252   : > { %v15785_v46 = vadd.f32 %v12960_v21, %v5060_v14  ;;  %v5058_v35 = vadd.f32 %v4945_v1, %v15602_v15  ;;  %13245 = vmatprep.subr.bf16.mxu1 %v13933_v45  ;;  %13287 = vmatprep.subr.bf16.mxu0 %v13934_v36 }
 0x253   : > { %v12921_v25 = vpop.f32.mrf.mxu1  ;;  %v12963_v32 = vpop.f32.mrf.mxu0  ;;  %13172 = vmatmul.mubr.msk.bf16.gmra.mxu1 %vm736_vm0, %v13911_v56  ;;  %13214 = vmatmul.mubr.msk.bf16.gmra.mxu0 %vm736_vm0, %v13912_v8 }
 0x254   : > { %v15800_v15 = vadd.f32 %v5339_v43, %v5058_v35  ;;  %v5063_v40 = vadd.f32 %v12921_v25, %v15607_v48  ;;  %13175 = vmatprep.mubr.msk.bf16.mxu1 %vm736_vm0, %v13913_v2  ;;  %13217 = vmatprep.mubr.msk.bf16.mxu0 %vm736_vm0, %v13914_v13  ;;  %v13921_v2 = vld [vmem:[%s14874_s16 + $0x58] sm:$0xff]   ;;  %v13922_v13 = vld [vmem:[%s14874_s16 + $0x60] sm:$0xff]  }
 0x255   : > { %v4958_v51 = vpop.f32.mrf.mxu1  ;;  %v5352_v50 = vpop.f32.mrf.mxu0  ;;  %13246 = vmatpush3.bf16.msra.mxu1 %v13933_v45  ;;  %13288 = vmatpush3.bf16.msra.mxu0 %v13934_v36  ;;  %v13923_v35 = vld [vmem:[%s14874_s16 + $0x60] sm:$0xff]  }
 0x256   : > { %v15805_v52 = vadd.f32 %v12963_v32, %v5063_v40  ;;  %v5061_v53 = vadd.f32 %v4958_v51, %v15614_v0  ;;  %13321 = vmatprep.subr.bf16.mxu1 %v15791_v23  ;;  %13363 = vmatprep.subr.bf16.mxu0 %v15796_v54 }
 0x257   : > { %v12922_v34 = vpop.f32.mrf.mxu1  ;;  %v12964_v48 = vpop.f32.mrf.mxu0 }
 0x258   : > { %v15812_v19 = vadd.f32 %v5352_v50, %v5061_v53  ;;  %v5064_v63 = vadd.f32 %v12922_v34, %v15619_v27 }
 0x259   : > { %v4961_v44 = vpop.f32.mrf.mxu1  ;;  %v5355_v31 = vpop.f32.mrf.mxu0 }
 0x25a   : > { %v15817_v59 = vadd.f32 %v12964_v48, %v5064_v63  ;;  %v5062_v0 = vadd.f32 %v4961_v44, %v15624_v7 }
 0x25b   : > { %v12925_v38 = vpop.f32.mrf.mxu1  ;;  %v12967_v45 = vpop.f32.mrf.mxu0  ;;  %13176 = vmatmul.mubr.msk.bf16.gmra.mxu1 %vm736_vm0, %v13915_v55  ;;  %13218 = vmatmul.mubr.msk.bf16.gmra.mxu0 %vm736_vm0, %v13916_v5 }
 0x25c   : > { %v15822_v36 = vadd.f32 %v5355_v31, %v5062_v0  ;;  %v5067_v27 = vadd.f32 %v12925_v38, %v15629_v33  ;;  %13179 = vmatprep.mubr.msk.bf16.mxu1 %vm736_vm0, %v13919_v3  ;;  %13221 = vmatprep.mubr.msk.bf16.mxu0 %vm736_vm0, %v13920_v37  ;;  %v13924_v33 = vld [vmem:[%s14874_s16 + $0x68] sm:$0xff]   ;;  %v13927_v37 = vld [vmem:[%s14874_s16 + $0x70] sm:$0xff]  }
 0x25d   : > { %v4974_v10 = vpop.f32.mrf.mxu1  ;;  %v5368_v21 = vpop.f32.mrf.mxu0  ;;  %v13926_v3 = vld [vmem:[%s14874_s16 + $0x68] sm:$0xff]   ;;  %v13929_v0 = vld [vmem:[%s14874_s16 + $0x70] sm:$0xff]  }
 0x25e   : > { %v15827_v7 = vadd.f32 %v12967_v45, %v5067_v27  ;;  %v5065_v56 = vadd.f32 %v4974_v10, %v15634_v42 }
 0x25f   : > { %v12926_v8 = vpop.f32.mrf.mxu1  ;;  %v12968_v14 = vpop.f32.mrf.mxu0 }
 0x260   : > { %v15832_v1 = vadd.f32 %v5368_v21, %v5065_v56  ;;  %v5068_v43 = vadd.f32 %v12926_v8, %v15639_v9 }
 0x261   : > { %v4977_v25 = vpop.f32.mrf.mxu1  ;;  %v5371_v32 = vpop.f32.mrf.mxu0 }
 0x262   : > { %v15837_v40 = vadd.f32 %v12968_v14, %v5068_v43  ;;  %v5066_v51 = vadd.f32 %v4977_v25, %v15644_v17 }
 0x263   : > { %v12929_v50 = vpop.f32.mrf.mxu1  ;;  %v12971_v42 = vpop.f32.mrf.mxu0  ;;  %13180 = vmatmul.mubr.msk.bf16.gmra.mxu1 %vm736_vm0, %v13921_v2  ;;  %13222 = vmatmul.mubr.msk.bf16.gmra.mxu0 %vm736_vm0, %v13922_v13 }
 0x264   : > { %v15842_v53 = vadd.f32 %v5371_v32, %v5066_v51  ;;  %v5071_v9 = vadd.f32 %v12929_v50, %v15649_v41  ;;  %13183 = vmatprep.mubr.msk.bf16.mxu1 %vm736_vm0, %v13923_v35  ;;  %13225 = vmatprep.mubr.msk.bf16.mxu0 %vm736_vm0, %v13924_v33  ;;  %v13930_v41 = vld [vmem:[%s14874_s16 + $0x78] sm:$0xff]   ;;  %v13932_v33 = vld [vmem:[%s14874_s16 + $0x80] sm:$0xff]  }
 0x265   : > { %v4990_v34 = vpop.f32.mrf.mxu1  ;;  %v5384_v48 = vpop.f32.mrf.mxu0  ;;  %v13931_v35 = vld [vmem:[%s14874_s16 + $0x78] sm:$0xff]   ;;  %v13935_v51 = vld [vmem:[%s14874_s16 + $0x80] sm:$0xff]  }
 0x266   : > { %v15847_v17 = vadd.f32 %v12971_v42, %v5071_v9  ;;  %v5069_v55 = vadd.f32 %v4990_v34, %v15654_v47 }
 0x267   : > { %v12930_v5 = vpop.f32.mrf.mxu1  ;;  %v12972_v63 = vpop.f32.mrf.mxu0 }
 0x268   : > { %v15852_v44 = vadd.f32 %v5384_v48, %v5069_v55  ;;  %v5072_v31 = vadd.f32 %v12930_v5, %v15659_v39 }
 0x269   : > { %v4993_v38 = vpop.f32.mrf.mxu1  ;;  %v5387_v45 = vpop.f32.mrf.mxu0 }
 0x26a   : > { %v15857_v27 = vadd.f32 %v12972_v63, %v5072_v31  ;;  %v5070_v10 = vadd.f32 %v4993_v38, %v15664_v20 }
 0x26b   : > { %v12933_v21 = vpop.f32.mrf.mxu1  ;;  %v12975_v47 = vpop.f32.mrf.mxu0  ;;  %13184 = vmatmul.mubr.msk.bf16.gmra.mxu1 %vm736_vm0, %v13926_v3  ;;  %13226 = vmatmul.mubr.msk.bf16.gmra.mxu0 %vm736_vm0, %v13927_v37 }
 0x26c   : > { %v15862_v56 = vadd.f32 %v5387_v45, %v5070_v10  ;;  %v5075_v39 = vadd.f32 %v12933_v21, %v15669_v60  ;;  %13187 = vmatprep.mubr.msk.bf16.mxu1 %vm736_vm0, %v13929_v0  ;;  %13229 = vmatprep.mubr.msk.bf16.mxu0 %vm736_vm0, %v13930_v41  ;;  %v13936_v60 = vld [vmem:[%s14874_s16 + $0x88] sm:$0xff]   ;;  %v13938_v41 = vld [vmem:[%s14874_s16 + $0x90] sm:$0xff]   ;;  %v13939_v10 = vld [vmem:[%s14874_s16 + $0x20] sm:$0xff]  }
 0x26d   : > { %v5006_v8 = vpop.f32.mrf.mxu1  ;;  %v5400_v14 = vpop.f32.mrf.mxu0  ;;  %v13937_v0 = vld [vmem:[%s14874_s16 + $0x88] sm:$0xff]  }
 0x26e   : > { %v15867_v20 = vadd.f32 %v12975_v47, %v5075_v39  ;;  %v5073_v2 = vadd.f32 %v5006_v8, %v15674_v12 }
 0x26f   : > { %v12934_v13 = vpop.f32.mrf.mxu1  ;;  %v12976_v43 = vpop.f32.mrf.mxu0 }
 0x270   : > { %v15872_v25 = vadd.f32 %v5400_v14, %v5073_v2  ;;  %v5076_v32 = vadd.f32 %v12934_v13, %v15679_v30 }
 0x271   : > { %v5009_v50 = vpop.f32.mrf.mxu1  ;;  %v5403_v42 = vpop.f32.mrf.mxu0 }
 0x272   : > { %v15877_v9 = vadd.f32 %v12976_v43, %v5076_v32  ;;  %v5074_v34 = vadd.f32 %v5009_v50, %v15684_v61 }
 0x273   : > { %v12937_v48 = vpop.f32.mrf.mxu1  ;;  %v12979_v12 = vpop.f32.mrf.mxu0  ;;  %13188 = vmatmul.mubr.msk.bf16.gmra.mxu1 %vm736_vm0, %v13931_v35  ;;  %13230 = vmatmul.mubr.msk.bf16.gmra.mxu0 %vm736_vm0, %v13932_v33 }
 0x274   : > { %v15882_v55 = vadd.f32 %v5403_v42, %v5074_v34  ;;  %v5079_v30 = vadd.f32 %v12937_v48, %v15689_v26  ;;  %13191 = vmatprep.mubr.msk.bf16.mxu1 %vm736_vm0, %v13935_v51  ;;  %13233 = vmatprep.mubr.msk.bf16.mxu0 %vm736_vm0, %v13936_v60  ;;  %v13940_v26 = vld [vmem:[%s15106_s17] sm:$0xff]   ;;  %v13941_v51 = vld [vmem:[%s14874_s16 + $0x28] sm:$0xff]   ;;  %v13945_v48 = vld [vmem:[%s14874_s16 + $0x30] sm:$0xff]  }
 0x275   : > { %v5022_v5 = vpop.f32.mrf.mxu1  ;;  %v5416_v63 = vpop.f32.mrf.mxu0  ;;  %v13942_v60 = vld [vmem:[%s15106_s17 + $0x8] sm:$0xff]  }
 0x276   : > { %v15887_v61 = vadd.f32 %v12979_v12, %v5079_v30  ;;  %v5077_v3 = vadd.f32 %v5022_v5, %v15694_v22  ;;  %v13946_v12 = vld [vmem:[%s15106_s17 + $0x10] sm:$0xff]  }
 0x277   : > { %v12938_v37 = vpop.f32.mrf.mxu1  ;;  %v12980_v31 = vpop.f32.mrf.mxu0 }
 0x278   : > { %v15892_v38 = vadd.f32 %v5416_v63, %v5077_v3  ;;  %v5080_v45 = vadd.f32 %v12938_v37, %v15699_v4  ;;  %v13952_v63 = vld [vmem:[%s17204_s5 + $0x388] sm:$0xff]  }
 0x279   : > { %v5025_v21 = vpop.f32.mrf.mxu1  ;;  %v5419_v47 = vpop.f32.mrf.mxu0 }
 0x27a   : > { %v15897_v39 = vadd.f32 %v12980_v31, %v5080_v45  ;;  %v5078_v8 = vadd.f32 %v5025_v21, %v15704_v29  ;;  %v13948_v21 = vld [vmem:[%s15106_s17 + $0x18] sm:$0xff]  }
 0x27b   : > { %v12941_v14 = vpop.f32.mrf.mxu1  ;;  %v12983_v22 = vpop.f32.mrf.mxu0  ;;  %13192 = vmatmul.mubr.msk.bf16.gmra.mxu1 %vm736_vm0, %v13937_v0  ;;  %13234 = vmatmul.mubr.msk.bf16.gmra.mxu0 %vm736_vm0, %v13938_v41  ;;  %v13959_v41 = vld [vmem:[%s17204_s5 + $0x358] sm:$0xff]  }
 0x27c   : > { %v15902_v2 = vadd.f32 %v5419_v47, %v5078_v8  ;;  %v5083_v4 = vadd.f32 %v12941_v14, %v15709_v6  ;;  %13247 = vmatprep.mubr.msk.bf16.mxu1 %vm736_vm0, %v13939_v10  ;;  %13289 = vmatprep.mubr.msk.bf16.mxu0 %vm736_vm0, %v13940_v26  ;;  %v13947_v26 = vld [vmem:[%s14874_s16 + $0x38] sm:$0xff]   ;;  %v13950_v14 = vld [vmem:[%s14874_s16 + $0x40] sm:$0xff]  }
 0x27d   : > { %v5038_v13 = vpop.f32.mrf.mxu1  ;;  %v5432_v43 = vpop.f32.mrf.mxu0 }
 0x27e   : > { %v15907_v29 = vadd.f32 %v12983_v22, %v5083_v4  ;;  %v5081_v35 = vadd.f32 %v5038_v13, %v15714_v24  ;;  %v13949_v24 = vld [vmem:[%s17204_s5 + $0x360] sm:$0xff]  }
 0x27f   : > { %v12942_v33 = vpop.f32.mrf.mxu1  ;;  %v12984_v32 = vpop.f32.mrf.mxu0  ;;  %v13951_v22 = vld [vmem:[%s15106_s17 + $0x20] sm:$0xff]  }
 0x280   : > { %v15912_v50 = vadd.f32 %v5432_v43, %v5081_v35  ;;  %v5084_v42 = vadd.f32 %v12942_v33, %v15719_v49  ;;  %v13967_v35 = vld [vmem:[%s17204_s5 + $0x350] sm:$0xff]  }
 0x281   : > { %v5041_v6 = vpop.f32.mrf.mxu1  ;;  %v5435_v34 = vpop.f32.mrf.mxu0 }
 0x282   : > { %v15917_v30 = vadd.f32 %v12984_v32, %v5084_v42  ;;  %v5082_v5 = vadd.f32 %v5041_v6, %v15730_v58 }
 0x283   : > { %v12997_v3 = vpop.f32.mrf.mxu1  ;;  %v13039_v37 = vpop.f32.mrf.mxu0  ;;  %13248 = vmatmul.mubr.msk.bf16.vlgmr.msra.gmra.mxu1 %vm736_vm0, %v13941_v51  ;;  %13290 = vmatmul.mubr.msk.bf16.vlgmr.msra.gmra.mxu0 %vm736_vm0, %v13942_v60 }
 0x284   : > { %v15928_v49 = vadd.f32 %v5435_v34, %v5082_v5  ;;  %v5843_v31 = vadd.f32 %v12997_v3, %v15743_v18  ;;  %13322 = vmatpush3.bf16.msra.mxu1 %v15791_v23  ;;  %13364 = vmatpush3.bf16.msra.mxu0 %v15796_v54  ;;  %v13960_v18 = vld [vmem:[%s17204_s5 + $0x380] sm:$0xff]  }
 0x285   : > { %v5714_v58 = vpop.f32.mrf.mxu1  ;;  %v6108_v0 = vpop.f32.mrf.mxu0  ;;  %13251 = vmatprep.mubr.msk.bf16.mxu1 %vm736_vm0, %v13945_v48  ;;  %13293 = vmatprep.mubr.msk.bf16.mxu0 %vm736_vm0, %v13946_v12  ;;  %v13976_v48 = vld [vmem:[%s17204_s5 + $0x370] sm:$0xff]  }
 0x286   : > { %v15941_v45 = vadd.f32 %v13039_v37, %v5843_v31  ;;  %v5841_v23 = vadd.f32 %v5714_v58, %v15748_v16  ;;  %13323 = vmatprep.subr.bf16.mxu1 %v13949_v24  ;;  %13365 = vmatprep.subr.bf16.mxu0 %v13952_v63  ;;  %v13955_v31 = vld [vmem:[%s14874_s16 + $0x50] sm:$0xff]  }
 0x287   : > { %v12998_v54 = vpop.f32.mrf.mxu1  ;;  %v13040_v10 = vpop.f32.mrf.mxu0 }
 0x288   : > { %v15946_v47 = vadd.f32 %v6108_v0, %v5841_v23  ;;  %v5844_v8 = vadd.f32 %v12998_v54, %v15753_v62  ;;  %13324 = vmatpush3.bf16.msra.mxu1 %v13949_v24  ;;  %13366 = vmatpush3.bf16.msra.mxu0 %v13952_v63  ;;  %v13970_v62 = vld [vmem:[%s17204_s5 + $0x378] sm:$0xff]   ;;  %v13953_v24 = vld [vmem:[%s14874_s16 + $0x48] sm:$0xff]  }
 0x289   : > { %v5717_v4 = vpop.f32.mrf.mxu1  ;;  %v6111_v13 = vpop.f32.mrf.mxu0  ;;  %13325 = vmatprep.subr.bf16.mxu1 %v13959_v41  ;;  %13367 = vmatprep.subr.bf16.mxu0 %v13960_v18  ;;  %v13954_v63 = vld [vmem:[%s15106_s17 + $0x28] sm:$0xff]   ;;  %v15989_v23 = vld [vmem:[%s17204_s5 + $0x3b8] sm:$0xff]  }
 0x28a   : > { %v15951_v43 = vadd.f32 %v13040_v10, %v5844_v8  ;;  %v5842_v16 = vadd.f32 %v5717_v4, %v15764_v57 }
 0x28b   : > { %v13001_v33 = vpop.f32.mrf.mxu1  ;;  %v13043_v32 = vpop.f32.mrf.mxu0  ;;  %13252 = vmatmul.mubr.msk.bf16.gmra.mxu1 %vm736_vm0, %v13947_v26  ;;  %13294 = vmatmul.mubr.msk.bf16.gmra.mxu0 %vm736_vm0, %v13948_v21 }
 0x28c   : > { %v15962_v51 = vadd.f32 %v6111_v13, %v5842_v16  ;;  %v5847_v60 = vadd.f32 %v13001_v33, %v15769_v11  ;;  %13255 = vmatprep.mubr.msk.bf16.mxu1 %vm736_vm0, %v13950_v14  ;;  %13297 = vmatprep.mubr.msk.bf16.mxu0 %vm736_vm0, %v13951_v22  ;;  %v13975_v11 = vld [vmem:[%s17204_s5 + $0x348] sm:$0xff]   ;;  %v13957_v13 = vld [vmem:[%s14874_s16 + $0x58] sm:$0xff]   ;;  %v13961_v33 = vld [vmem:[%s14874_s16 + $0x60] sm:$0xff]  }
 0x28d   : > { %v5730_v57 = vpop.f32.mrf.mxu1  ;;  %v6124_v42 = vpop.f32.mrf.mxu0  ;;  %13326 = vmatpush3.bf16.msra.mxu1 %v13959_v41  ;;  %13368 = vmatpush3.bf16.msra.mxu0 %v13960_v18  ;;  %v13958_v16 = vld [vmem:[%s15106_s17 + $0x38] sm:$0xff]  }
 0x28e   : > { %v15967_v6 = vadd.f32 %v13043_v32, %v5847_v60  ;;  %v5845_v34 = vadd.f32 %v5730_v57, %v15780_v28  ;;  %13327 = vmatprep.subr.bf16.mxu1 %v13967_v35  ;;  %13369 = vmatprep.subr.bf16.mxu0 %v13970_v62  ;;  %v13956_v28 = vld [vmem:[%s15106_s17 + $0x30] sm:$0xff]   ;;  %v13962_v32 = vld [vmem:[%s15106_s17 + $0x40] sm:$0xff]  }
 0x28f   : > { %v13002_v12 = vpop.f32.mrf.mxu1  ;;  %v13044_v5 = vpop.f32.mrf.mxu0 }
 0x290   : > { %v15978_v3 = vadd.f32 %v6124_v42, %v5845_v34  ;;  %v5848_v37 = vadd.f32 %v13002_v12, %v15785_v46  ;;  %v15994_v46 = vld [vmem:[%s17204_s5 + $0x3e0] sm:$0xff]  }
 0x291   : > { %v5733_v58 = vpop.f32.mrf.mxu1  ;;  %v6127_v0 = vpop.f32.mrf.mxu0  ;;  %13328 = vmatpush3.bf16.msra.mxu1 %v13967_v35  ;;  %13370 = vmatpush3.bf16.msra.mxu0 %v13970_v62 }
 0x292   : > { %v15983_v41 = vadd.f32 %v13044_v5, %v5848_v37  ;;  %v5846_v18 = vadd.f32 %v5733_v58, %v15800_v15  ;;  %13329 = vmatprep.subr.bf16.mxu1 %v13975_v11  ;;  %13371 = vmatprep.subr.bf16.mxu0 %v13976_v48 }
 0x293   : > { %v13005_v54 = vpop.f32.mrf.mxu1  ;;  %v13047_v10 = vpop.f32.mrf.mxu0  ;;  %13256 = vmatmul.mubr.msk.bf16.gmra.mxu1 %vm736_vm0, %v13953_v24  ;;  %13298 = vmatmul.mubr.msk.bf16.gmra.mxu0 %vm736_vm0, %v13954_v63 }
 0x294   : > { %v15998_v15 = vadd.f32 %v6127_v0, %v5846_v18  ;;  %v5851_v26 = vadd.f32 %v13005_v54, %v15805_v52  ;;  %13259 = vmatprep.mubr.msk.bf16.mxu1 %vm736_vm0, %v13955_v31  ;;  %13301 = vmatprep.mubr.msk.bf16.mxu0 %vm736_vm0, %v13956_v28  ;;  %v13963_v31 = vld [vmem:[%s14874_s16 + $0x68] sm:$0xff]   ;;  %v13965_v18 = vld [vmem:[%s14874_s16 + $0x70] sm:$0xff]  }
 0x295   : > { %v5746_v21 = vpop.f32.mrf.mxu1  ;;  %v6140_v8 = vpop.f32.mrf.mxu0  ;;  %13330 = vmatpush3.bf16.msra.mxu1 %v13975_v11  ;;  %13372 = vmatpush3.bf16.msra.mxu0 %v13976_v48  ;;  %v13964_v28 = vld [vmem:[%s15106_s17 + $0x48] sm:$0xff]  }
 0x296   : > { %v16003_v14 = vadd.f32 %v13047_v10, %v5851_v26  ;;  %v5849_v22 = vadd.f32 %v5746_v21, %v15812_v19  ;;  %13405 = vmatprep.subr.bf16.mxu1 %v15989_v23  ;;  %13447 = vmatprep.subr.bf16.mxu0 %v15994_v46 }
 0x297   : > { %v13006_v4 = vpop.f32.mrf.mxu1  ;;  %v13048_v52 = vpop.f32.mrf.mxu0 }
 0x298   : > { %v16010_v35 = vadd.f32 %v6140_v8, %v5849_v22  ;;  %v5852_v62 = vadd.f32 %v13006_v4, %v15817_v59 }
 0x299   : > { %v5749_v60 = vpop.f32.mrf.mxu1  ;;  %v6143_v57 = vpop.f32.mrf.mxu0 }
 0x29a   : > { %v16015_v42 = vadd.f32 %v13048_v52, %v5852_v62  ;;  %v5850_v19 = vadd.f32 %v5749_v60, %v15822_v36 }
 0x29b   : > { %v13009_v34 = vpop.f32.mrf.mxu1  ;;  %v13051_v11 = vpop.f32.mrf.mxu0  ;;  %13260 = vmatmul.mubr.msk.bf16.gmra.mxu1 %vm736_vm0, %v13957_v13  ;;  %13302 = vmatmul.mubr.msk.bf16.gmra.mxu0 %vm736_vm0, %v13958_v16 }
 0x29c   : > { %v16020_v48 = vadd.f32 %v6143_v57, %v5850_v19  ;;  %v5855_v59 = vadd.f32 %v13009_v34, %v15827_v7  ;;  %13263 = vmatprep.mubr.msk.bf16.mxu1 %vm736_vm0, %v13961_v33  ;;  %13305 = vmatprep.mubr.msk.bf16.mxu0 %vm736_vm0, %v13962_v32  ;;  %v13966_v7 = vld [vmem:[%s15106_s17 + $0x50] sm:$0xff]   ;;  %v13968_v33 = vld [vmem:[%s14874_s16 + $0x78] sm:$0xff]   ;;  %v13971_v19 = vld [vmem:[%s14874_s16 + $0x80] sm:$0xff]  }
 0x29d   : > { %v5762_v12 = vpop.f32.mrf.mxu1  ;;  %v6156_v5 = vpop.f32.mrf.mxu0  ;;  %v13969_v32 = vld [vmem:[%s15106_s17 + $0x58] sm:$0xff]  }
 0x29e   : > { %v16025_v36 = vadd.f32 %v13051_v11, %v5855_v59  ;;  %v5853_v24 = vadd.f32 %v5762_v12, %v15832_v1 }
 0x29f   : > { %v13010_v63 = vpop.f32.mrf.mxu1  ;;  %v13052_v37 = vpop.f32.mrf.mxu0 }
 0x2a0   : > { %v16030_v58 = vadd.f32 %v6156_v5, %v5853_v24  ;;  %v5856_v0 = vadd.f32 %v13010_v63, %v15837_v40 }
 0x2a1   : > { %v5765_v54 = vpop.f32.mrf.mxu1  ;;  %v6159_v10 = vpop.f32.mrf.mxu0 }
 0x2a2   : > { %v16035_v26 = vadd.f32 %v13052_v37, %v5856_v0  ;;  %v5854_v21 = vadd.f32 %v5765_v54, %v15842_v53 }
 0x2a3   : > { %v13013_v8 = vpop.f32.mrf.mxu1  ;;  %v13055_v1 = vpop.f32.mrf.mxu0  ;;  %13264 = vmatmul.mubr.msk.bf16.gmra.mxu1 %vm736_vm0, %v13963_v31  ;;  %13306 = vmatmul.mubr.msk.bf16.gmra.mxu0 %vm736_vm0, %v13964_v28 }
 0x2a4   : > { %v16040_v22 = vadd.f32 %v6159_v10, %v5854_v21  ;;  %v5859_v40 = vadd.f32 %v13013_v8, %v15847_v17  ;;  %13267 = vmatprep.mubr.msk.bf16.mxu1 %vm736_vm0, %v13965_v18  ;;  %13309 = vmatprep.mubr.msk.bf16.mxu0 %vm736_vm0, %v13966_v7  ;;  %v13972_v17 = vld [vmem:[%s15106_s17 + $0x60] sm:$0xff]   ;;  %v13973_v18 = vld [vmem:[%s14874_s16 + $0x88] sm:$0xff]   ;;  %v13977_v21 = vld [vmem:[%s14874_s16 + $0x90] sm:$0xff]  }
 0x2a5   : > { %v5778_v4 = vpop.f32.mrf.mxu1  ;;  %v6172_v52 = vpop.f32.mrf.mxu0  ;;  %v13974_v7 = vld [vmem:[%s15106_s17 + $0x68] sm:$0xff]  }
 0x2a6   : > { %v16045_v53 = vadd.f32 %v13055_v1, %v5859_v40  ;;  %v5857_v13 = vadd.f32 %v5778_v4, %v15852_v44 }
 0x2a7   : > { %v13014_v16 = vpop.f32.mrf.mxu1  ;;  %v13056_v62 = vpop.f32.mrf.mxu0 }
 0x2a8   : > { %v16050_v60 = vadd.f32 %v6172_v52, %v5857_v13  ;;  %v5860_v57 = vadd.f32 %v13014_v16, %v15857_v27 }
 0x2a9   : > { %v5781_v34 = vpop.f32.mrf.mxu1  ;;  %v6175_v11 = vpop.f32.mrf.mxu0 }
 0x2aa   : > { %v16055_v59 = vadd.f32 %v13056_v62, %v5860_v57  ;;  %v5858_v12 = vadd.f32 %v5781_v34, %v15862_v56 }
 0x2ab   : > { %v13017_v5 = vpop.f32.mrf.mxu1  ;;  %v13059_v44 = vpop.f32.mrf.mxu0  ;;  %13268 = vmatmul.mubr.msk.bf16.gmra.mxu1 %vm736_vm0, %v13968_v33  ;;  %13310 = vmatmul.mubr.msk.bf16.gmra.mxu0 %vm736_vm0, %v13969_v32 }
 0x2ac   : > { %v16060_v24 = vadd.f32 %v6175_v11, %v5858_v12  ;;  %v5863_v27 = vadd.f32 %v13017_v5, %v15867_v20  ;;  %13271 = vmatprep.mubr.msk.bf16.mxu1 %vm736_vm0, %v13971_v19  ;;  %13313 = vmatprep.mubr.msk.bf16.mxu0 %vm736_vm0, %v13972_v17  ;;  %v13978_v20 = vld [vmem:[%s15106_s17 + $0x70] sm:$0xff]   ;;  %v13979_v19 = vld [vmem:[%s14874_s16 + $0x98] sm:$0xff]   ;;  %v13981_v12 = vld [vmem:[%s15106_s17 + $0x8] sm:$0xff]  }
 0x2ad   : > { %v5794_v63 = vpop.f32.mrf.mxu1  ;;  %v6188_v37 = vpop.f32.mrf.mxu0  ;;  %v13980_v17 = vld [vmem:[%s15106_s17 + $0x78] sm:$0xff]  }
 0x2ae   : > { %v16065_v56 = vadd.f32 %v13059_v44, %v5863_v27  ;;  %v5861_v31 = vadd.f32 %v5794_v63, %v15872_v25 }
 0x2af   : > { %v13018_v28 = vpop.f32.mrf.mxu1  ;;  %v13060_v0 = vpop.f32.mrf.mxu0 }
 0x2b0   : > { %v16070_v54 = vadd.f32 %v6188_v37, %v5861_v31  ;;  %v5864_v10 = vadd.f32 %v13018_v28, %v15877_v9 }
 0x2b1   : > { %v5797_v8 = vpop.f32.mrf.mxu1  ;;  %v6191_v1 = vpop.f32.mrf.mxu0 }
 0x2b2   : > { %v16075_v40 = vadd.f32 %v13060_v0, %v5864_v10  ;;  %v5862_v4 = vadd.f32 %v5797_v8, %v15882_v55 }
 0x2b3   : > { %v13021_v52 = vpop.f32.mrf.mxu1  ;;  %v13063_v25 = vpop.f32.mrf.mxu0  ;;  %13272 = vmatmul.mubr.msk.bf16.gmra.mxu1 %vm736_vm0, %v13973_v18  ;;  %13314 = vmatmul.mubr.msk.bf16.gmra.mxu0 %vm736_vm0, %v13974_v7 }
 0x2b4   : > { %v16080_v13 = vadd.f32 %v6191_v1, %v5862_v4  ;;  %v5867_v9 = vadd.f32 %v13021_v52, %v15887_v61  ;;  %13275 = vmatprep.mubr.msk.bf16.mxu1 %vm736_vm0, %v13977_v21  ;;  %13317 = vmatprep.mubr.msk.bf16.mxu0 %vm736_vm0, %v13978_v20  ;;  %v13982_v61 = vld [vmem:[%s15106_s17 + $0x10] sm:$0xff]   ;;  %v13984_v20 = vld [vmem:[%s15106_s17 + $0x18] sm:$0xff]  }
 0x2b5   : > { %v5810_v16 = vpop.f32.mrf.mxu1  ;;  %v6204_v62 = vpop.f32.mrf.mxu0  ;;  %v13983_v21 = vld [vmem:[%s15106_s17 + $0x10] sm:$0xff]   ;;  %v13987_v52 = vld [vmem:[%s15106_s17 + $0x18] sm:$0xff]  }
 0x2b6   : > { %v16085_v55 = vadd.f32 %v13063_v25, %v5867_v9  ;;  %v5865_v33 = vadd.f32 %v5810_v16, %v15892_v38  ;;  %v13988_v25 = vld [vmem:[%s15106_s17 + $0x20] sm:$0xff]  }
 0x2b7   : > { %v13022_v32 = vpop.f32.mrf.mxu1  ;;  %v13064_v57 = vpop.f32.mrf.mxu0 }
 0x2b8   : > { %v16090_v34 = vadd.f32 %v6204_v62, %v5865_v33  ;;  %v5868_v11 = vadd.f32 %v13022_v32, %v15897_v39  ;;  %v13994_v62 = vld [vmem:[%s17204_s5 + $0x3d8] sm:$0xff]  }
 0x2b9   : > { %v5813_v5 = vpop.f32.mrf.mxu1  ;;  %v6207_v44 = vpop.f32.mrf.mxu0 }
 0x2ba   : > { %v16095_v27 = vadd.f32 %v13064_v57, %v5868_v11  ;;  %v5866_v63 = vadd.f32 %v5813_v5, %v15902_v2  ;;  %v13990_v5 = vld [vmem:[%s15106_s17 + $0x28] sm:$0xff]  }
 0x2bb   : > { %v13025_v37 = vpop.f32.mrf.mxu1  ;;  %v13067_v38 = vpop.f32.mrf.mxu0  ;;  %13276 = vmatmul.mubr.msk.bf16.gmra.mxu1 %vm736_vm0, %v13979_v19  ;;  %13318 = vmatmul.mubr.msk.bf16.gmra.mxu0 %vm736_vm0, %v13980_v17  ;;  %v14001_v17 = vld [vmem:[%s17204_s5 + $0x3a8] sm:$0xff]  }
 0x2bc   : > { %v16100_v31 = vadd.f32 %v6207_v44, %v5866_v63  ;;  %v5871_v39 = vadd.f32 %v13025_v37, %v15907_v29  ;;  %13331 = vmatprep.mubr.msk.bf16.mxu1 %vm736_vm0, %v13981_v12  ;;  %13373 = vmatprep.mubr.msk.bf16.mxu0 %vm736_vm0, %v13982_v61  ;;  %v13989_v61 = vld [vmem:[%s15106_s17 + $0x20] sm:$0xff]   ;;  %v13992_v37 = vld [vmem:[%s15106_s17 + $0x28] sm:$0xff]  }
 0x2bd   : > { %v5826_v28 = vpop.f32.mrf.mxu1  ;;  %v6220_v0 = vpop.f32.mrf.mxu0 }
 0x2be   : > { %v16105_v2 = vadd.f32 %v13067_v38, %v5871_v39  ;;  %v5869_v18 = vadd.f32 %v5826_v28, %v15912_v50  ;;  %v13991_v50 = vld [vmem:[%s17204_s5 + $0x3b0] sm:$0xff]  }
 0x2bf   : > { %v13026_v7 = vpop.f32.mrf.mxu1  ;;  %v13068_v10 = vpop.f32.mrf.mxu0  ;;  %v13993_v38 = vld [vmem:[%s15106_s17 + $0x30] sm:$0xff]  }
 0x2c0   : > { %v16110_v8 = vadd.f32 %v6220_v0, %v5869_v18  ;;  %v5872_v1 = vadd.f32 %v13026_v7, %v15917_v30  ;;  %v14009_v18 = vld [vmem:[%s17204_s5 + $0x3a0] sm:$0xff]  }
 0x2c1   : > { %v5829_v29 = vpop.f32.mrf.mxu1  ;;  %v6223_v4 = vpop.f32.mrf.mxu0 }
 0x2c2   : > { %v16115_v9 = vadd.f32 %v13068_v10, %v5872_v1  ;;  %v5870_v16 = vadd.f32 %v5829_v29, %v15928_v49 }
 0x2c3   : > { %v13081_v33 = vpop.f32.mrf.mxu1  ;;  %v13123_v32 = vpop.f32.mrf.mxu0  ;;  %13332 = vmatmul.mubr.msk.bf16.vlgmr.msra.gmra.mxu1 %vm736_vm0, %v13983_v21  ;;  %13374 = vmatmul.mubr.msk.bf16.vlgmr.msra.gmra.mxu0 %vm736_vm0, %v13984_v20 }
 0x2c4   : > { %v16126_v30 = vadd.f32 %v6223_v4, %v5870_v16  ;;  %v6631_v57 = vadd.f32 %v13081_v33, %v15941_v45  ;;  %13406 = vmatpush3.bf16.msra.mxu1 %v15989_v23  ;;  %13448 = vmatpush3.bf16.msra.mxu0 %v15994_v46  ;;  %v14002_v45 = vld [vmem:[%s17204_s5 + $0x3d0] sm:$0xff]  }
 0x2c5   : > { %v6502_v49 = vpop.f32.mrf.mxu1  ;;  %v6896_v19 = vpop.f32.mrf.mxu0  ;;  %13335 = vmatprep.mubr.msk.bf16.mxu1 %vm736_vm0, %v13987_v52  ;;  %13377 = vmatprep.mubr.msk.bf16.mxu0 %vm736_vm0, %v13988_v25  ;;  %v14018_v52 = vld [vmem:[%s17204_s5 + $0x3c0] sm:$0xff]  }
 0x2c6   : > { %v16139_v11 = vadd.f32 %v13123_v32, %v6631_v57  ;;  %v6629_v23 = vadd.f32 %v6502_v49, %v15946_v47  ;;  %13407 = vmatprep.subr.bf16.mxu1 %v13991_v50  ;;  %13449 = vmatprep.subr.bf16.mxu0 %v13994_v62  ;;  %v13997_v57 = vld [vmem:[%s15106_s17 + $0x38] sm:$0xff]  }
 0x2c7   : > { %v13082_v46 = vpop.f32.mrf.mxu1  ;;  %v13124_v12 = vpop.f32.mrf.mxu0 }
 0x2c8   : > { %v16144_v44 = vadd.f32 %v6896_v19, %v6629_v23  ;;  %v6632_v63 = vadd.f32 %v13082_v46, %v15951_v43  ;;  %13408 = vmatpush3.bf16.msra.mxu1 %v13991_v50  ;;  %13450 = vmatpush3.bf16.msra.mxu0 %v13994_v62  ;;  %v14012_v43 = vld [vmem:[%s17204_s5 + $0x3c8] sm:$0xff]   ;;  %v13995_v50 = vld [vmem:[%s15106_s17 + $0x30] sm:$0xff]   ;;  %v13996_v62 = vld [vmem:[%s15106_s17 + $0x38] sm:$0xff]  }
 0x2c9   : > { %v6505_v39 = vpop.f32.mrf.mxu1  ;;  %v6899_v28 = vpop.f32.mrf.mxu0  ;;  %13409 = vmatprep.subr.bf16.mxu1 %v14001_v17  ;;  %13451 = vmatprep.subr.bf16.mxu0 %v14002_v45 }
 0x2ca   : > { %v16149_v0 = vadd.f32 %v13124_v12, %v6632_v63  ;;  %v6630_v47 = vadd.f32 %v6505_v39, %v15962_v51  ;;  %v13999_v39 = vld [vmem:[%s15106_s17 + $0x40] sm:$0xff]  }
 0x2cb   : > { %v13085_v7 = vpop.f32.mrf.mxu1  ;;  %v13127_v10 = vpop.f32.mrf.mxu0  ;;  %13336 = vmatmul.mubr.msk.bf16.gmra.mxu1 %vm736_vm0, %v13989_v61  ;;  %13378 = vmatmul.mubr.msk.bf16.gmra.mxu0 %vm736_vm0, %v13990_v5 }
 0x2cc   : > { %v16160_v21 = vadd.f32 %v6899_v28, %v6630_v47  ;;  %v6635_v20 = vadd.f32 %v13085_v7, %v15967_v6  ;;  %13339 = vmatprep.mubr.msk.bf16.mxu1 %vm736_vm0, %v13992_v37  ;;  %13381 = vmatprep.mubr.msk.bf16.mxu0 %vm736_vm0, %v13993_v38  ;;  %v14017_v6 = vld [vmem:[%s17204_s5 + $0x398] sm:$0xff]   ;;  %v14000_v28 = vld [vmem:[%s15106_s17 + $0x48] sm:$0xff]  }
 0x2cd   : > { %v6518_v51 = vpop.f32.mrf.mxu1  ;;  %v6912_v1 = vpop.f32.mrf.mxu0  ;;  %13410 = vmatpush3.bf16.msra.mxu1 %v14001_v17  ;;  %13452 = vmatpush3.bf16.msra.mxu0 %v14002_v45 }
 0x2ce   : > { %v16165_v29 = vadd.f32 %v13127_v10, %v6635_v20  ;;  %v6633_v4 = vadd.f32 %v6518_v51, %v15978_v3  ;;  %13411 = vmatprep.subr.bf16.mxu1 %v14009_v18  ;;  %13453 = vmatprep.subr.bf16.mxu0 %v14012_v43  ;;  %v13998_v3 = vld [vmem:[%s15106_s17 + $0x40] sm:$0xff]  }
 0x2cf   : > { %v13086_v25 = vpop.f32.mrf.mxu1  ;;  %v13128_v16 = vpop.f32.mrf.mxu0 }
 0x2d0   : > { %v16176_v33 = vadd.f32 %v6912_v1, %v6633_v4  ;;  %v6636_v32 = vadd.f32 %v13086_v25, %v15983_v41 }
 0x2d1   : > { %v6521_v49 = vpop.f32.mrf.mxu1  ;;  %v6915_v19 = vpop.f32.mrf.mxu0  ;;  %13412 = vmatpush3.bf16.msra.mxu1 %v14009_v18  ;;  %13454 = vmatpush3.bf16.msra.mxu0 %v14012_v43  ;;  %v14003_v18 = vld [vmem:[%s15106_s17 + $0x48] sm:$0xff]   ;;  %v14004_v43 = vld [vmem:[%s15106_s17 + $0x50] sm:$0xff]  }
 0x2d2   : > { %v16181_v17 = vadd.f32 %v13128_v16, %v6636_v32  ;;  %v6634_v45 = vadd.f32 %v6521_v49, %v15998_v15  ;;  %13413 = vmatprep.subr.bf16.mxu1 %v14017_v6  ;;  %13455 = vmatprep.subr.bf16.mxu0 %v14018_v52  ;;  %v14006_v32 = vld [vmem:[%s15106_s17 + $0x58] sm:$0xff]  }
 0x2d3   : > { %v13089_v23 = vpop.f32.mrf.mxu1  ;;  %v13131_v46 = vpop.f32.mrf.mxu0  ;;  %13340 = vmatmul.mubr.msk.bf16.gmra.mxu1 %vm736_vm0, %v13995_v50  ;;  %13382 = vmatmul.mubr.msk.bf16.gmra.mxu0 %vm736_vm0, %v13996_v62  ;;  %v14005_v62 = vld [vmem:[%s15106_s17 + $0x50] sm:$0xff]   ;;  %v14007_v49 = vld [vmem:[%s15106_s17 + $0x58] sm:$0xff]  }
 0x2d4   : > { %v16186_v41 = vadd.f32 %v6915_v19, %v6634_v45  ;;  %v6639_v12 = vadd.f32 %v13089_v23, %v16003_v14  ;;  %13343 = vmatprep.mubr.msk.bf16.mxu1 %vm736_vm0, %v13997_v57  ;;  %13385 = vmatprep.mubr.msk.bf16.mxu0 %vm736_vm0, %v13998_v3 }
 0x2d5   : > { %v6534_v15 = vpop.f32.mrf.mxu1  ;;  %v6928_v61 = vpop.f32.mrf.mxu0  ;;  %13414 = vmatpush3.bf16.msra.mxu1 %v14017_v6  ;;  %13456 = vmatpush3.bf16.msra.mxu0 %v14018_v52 }
 0x2d6   : > { %v16191_v5 = vadd.f32 %v13131_v46, %v6639_v12  ;;  %v6637_v63 = vadd.f32 %v6534_v15, %v16010_v35 }
 0x2d7   : > { %v13090_v37 = vpop.f32.mrf.mxu1  ;;  %v13132_v38 = vpop.f32.mrf.mxu0 }
 0x2d8   : > { %v16196_v47 = vadd.f32 %v6928_v61, %v6637_v63  ;;  %v6640_v14 = vadd.f32 %v13090_v37, %v16015_v42 }
 0x2d9   : > { %v6537_v7 = vpop.f32.mrf.mxu1  ;;  %v6931_v10 = vpop.f32.mrf.mxu0 }
 0x2da   : > { %v16201_v20 = vadd.f32 %v13132_v38, %v6640_v14  ;;  %v6638_v51 = vadd.f32 %v6537_v7, %v16020_v48  ;;  %v14011_v14 = vld [vmem:[%s15106_s17 + $0x68] sm:$0xff]  }
 0x2db   : > { %v13093_v1 = vpop.f32.mrf.mxu1  ;;  %v13135_v35 = vpop.f32.mrf.mxu0  ;;  %13344 = vmatmul.mubr.msk.bf16.gmra.mxu1 %vm736_vm0, %v13999_v39  ;;  %13386 = vmatmul.mubr.msk.bf16.gmra.mxu0 %vm736_vm0, %v14000_v28  ;;  %v14010_v28 = vld [vmem:[%s15106_s17 + $0x60] sm:$0xff]   ;;  %v14013_v7 = vld [vmem:[%s15106_s17 + $0x68] sm:$0xff]  }
 0x2dc   : > { %v16206_v4 = vadd.f32 %v6931_v10, %v6638_v51  ;;  %v6643_v42 = vadd.f32 %v13093_v1, %v16025_v36  ;;  %13347 = vmatprep.mubr.msk.bf16.mxu1 %vm736_vm0, %v14003_v18  ;;  %13389 = vmatprep.mubr.msk.bf16.mxu0 %vm736_vm0, %v14004_v43  ;;  %v14008_v36 = vld [vmem:[%s15106_s17 + $0x60] sm:$0xff]  }
 0x2dd   : > { %v6550_v6 = vpop.f32.mrf.mxu1  ;;  %v6944_v52 = vpop.f32.mrf.mxu0 }
 0x2de   : > { %v16211_v48 = vadd.f32 %v13135_v35, %v6643_v42  ;;  %v6641_v25 = vadd.f32 %v6550_v6, %v16030_v58 }
 0x2df   : > { %v13094_v16 = vpop.f32.mrf.mxu1  ;;  %v13136_v50 = vpop.f32.mrf.mxu0 }
 0x2e0   : > { %v16216_v57 = vadd.f32 %v6944_v52, %v6641_v25  ;;  %v6644_v3 = vadd.f32 %v13094_v16, %v16035_v26 }
 0x2e1   : > { %v6553_v19 = vpop.f32.mrf.mxu1  ;;  %v6947_v45 = vpop.f32.mrf.mxu0 }
 0x2e2   : > { %v16221_v23 = vadd.f32 %v13136_v50, %v6644_v3  ;;  %v6642_v46 = vadd.f32 %v6553_v19, %v16040_v22  ;;  %v14016_v3 = vld [vmem:[%s15106_s17 + $0x78] sm:$0xff]  }
 0x2e3   : > { %v13097_v12 = vpop.f32.mrf.mxu1  ;;  %v13139_v58 = vpop.f32.mrf.mxu0  ;;  %13348 = vmatmul.mubr.msk.bf16.gmra.mxu1 %vm736_vm0, %v14005_v62  ;;  %13390 = vmatmul.mubr.msk.bf16.gmra.mxu0 %vm736_vm0, %v14006_v32  ;;  %v14015_v32 = vld [vmem:[%s15106_s17 + $0x70] sm:$0xff]   ;;  %v14019_v19 = vld [vmem:[%s15106_s17 + $0x78] sm:$0xff]  }
 0x2e4   : > { %v16226_v15 = vadd.f32 %v6947_v45, %v6642_v46  ;;  %v6647_v26 = vadd.f32 %v13097_v12, %v16045_v53  ;;  %13351 = vmatprep.mubr.msk.bf16.mxu1 %vm736_vm0, %v14007_v49  ;;  %13393 = vmatprep.mubr.msk.bf16.mxu0 %vm736_vm0, %v14008_v36  ;;  %v14014_v53 = vld [vmem:[%s15106_s17 + $0x70] sm:$0xff]  }
 0x2e5   : > { %v6566_v61 = vpop.f32.mrf.mxu1  ;;  %v6960_v63 = vpop.f32.mrf.mxu0 }
 0x2e6   : > { %v16231_v22 = vadd.f32 %v13139_v58, %v6647_v26  ;;  %v6645_v37 = vadd.f32 %v6566_v61, %v16050_v60 }
 0x2e7   : > { %v13098_v38 = vpop.f32.mrf.mxu1  ;;  %v13140_v39 = vpop.f32.mrf.mxu0 }
 0x2e8   : > { %v16236_v18 = vadd.f32 %v6960_v63, %v6645_v37  ;;  %v6648_v43 = vadd.f32 %v13098_v38, %v16055_v59 }
 0x2e9   : > { %v6569_v10 = vpop.f32.mrf.mxu1  ;;  %v6963_v51 = vpop.f32.mrf.mxu0 }
 0x2ea   : > { %v16241_v1 = vadd.f32 %v13140_v39, %v6648_v43  ;;  %v6646_v35 = vadd.f32 %v6569_v10, %v16060_v24  ;;  %v14022_v43 = vld [vmem:[%s15106_s17 + $0x88] sm:$0xff]   ;;  %v14023_v10 = vld [vmem:[%s15106_s17 + $0x18] sm:$0xff]  }
 0x2eb   : > { %v13101_v42 = vpop.f32.mrf.mxu1  ;;  %v13143_v60 = vpop.f32.mrf.mxu0  ;;  %13352 = vmatmul.mubr.msk.bf16.gmra.mxu1 %vm736_vm0, %v14010_v28  ;;  %13394 = vmatmul.mubr.msk.bf16.gmra.mxu0 %vm736_vm0, %v14011_v14  ;;  %v14021_v14 = vld [vmem:[%s15106_s17 + $0x80] sm:$0xff]  }
 0x2ec   : > { %v16246_v6 = vadd.f32 %v6963_v51, %v6646_v35  ;;  %v6651_v59 = vadd.f32 %v13101_v42, %v16065_v56  ;;  %13355 = vmatprep.mubr.msk.bf16.mxu1 %vm736_vm0, %v14013_v7  ;;  %13397 = vmatprep.mubr.msk.bf16.mxu0 %vm736_vm0, %v14014_v53  ;;  %v14020_v56 = vld [vmem:[%s15106_s17 + $0x80] sm:$0xff]  }
 0x2ed   : > { %v6582_v52 = vpop.f32.mrf.mxu1  ;;  %v6976_v25 = vpop.f32.mrf.mxu0 }
 0x2ee   : > { %v16251_v24 = vadd.f32 %v13143_v60, %v6651_v59  ;;  %v6649_v16 = vadd.f32 %v6582_v52, %v16070_v54 }
 0x2ef   : > { %v13102_v50 = vpop.f32.mrf.mxu1  ;;  %v13144_v62 = vpop.f32.mrf.mxu0 }
 0x2f0   : > { %v16256_v49 = vadd.f32 %v6976_v25, %v6649_v16  ;;  %v6652_v36 = vadd.f32 %v13102_v50, %v16075_v40 }
 0x2f1   : > { %v6585_v45 = vpop.f32.mrf.mxu1  ;;  %v6979_v46 = vpop.f32.mrf.mxu0 }
 0x2f2   : > { %v16261_v12 = vadd.f32 %v13144_v62, %v6652_v36  ;;  %v6650_v58 = vadd.f32 %v6585_v45, %v16080_v13  ;;  %v14026_v36 = vld [vmem:[%s15106_s17 + $0x28] sm:$0xff]  }
 0x2f3   : > { %v13105_v26 = vpop.f32.mrf.mxu1  ;;  %v13147_v54 = vpop.f32.mrf.mxu0  ;;  %13356 = vmatmul.mubr.msk.bf16.gmra.mxu1 %vm736_vm0, %v14015_v32  ;;  %13398 = vmatmul.mubr.msk.bf16.gmra.mxu0 %vm736_vm0, %v14016_v3  ;;  %v14025_v3 = vld [vmem:[%s15106_s17 + $0x20] sm:$0xff]   ;;  %v14027_v45 = vld [vmem:[%s15106_s17 + $0x28] sm:$0xff]  }
 0x2f4   : > { %v16266_v61 = vadd.f32 %v6979_v46, %v6650_v58  ;;  %v6655_v40 = vadd.f32 %v13105_v26, %v16085_v55  ;;  %13359 = vmatprep.mubr.msk.bf16.mxu1 %vm736_vm0, %v14019_v19  ;;  %13401 = vmatprep.mubr.msk.bf16.mxu0 %vm736_vm0, %v14020_v56  ;;  %v14024_v55 = vld [vmem:[%s15106_s17 + $0x20] sm:$0xff]  }
 0x2f5   : > { %v6598_v63 = vpop.f32.mrf.mxu1  ;;  %v6992_v37 = vpop.f32.mrf.mxu0 }
 0x2f6   : > { %v16271_v13 = vadd.f32 %v13147_v54, %v6655_v40  ;;  %v6653_v38 = vadd.f32 %v6598_v63, %v16090_v34 }
 0x2f7   : > { %v13106_v39 = vpop.f32.mrf.mxu1  ;;  %v13148_v28 = vpop.f32.mrf.mxu0 }
 0x2f8   : > { %v16276_v7 = vadd.f32 %v6992_v37, %v6653_v38  ;;  %v6656_v53 = vadd.f32 %v13106_v39, %v16095_v27 }
 0x2f9   : > { %v6601_v51 = vpop.f32.mrf.mxu1  ;;  %v6995_v35 = vpop.f32.mrf.mxu0 }
 0x2fa   : > { %v16281_v42 = vadd.f32 %v13148_v28, %v6656_v53  ;;  %v6654_v60 = vadd.f32 %v6601_v51, %v16100_v31  ;;  %v14030_v53 = vld [vmem:[%s15106_s17 + $0x38] sm:$0xff]  }
 0x2fb   : > { %v13109_v59 = vpop.f32.mrf.mxu1  ;;  %v13151_v34 = vpop.f32.mrf.mxu0  ;;  %13360 = vmatmul.mubr.msk.bf16.gmra.mxu1 %vm736_vm0, %v14021_v14  ;;  %13402 = vmatmul.mubr.msk.bf16.gmra.mxu0 %vm736_vm0, %v14022_v43  ;;  %v14029_v43 = vld [vmem:[%s15106_s17 + $0x30] sm:$0xff]   ;;  %v14031_v51 = vld [vmem:[%s15106_s17 + $0x38] sm:$0xff]  }
 0x2fc   : > { %v16286_v52 = vadd.f32 %v6995_v35, %v6654_v60  ;;  %v6659_v27 = vadd.f32 %v13109_v59, %v16105_v2  ;;  %13415 = vmatprep.mubr.msk.bf16.mxu1 %vm736_vm0, %v14023_v10  ;;  %13457 = vmatprep.mubr.msk.bf16.mxu0 %vm736_vm0, %v14024_v55  ;;  %v14028_v2 = vld [vmem:[%s15106_s17 + $0x30] sm:$0xff]  }
 0x2fd   : > { %v6614_v25 = vpop.f32.mrf.mxu1  ;;  %v7008_v16 = vpop.f32.mrf.mxu0 }
 0x2fe   : > { %v16291_v31 = vadd.f32 %v13151_v34, %v6659_v27  ;;  %v6657_v50 = vadd.f32 %v6614_v25, %v16110_v8 }
 0x2ff   : > { %v13110_v62 = vpop.f32.mrf.mxu1  ;;  %v13152_v32 = vpop.f32.mrf.mxu0 }
 0x300   : > { %v16296_v19 = vadd.f32 %v7008_v16, %v6657_v50  ;;  %v6660_v56 = vadd.f32 %v13110_v62, %v16115_v9 }
 0x301   : > { %v6617_v46 = vpop.f32.mrf.mxu1  ;;  %v7011_v58 = vpop.f32.mrf.mxu0 }
 0x302   : > { %v16301_v26 = vadd.f32 %v13152_v32, %v6660_v56  ;;  %v6658_v54 = vadd.f32 %v6617_v46, %v16126_v30  ;;  %v14034_v56 = vld [vmem:[%s15106_s17 + $0x48] sm:$0xff]  }
 0x303   : > { %v13165_v40 = vpop.f32.mrf.mxu1  ;;  %v13207_v8 = vpop.f32.mrf.mxu0  ;;  %13416 = vmatmul.mubr.msk.bf16.vlgmr.msra.gmra.mxu1 %vm736_vm0, %v14025_v3  ;;  %13458 = vmatmul.mubr.msk.bf16.vlgmr.msra.gmra.mxu0 %vm736_vm0, %v14026_v36  ;;  %v14033_v36 = vld [vmem:[%s15106_s17 + $0x40] sm:$0xff]   ;;  %v14035_v46 = vld [vmem:[%s15106_s17 + $0x48] sm:$0xff]  }
 0x304   : > { %v16306_v63 = vadd.f32 %v7011_v58, %v6658_v54  ;;  %v7419_v9 = vadd.f32 %v13165_v40, %v16139_v11  ;;  %13419 = vmatprep.mubr.msk.bf16.mxu1 %vm736_vm0, %v14027_v45  ;;  %13461 = vmatprep.mubr.msk.bf16.mxu0 %vm736_vm0, %v14028_v2  ;;  %v14032_v11 = vld [vmem:[%s15106_s17 + $0x40] sm:$0xff]  }
 0x305   : > { %v7290_v37 = vpop.f32.mrf.mxu1  ;;  %v7684_v38 = vpop.f32.mrf.mxu0 }
 0x306   : > { %v16311_v30 = vadd.f32 %v13207_v8, %v7419_v9  ;;  %v7417_v39 = vadd.f32 %v7290_v37, %v16144_v44 }
 0x307   : > { %v13166_v28 = vpop.f32.mrf.mxu1  ;;  %v13208_v14 = vpop.f32.mrf.mxu0 }
 0x308   : > { %v16316_v10 = vadd.f32 %v7684_v38, %v7417_v39  ;;  %v7420_v55 = vadd.f32 %v13166_v28, %v16149_v0 }
 0x309   : > { %v7293_v35 = vpop.f32.mrf.mxu1  ;;  %v7687_v60 = vpop.f32.mrf.mxu0 }
 0x30a   : > { %v16321_v59 = vadd.f32 %v13208_v14, %v7420_v55  ;;  %v7418_v34 = vadd.f32 %v7293_v35, %v16160_v21  ;;  %v14038_v55 = vld [vmem:[%s15106_s17 + $0x58] sm:$0xff]  }
 0x30b   : > { %v13169_v27 = vpop.f32.mrf.mxu1  ;;  %v13211_v44 = vpop.f32.mrf.mxu0  ;;  %13420 = vmatmul.mubr.msk.bf16.gmra.mxu1 %vm736_vm0, %v14029_v43  ;;  %13462 = vmatmul.mubr.msk.bf16.gmra.mxu0 %vm736_vm0, %v14030_v53  ;;  %v14037_v53 = vld [vmem:[%s15106_s17 + $0x50] sm:$0xff]   ;;  %v14039_v35 = vld [vmem:[%s15106_s17 + $0x58] sm:$0xff]  }
 0x30c   : > { %v16326_v25 = vadd.f32 %v7687_v60, %v7418_v34  ;;  %v7423_v0 = vadd.f32 %v13169_v27, %v16165_v29  ;;  %13423 = vmatprep.mubr.msk.bf16.mxu1 %vm736_vm0, %v14031_v51  ;;  %13465 = vmatprep.mubr.msk.bf16.mxu0 %vm736_vm0, %v14032_v11  ;;  %v14036_v29 = vld [vmem:[%s15106_s17 + $0x50] sm:$0xff]  }
 0x30d   : > { %v7306_v16 = vpop.f32.mrf.mxu1  ;;  %v7700_v50 = vpop.f32.mrf.mxu0 }
 0x30e   : > { %v16331_v21 = vadd.f32 %v13211_v44, %v7423_v0  ;;  %v7421_v62 = vadd.f32 %v7306_v16, %v16176_v33 }
 0x30f   : > { %v13170_v32 = vpop.f32.mrf.mxu1  ;;  %v13212_v3 = vpop.f32.mrf.mxu0 }
 0x310   : > { %v16336_v45 = vadd.f32 %v7700_v50, %v7421_v62  ;;  %v7424_v2 = vadd.f32 %v13170_v32, %v16181_v17 }
 0x311   : > { %v7309_v58 = vpop.f32.mrf.mxu1  ;;  %v7703_v54 = vpop.f32.mrf.mxu0 }
 0x312   : > { %v16341_v40 = vadd.f32 %v13212_v3, %v7424_v2  ;;  %v7422_v8 = vadd.f32 %v7309_v58, %v16186_v41  ;;  %v14042_v2 = vld [vmem:[%s15106_s17 + $0x68] sm:$0xff]  }
 0x313   : > { %v13173_v9 = vpop.f32.mrf.mxu1  ;;  %v13215_v33 = vpop.f32.mrf.mxu0  ;;  %13424 = vmatmul.mubr.msk.bf16.gmra.mxu1 %vm736_vm0, %v14033_v36  ;;  %13466 = vmatmul.mubr.msk.bf16.gmra.mxu0 %vm736_vm0, %v14034_v56  ;;  %v14041_v56 = vld [vmem:[%s15106_s17 + $0x60] sm:$0xff]   ;;  %v14043_v58 = vld [vmem:[%s15106_s17 + $0x68] sm:$0xff]  }
 0x314   : > { %v16346_v37 = vadd.f32 %v7703_v54, %v7422_v8  ;;  %v7427_v17 = vadd.f32 %v13173_v9, %v16191_v5  ;;  %13427 = vmatprep.mubr.msk.bf16.mxu1 %vm736_vm0, %v14035_v46  ;;  %13469 = vmatprep.mubr.msk.bf16.mxu0 %vm736_vm0, %v14036_v29  ;;  %v14040_v5 = vld [vmem:[%s15106_s17 + $0x60] sm:$0xff]  }
 0x315   : > { %v7322_v38 = vpop.f32.mrf.mxu1  ;;  %v7716_v39 = vpop.f32.mrf.mxu0 }
 0x316   : > { %v16351_v41 = vadd.f32 %v13215_v33, %v7427_v17  ;;  %v7425_v28 = vadd.f32 %v7322_v38, %v16196_v47 }
 0x317   : > { %v13174_v14 = vpop.f32.mrf.mxu1  ;;  %v13216_v43 = vpop.f32.mrf.mxu0 }
 0x318   : > { %v16356_v51 = vadd.f32 %v7716_v39, %v7425_v28  ;;  %v7428_v11 = vadd.f32 %v13174_v14, %v16201_v20 }
 0x319   : > { %v7325_v60 = vpop.f32.mrf.mxu1  ;;  %v7719_v34 = vpop.f32.mrf.mxu0 }
 0x31a   : > { %v16361_v27 = vadd.f32 %v13216_v43, %v7428_v11  ;;  %v7426_v44 = vadd.f32 %v7325_v60, %v16206_v4  ;;  %v14046_v11 = vld [vmem:[%s15106_s17 + $0x78] sm:$0xff]  }
 0x31b   : > { %v13177_v0 = vpop.f32.mrf.mxu1  ;;  %v13219_v47 = vpop.f32.mrf.mxu0  ;;  %13428 = vmatmul.mubr.msk.bf16.gmra.mxu1 %vm736_vm0, %v14037_v53  ;;  %13470 = vmatmul.mubr.msk.bf16.gmra.mxu0 %vm736_vm0, %v14038_v55  ;;  %v14045_v55 = vld [vmem:[%s15106_s17 + $0x70] sm:$0xff]   ;;  %v14047_v60 = vld [vmem:[%s15106_s17 + $0x78] sm:$0xff]  }
 0x31c   : > { %v16366_v16 = vadd.f32 %v7719_v34, %v7426_v44  ;;  %v7431_v20 = vadd.f32 %v13177_v0, %v16211_v48  ;;  %13431 = vmatprep.mubr.msk.bf16.mxu1 %vm736_vm0, %v14039_v35  ;;  %13473 = vmatprep.mubr.msk.bf16.mxu0 %vm736_vm0, %v14040_v5  ;;  %v14044_v48 = vld [vmem:[%s15106_s17 + $0x70] sm:$0xff]  }
 0x31d   : > { %v7338_v50 = vpop.f32.mrf.mxu1  ;;  %v7732_v62 = vpop.f32.mrf.mxu0 }
 0x31e   : > { %v16371_v4 = vadd.f32 %v13219_v47, %v7431_v20  ;;  %v7429_v32 = vadd.f32 %v7338_v50, %v16216_v57 }
 0x31f   : > { %v13178_v3 = vpop.f32.mrf.mxu1  ;;  %v13220_v36 = vpop.f32.mrf.mxu0 }
 0x320   : > { %v16376_v46 = vadd.f32 %v7732_v62, %v7429_v32  ;;  %v7432_v29 = vadd.f32 %v13178_v3, %v16221_v23 }
 0x321   : > { %v7341_v54 = vpop.f32.mrf.mxu1  ;;  %v7735_v8 = vpop.f32.mrf.mxu0 }
 0x322   : > { %v16381_v9 = vadd.f32 %v13220_v36, %v7432_v29  ;;  %v7430_v33 = vadd.f32 %v7341_v54, %v16226_v15  ;;  %v14050_v29 = vld [vmem:[%s15106_s17 + $0x88] sm:$0xff]  }
 0x323   : > { %v13181_v17 = vpop.f32.mrf.mxu1  ;;  %v13223_v57 = vpop.f32.mrf.mxu0  ;;  %13432 = vmatmul.mubr.msk.bf16.gmra.mxu1 %vm736_vm0, %v14041_v56  ;;  %13474 = vmatmul.mubr.msk.bf16.gmra.mxu0 %vm736_vm0, %v14042_v2  ;;  %v14049_v2 = vld [vmem:[%s15106_s17 + $0x80] sm:$0xff]   ;;  %v14051_v54 = vld [vmem:[%s15106_s17 + $0x88] sm:$0xff]  }
 0x324   : > { %v16386_v38 = vadd.f32 %v7735_v8, %v7430_v33  ;;  %v7435_v23 = vadd.f32 %v13181_v17, %v16231_v22  ;;  %13435 = vmatprep.mubr.msk.bf16.mxu1 %vm736_vm0, %v14043_v58  ;;  %13477 = vmatprep.mubr.msk.bf16.mxu0 %vm736_vm0, %v14044_v48  ;;  %v14048_v22 = vld [vmem:[%s15106_s17 + $0x80] sm:$0xff]  }
 0x325   : > { %v7354_v39 = vpop.f32.mrf.mxu1  ;;  %v7748_v28 = vpop.f32.mrf.mxu0 }
 0x326   : > { %v16391_v15 = vadd.f32 %v13223_v57, %v7435_v23  ;;  %v7433_v14 = vadd.f32 %v7354_v39, %v16236_v18 }
 0x327   : > { %v13182_v43 = vpop.f32.mrf.mxu1  ;;  %v13224_v53 = vpop.f32.mrf.mxu0 }
 0x328   : > { %v16396_v35 = vadd.f32 %v7748_v28, %v7433_v14  ;;  %v7436_v5 = vadd.f32 %v13182_v43, %v16241_v1 }
 0x329   : > { %v7357_v34 = vpop.f32.mrf.mxu1  ;;  %v7751_v44 = vpop.f32.mrf.mxu0 }
 0x32a   : > { %v16401_v0 = vadd.f32 %v13224_v53, %v7436_v5  ;;  %v7434_v47 = vadd.f32 %v7357_v34, %v16246_v6  ;;  %v14054_v5 = vld [vmem:[%s15106_s17 + $0x98] sm:$0xff]  }
 0x32b   : > { %v13185_v20 = vpop.f32.mrf.mxu1  ;;  %v13227_v18 = vpop.f32.mrf.mxu0  ;;  %13436 = vmatmul.mubr.msk.bf16.gmra.mxu1 %vm736_vm0, %v14045_v55  ;;  %13478 = vmatmul.mubr.msk.bf16.gmra.mxu0 %vm736_vm0, %v14046_v11  ;;  %v14053_v11 = vld [vmem:[%s15106_s17 + $0x90] sm:$0xff]  }
 0x32c   : > { %v16406_v50 = vadd.f32 %v7751_v44, %v7434_v47  ;;  %v7439_v1 = vadd.f32 %v13185_v20, %v16251_v24  ;;  %13439 = vmatprep.mubr.msk.bf16.mxu1 %vm736_vm0, %v14047_v60  ;;  %13481 = vmatprep.mubr.msk.bf16.mxu0 %vm736_vm0, %v14048_v22  ;;  %v14052_v24 = vld [vmem:[%s15106_s17 + $0x90] sm:$0xff]   ;;  %s10756_s17 = sshll.u32 %s17309_s30, 5 }
 0x32d   : > { %v7370_v62 = vpop.f32.mrf.mxu1  ;;  %v7764_v32 = vpop.f32.mrf.mxu0  ;;  %s553_s23 = sadd.s32 %s10757_s21, %s10756_s17  ;;  %s569_s17 = scalar_lea.vmem %s17208_s9, %s17036_s19 }
 0x32e   : > { %v16411_v6 = vadd.f32 %v13227_v18, %v7439_v1  ;;  %v7437_v3 = vadd.f32 %v7370_v62, %v16256_v49  ;;  %s10758_s22 = sshll.u32 %s553_s23, 3 }
 0x32f   : > { %v13186_v36 = vpop.f32.mrf.mxu1  ;;  %v13228_v56 = vpop.f32.mrf.mxu0  ;;  %s16710_s29 = scalar_lea.vmem %s17206_s7, %s10758_s22 }
 0x330   : > { %v16416_v58 = vadd.f32 %v7764_v32, %v7437_v3  ;;  %v7440_v48 = vadd.f32 %v13186_v36, %v16261_v12 }
 0x331   : > { %v7373_v8 = vpop.f32.mrf.mxu1  ;;  %v7767_v33 = vpop.f32.mrf.mxu0 }
 0x332   : > { %v16421_v17 = vadd.f32 %v13228_v56, %v7440_v48  ;;  %v7438_v57 = vadd.f32 %v7373_v8, %v16266_v61 }
 0x333   : > { %v13189_v23 = vpop.f32.mrf.mxu1  ;;  %v13231_v49 = vpop.f32.mrf.mxu0  ;;  %13440 = vmatmul.mubr.msk.bf16.gmra.mxu1 %vm736_vm0, %v14049_v2  ;;  %13482 = vmatmul.mubr.msk.bf16.gmra.mxu0 %vm736_vm0, %v14050_v29 }
 0x334   : > { %v16426_v39 = vadd.f32 %v7767_v33, %v7438_v57  ;;  %v7443_v12 = vadd.f32 %v13189_v23, %v16271_v13  ;;  %13443 = vmatprep.mubr.msk.bf16.mxu1 %vm736_vm0, %v14051_v54  ;;  %13485 = vmatprep.mubr.msk.bf16.mxu0 %vm736_vm0, %v14052_v24 }
 0x335   : > { %v7386_v28 = vpop.f32.mrf.mxu1  ;;  %v7780_v14 = vpop.f32.mrf.mxu0 }
 0x336   : > { %v16431_v43 = vadd.f32 %v13231_v49, %v7443_v12  ;;  %v7441_v61 = vadd.f32 %v7386_v28, %v16276_v7 }
 0x337   : > { %v13190_v53 = vpop.f32.mrf.mxu1  ;;  %v13232_v55 = vpop.f32.mrf.mxu0 }
 0x338   : > { %v16436_v60 = vadd.f32 %v7780_v14, %v7441_v61  ;;  %v7444_v22 = vadd.f32 %v13190_v53, %v16281_v42 }
 0x339   : > { %v7389_v34 = vpop.f32.mrf.mxu1  ;;  %v7783_v13 = vpop.f32.mrf.mxu0 }
 0x33a   : > { %v16439_v44 = vadd.f32 %v13232_v55, %v7444_v22  ;;  %v7442_v47 = vadd.f32 %v7389_v34, %v16286_v52 }
 0x33b   : > { %v13193_v20 = vpop.f32.mrf.mxu1  ;;  %v13235_v18 = vpop.f32.mrf.mxu0  ;;  %13444 = vmatmul.mubr.msk.bf16.gmra.mxu1 %vm736_vm0, %v14053_v11  ;;  %13486 = vmatmul.mubr.msk.bf16.gmra.mxu0 %vm736_vm0, %v14054_v5 }
 0x33c   : > { %v16444_v7 = vadd.f32 %v7783_v13, %v7442_v47  ;;  %v7447_v1 = vadd.f32 %v13193_v20, %v16291_v31 }
 0x33d   : > { %v7402_v62 = vpop.f32.mrf.mxu1  ;;  %v7796_v32 = vpop.f32.mrf.mxu0 }
 0x33e   : > { %v16447_v3 = vadd.f32 %v13235_v18, %v7447_v1  ;;  %v7445_v42 = vadd.f32 %v7402_v62, %v16296_v19 }
 0x33f   : > { %v13194_v36 = vpop.f32.mrf.mxu1  ;;  %v13236_v56 = vpop.f32.mrf.mxu0 }
 0x340   : > { %v16450_v2 = vadd.f32 %v7796_v32, %v7445_v42  ;;  %v7448_v52 = vadd.f32 %v13194_v36, %v16301_v26 }
 0x341   : > { %v7405_v29 = vpop.f32.mrf.mxu1  ;;  %v7799_v48 = vpop.f32.mrf.mxu0 }
 0x342   : > { %v16453_v54 = vadd.f32 %v13236_v56, %v7448_v52  ;;  %v7446_v24 = vadd.f32 %v7405_v29, %v16306_v63 }
 0x343   : > { %v13249_v8 = vpop.f32.mrf.mxu1  ;;  %v13291_v31 = vpop.f32.mrf.mxu0 }
 0x344   : > { %v16456_v33 = vadd.f32 %v7799_v48, %v7446_v24  ;;  %v8207_v57 = vadd.f32 %v13249_v8, %v16311_v30 }
 0x345   : > { %v8078_v23 = vpop.f32.mrf.mxu1  ;;  %v8472_v19 = vpop.f32.mrf.mxu0 }
 0x346   : > { %v16459_v49 = vadd.f32 %v13291_v31, %v8207_v57  ;;  %v8205_v12 = vadd.f32 %v8078_v23, %v16316_v10 }
 0x347   : > { %v13250_v28 = vpop.f32.mrf.mxu1  ;;  %v13292_v26 = vpop.f32.mrf.mxu0 }
 0x348   : > { %v16462_v14 = vadd.f32 %v8472_v19, %v8205_v12  ;;  %v8208_v61 = vadd.f32 %v13250_v28, %v16321_v59 }
 0x349   : > { %v8081_v53 = vpop.f32.mrf.mxu1  ;;  %v8475_v63 = vpop.f32.mrf.mxu0 }
 0x34a   : > { %v16465_v55 = vadd.f32 %v13292_v26, %v8208_v61  ;;  %v8206_v11 = vadd.f32 %v8081_v53, %v16326_v25 }
 0x34b   : > { %v13253_v5 = vpop.f32.mrf.mxu1  ;;  %v13295_v30 = vpop.f32.mrf.mxu0 }
 0x34c   : > { %v16468_v22 = vadd.f32 %v8475_v63, %v8206_v11  ;;  %v8211_v34 = vadd.f32 %v13253_v5, %v16331_v21 }
 0x34d   : > { %v8094_v13 = vpop.f32.mrf.mxu1  ;;  %v8488_v10 = vpop.f32.mrf.mxu0 }
 0x34e   : > { %v16471_v47 = vadd.f32 %v13295_v30, %v8211_v34  ;;  %v8209_v20 = vadd.f32 %v8094_v13, %v16336_v45 }
 0x34f   : > { %v13254_v18 = vpop.f32.mrf.mxu1  ;;  %v13296_v59 = vpop.f32.mrf.mxu0 }
 0x350   : > { %v16474_v1 = vadd.f32 %v8488_v10, %v8209_v20  ;;  %v8212_v62 = vadd.f32 %v13254_v18, %v16341_v40 }
 0x351   : > { %v8097_v32 = vpop.f32.mrf.mxu1  ;;  %v8491_v25 = vpop.f32.mrf.mxu0 }
 0x352   : > { %v16477_v42 = vadd.f32 %v13296_v59, %v8212_v62  ;;  %v8210_v36 = vadd.f32 %v8097_v32, %v16346_v37 }
 0x353   : > { %v13257_v56 = vpop.f32.mrf.mxu1  ;;  %v13299_v21 = vpop.f32.mrf.mxu0 }
 0x354   : > { %v16480_v52 = vadd.f32 %v8491_v25, %v8210_v36  ;;  %v8215_v29 = vadd.f32 %v13257_v56, %v16351_v41 }
 0x355   : > { %v8110_v48 = vpop.f32.mrf.mxu1  ;;  %v8504_v45 = vpop.f32.mrf.mxu0 }
 0x356   : > { %v16483_v24 = vadd.f32 %v13299_v21, %v8215_v29  ;;  %v8213_v8 = vadd.f32 %v8110_v48, %v16356_v51 }
 0x357   : > { %v13258_v31 = vpop.f32.mrf.mxu1  ;;  %v13300_v40 = vpop.f32.mrf.mxu0 }
 0x358   : > { %v16486_v57 = vadd.f32 %v8504_v45, %v8213_v8  ;;  %v8216_v23 = vadd.f32 %v13258_v31, %v16361_v27 }
 0x359   : > { %v8113_v19 = vpop.f32.mrf.mxu1  ;;  %v8507_v37 = vpop.f32.mrf.mxu0 }
 0x35a   : > { %v16489_v12 = vadd.f32 %v13300_v40, %v8216_v23  ;;  %v8214_v28 = vadd.f32 %v8113_v19, %v16366_v16 }
 0x35b   : > { %v13261_v26 = vpop.f32.mrf.mxu1  ;;  %v13303_v41 = vpop.f32.mrf.mxu0 }
 0x35c   : > { %v16492_v61 = vadd.f32 %v8507_v37, %v8214_v28  ;;  %v8219_v53 = vadd.f32 %v13261_v26, %v16371_v4 }
 0x35d   : > { %v8126_v63 = vpop.f32.mrf.mxu1  ;;  %v8520_v51 = vpop.f32.mrf.mxu0 }
 0x35e   : > { %v16495_v11 = vadd.f32 %v13303_v41, %v8219_v53  ;;  %v8217_v5 = vadd.f32 %v8126_v63, %v16376_v46 }
 0x35f   : > { %v13262_v30 = vpop.f32.mrf.mxu1  ;;  %v13304_v27 = vpop.f32.mrf.mxu0 }
 0x360   : > { %v16498_v34 = vadd.f32 %v8520_v51, %v8217_v5  ;;  %v8220_v13 = vadd.f32 %v13262_v30, %v16381_v9 }
 0x361   : > { %v8129_v10 = vpop.f32.mrf.mxu1  ;;  %v8523_v16 = vpop.f32.mrf.mxu0 }
 0x362   : > { %v16501_v20 = vadd.f32 %v13304_v27, %v8220_v13  ;;  %v8218_v18 = vadd.f32 %v8129_v10, %v16386_v38 }
 0x363   : > { %v13265_v59 = vpop.f32.mrf.mxu1  ;;  %v13307_v4 = vpop.f32.mrf.mxu0 }
 0x364   : > { %v16504_v62 = vadd.f32 %v8523_v16, %v8218_v18  ;;  %v8223_v32 = vadd.f32 %v13265_v59, %v16391_v15 }
 0x365   : > { %v8142_v25 = vpop.f32.mrf.mxu1  ;;  %v8536_v46 = vpop.f32.mrf.mxu0 }
 0x366   : > { %v16507_v36 = vadd.f32 %v13307_v4, %v8223_v32  ;;  %v8221_v56 = vadd.f32 %v8142_v25, %v16396_v35 }
 0x367   : > { %v13266_v21 = vpop.f32.mrf.mxu1  ;;  %v13308_v9 = vpop.f32.mrf.mxu0 }
 0x368   : > { %v16510_v29 = vadd.f32 %v8536_v46, %v8221_v56  ;;  %v8224_v48 = vadd.f32 %v13266_v21, %v16401_v0 }
 0x369   : > { %v8145_v45 = vpop.f32.mrf.mxu1  ;;  %v8539_v38 = vpop.f32.mrf.mxu0 }
 0x36a   : > { %v16513_v8 = vadd.f32 %v13308_v9, %v8224_v48  ;;  %v8222_v31 = vadd.f32 %v8145_v45, %v16406_v50 }
 0x36b   : > { %v13269_v40 = vpop.f32.mrf.mxu1  ;;  %v13311_v15 = vpop.f32.mrf.mxu0 }
 0x36c   : > { %v16516_v23 = vadd.f32 %v8539_v38, %v8222_v31  ;;  %v8227_v19 = vadd.f32 %v13269_v40, %v16411_v6 }
 0x36d   : > { %v8158_v37 = vpop.f32.mrf.mxu1  ;;  %v8552_v35 = vpop.f32.mrf.mxu0 }
 0x36e   : > { %17210 = vst [vmem:[#allocation2_spill] sm:$0xff] %v16516_v23  ;;  %v16519_v28 = vadd.f32 %v13311_v15, %v8227_v19  ;;  %v8225_v26 = vadd.f32 %v8158_v37, %v16416_v58 }
 0x36f   : > { %v13270_v41 = vpop.f32.mrf.mxu1  ;;  %v13312_v0 = vpop.f32.mrf.mxu0 }
 0x370   : > { %17211 = vst [vmem:[#allocation3_spill] sm:$0xff] %v16519_v28  ;;  %v16522_v53 = vadd.f32 %v8552_v35, %v8225_v26  ;;  %v8228_v63 = vadd.f32 %v13270_v41, %v16421_v17 }
 0x371   : > { %v8161_v51 = vpop.f32.mrf.mxu1  ;;  %v8555_v50 = vpop.f32.mrf.mxu0 }
 0x372   : > { %17212 = vst [vmem:[#allocation4_spill] sm:$0xff] %v16522_v53  ;;  %v16525_v5 = vadd.f32 %v13312_v0, %v8228_v63  ;;  %v8226_v30 = vadd.f32 %v8161_v51, %v16426_v39 }
 0x373   : > { %v13273_v27 = vpop.f32.mrf.mxu1  ;;  %v13315_v6 = vpop.f32.mrf.mxu0 }
 0x374   : > { %17213 = vst [vmem:[#allocation5_spill] sm:$0xff] %v16525_v5  ;;  %v16528_v13 = vadd.f32 %v8555_v50, %v8226_v30  ;;  %v8231_v10 = vadd.f32 %v13273_v27, %v16431_v43 }
 0x375   : > { %v8174_v16 = vpop.f32.mrf.mxu1  ;;  %v8568_v58 = vpop.f32.mrf.mxu0 }
 0x376   : > { %17214 = vst [vmem:[#allocation6_spill] sm:$0xff] %v16528_v13  ;;  %v16531_v18 = vadd.f32 %v13315_v6, %v8231_v10  ;;  %v8229_v59 = vadd.f32 %v8174_v16, %v16436_v60 }
 0x377   : > { %v13274_v4 = vpop.f32.mrf.mxu1  ;;  %v13316_v17 = vpop.f32.mrf.mxu0 }
 0x378   : > { %17215 = vst [vmem:[#allocation7_spill] sm:$0xff] %v16531_v18  ;;  %v16534_v32 = vadd.f32 %v8568_v58, %v8229_v59  ;;  %v8232_v25 = vadd.f32 %v13274_v4, %v16439_v44 }
 0x379   : > { %v8177_v46 = vpop.f32.mrf.mxu1  ;;  %v8571_v39 = vpop.f32.mrf.mxu0 }
 0x37a   : > { %17216 = vst [vmem:[#allocation8_spill] sm:$0xff] %v16534_v32  ;;  %v16537_v56 = vadd.f32 %v13316_v17, %v8232_v25  ;;  %v8230_v21 = vadd.f32 %v8177_v46, %v16444_v7 }
 0x37b   : > { %v13277_v9 = vpop.f32.mrf.mxu1  ;;  %v13319_v43 = vpop.f32.mrf.mxu0 }
 0x37c   : > { %17217 = vst [vmem:[#allocation9_spill] sm:$0xff] %v16537_v56  ;;  %v16540_v48 = vadd.f32 %v8571_v39, %v8230_v21  ;;  %v8235_v45 = vadd.f32 %v13277_v9, %v16447_v3 }
 0x37d   : > { %v8190_v38 = vpop.f32.mrf.mxu1  ;;  %v8584_v60 = vpop.f32.mrf.mxu0 }
 0x37e   : > { %17218 = vst [vmem:[#allocation10_spill] sm:$0xff] %v16540_v48  ;;  %v16543_v31 = vadd.f32 %v13319_v43, %v8235_v45  ;;  %v8233_v40 = vadd.f32 %v8190_v38, %v16450_v2 }
 0x37f   : > { %v13278_v15 = vpop.f32.mrf.mxu1  ;;  %v13320_v44 = vpop.f32.mrf.mxu0 }
 0x380   : > { %17219 = vst [vmem:[#allocation11_spill] sm:$0xff] %v16543_v31  ;;  %v16546_v19 = vadd.f32 %v8584_v60, %v8233_v40  ;;  %v8236_v37 = vadd.f32 %v13278_v15, %v16453_v54 }
 0x381   : > { %v8193_v35 = vpop.f32.mrf.mxu1  ;;  %v8587_v7 = vpop.f32.mrf.mxu0 }
 0x382   : > { %17220 = vst [vmem:[#allocation12_spill] sm:$0xff] %v16546_v19  ;;  %v16549_v26 = vadd.f32 %v13320_v44, %v8236_v37  ;;  %v8234_v41 = vadd.f32 %v8193_v35, %v16456_v33 }
 0x383   : > { %v16552_v0 = vpop.f32.mrf.mxu1  ;;  %v16554_v3 = vpop.f32.mrf.mxu0 }
 0x384   : > { %17221 = vst [vmem:[#allocation13_spill] sm:$0xff] %v16549_v26  ;;  %v16556_v63 = vadd.f32 %v8587_v7, %v8234_v41 }
 0x385   : > { %v16558_v51 = vpop.f32.mrf.mxu1  ;;  %v16560_v2 = vpop.f32.mrf.mxu0 }
 0x386   : > { %17222 = vst [vmem:[#allocation14_spill] sm:$0xff] %v16556_v63 }
 0x387   : > { %v16562_v50 = vpop.f32.mrf.mxu1  ;;  %v16564_v30 = vpop.f32.mrf.mxu0 }
 0x389   : > { %v16566_v54 = vpop.f32.mrf.mxu1  ;;  %v16568_v27 = vpop.f32.mrf.mxu0 }
 0x38b   : > { %v16570_v6 = vpop.f32.mrf.mxu1  ;;  %v16572_v33 = vpop.f32.mrf.mxu0 }
 0x38d   : > { %v16574_v10 = vpop.f32.mrf.mxu1  ;;  %v16576_v16 = vpop.f32.mrf.mxu0 }
 0x38f   : > { %v16578_v58 = vpop.f32.mrf.mxu1  ;;  %v16580_v59 = vpop.f32.mrf.mxu0 }
 0x391   : > { %v16582_v4 = vpop.f32.mrf.mxu1  ;;  %v16584_v17 = vpop.f32.mrf.mxu0 }
 0x393   : > { %v16586_v25 = vpop.f32.mrf.mxu1  ;;  %v16588_v46 = vpop.f32.mrf.mxu0 }
 0x395   : > { %v16590_v39 = vpop.f32.mrf.mxu1  ;;  %v16592_v21 = vpop.f32.mrf.mxu0 }
 0x397   : > { %v16594_v9 = vpop.f32.mrf.mxu1  ;;  %v16596_v43 = vpop.f32.mrf.mxu0 }
 0x399   : > { %v16598_v45 = vpop.f32.mrf.mxu1  ;;  %v16600_v38 = vpop.f32.mrf.mxu0 }
 0x39b   : > { %v16602_v60 = vpop.f32.mrf.mxu1  ;;  %v16604_v40 = vpop.f32.mrf.mxu0 }
 0x39d   : > { %v16606_v15 = vpop.f32.mrf.mxu1  ;;  %v16608_v44 = vpop.f32.mrf.mxu0 }
 0x39f   : > { %v16610_v37 = vpop.f32.mrf.mxu1  ;;  %v16612_v35 = vpop.f32.mrf.mxu0 }
 0x3a1   : > { %v16614_v7 = vpop.f32.mrf.mxu1  ;;  %v16616_v41 = vpop.f32.mrf.mxu0 }
 0x3a3   : > { %v16618_v63 = vpop.f32.mrf.mxu1  ;;  %v16620_v26 = vpop.f32.mrf.mxu0 }
 0x3a5   : > { %v16622_v19 = vpop.f32.mrf.mxu1  ;;  %v16624_v31 = vpop.f32.mrf.mxu0 }
 0x3a6   : > { %17223 = vst [vmem:[#allocation15_spill] sm:$0xff] %v16624_v31 }
 0x3a7   : > { %v16626_v48 = vpop.f32.mrf.mxu1  ;;  %v16628_v56 = vpop.f32.mrf.mxu0 }
 0x3a8   : > { %17224 = vst [vmem:[#allocation16_spill] sm:$0xff] %v16626_v48  ;;  %17225 = vst [vmem:[#allocation17_spill] sm:$0xff] %v16628_v56 }
 0x3a9   : > { %v16630_v32 = vpop.f32.mrf.mxu1  ;;  %v16632_v18 = vpop.f32.mrf.mxu0 }
 0x3aa   : > { %17226 = vst [vmem:[#allocation18_spill] sm:$0xff] %v16630_v32  ;;  %17227 = vst [vmem:[#allocation19_spill] sm:$0xff] %v16632_v18 }
 0x3ab   : > { %v16634_v13 = vpop.f32.mrf.mxu1  ;;  %v16636_v5 = vpop.f32.mrf.mxu0 }
 0x3ac   : > { %17228 = vst [vmem:[#allocation20_spill] sm:$0xff] %v16634_v13  ;;  %17229 = vst [vmem:[#allocation21_spill] sm:$0xff] %v16636_v5 }
 0x3ad   : > { %v16638_v53 = vpop.f32.mrf.mxu1  ;;  %v16640_v28 = vpop.f32.mrf.mxu0 }
 0x3ae   : > { %17230 = vst [vmem:[#allocation22_spill] sm:$0xff] %v16638_v53  ;;  %17231 = vst [vmem:[#allocation23_spill] sm:$0xff] %v16640_v28 }
 0x3af   : > { %v16642_v23 = vpop.f32.mrf.mxu1  ;;  %v16644_v31 = vpop.f32.mrf.mxu0 }
 0x3b0   : > { %17232 = vst [vmem:[#allocation24_spill] sm:$0xff] %v16642_v23  ;;  %17233 = vst [vmem:[#allocation25_spill] sm:$0xff] %v16644_v31 }
 0x3b1   : > { %v16646_v48 = vpop.f32.mrf.mxu1  ;;  %v16648_v56 = vpop.f32.mrf.mxu0 }
 0x3b2   : > { %17234 = vst [vmem:[#allocation26_spill] sm:$0xff] %v16648_v56 }
 0x3b3   : > { %v16650_v32 = vpop.f32.mrf.mxu1  ;;  %v16652_v18 = vpop.f32.mrf.mxu0 }
 0x3b4   : > { %17235 = vst [vmem:[#allocation27_spill] sm:$0xff] %v16650_v32  ;;  %17236 = vst [vmem:[#allocation28_spill] sm:$0xff] %v16652_v18 }
 0x3b5   : > { %v16654_v13 = vpop.f32.mrf.mxu1  ;;  %v16656_v5 = vpop.f32.mrf.mxu0 }
 0x3b6   : > { %17237 = vst [vmem:[#allocation29_spill] sm:$0xff] %v16654_v13  ;;  %17238 = vst [vmem:[#allocation30_spill] sm:$0xff] %v16656_v5  ;;  %v8995_v5 = vadd.f32 %v16552_v0, %v16459_v49  ;;  %v8994_v49 = vadd.f32 %v16566_v54, %v16468_v22 }
 0x3b7   : > { %v16659_v53 = vpop.f32.mrf.mxu1  ;;  %v16661_v28 = vpop.f32.mrf.mxu0 }
 0x3b8   : > { %17239 = vst [vmem:[#allocation31_spill] sm:$0xff] %v16659_v53  ;;  %17240 = vst [vmem:[#allocation32_spill] sm:$0xff] %v16661_v28  ;;  %v9388_v54 = vadd.f32 %v16568_v27, %v8994_v49  ;;  %v9000_v27 = vadd.f32 %v16578_v58, %v16477_v42  ;;  %v8998_v49 = vadd.f32 %v16582_v4, %v16480_v52 }
 0x3b9   : > { %v16663_v23 = vpop.f32.mrf.mxu1  ;;  %v16665_v31 = vpop.f32.mrf.mxu0 }
 0x3ba   : > { %17241 = vst [vmem:[#allocation33_spill] sm:$0xff] %v16663_v23  ;;  %17242 = vst [vmem:[#allocation34_spill] sm:$0xff] %v16665_v31  ;;  %v8993_v31 = vadd.f32 %v16558_v51, %v16462_v14  ;;  %v8999_v14 = vadd.f32 %v16570_v6, %v16471_v47  ;;  %v16703_v51 = vld [vmem:[%s17205_s6] ss:$0 sm:$0xff]  ;;  %v9394_v52 = vadd.f32 %v16580_v59, %v9000_v27 }
 0x3bb   : > { %v16670_v56 = vpop.f32.mrf.mxu1  ;;  %v16672_v32 = vpop.f32.mrf.mxu0 }
 0x3bc   : > { %17243 = vst [vmem:[#allocation35_spill] sm:$0xff] %v16670_v56  ;;  %17244 = vst [vmem:[#allocation36_spill] sm:$0xff] %v16672_v32  ;;  %v9389_v32 = vadd.f32 %v16554_v3, %v8995_v5 }
 0x3bd   : > { %v16674_v18 = vpop.f32.mrf.mxu1  ;;  %v16676_v13 = vpop.f32.mrf.mxu0 }
 0x3be   : > { %17245 = vst [vmem:[#allocation37_spill] sm:$0xff] %v16674_v18  ;;  %17246 = vst [vmem:[#allocation38_spill] sm:$0xff] %v16676_v13  ;;  %v8996_v13 = vadd.f32 %v16562_v50, %v16465_v55 }
 0x3bf   : > { %v16682_v28 = vpop.f32.mrf.mxu1  ;;  %v16684_v23 = vpop.f32.mrf.mxu0 }
 0x3c0   : > { %17247 = vst [vmem:[#allocation39_spill] sm:$0xff] %v16682_v28  ;;  %17248 = vst [vmem:[#allocation40_spill] sm:$0xff] %v16684_v23  ;;  %v9387_v23 = vadd.f32 %v16560_v2, %v8993_v31  ;;  %v9390_v55 = vadd.f32 %v16564_v30, %v8996_v13  ;;  %v8997_v31 = vadd.f32 %v16574_v10, %v16474_v1 }
 0x3c1   : > { %v16688_v53 = vpop.f32.mrf.mxu1  ;;  %v16690_v56 = vpop.f32.mrf.mxu0  ;;  %v9393_v13 = vadd.f32 %v16572_v33, %v8999_v14 }
 0x3c2   : > { %v9391_v33 = vadd.f32 %v16576_v16, %v8997_v31 }
 0x3c3   : > { %v13417_v0 = vpop.f32.mrf.mxu1  ;;  %v13459_v28 = vpop.f32.mrf.mxu0 }
 0x3c4   : > { %v9783_v18 = vadd.f32 %v13417_v0, %v9389_v32 }
 0x3c5   : > { %v9654_v5 = vpop.f32.mrf.mxu1  ;;  %v10048_v3 = vpop.f32.mrf.mxu0 }
 0x3c6   : > { %v10177_v50 = vadd.f32 %v13459_v28, %v9783_v18  ;;  %v9781_v22 = vadd.f32 %v9654_v5, %v9387_v23 }
 0x3c7   : > { %v13418_v47 = vpop.f32.mrf.mxu1  ;;  %v13460_v32 = vpop.f32.mrf.mxu0 }
 0x3c8   : > { %v16715_v2 = vadd.f32 %v16703_v51, %v10177_v50  ;;  %v10175_v28 = vadd.f32 %v10048_v3, %v9781_v22  ;;  %v9784_v23 = vadd.f32 %v13418_v47, %v9390_v55  ;;  %v9003_v3 = vadd.f32 %v16586_v25, %v16483_v24 }
 0x3c9   : > { %v9657_v18 = vpop.f32.mrf.mxu1  ;;  %v10051_v30 = vpop.f32.mrf.mxu0  ;;  %v9001_v47 = vadd.f32 %v16590_v39, %v16486_v57  ;;  %v9004_v57 = vadd.f32 %v16594_v9, %v16489_v12  ;;  %v9002_v12 = vadd.f32 %v16598_v45, %v16492_v61  ;;  %v9007_v61 = vadd.f32 %v16602_v60, %v16495_v11 }
 0x3ca   : > { %10249 = vst.msk [vmem:[%s16710_s29 + $0x10] sm:$0xff] %vm10246_vm1, %v16715_v2  ;;  %v16724_v6 = vadd.f32 %v16703_v51, %v10175_v28  ;;  %v10178_v1 = vadd.f32 %v13460_v32, %v9784_v23  ;;  %v9782_v10 = vadd.f32 %v9657_v18, %v9388_v54  ;;  %v9392_v54 = vadd.f32 %v16584_v17, %v8998_v49 }
 0x3cb   : > { %v13421_v0 = vpop.f32.mrf.mxu1  ;;  %v13463_v5 = vpop.f32.mrf.mxu0  ;;  %v9397_v23 = vadd.f32 %v16588_v46, %v9003_v3  ;;  %v9395_v46 = vadd.f32 %v16592_v21, %v9001_v47  ;;  %v9398_v21 = vadd.f32 %v16596_v43, %v9004_v57  ;;  %v9005_v11 = vadd.f32 %v16606_v15, %v16498_v34 }
 0x3cc   : > { %10247 = vst.msk [vmem:[%s16710_s29] sm:$0xff] %vm10246_vm1, %v16724_v6  ;;  %v16733_v42 = vadd.f32 %v16703_v51, %v10178_v1  ;;  %v10176_v58 = vadd.f32 %v10051_v30, %v9782_v10  ;;  %v9787_v14 = vadd.f32 %v13421_v0, %v9393_v13  ;;  %v10279_v24 = vsel %vm10246_vm1, %v16724_v6, 0.0 }
 0x3cd   : > { %v9670_v55 = vpop.f32.mrf.mxu1  ;;  %v10064_v50 = vpop.f32.mrf.mxu0  ;;  %v10282_v30 = vsel %vm10246_vm1, %v16715_v2, 0.0  ;;  %v9008_v34 = vadd.f32 %v16610_v37, %v16501_v20  ;;  %v9006_v20 = vadd.f32 %v16614_v7, %v16504_v62  ;;  %v9011_v62 = vadd.f32 %v16618_v63, %v16507_v36 }
 0x3ce   : > { %10250 = vst.msk [vmem:[%s16710_s29 + $0x18] sm:$0xff] %vm10246_vm1, %v16733_v42  ;;  %v16742_v16 = vadd.f32 %v16703_v51, %v10176_v58  ;;  %v10181_v4 = vadd.f32 %v13463_v5, %v9787_v14  ;;  %v9785_v22 = vadd.f32 %v9670_v55, %v9391_v33  ;;  %v10284_v5 = vsel %vm10246_vm1, %v16733_v42, 0.0 }
 0x3cf   : > { %v13422_v25 = vpop.f32.mrf.mxu1  ;;  %v13464_v32 = vpop.f32.mrf.mxu0  ;;  %v9009_v36 = vadd.f32 %v16622_v19, %v16510_v29 }
 0x3d0   : > { %10248 = vst.msk [vmem:[%s16710_s29 + $0x8] sm:$0xff] %vm10246_vm1, %v16742_v16  ;;  %v10280_v59 = vsel %vm10246_vm1, %v16742_v16, 0.0  ;;  %v16755_v31 = vadd.f32 %v16703_v51, %v10181_v4  ;;  %v10179_v28 = vadd.f32 %v10064_v50, %v9785_v22  ;;  %v9788_v17 = vadd.f32 %v13422_v25, %v9394_v52 }
 0x3d1   : > { %v10281_v39 = vadd.f32 %v10280_v59, %v10279_v24  ;;  %v9673_v13 = vpop.f32.mrf.mxu1  ;;  %v10067_v18 = vpop.f32.mrf.mxu0 }
 0x3d2   : > { %10253 = vst.msk [vmem:[%s16710_s29 + $0x30] sm:$0xff] %vm10246_vm1, %v16755_v31  ;;  %v16766_v27 = vadd.f32 %v16703_v51, %v10179_v28  ;;  %v10182_v1 = vadd.f32 %v13464_v32, %v9788_v17  ;;  %v9786_v10 = vadd.f32 %v9673_v13, %v9392_v54  ;;  %v9396_v54 = vadd.f32 %v16600_v38, %v9002_v12 }
 0x3d3   : > { %v10283_v9 = vadd.f32 %v10282_v30, %v10281_v39  ;;  %v13425_v49 = vpop.f32.mrf.mxu1  ;;  %v13467_v0 = vpop.f32.mrf.mxu0  ;;  %v9401_v38 = vadd.f32 %v16604_v40, %v9007_v61  ;;  %v9399_v40 = vadd.f32 %v16608_v44, %v9005_v11  ;;  %v9402_v44 = vadd.f32 %v16612_v35, %v9008_v34 }
 0x3d4   : > { %10251 = vst.msk [vmem:[%s16710_s29 + $0x20] sm:$0xff] %vm10246_vm1, %v16766_v27  ;;  %v16777_v33 = vadd.f32 %v16703_v51, %v10182_v1  ;;  %v10180_v58 = vadd.f32 %v10067_v18, %v9786_v10  ;;  %v9791_v14 = vadd.f32 %v13425_v49, %v9397_v23  ;;  %v10286_v50 = vsel %vm10246_vm1, %v16766_v27, 0.0 }
 0x3d5   : > { %v10285_v45 = vadd.f32 %v10284_v5, %v10283_v9  ;;  %v9686_v3 = vpop.f32.mrf.mxu1  ;;  %v10080_v55 = vpop.f32.mrf.mxu0  ;;  %v10290_v23 = vsel %vm10246_vm1, %v16755_v31, 0.0 }
 0x3d6   : > { %10254 = vst.msk [vmem:[%s16710_s29 + $0x38] sm:$0xff] %vm10246_vm1, %v16777_v33  ;;  %v16788_v52 = vadd.f32 %v16703_v51, %v10180_v58  ;;  %v10185_v4 = vadd.f32 %v13467_v0, %v9791_v14  ;;  %v9789_v22 = vadd.f32 %v9686_v3, %v9395_v46  ;;  %v10292_v1 = vsel %vm10246_vm1, %v16777_v33, 0.0 }
 0x3d7   : > { %v10287_v43 = vadd.f32 %v10286_v50, %v10285_v45  ;;  %v13426_v60 = vpop.f32.mrf.mxu1  ;;  %v13468_v47 = vpop.f32.mrf.mxu0 }
 0x3d8   : > { %10252 = vst.msk [vmem:[%s16710_s29 + $0x28] sm:$0xff] %vm10246_vm1, %v16788_v52  ;;  %v10288_v24 = vsel %vm10246_vm1, %v16788_v52, 0.0  ;;  %v16799_v25 = vadd.f32 %v16703_v51, %v10185_v4  ;;  %v10183_v32 = vadd.f32 %v10080_v55, %v9789_v22  ;;  %v9792_v59 = vadd.f32 %v13426_v60, %v9398_v21  ;;  %v17249_v4 = vld [vmem:[#allocation16_spill] sm:$0xff] }
 0x3d9   : > { %v10289_v15 = vadd.f32 %v10288_v24, %v10287_v43  ;;  %v9689_v28 = vpop.f32.mrf.mxu1  ;;  %v10083_v17 = vpop.f32.mrf.mxu0  ;;  %v9400_v21 = vadd.f32 %v16616_v41, %v9006_v20  ;;  %v9405_v41 = vadd.f32 %v16620_v26, %v9011_v62  ;;  %v9012_v29 = vadd.f32 %v17249_v4, %v16513_v8  ;;  %v17250_v24 = vld [vmem:[#allocation15_spill] sm:$0xff]  ;;  %v17260_v4 = vld [vmem:[#allocation5_spill] sm:$0xff] }
 0x3da   : > { %10257 = vst.msk [vmem:[%s16710_s29 + $0x50] sm:$0xff] %vm10246_vm1, %v16799_v25  ;;  %v16810_v57 = vadd.f32 %v16703_v51, %v10183_v32  ;;  %v10186_v39 = vadd.f32 %v13468_v47, %v9792_v59  ;;  %v9790_v13 = vadd.f32 %v9689_v28, %v9396_v54  ;;  %v10298_v11 = vsel %vm10246_vm1, %v16799_v25, 0.0  ;;  %v17251_v32 = vld [vmem:[#allocation2_spill] sm:$0xff]  ;;  %v17254_v20 = vld [vmem:[#allocation3_spill] sm:$0xff] }
 0x3db   : > { %v10291_v37 = vadd.f32 %v10290_v23, %v10289_v15  ;;  %v13429_v18 = vpop.f32.mrf.mxu1  ;;  %v13471_v30 = vpop.f32.mrf.mxu0  ;;  %v9403_v26 = vadd.f32 %v17250_v24, %v9009_v36  ;;  %v17252_v59 = vld [vmem:[#allocation18_spill] sm:$0xff] }
 0x3dc   : > { %10255 = vst.msk [vmem:[%s16710_s29 + $0x40] sm:$0xff] %vm10246_vm1, %v16810_v57  ;;  %v16821_v10 = vadd.f32 %v16703_v51, %v10186_v39  ;;  %v10184_v46 = vadd.f32 %v10083_v17, %v9790_v13  ;;  %v9795_v12 = vadd.f32 %v13429_v18, %v9401_v38  ;;  %v10294_v0 = vsel %vm10246_vm1, %v16810_v57, 0.0  ;;  %v17253_v13 = vld [vmem:[#allocation17_spill] sm:$0xff] }
 0x3dd   : > { %v10293_v7 = vadd.f32 %v10292_v1, %v10291_v37  ;;  %v9702_v9 = vpop.f32.mrf.mxu1  ;;  %v10096_v49 = vpop.f32.mrf.mxu0  ;;  %v9010_v8 = vadd.f32 %v17252_v59, %v17251_v32  ;;  %v17255_v37 = vld [vmem:[#allocation20_spill] sm:$0xff]  ;;  %v17262_v32 = vld [vmem:[#allocation23_spill] sm:$0xff] }
 0x3de   : > { %10258 = vst.msk [vmem:[%s16710_s29 + $0x58] sm:$0xff] %vm10246_vm1, %v16821_v10  ;;  %v16832_v5 = vadd.f32 %v16703_v51, %v10184_v46  ;;  %v10189_v58 = vadd.f32 %v13471_v30, %v9795_v12  ;;  %v9793_v14 = vadd.f32 %v9702_v9, %v9399_v40  ;;  %v10300_v28 = vsel %vm10246_vm1, %v16821_v10, 0.0  ;;  %v17256_v9 = vld [vmem:[#allocation19_spill] sm:$0xff] }
 0x3df   : > { %v10295_v63 = vadd.f32 %v10294_v0, %v10293_v7  ;;  %v13430_v35 = vpop.f32.mrf.mxu1  ;;  %v13472_v61 = vpop.f32.mrf.mxu0  ;;  %v9406_v40 = vadd.f32 %v17253_v13, %v9012_v29  ;;  %v9015_v18 = vadd.f32 %v17255_v37, %v17254_v20  ;;  %v17257_v0 = vld [vmem:[#allocation4_spill] sm:$0xff]  ;;  %v17264_v20 = vld [vmem:[#allocation25_spill] sm:$0xff] }
 0x3e0   : > { %10256 = vst.msk [vmem:[%s16710_s29 + $0x48] sm:$0xff] %vm10246_vm1, %v16832_v5  ;;  %v10296_v45 = vsel %vm10246_vm1, %v16832_v5, 0.0  ;;  %v16843_v3 = vadd.f32 %v16703_v51, %v10189_v58  ;;  %v10187_v55 = vadd.f32 %v10096_v49, %v9793_v14  ;;  %v9796_v50 = vadd.f32 %v13430_v35, %v9402_v44  ;;  %v17258_v58 = vld [vmem:[#allocation22_spill] sm:$0xff]  ;;  %v17261_v29 = vld [vmem:[#allocation24_spill] sm:$0xff] }
 0x3e1   : > { %v10297_v19 = vadd.f32 %v10296_v45, %v10295_v63  ;;  %v9705_v22 = vpop.f32.mrf.mxu1  ;;  %v10099_v54 = vpop.f32.mrf.mxu0  ;;  %v9404_v49 = vadd.f32 %v17256_v9, %v9010_v8  ;;  %v9013_v14 = vadd.f32 %v17258_v58, %v17257_v0  ;;  %v17263_v8 = vld [vmem:[#allocation6_spill] sm:$0xff] }
 0x3e2   : > { %10261 = vst.msk [vmem:[%s16710_s29 + $0x70] sm:$0xff] %vm10246_vm1, %v16843_v3  ;;  %v16854_v43 = vadd.f32 %v16703_v51, %v10187_v55  ;;  %v10190_v60 = vadd.f32 %v13472_v61, %v9796_v50  ;;  %v9794_v47 = vadd.f32 %v9705_v22, %v9400_v21  ;;  %v17259_v50 = vld [vmem:[#allocation21_spill] sm:$0xff]  ;;  %v17267_v0 = vld [vmem:[#allocation26_spill] sm:$0xff] }
 0x3e3   : > { %v10299_v38 = vadd.f32 %v10298_v11, %v10297_v19  ;;  %v13433_v34 = vpop.f32.mrf.mxu1  ;;  %v13475_v15 = vpop.f32.mrf.mxu0  ;;  %v9016_v19 = vadd.f32 %v17261_v29, %v17260_v4  ;;  %v9407_v59 = vadd.f32 %v17262_v32, %v9013_v14  ;;  %v17268_v14 = vld [vmem:[#allocation8_spill] sm:$0xff] }
 0x3e4   : > { %10259 = vst.msk [vmem:[%s16710_s29 + $0x60] sm:$0xff] %vm10246_vm1, %v16854_v43  ;;  %v16865_v17 = vadd.f32 %v16703_v51, %v10190_v60  ;;  %v10188_v23 = vadd.f32 %v10099_v54, %v9794_v47  ;;  %v9799_v39 = vadd.f32 %v13433_v34, %v9405_v41  ;;  %v10302_v12 = vsel %vm10246_vm1, %v16854_v43, 0.0  ;;  %v17270_v29 = vld [vmem:[#allocation28_spill] sm:$0xff] }
 0x3e5   : > { %v10301_v30 = vadd.f32 %v10300_v28, %v10299_v38  ;;  %v9718_v1 = vpop.f32.mrf.mxu1  ;;  %v10112_v46 = vpop.f32.mrf.mxu0  ;;  %v9409_v41 = vadd.f32 %v17259_v50, %v9015_v18  ;;  %v10306_v60 = vsel %vm10246_vm1, %v16843_v3, 0.0  ;;  %v9014_v38 = vadd.f32 %v16646_v48, %v17263_v8  ;;  %v17265_v18 = vld [vmem:[#allocation7_spill] sm:$0xff] }
 0x3e6   : > { %10262 = vst.msk [vmem:[%s16710_s29 + $0x78] sm:$0xff] %vm10246_vm1, %v16865_v17  ;;  %v16876_v44 = vadd.f32 %v16703_v51, %v10188_v23  ;;  %v10193_v62 = vadd.f32 %v13475_v15, %v9799_v39  ;;  %v9797_v7 = vadd.f32 %v9718_v1, %v9403_v26  ;;  %v10308_v23 = vsel %vm10246_vm1, %v16865_v17, 0.0 }
 0x3e7   : > { %v10303_v21 = vadd.f32 %v10302_v12, %v10301_v30  ;;  %v13434_v36 = vpop.f32.mrf.mxu1  ;;  %v13476_v63 = vpop.f32.mrf.mxu0  ;;  %v9410_v37 = vadd.f32 %v17264_v20, %v9016_v19  ;;  %v17266_v30 = vld [vmem:[#allocation27_spill] sm:$0xff]  ;;  %v9408_v58 = vadd.f32 %v17267_v0, %v9014_v38 }
 0x3e8   : > { %10260 = vst.msk [vmem:[%s16710_s29 + $0x68] sm:$0xff] %vm10246_vm1, %v16876_v44  ;;  %v10304_v35 = vsel %vm10246_vm1, %v16876_v44, 0.0  ;;  %v16887_v61 = vadd.f32 %v16703_v51, %v10193_v62  ;;  %v10191_v45 = vadd.f32 %v10112_v46, %v9797_v7  ;;  %v9800_v55 = vadd.f32 %v13434_v36, %v9406_v40 }
 0x3e9   : > { %v10305_v22 = vadd.f32 %v10304_v35, %v10303_v21  ;;  %v9721_v54 = vpop.f32.mrf.mxu1  ;;  %v10115_v11 = vpop.f32.mrf.mxu0  ;;  %v9019_v48 = vadd.f32 %v17266_v30, %v17265_v18  ;;  %v17269_v21 = vld [vmem:[#allocation29_spill] sm:$0xff] }
 0x3ea   : > { %10265 = vst.msk [vmem:[%s16710_s29 + $0x90] sm:$0xff] %vm10246_vm1, %v16887_v61  ;;  %v16898_v47 = vadd.f32 %v16703_v51, %v10191_v45  ;;  %v10194_v24 = vadd.f32 %v13476_v63, %v9800_v55  ;;  %v9798_v26 = vadd.f32 %v9721_v54, %v9404_v49  ;;  %v9017_v36 = vadd.f32 %v17269_v21, %v17268_v14  ;;  %v17272_v54 = vld [vmem:[#allocation31_spill] sm:$0xff] }
 0x3eb   : > { %v10307_v34 = vadd.f32 %v10306_v60, %v10305_v22  ;;  %v13437_v15 = vpop.f32.mrf.mxu1  ;;  %v13479_v28 = vpop.f32.mrf.mxu0  ;;  %v9413_v19 = vadd.f32 %v17270_v29, %v9019_v48  ;;  %v17271_v22 = vld [vmem:[#allocation9_spill] sm:$0xff]  ;;  %v10314_v32 = vsel %vm10246_vm1, %v16887_v61, 0.0 }
 0x3ec   : > { %10263 = vst.msk [vmem:[%s16710_s29 + $0x80] sm:$0xff] %vm10246_vm1, %v16898_v47  ;;  %v16909_v39 = vadd.f32 %v16703_v51, %v10194_v24  ;;  %v10192_v13 = vadd.f32 %v10115_v11, %v9798_v26  ;;  %v9803_v40 = vadd.f32 %v13437_v15, %v9409_v41  ;;  %v10310_v62 = vsel %vm10246_vm1, %v16898_v47, 0.0 }
 0x3ed   : > { %v10309_v1 = vadd.f32 %v10308_v23, %v10307_v34  ;;  %v9734_v46 = vpop.f32.mrf.mxu1  ;;  %v10128_v12 = vpop.f32.mrf.mxu0  ;;  %v9020_v11 = vadd.f32 %v17272_v54, %v17271_v22  ;;  %v17273_v34 = vld [vmem:[#allocation30_spill] sm:$0xff]  ;;  %v17275_v23 = vld [vmem:[#allocation33_spill] sm:$0xff] }
 0x3ee   : > { %10266 = vst.msk [vmem:[%s16710_s29 + $0x98] sm:$0xff] %vm10246_vm1, %v16909_v39  ;;  %v16920_v7 = vadd.f32 %v16703_v51, %v10192_v13  ;;  %v10197_v9 = vadd.f32 %v13479_v28, %v9803_v40  ;;  %v9801_v49 = vadd.f32 %v9734_v46, %v9407_v59  ;;  %v9411_v15 = vadd.f32 %v17273_v34, %v9017_v36  ;;  %v17274_v28 = vld [vmem:[#allocation10_spill] sm:$0xff]  ;;  %v17276_v46 = vld [vmem:[#allocation32_spill] sm:$0xff]  ;;  %v17284_v34 = vld [vmem:[#allocation39_spill] sm:$0xff] }
 0x3ef   : > { %v10311_v63 = vadd.f32 %v10310_v62, %v10309_v1  ;;  %v13438_v35 = vpop.f32.mrf.mxu1  ;;  %v13480_v45 = vpop.f32.mrf.mxu0  ;;  %v9018_v13 = vadd.f32 %v17275_v23, %v17274_v28  ;;  %v10316_v18 = vsel %vm10246_vm1, %v16909_v39, 0.0  ;;  %v17277_v62 = vld [vmem:[#allocation11_spill] sm:$0xff] }
 0x3f0   : > { %10264 = vst.msk [vmem:[%s16710_s29 + $0x88] sm:$0xff] %vm10246_vm1, %v16920_v7  ;;  %v10312_v55 = vsel %vm10246_vm1, %v16920_v7, 0.0  ;;  %v16931_v50 = vadd.f32 %v16703_v51, %v10197_v9  ;;  %v10195_v41 = vadd.f32 %v10128_v12, %v9801_v49  ;;  %v9804_v4 = vadd.f32 %v13438_v35, %v9410_v37  ;;  %v17278_v9 = vld [vmem:[#allocation35_spill] sm:$0xff] }
 0x3f1   : > { %v10313_v60 = vadd.f32 %v10312_v55, %v10311_v63  ;;  %v9737_v24 = vpop.f32.mrf.mxu1  ;;  %v10131_v26 = vpop.f32.mrf.mxu0  ;;  %v9414_v12 = vadd.f32 %v17276_v46, %v9020_v11  ;;  %v9023_v49 = vadd.f32 %v17278_v9, %v17277_v62  ;;  %v17286_v46 = vld [vmem:[#allocation14_spill] sm:$0xff] }
 0x3f2   : > { %10269 = vst.msk [vmem:[%s16710_s29 + $0xb0] sm:$0xff] %vm10246_vm1, %v16931_v50  ;;  %v16942_v59 = vadd.f32 %v16703_v51, %v10195_v41  ;;  %v10198_v8 = vadd.f32 %v13480_v45, %v9804_v4  ;;  %v9802_v38 = vadd.f32 %v9737_v24, %v9408_v58  ;;  %v17279_v45 = vld [vmem:[#allocation34_spill] sm:$0xff]  ;;  %v17280_v41 = vld [vmem:[#allocation12_spill] sm:$0xff]  ;;  %v17281_v4 = vld [vmem:[#allocation37_spill] sm:$0xff] }
 0x3f3   : > { %v10315_v40 = vadd.f32 %v10314_v32, %v10313_v60  ;;  %v13441_v20 = vpop.f32.mrf.mxu1  ;;  %v13483_v37 = vpop.f32.mrf.mxu0  ;;  %v9412_v55 = vadd.f32 %v17279_v45, %v9018_v13  ;;  %v9021_v29 = vadd.f32 %v17281_v4, %v17280_v41  ;;  %v17282_v32 = vld [vmem:[#allocation36_spill] sm:$0xff] }
 0x3f4   : > { %10267 = vst.msk [vmem:[%s16710_s29 + $0xa0] sm:$0xff] %vm10246_vm1, %v16942_v59  ;;  %v16953_v30 = vadd.f32 %v16703_v51, %v10198_v8  ;;  %v10196_v48 = vadd.f32 %v10131_v26, %v9802_v38  ;;  %v9807_v1 = vadd.f32 %v13441_v20, %v9413_v19  ;;  %v10318_v21 = vsel %vm10246_vm1, %v16942_v59, 0.0  ;;  %v17283_v38 = vld [vmem:[#allocation13_spill] sm:$0xff] }
 0x3f5   : > { %v10317_v0 = vadd.f32 %v10316_v18, %v10315_v40  ;;  %v9750_v58 = vpop.f32.mrf.mxu1  ;;  %v10144_v14 = vpop.f32.mrf.mxu0  ;;  %v9417_v8 = vadd.f32 %v17282_v32, %v9023_v49  ;;  %v10322_v40 = vsel %vm10246_vm1, %v16931_v50, 0.0 }
 0x3f6   : > { %10270 = vst.msk [vmem:[%s16710_s29 + $0xb8] sm:$0xff] %vm10246_vm1, %v16953_v30  ;;  %v16964_v36 = vadd.f32 %v16703_v51, %v10196_v48  ;;  %v10201_v63 = vadd.f32 %v13483_v37, %v9807_v1  ;;  %v9805_v35 = vadd.f32 %v9750_v58, %v9411_v15  ;;  %v9024_v15 = vadd.f32 %v17284_v34, %v17283_v38  ;;  %v17285_v48 = vld [vmem:[#allocation38_spill] sm:$0xff] }
 0x3f7   : > { %v10319_v19 = vadd.f32 %v10318_v21, %v10317_v0  ;;  %v13442_v22 = vpop.f32.mrf.mxu1  ;;  %v13484_v54 = vpop.f32.mrf.mxu0  ;;  %v9415_v1 = vadd.f32 %v17285_v48, %v9021_v29  ;;  %v10324_v0 = vsel %vm10246_vm1, %v16953_v30, 0.0 }
 0x3f8   : > { %10268 = vst.msk [vmem:[%s16710_s29 + $0xa8] sm:$0xff] %vm10246_vm1, %v16964_v36  ;;  %v10320_v11 = vsel %vm10246_vm1, %v16964_v36, 0.0  ;;  %v16975_v60 = vadd.f32 %v16703_v51, %v10201_v63  ;;  %v10199_v24 = vadd.f32 %v10144_v14, %v9805_v35  ;;  %v9808_v26 = vadd.f32 %v13442_v22, %v9414_v12  ;;  %v17287_v63 = vld [vmem:[#allocation40_spill] sm:$0xff] }
 0x3f9   : > { %v10321_v28 = vadd.f32 %v10320_v11, %v10319_v19  ;;  %v9753_v23 = vpop.f32.mrf.mxu1  ;;  %v10147_v13 = vpop.f32.mrf.mxu0  ;;  %v9022_v12 = vadd.f32 %v16688_v53, %v17286_v46  ;;  %v9418_v35 = vadd.f32 %v17287_v63, %v9024_v15 }
 0x3fa   : > { %10273 = vst.msk [vmem:[%s16710_s29 + $0xd0] sm:$0xff] %vm10246_vm1, %v16975_v60  ;;  %v16986_v20 = vadd.f32 %v16703_v51, %v10199_v24  ;;  %v10202_v37 = vadd.f32 %v13484_v54, %v9808_v26  ;;  %v9806_v18 = vadd.f32 %v9753_v23, %v9412_v55 }
 0x3fb   : > { %v10323_v62 = vadd.f32 %v10322_v40, %v10321_v28  ;;  %v13445_v9 = vpop.f32.mrf.mxu1  ;;  %v13487_v49 = vpop.f32.mrf.mxu0  ;;  %v9416_v22 = vadd.f32 %v16690_v56, %v9022_v12  ;;  %v10330_v56 = vsel %vm10246_vm1, %v16975_v60, 0.0 }
 0x3fc   : > { %10271 = vst.msk [vmem:[%s16710_s29 + $0xc0] sm:$0xff] %vm10246_vm1, %v16986_v20  ;;  %v16997_v58 = vadd.f32 %v16703_v51, %v10202_v37  ;;  %v10200_v14 = vadd.f32 %v10147_v13, %v9806_v18  ;;  %v9811_v21 = vadd.f32 %v13445_v9, %v9417_v8  ;;  %v10326_v41 = vsel %vm10246_vm1, %v16986_v20, 0.0 }
 0x3fd   : > { %v10325_v45 = vadd.f32 %v10324_v0, %v10323_v62  ;;  %v9766_v55 = vpop.f32.mrf.mxu1  ;;  %v10160_v53 = vpop.f32.mrf.mxu0 }
 0x3fe   : > { %10274 = vst.msk [vmem:[%s16710_s29 + $0xd8] sm:$0xff] %vm10246_vm1, %v16997_v58  ;;  %v17006_v4 = vadd.f32 %v16703_v51, %v10200_v14  ;;  %v10205_v29 = vadd.f32 %v13487_v49, %v9811_v21  ;;  %v9809_v19 = vadd.f32 %v9766_v55, %v9415_v1  ;;  %v10332_v18 = vsel %vm10246_vm1, %v16997_v58, 0.0 }
 0x3ff   : > { %v10327_v54 = vadd.f32 %v10326_v41, %v10325_v45  ;;  %v13446_v11 = vpop.f32.mrf.mxu1  ;;  %v13488_v24 = vpop.f32.mrf.mxu0 }
 0x400   : > { %10272 = vst.msk [vmem:[%s16710_s29 + $0xc8] sm:$0xff] %vm10246_vm1, %v17006_v4  ;;  %v10328_v26 = vsel %vm10246_vm1, %v17006_v4, 0.0  ;;  %v10244_v32 = vadd.f32 %v16703_v51, %v10205_v29  ;;  %v10203_v8 = vadd.f32 %v10160_v53, %v9809_v19  ;;  %v9812_v38 = vadd.f32 %v13446_v11, %v9418_v35 }
 0x401   : > { %v10329_v34 = vadd.f32 %v10328_v26, %v10327_v54  ;;  %v9769_v15 = vpop.f32.mrf.mxu1  ;;  %v10163_v37 = vpop.f32.mrf.mxu0 }
 0x402   : > { %10277 = vst.msk [vmem:[%s16710_s29 + $0xf0] sm:$0xff] %vm10246_vm1, %v10244_v32  ;;  %v10242_v28 = vadd.f32 %v16703_v51, %v10203_v8  ;;  %v10206_v23 = vadd.f32 %v13488_v24, %v9812_v38  ;;  %v9810_v13 = vadd.f32 %v9769_v15, %v9416_v22  ;;  %v10338_v14 = vsel %vm10246_vm1, %v10244_v32, 0.0 }
 0x403   : > { %v10331_v40 = vadd.f32 %v10330_v56, %v10329_v34 }
 0x404   : > { %10275 = vst.msk [vmem:[%s16710_s29 + $0xe0] sm:$0xff] %vm10246_vm1, %v10242_v28  ;;  %v10245_v48 = vadd.f32 %v16703_v51, %v10206_v23  ;;  %v10204_v1 = vadd.f32 %v10163_v37, %v9810_v13  ;;  %v10334_v12 = vsel %vm10246_vm1, %v10242_v28, 0.0 }
 0x405   : > { %v10333_v46 = vadd.f32 %v10332_v18, %v10331_v40 }
 0x406   : > { %10278 = vst.msk [vmem:[%s16710_s29 + $0xf8] sm:$0xff] %vm10246_vm1, %v10245_v48  ;;  %v10243_v62 = vadd.f32 %v16703_v51, %v10204_v1  ;;  %v10340_v63 = vsel %vm10246_vm1, %v10245_v48, 0.0 }
 0x407   : > { %v10335_v9 = vadd.f32 %v10334_v12, %v10333_v46 }
 0x408   : > { %10276 = vst.msk [vmem:[%s16710_s29 + $0xe8] sm:$0xff] %vm10246_vm1, %v10243_v62  ;;  %v10336_v49 = vsel %vm10246_vm1, %v10243_v62, 0.0 }
 0x409   : > { %v10337_v0 = vadd.f32 %v10336_v49, %v10335_v9 }
 0x40b   : > { %v10339_v21 = vadd.f32 %v10338_v14, %v10337_v0 }
 0x40d   : > { %v10341_v35 = vadd.f32 %v10340_v63, %v10339_v21 }
 0x40f   : > { %v10342_v45 = vrot.slane %v10341_v35, 4 }
 0x411   : > { %v10343_v55 = vadd.f32 %v10342_v45, %v10341_v35 }
 0x413   : > { %v10344_v53 = vrot.slane %v10343_v55, 2 }
 0x415   : > { %v10345_v51 = vadd.f32 %v10344_v53, %v10343_v55 }
 0x417   : > { %v10346_v41 = vrot.slane %v10345_v51, 1 }
 0x419   : > { %v10347_v29 = vadd.f32 %v10346_v41, %v10345_v51 }
 0x41b   : > { %v10348_v19 = vmul.f32 0.00390625, %v10347_v29  ;;  %10382 = vst.msk [vmem:[%s562_s20] sm:$0x1] %vm10381_vm2, %v10347_v29 }
 0x41d   : > { %v10358_v22 = vsub.f32 %v16832_v5, %v10348_v19  ;;  %v10361_v54 = vsub.f32 %v16854_v43, %v10348_v19  ;;  %v17046_v11 = vsub.f32 %v16876_v44, %v10348_v19  ;;  %v17049_v24 = vsub.f32 %v16843_v3, %v10348_v19 }
 0x41e   : > { %v17052_v26 = vsub.f32 %v16865_v17, %v10348_v19  ;;  %v17055_v8 = vsub.f32 %v16898_v47, %v10348_v19  ;;  %v17058_v38 = vsub.f32 %v16920_v7, %v10348_v19  ;;  %v17061_v34 = vsub.f32 %v16887_v61, %v10348_v19 }
 0x41f   : > { %v17064_v5 = vsub.f32 %v16909_v39, %v10348_v19  ;;  %v17067_v43 = vsub.f32 %v16942_v59, %v10348_v19  ;;  %v17070_v3 = vsub.f32 %v16964_v36, %v10348_v19  ;;  %v17073_v17 = vsub.f32 %v16931_v50, %v10348_v19 }
 0x420   : > { %v17076_v44 = vsub.f32 %v16953_v30, %v10348_v19  ;;  %v17079_v47 = vsub.f32 %v16986_v20, %v10348_v19  ;;  %v17082_v61 = vsub.f32 %v17006_v4, %v10348_v19  ;;  %v17085_v39 = vsub.f32 %v16975_v60, %v10348_v19 }
 0x421   : > { %v17088_v7 = vsub.f32 %v16997_v58, %v10348_v19  ;;  %v17090_v59 = vsub.f32 %v10242_v28, %v10348_v19  ;;  %v17092_v36 = vsub.f32 %v10243_v62, %v10348_v19  ;;  %v17094_v50 = vsub.f32 %v10244_v32, %v10348_v19 }
 0x422   : > { %v17096_v30 = vsub.f32 %v10245_v48, %v10348_v19  ;;  %v10349_v20 = vsub.f32 %v16724_v6, %v10348_v19  ;;  %v10350_v15 = vsub.f32 %v16742_v16, %v10348_v19  ;;  %v10351_v4 = vsub.f32 %v16715_v2, %v10348_v19 }
 0x423   : > { %v10352_v60 = vsub.f32 %v16733_v42, %v10348_v19  ;;  %v10353_v58 = vsub.f32 %v16766_v27, %v10348_v19  ;;  %v10354_v13 = vsub.f32 %v16788_v52, %v10348_v19  ;;  %v10355_v6 = vsub.f32 %v16755_v31, %v10348_v19 }
 0x424   : > { %v10383_v56 = vmul.f32 %v10349_v20, %v10349_v20  ;;  %v10384_v23 = vmul.f32 %v10350_v15, %v10350_v15  ;;  %v10385_v28 = vmul.f32 %v10351_v4, %v10351_v4  ;;  %v10356_v42 = vsub.f32 %v16777_v33, %v10348_v19 }
 0x425   : > { %v10386_v40 = vmul.f32 %v10352_v60, %v10352_v60  ;;  %v10387_v16 = vmul.f32 %v10353_v58, %v10353_v58  ;;  %v10388_v1 = vmul.f32 %v10354_v13, %v10354_v13  ;;  %v10357_v52 = vsub.f32 %v16810_v57, %v10348_v19 }
 0x426   : > { %v10415_v32 = vsel %vm10246_vm1, %v10383_v56, 0.0  ;;  %v10416_v37 = vsel %vm10246_vm1, %v10384_v23, 0.0  ;;  %v10418_v2 = vsel %vm10246_vm1, %v10385_v28, 0.0  ;;  %v10389_v12 = vmul.f32 %v10355_v6, %v10355_v6 }
 0x427   : > { %v10417_v18 = vadd.f32 %v10416_v37, %v10415_v32  ;;  %v10420_v27 = vsel %vm10246_vm1, %v10386_v40, 0.0  ;;  %v10422_v62 = vsel %vm10246_vm1, %v10387_v16, 0.0  ;;  %v10390_v49 = vmul.f32 %v10356_v42, %v10356_v42 }
 0x428   : > { %v10424_v0 = vsel %vm10246_vm1, %v10388_v1, 0.0  ;;  %v10359_v14 = vsub.f32 %v16799_v25, %v10348_v19  ;;  %v10391_v21 = vmul.f32 %v10357_v52, %v10357_v52  ;;  %v10426_v63 = vsel %vm10246_vm1, %v10389_v12, 0.0 }
 0x429   : > { %v10419_v48 = vadd.f32 %v10418_v2, %v10417_v18  ;;  %v10360_v35 = vsub.f32 %v16821_v10, %v10348_v19  ;;  %v10392_v45 = vmul.f32 %v10358_v22, %v10358_v22  ;;  %v10428_v55 = vsel %vm10246_vm1, %v10390_v49, 0.0 }
 0x42a   : > { %v10393_v53 = vmul.f32 %v10359_v14, %v10359_v14  ;;  %v10430_v51 = vsel %vm10246_vm1, %v10391_v21, 0.0  ;;  %v10395_v4 = vmul.f32 %v10361_v54, %v10361_v54  ;;  %v10396_v56 = vmul.f32 %v17046_v11, %v17046_v11 }
 0x42b   : > { %v10421_v46 = vadd.f32 %v10420_v27, %v10419_v48  ;;  %v10394_v29 = vmul.f32 %v10360_v35, %v10360_v35  ;;  %v10432_v20 = vsel %vm10246_vm1, %v10392_v45, 0.0  ;;  %v10397_v22 = vmul.f32 %v17049_v24, %v17049_v24 }
 0x42c   : > { %v10434_v25 = vsel %vm10246_vm1, %v10393_v53, 0.0  ;;  %v10438_v23 = vsel %vm10246_vm1, %v10395_v4, 0.0  ;;  %v10398_v28 = vmul.f32 %v17052_v26, %v17052_v26  ;;  %v10440_v54 = vsel %vm10246_vm1, %v10396_v56, 0.0 }
 0x42d   : > { %v10423_v9 = vadd.f32 %v10422_v62, %v10421_v46  ;;  %v10436_v10 = vsel %vm10246_vm1, %v10394_v29, 0.0  ;;  %v10399_v40 = vmul.f32 %v17055_v8, %v17055_v8  ;;  %v10442_v11 = vsel %vm10246_vm1, %v10397_v22, 0.0 }
 0x42e   : > { %v10400_v37 = vmul.f32 %v17058_v38, %v17058_v38  ;;  %v10444_v24 = vsel %vm10246_vm1, %v10398_v28, 0.0  ;;  %v10401_v6 = vmul.f32 %v17061_v34, %v17061_v34  ;;  %v10402_v2 = vmul.f32 %v17064_v5, %v17064_v5 }
 0x42f   : > { %v10425_v31 = vadd.f32 %v10424_v0, %v10423_v9  ;;  %v10446_v26 = vsel %vm10246_vm1, %v10399_v40, 0.0  ;;  %v10403_v42 = vmul.f32 %v17067_v43, %v17067_v43  ;;  %v10404_v27 = vmul.f32 %v17070_v3, %v17070_v3 }
 0x430   : > { %v10448_v8 = vsel %vm10246_vm1, %v10400_v37, 0.0  ;;  %v10450_v38 = vsel %vm10246_vm1, %v10401_v6, 0.0  ;;  %v10452_v34 = vsel %vm10246_vm1, %v10402_v2, 0.0  ;;  %v10405_v52 = vmul.f32 %v17073_v17, %v17073_v17 }
 0x431   : > { %v10427_v33 = vadd.f32 %v10426_v63, %v10425_v31  ;;  %v10454_v5 = vsel %vm10246_vm1, %v10403_v42, 0.0  ;;  %v10406_v62 = vmul.f32 %v17076_v44, %v17076_v44  ;;  %v10456_v43 = vsel %vm10246_vm1, %v10404_v27, 0.0 }
 0x432   : > { %v10407_v49 = vmul.f32 %v17079_v47, %v17079_v47  ;;  %v10458_v3 = vsel %vm10246_vm1, %v10405_v52, 0.0  ;;  %v10408_v31 = vmul.f32 %v17082_v61, %v17082_v61  ;;  %v10409_v21 = vmul.f32 %v17085_v39, %v17085_v39 }
 0x433   : > { %v10429_v57 = vadd.f32 %v10428_v55, %v10427_v33  ;;  %v10460_v17 = vsel %vm10246_vm1, %v10406_v62, 0.0  ;;  %v10410_v33 = vmul.f32 %v17088_v7, %v17088_v7  ;;  %v10411_v45 = vmul.f32 %v17090_v59, %v17090_v59 }
 0x434   : > { %v10462_v44 = vsel %vm10246_vm1, %v10407_v49, 0.0  ;;  %v10464_v47 = vsel %vm10246_vm1, %v10408_v31, 0.0  ;;  %v10466_v61 = vsel %vm10246_vm1, %v10409_v21, 0.0  ;;  %v10414_v29 = vmul.f32 %v17096_v30, %v17096_v30 }
 0x435   : > { %v10431_v41 = vadd.f32 %v10430_v51, %v10429_v57  ;;  %v10412_v57 = vmul.f32 %v17092_v36, %v17092_v36  ;;  %v10468_v39 = vsel %vm10246_vm1, %v10410_v33, 0.0  ;;  %v10413_v51 = vmul.f32 %v17094_v50, %v17094_v50 }
 0x436   : > { %v10470_v7 = vsel %vm10246_vm1, %v10411_v45, 0.0  ;;  %v10476_v36 = vsel %vm10246_vm1, %v10414_v29, 0.0 }
 0x437   : > { %v10433_v15 = vadd.f32 %v10432_v20, %v10431_v41  ;;  %v10472_v59 = vsel %vm10246_vm1, %v10412_v57, 0.0 }
 0x439   : > { %v10435_v60 = vadd.f32 %v10434_v25, %v10433_v15  ;;  %v10474_v15 = vsel %vm10246_vm1, %v10413_v51, 0.0 }
 0x43b   : > { %v10437_v19 = vadd.f32 %v10436_v10, %v10435_v60 }
 0x43d   : > { %v10439_v58 = vadd.f32 %v10438_v23, %v10437_v19 }
 0x43f   : > { %v10441_v13 = vadd.f32 %v10440_v54, %v10439_v58 }
 0x441   : > { %v10443_v32 = vadd.f32 %v10442_v11, %v10441_v13 }
 0x443   : > { %v10445_v18 = vadd.f32 %v10444_v24, %v10443_v32 }
 0x445   : > { %v10447_v16 = vadd.f32 %v10446_v26, %v10445_v18 }
 0x447   : > { %v10449_v48 = vadd.f32 %v10448_v8, %v10447_v16 }
 0x449   : > { %v10451_v1 = vadd.f32 %v10450_v38, %v10449_v48 }
 0x44b   : > { %v10453_v46 = vadd.f32 %v10452_v34, %v10451_v1 }
 0x44d   : > { %v10455_v12 = vadd.f32 %v10454_v5, %v10453_v46 }
 0x44f   : > { %v10457_v9 = vadd.f32 %v10456_v43, %v10455_v12 }
 0x451   : > { %v10459_v0 = vadd.f32 %v10458_v3, %v10457_v9 }
 0x453   : > { %v10461_v14 = vadd.f32 %v10460_v17, %v10459_v0 }
 0x455   : > { %v10463_v63 = vadd.f32 %v10462_v44, %v10461_v14 }
 0x457   : > { %v10465_v35 = vadd.f32 %v10464_v47, %v10463_v63 }
 0x459   : > { %v10467_v55 = vadd.f32 %v10466_v61, %v10465_v35 }
 0x45b   : > { %v10469_v53 = vadd.f32 %v10468_v39, %v10467_v55 }
 0x45d   : > { %v10471_v41 = vadd.f32 %v10470_v7, %v10469_v53 }
 0x45f   : > { %v10473_v20 = vadd.f32 %v10472_v59, %v10471_v41 }
 0x461   : > { %v10475_v4 = vadd.f32 %v10474_v15, %v10473_v20 }
 0x463   : > { %v10477_v25 = vadd.f32 %v10476_v36, %v10475_v4 }
 0x465   : > { %v10478_v60 = vrot.slane %v10477_v25, 4 }
 0x467   : > { %v10479_v56 = vadd.f32 %v10478_v60, %v10477_v25 }
 0x469   : > { %v10480_v10 = vrot.slane %v10479_v56, 2 }
 0x46b   : > { %v10481_v19 = vadd.f32 %v10480_v10, %v10479_v56 }
 0x46d   : > { %v10482_v50 = vrot.slane %v10481_v19, 1 }
 0x46f   : > { %v10483_v22 = vadd.f32 %v10482_v50, %v10481_v19 }
 0x471   : > { %10484 = vst.msk [vmem:[%s569_s17] sm:$0x1] %vm10381_vm2, %v10483_v22 }
 0x472 PF: > { %s20_s13 = sadd.s32 1, %s14093_s13   ;;  %s17288_s30 = smov %s14085_s11 }
 0x473   : > { %p17_p12 = scmp.ge.s32.totalorder %s20_s13, 34   ;;  %s17289_s10 = smov %s14089_s12 }
 0x474   : > { %s17290_s11 = smov %s17293_s14  ;;  %s17291_s12 = smov %s17297_s15 }
 0x475   :  { %19 = sbr.rel (!%p17_p12) target bundleno = 3 (0x3), region = 138 }

// kernel: up_transition_forward.11
= control target key start
LH: loop header
LB: loop body
LE: loop exit
PB: predicated region body
PF: predicated region fallthrough
CT: control target
= control target key end

     0   :  { %s1129_s15 = smov 0   ;;  %s1761_s0 = inlined_call_operand.vmem [shape: f32[1024,128], index: 0, kind: input, shape index: {}, may-alias: {0,4}]   ;;  %s1762_s1 = inlined_call_operand.vmem [shape: f32[1024,128], index: 1, kind: input, shape index: {}]   ;;  %s1763_s2 = inlined_call_operand.vmem [shape: f32[1,128], index: 2, kind: input, shape index: {}]   ;;  %s1764_s3 = inlined_call_operand.vmem [shape: f32[1,128], index: 3, kind: input, shape index: {}]   ;;  %s1765_s4 = inlined_call_operand.vmem [shape: f32[1024,128], index: 4, kind: output, shape index: {}, may-alias: {0,4}]  }
   0x1 LB: > { %s881_s16 = sadd.s32 4294967295, %s1102_s15   ;;  %p885_p0 = scmp.ge.s32.totalorder %s1102_s15, 1  ;;  %s1102_s15 = sphi %s1129_s15, %s14_s15  }
   0x2   : > { %p174_p1 = scmp.lt.s32.totalorder %s1102_s15, 5 }
   0x4   : > { %p175_p2 = pnand %p885_p0, %p174_p1 }
   0x5   : > { %s886_s17 = sshll.u32 (!%p175_p2), %s881_s16, 5 }
   0x6   : > { %178 = sbr.rel (%p175_p2) target bundleno = 158 (0x9e), region = 36  ;;  %p206_p3 = scmp.lt.s32.totalorder (!%p175_p2), %s886_s17, 127 }
   0xb   : > { %s1767_s17 = smov (!%p206_p3, %s886_s17), 127  ;;  %v1142_v0 = vld [vmem:[%s1763_s2] ss:$0 sm:$0xff] }
   0xc   : > { %s1137_s18 = sshll.u32 %s1767_s17, 3  ;;  %v1153_v1 = vld [vmem:[%s1764_s3] ss:$0 sm:$0xff] }
   0xd   : > { %s1148_s23 = scalar_lea.vmem %s1761_s0, %s1137_s18  ;;  %s1241_s28 = scalar_lea.vmem %s1762_s1, %s1137_s18 }
   0xe   : > { %v223_v2 = vld [vmem:[%s1148_s23] sm:$0xff]  ;;  %v224_v3 = vld [vmem:[%s1148_s23 + $0x8] sm:$0xff]  ;;  %v225_v4 = vld [vmem:[%s1148_s23 + $0x10] sm:$0xff]  ;;  %s1381_s5 = scalar_lea.vmem %s1765_s4, %s1137_s18 }
   0xf   : > { %v226_v5 = vld [vmem:[%s1148_s23 + $0x18] sm:$0xff]  ;;  %v227_v6 = vld [vmem:[%s1148_s23 + $0x20] sm:$0xff]  ;;  %v228_v7 = vld [vmem:[%s1148_s23 + $0x28] sm:$0xff]  ;;  %v262_v8 = vmul.f32 %v1142_v0, %v223_v2  ;;  %v263_v9 = vmul.f32 %v1142_v0, %v224_v3  ;;  %v264_v10 = vmul.f32 %v1142_v0, %v225_v4 }
  0x10   : > { %v229_v11 = vld [vmem:[%s1148_s23 + $0x30] sm:$0xff]  ;;  %v230_v12 = vld [vmem:[%s1148_s23 + $0x38] sm:$0xff]  ;;  %v265_v13 = vmul.f32 %v1142_v0, %v226_v5  ;;  %v266_v14 = vmul.f32 %v1142_v0, %v227_v6  ;;  %v267_v18 = vmul.f32 %v1142_v0, %v228_v7  ;;  %v231_v19 = vld [vmem:[%s1148_s23 + $0x40] sm:$0xff] }
  0x11   : > { %v1169_v15 = vadd.f32 %v1153_v1, %v262_v8  ;;  %v1172_v16 = vadd.f32 %v1153_v1, %v263_v9  ;;  %v1175_v17 = vadd.f32 %v1153_v1, %v264_v10  ;;  %v232_v20 = vld [vmem:[%s1148_s23 + $0x48] sm:$0xff]  ;;  %v268_v22 = vmul.f32 %v1142_v0, %v229_v11  ;;  %v233_v23 = vld [vmem:[%s1148_s23 + $0x50] sm:$0xff]  ;;  %v234_v33 = vld [vmem:[%s1148_s23 + $0x58] sm:$0xff] }
  0x12   : > { %v1181_v21 = vadd.f32 %v1153_v1, %v265_v13  ;;  %v269_v25 = vmul.f32 %v1142_v0, %v230_v12  ;;  %v1190_v28 = vadd.f32 %v1153_v1, %v266_v14  ;;  %v1193_v30 = vadd.f32 %v1153_v1, %v267_v18  ;;  %v235_v51 = vld [vmem:[%s1148_s23 + $0x60] sm:$0xff]  ;;  %v236_v52 = vld [vmem:[%s1148_s23 + $0x68] sm:$0xff]  ;;  %v237_v5 = vld [vmem:[%s1148_s23 + $0x70] sm:$0xff] }
  0x13   : > { %v365_v24 = vmin.f32 %v1169_v15, 0.0  ;;  %v366_v26 = vmin.f32 %v1172_v16, 0.0  ;;  %v367_v27 = vmin.f32 %v1175_v17, 0.0  ;;  %v270_v31 = vmul.f32 %v1142_v0, %v231_v19  ;;  %v238_v6 = vld [vmem:[%s1148_s23 + $0x78] sm:$0xff]  ;;  %v239_v8 = vld [vmem:[%s1148_s23 + $0x80] sm:$0xff] }
  0x14   : > { %v271_v32 = vmul.f32 %v1142_v0, %v232_v20  ;;  %v368_v35 = vmin.f32 %v1181_v21, 0.0  ;;  %v1200_v36 = vadd.f32 %v1153_v1, %v268_v22  ;;  %v272_v37 = vmul.f32 %v1142_v0, %v233_v23  ;;  %v525_v14 = vld [vmem:[%s1241_s28] sm:$0xff] }
  0x15   : > { %v397_v29 = vmul.f32 1.442695, %v365_v24  ;;  %v399_v34 = vmul.f32 1.442695, %v366_v26  ;;  %v401_v38 = vmul.f32 1.442695, %v367_v27  ;;  %v1204_v39 = vadd.f32 %v1153_v1, %v269_v25 }
  0x16   : > { %v403_v40 = vmul.f32 1.442695, %v368_v35  ;;  %v369_v41 = vmin.f32 %v1190_v28, 0.0  ;;  %v1208_v42 = vadd.f32 %v1153_v1, %v270_v31  ;;  %v370_v43 = vmin.f32 %v1193_v30, 0.0  ;;  %v526_v24 = vld [vmem:[%s1241_s28 + $0x8] sm:$0xff]  ;;  %v527_v31 = vld [vmem:[%s1241_s28 + $0x10] sm:$0xff] }
  0x17   : > { %968 = vpow2.f32 %v397_v29  ;;  %v1212_v44 = vadd.f32 %v1153_v1, %v271_v32  ;;  %v273_v45 = vmul.f32 %v1142_v0, %v234_v33  ;;  %v371_v47 = vmin.f32 %v1200_v36, 0.0 }
  0x18   : > { %970 = vpow2.f32 %v399_v34  ;;  %v405_v46 = vmul.f32 1.442695, %v369_v41  ;;  %v1217_v48 = vadd.f32 %v1153_v1, %v272_v37  ;;  %v407_v49 = vmul.f32 1.442695, %v370_v43  ;;  %v528_v37 = vld [vmem:[%s1241_s28 + $0x18] sm:$0xff] }
  0x19   : > { %972 = vpow2.f32 %v401_v38  ;;  %v372_v50 = vmin.f32 %v1204_v39, 0.0  ;;  %v409_v53 = vmul.f32 1.442695, %v371_v47  ;;  %v373_v54 = vmin.f32 %v1208_v42, 0.0 }
  0x1a   : > { %974 = vpow2.f32 %v403_v40  ;;  %v374_v56 = vmin.f32 %v1212_v44, 0.0  ;;  %v375_v58 = vmin.f32 %v1217_v48, 0.0  ;;  %v1226_v59 = vadd.f32 %v1153_v1, %v273_v45  ;;  %v240_v40 = vld [vmem:[%s1148_s23 + $0x88] sm:$0xff] }
  0x1b   : > { %976 = vpow2.f32 %v405_v46  ;;  %v411_v55 = vmul.f32 1.442695, %v372_v50  ;;  %v413_v57 = vmul.f32 1.442695, %v373_v54  ;;  %v274_v61 = vmul.f32 %v1142_v0, %v235_v51 }
  0x1c   : > { %978 = vpow2.f32 %v407_v49  ;;  %v415_v60 = vmul.f32 1.442695, %v374_v56  ;;  %v275_v62 = vmul.f32 %v1142_v0, %v236_v52  ;;  %v417_v63 = vmul.f32 1.442695, %v375_v58 }
  0x1d   : > { %980 = vpow2.f32 %v409_v53  ;;  %v376_v2 = vmin.f32 %v1226_v59, 0.0  ;;  %v1232_v3 = vadd.f32 %v1153_v1, %v274_v61  ;;  %vm333_vm0 = vcmp.gt.f32.partialorder %v1169_v15, 0.0  ;;  %v529_v53 = vld [vmem:[%s1241_s28 + $0x20] sm:$0xff] }
  0x1e   : > { %982 = vpow2.f32 %v411_v55  ;;  %v1235_v4 = vadd.f32 %v1153_v1, %v275_v62  ;;  %vm334_vm1 = vcmp.gt.f32.partialorder %v1172_v16, 0.0  ;;  %vm335_vm2 = vcmp.gt.f32.partialorder %v1175_v17, 0.0 }
  0x1f   : > { %984 = vpow2.f32 %v413_v57  ;;  %v419_v7 = vmul.f32 1.442695, %v376_v2  ;;  %v377_v9 = vmin.f32 %v1232_v3, 0.0  ;;  %vm336_vm3 = vcmp.gt.f32.partialorder %v1181_v21, 0.0 }
  0x20   : > { %986 = vpow2.f32 %v415_v60  ;;  %v378_v10 = vmin.f32 %v1235_v4, 0.0  ;;  %vm337_vm4 = vcmp.gt.f32.partialorder %v1190_v28, 0.0  ;;  %vm338_vm5 = vcmp.gt.f32.partialorder %v1193_v30, 0.0 }
  0x21   : > { %988 = vpow2.f32 %v417_v63  ;;  %v421_v18 = vmul.f32 1.442695, %v377_v9  ;;  %v276_v19 = vmul.f32 %v1142_v0, %v237_v5  ;;  %v277_v20 = vmul.f32 %v1142_v0, %v238_v6 }
  0x22   : > { %vm339_vm6 = vcmp.gt.f32.partialorder %v1200_v36, 0.0  ;;  %990 = vpow2.f32 %v419_v7  ;;  %v278_v25 = vmul.f32 %v1142_v0, %v239_v8  ;;  %vm340_vm7 = vcmp.gt.f32.partialorder %v1204_v39, 0.0 }
  0x23   : > { %v423_v32 = vmul.f32 1.442695, %v378_v10  ;;  %992 = vpow2.f32 %v421_v18  ;;  %vm341_vm8 = vcmp.gt.f32.partialorder %v1208_v42, 0.0  ;;  %v1279_v43 = vadd.f32 %v1153_v1, %v276_v19  ;;  %v532_v19 = vld [vmem:[%s1241_s28 + $0x38] sm:$0xff] }
  0x24   : > { %v969_v11 = vpop.eup %968  ;;  %v1282_v45 = vadd.f32 %v1153_v1, %v277_v20  ;;  %vm342_vm9 = vcmp.gt.f32.partialorder %v1212_v44, 0.0  ;;  %vm343_vm10 = vcmp.gt.f32.partialorder %v1217_v48, 0.0  ;;  %v1302_v58 = vmul.f32 %v1142_v0, %v240_v40  ;;  %v534_v40 = vld [vmem:[%s1241_s28 + $0x48] sm:$0xff] }
  0x25   : > { %v971_v12 = vpop.eup %970  ;;  %v894_v13 = vadd.f32 -1.0, %v969_v11  ;;  %994 = vpow2.f32 %v423_v32  ;;  %vm344_vm11 = vcmp.gt.f32.partialorder %v1226_v59, 0.0  ;;  %v379_v2 = vmin.f32 %v1279_v43, 0.0 }
  0x26   : > { %v973_v22 = vpop.eup %972  ;;  %v895_v23 = vadd.f32 -1.0, %v971_v12  ;;  %v531_v12 = vld [vmem:[%s1241_s28 + $0x30] sm:$0xff]  ;;  %vm345_vm12 = vcmp.gt.f32.partialorder %v1232_v3, 0.0  ;;  %v380_v20 = vmin.f32 %v1282_v45, 0.0  ;;  %vm346_vm13 = vcmp.gt.f32.partialorder %v1235_v4, 0.0 }
  0x27   : > { %v975_v26 = vpop.eup %974  ;;  %v493_v27 = vsel %vm333_vm0, %v1169_v15, %v894_v13  ;;  %v896_v29 = vadd.f32 -1.0, %v973_v22 }
  0x28   : > { %v1265_v33 = vadd.f32 %v525_v14, %v493_v27  ;;  %v494_v34 = vsel %vm334_vm1, %v1172_v16, %v895_v23  ;;  %v897_v35 = vadd.f32 -1.0, %v975_v26  ;;  %v977_v38 = vpop.eup %976  ;;  %v1326_v23 = vmul.f32 1.442695, %v379_v2 }
  0x29   : > { %v1272_v41 = vadd.f32 %v526_v24, %v494_v34  ;;  %v495_v15 = vsel %vm335_vm2, %v1175_v17, %v896_v29  ;;  %v979_v16 = vpop.eup %978  ;;  %v1291_v17 = vadd.f32 %v1153_v1, %v278_v25  ;;  %v898_v52 = vadd.f32 -1.0, %v977_v38  ;;  %v533_v29 = vld [vmem:[%s1241_s28 + $0x40] sm:$0xff] }
  0x2a   : > { %v621_v46 = vmin.f32 %v1265_v33, 0.0  ;;  %v1285_v47 = vadd.f32 %v527_v31, %v495_v15  ;;  %v496_v49 = vsel %vm336_vm3, %v1181_v21, %v897_v35  ;;  %v981_v54 = vpop.eup %980  ;;  %v899_v57 = vadd.f32 -1.0, %v979_v16  ;;  %v530_v21 = vld [vmem:[%s1241_s28 + $0x28] sm:$0xff] }
  0x2b   : > { %v622_v50 = vmin.f32 %v1272_v41, 0.0  ;;  %v1294_v51 = vadd.f32 %v528_v37, %v496_v49  ;;  %v983_v60 = vpop.eup %982  ;;  %v497_v63 = vsel %vm337_vm4, %v1190_v28, %v898_v52  ;;  %v900_v28 = vadd.f32 -1.0, %v981_v54  ;;  %v535_v49 = vld [vmem:[%s1241_s28 + $0x50] sm:$0xff] }
  0x2c   : > { %v653_v55 = vmul.f32 1.442695, %v621_v46  ;;  %v623_v56 = vmin.f32 %v1285_v47, 0.0  ;;  %v985_v5 = vpop.eup %984  ;;  %v1310_v7 = vadd.f32 %v529_v53, %v497_v63  ;;  %v498_v8 = vsel %vm338_vm5, %v1193_v30, %v899_v57  ;;  %v536_v57 = vld [vmem:[%s1241_s28 + $0x58] sm:$0xff] }
  0x2d   : > { %v655_v61 = vmul.f32 1.442695, %v622_v50  ;;  %v624_v62 = vmin.f32 %v1294_v51, 0.0  ;;  %v987_v9 = vpop.eup %986  ;;  %v1315_v11 = vadd.f32 %v530_v21, %v498_v8  ;;  %v901_v18 = vadd.f32 -1.0, %v983_v60 }
  0x2e   : > { %996 = vpow2.f32 %v653_v55  ;;  %v657_v6 = vmul.f32 1.442695, %v623_v56  ;;  %v989_v13 = vpop.eup %988  ;;  %v625_v14 = vmin.f32 %v1310_v7, 0.0  ;;  %v499_v22 = vsel %vm339_vm6, %v1200_v36, %v900_v28 }
  0x2f   : > { %998 = vpow2.f32 %v655_v61  ;;  %v659_v10 = vmul.f32 1.442695, %v624_v62  ;;  %v626_v30 = vmin.f32 %v1315_v11, 0.0  ;;  %v1328_v25 = vadd.f32 %v531_v12, %v499_v22  ;;  %v991_v31 = vpop.eup %990  ;;  %v241_v12 = vld [vmem:[%s1148_s23 + $0x90] sm:$0xff] }
  0x30   : > { %1000 = vpow2.f32 %v657_v6  ;;  %v661_v24 = vmul.f32 1.442695, %v625_v14  ;;  %v500_v26 = vsel %vm340_vm7, %v1204_v39, %v901_v18  ;;  %v902_v27 = vadd.f32 -1.0, %v985_v5  ;;  %v993_v15 = vpop.eup %992  ;;  %v243_v14 = vld [vmem:[%s1148_s23 + $0xa0] sm:$0xff]  ;;  %v1387_v18 = vld [vmem:[%s1148_s23 + $0xa8] sm:$0xff]  ;;  %v1402_v22 = vld [vmem:[%s1148_s23 + $0xd0] sm:$0xff] }
  0x31   : > { %1002 = vpow2.f32 %v659_v10  ;;  %v663_v32 = vmul.f32 1.442695, %v626_v30  ;;  %v1334_v34 = vadd.f32 %v532_v19, %v500_v26  ;;  %v903_v35 = vadd.f32 -1.0, %v987_v9  ;;  %v1393_v19 = vld [vmem:[%s1148_s23 + $0xb8] sm:$0xff]  ;;  %v1399_v30 = vld [vmem:[%s1148_s23 + $0xc8] sm:$0xff] }
  0x32   : > { %v904_v37 = vadd.f32 -1.0, %v989_v13  ;;  %1004 = vpow2.f32 %v661_v24  ;;  %v627_v36 = vmin.f32 %v1328_v25, 0.0  ;;  %v501_v38 = vsel %vm341_vm8, %v1208_v42, %v902_v27  ;;  %v995_v21 = vpop.eup %994  ;;  %v242_v13 = vld [vmem:[%s1148_s23 + $0x98] sm:$0xff] }
  0x33   : > { %v1342_v39 = vmul.f32 1.442695, %v380_v20  ;;  %vm589_vm14 = vcmp.gt.f32.partialorder %v1265_v33, 0.0  ;;  %1006 = vpow2.f32 %v663_v32  ;;  %v628_v16 = vmin.f32 %v1334_v34, 0.0  ;;  %v1396_v20 = vld [vmem:[%s1148_s23 + $0xc0] sm:$0xff] }
  0x34   : > { %v1346_v46 = vadd.f32 %v533_v29, %v501_v38  ;;  %v665_v50 = vmul.f32 1.442695, %v627_v36  ;;  %v502_v42 = vsel %vm342_vm9, %v1212_v44, %v903_v35  ;;  %v503_v52 = vsel %vm343_vm10, %v1217_v48, %v904_v37  ;;  %v537_v48 = vld [vmem:[%s1241_s28 + $0x60] sm:$0xff]  ;;  %v538_v36 = vld [vmem:[%s1241_s28 + $0x68] sm:$0xff] }
  0x35   : > { %v905_v53 = vadd.f32 -1.0, %v991_v31  ;;  %vm590_vm15 = vcmp.gt.f32.partialorder %v1272_v41, 0.0  ;;  %v667_v54 = vmul.f32 1.442695, %v628_v16  ;;  %v1357_v56 = vadd.f32 %v534_v40, %v502_v42  ;;  %v1407_v31 = vld [vmem:[%s1148_s23 + $0xd8] sm:$0xff]  ;;  %v1410_v32 = vld [vmem:[%s1148_s23 + $0xe0] sm:$0xff] }
  0x36   : > { %v629_v55 = vmin.f32 %v1346_v46, 0.0  ;;  %1008 = vpow2.f32 %v665_v50  ;;  %v1360_v60 = vadd.f32 %v535_v49, %v503_v52  ;;  %v906_v61 = vadd.f32 -1.0, %v993_v15  ;;  %v1416_v40 = vld [vmem:[%s1148_s23 + $0xe8] sm:$0xff]  ;;  %v1419_v15 = vld [vmem:[%s1148_s23 + $0xf0] sm:$0xff]  ;;  %v1422_v16 = vld [vmem:[%s1148_s23 + $0xf8] sm:$0xff] }
  0x37   : > { %v504_v44 = vsel %vm344_vm11, %v1226_v59, %v905_v53  ;;  %vm591_vm0 = vcmp.gt.f32.partialorder %v1285_v47, 0.0  ;;  %1010 = vpow2.f32 %v667_v54  ;;  %v630_v63 = vmin.f32 %v1357_v56, 0.0 }
  0x38   : > { %v669_v62 = vmul.f32 1.442695, %v629_v55  ;;  %vm592_vm1 = vcmp.gt.f32.partialorder %v1294_v51, 0.0  ;;  %v631_v2 = vmin.f32 %v1360_v60, 0.0  ;;  %v1370_v59 = vadd.f32 %v536_v57, %v504_v44 }
  0x39   : > { %v505_v5 = vsel %vm345_vm12, %v1232_v3, %v906_v61  ;;  %v671_v8 = vmul.f32 1.442695, %v630_v63  ;;  %v907_v10 = vadd.f32 -1.0, %v995_v21  ;;  %v1390_v3 = vld [vmem:[%s1148_s23 + $0xb0] sm:$0xff]  ;;  %vm593_vm2 = vcmp.gt.f32.partialorder %v1310_v7, 0.0 }
  0x3a   : > { %1012 = vpow2.f32 %v669_v62  ;;  %v1375_v9 = vadd.f32 %v537_v48, %v505_v5  ;;  %v673_v26 = vmul.f32 1.442695, %v631_v2  ;;  %v632_v27 = vmin.f32 %v1370_v59, 0.0 }
  0x3b   : > { %v997_v6 = vpop.eup %996  ;;  %vm594_vm3 = vcmp.gt.f32.partialorder %v1315_v11, 0.0  ;;  %1014 = vpow2.f32 %v671_v8  ;;  %v506_v55 = vsel %vm346_vm13, %v1235_v4, %v907_v10  ;;  %vm595_vm4 = vcmp.gt.f32.partialorder %v1328_v25, 0.0 }
  0x3c   : > { %v999_v28 = vpop.eup %998  ;;  %v926_v24 = vadd.f32 -1.0, %v997_v6  ;;  %v633_v37 = vmin.f32 %v1375_v9, 0.0  ;;  %1016 = vpow2.f32 %v673_v26  ;;  %v675_v42 = vmul.f32 1.442695, %v632_v27 }
  0x3d   : > { %v1001_v29 = vpop.eup %1000  ;;  %v927_v35 = vadd.f32 -1.0, %v999_v28  ;;  %v1439_v57 = vadd.f32 %v538_v36, %v506_v55  ;;  %v381_v44 = vmin.f32 %v1291_v17, 0.0  ;;  %v1448_v4 = vadd.f32 %v1153_v1, %v1302_v58 }
  0x3e   : > { %v1003_v38 = vpop.eup %1002  ;;  %v749_v49 = vsel %vm589_vm14, %v1265_v33, %v926_v24  ;;  %v928_v50 = vadd.f32 -1.0, %v1001_v29  ;;  %v677_v54 = vmul.f32 1.442695, %v633_v37  ;;  %1018 = vpow2.f32 %v675_v42 }
  0x3f   : > { %781 = vst [vmem:[%s1381_s5] sm:$0xff] %v749_v49  ;;  %v750_v52 = vsel %vm590_vm15, %v1272_v41, %v927_v35  ;;  %v929_v53 = vadd.f32 -1.0, %v1003_v38  ;;  %v1005_v21 = vpop.eup %1004  ;;  %vm596_vm5 = vcmp.gt.f32.partialorder %v1334_v34, 0.0  ;;  %v634_v48 = vmin.f32 %v1439_v57, 0.0 }
  0x40   : > { %782 = vst [vmem:[%s1381_s5 + $0x8] sm:$0xff] %v750_v52  ;;  %v751_v33 = vsel %vm591_vm0, %v1285_v47, %v928_v50  ;;  %1020 = vpow2.f32 %v677_v54  ;;  %v1007_v47 = vpop.eup %1006  ;;  %v930_v61 = vadd.f32 -1.0, %v1005_v21  ;;  %vm597_vm6 = vcmp.gt.f32.partialorder %v1346_v46, 0.0 }
  0x41   : > { %783 = vst [vmem:[%s1381_s5 + $0x10] sm:$0xff] %v751_v33  ;;  %v752_v41 = vsel %vm592_vm1, %v1294_v51, %v929_v53  ;;  %1022 = vpow2.f32 %v1326_v23  ;;  %v931_v62 = vadd.f32 -1.0, %v1007_v47  ;;  %v429_v51 = vmul.f32 1.442695, %v381_v44 }
  0x42   : > { %784 = vst [vmem:[%s1381_s5 + $0x18] sm:$0xff] %v752_v41  ;;  %1024 = vpow2.f32 %v1342_v39  ;;  %v753_v58 = vsel %vm593_vm2, %v1310_v7, %v930_v61  ;;  %v679_v63 = vmul.f32 1.442695, %v634_v48  ;;  %v382_v2 = vmin.f32 %v1448_v4, 0.0 }
  0x43   : > { %v280_v5 = vmul.f32 %v1142_v0, %v241_v12  ;;  %v1009_v6 = vpop.eup %1008  ;;  %785 = vst [vmem:[%s1381_s5 + $0x20] sm:$0xff] %v753_v58  ;;  %v754_v23 = vsel %vm594_vm3, %v1315_v11, %v931_v62  ;;  %1026 = vpow2.f32 %v429_v51  ;;  %v281_v8 = vmul.f32 %v1142_v0, %v242_v13 }
  0x44   : > { %v282_v39 = vmul.f32 %v1142_v0, %v243_v14  ;;  %v1011_v10 = vpop.eup %1010  ;;  %786 = vst [vmem:[%s1381_s5 + $0x28] sm:$0xff] %v754_v23  ;;  %v932_v7 = vadd.f32 -1.0, %v1009_v6  ;;  %1028 = vpow2.f32 %v679_v63  ;;  %v431_v28 = vmul.f32 1.442695, %v382_v2  ;;  %v539_v2 = vld [vmem:[%s1241_s28 + $0x70] sm:$0xff] }
  0x45   : > { %v1469_v24 = vadd.f32 %v1153_v1, %v280_v5  ;;  %v933_v12 = vadd.f32 -1.0, %v1011_v10  ;;  %vm347_vm7 = vcmp.gt.f32.partialorder %v1279_v43, 0.0  ;;  %v1473_v11 = vadd.f32 %v1153_v1, %v281_v8  ;;  %v540_v8 = vld [vmem:[%s1241_s28 + $0x78] sm:$0xff] }
  0x46   : > { %v1476_v13 = vadd.f32 %v1153_v1, %v282_v39  ;;  %v283_v14 = vmul.f32 %v1142_v0, %v1387_v18  ;;  %v755_v27 = vsel %vm595_vm4, %v1328_v25, %v932_v7  ;;  %vm598_vm8 = vcmp.gt.f32.partialorder %v1357_v56, 0.0 }
  0x47   : > { %v1013_v26 = vpop.eup %1012  ;;  %vm348_vm9 = vcmp.gt.f32.partialorder %v1282_v45, 0.0  ;;  %1030 = vpow2.f32 %v431_v28  ;;  %v383_v29 = vmin.f32 %v1469_v24, 0.0  ;;  %787 = vst [vmem:[%s1381_s5 + $0x30] sm:$0xff] %v755_v27  ;;  %v756_v35 = vsel %vm596_vm5, %v1334_v34, %v933_v12 }
  0x48   : > { %v934_v37 = vadd.f32 -1.0, %v1013_v26  ;;  %vm599_vm10 = vcmp.gt.f32.partialorder %v1360_v60, 0.0  ;;  %v384_v18 = vmin.f32 %v1473_v11, 0.0  ;;  %v1015_v36 = vpop.eup %1014  ;;  %788 = vst [vmem:[%s1381_s5 + $0x38] sm:$0xff] %v756_v35  ;;  %vm600_vm11 = vcmp.gt.f32.partialorder %v1370_v59, 0.0  ;;  %v541_v26 = vld [vmem:[%s1241_s28 + $0x80] sm:$0xff] }
  0x49   : > { %v433_v25 = vmul.f32 1.442695, %v383_v29  ;;  %v385_v38 = vmin.f32 %v1476_v13, 0.0  ;;  %v1496_v49 = vadd.f32 %v1153_v1, %v283_v14  ;;  %v1017_v50 = vpop.eup %1016  ;;  %v935_v42 = vadd.f32 -1.0, %v1015_v36 }
  0x4a   : > { %v757_v34 = vsel %vm597_vm6, %v1346_v46, %v934_v37  ;;  %v435_v52 = vmul.f32 1.442695, %v384_v18  ;;  %v284_v53 = vmul.f32 %v1142_v0, %v1390_v3  ;;  %v936_v54 = vadd.f32 -1.0, %v1017_v50 }
  0x4b   : > { %789 = vst [vmem:[%s1381_s5 + $0x40] sm:$0xff] %v757_v34  ;;  %vm601_vm12 = vcmp.gt.f32.partialorder %v1375_v9, 0.0  ;;  %1032 = vpow2.f32 %v433_v25  ;;  %v437_v55 = vmul.f32 1.442695, %v385_v38  ;;  %v1019_v33 = vpop.eup %1018  ;;  %v758_v21 = vsel %vm598_vm8, %v1357_v56, %v935_v42  ;;  %v542_v42 = vld [vmem:[%s1241_s28 + $0x88] sm:$0xff] }
  0x4c   : > { %1034 = vpow2.f32 %v435_v52  ;;  %v386_v46 = vmin.f32 %v1496_v49, 0.0  ;;  %v1510_v41 = vadd.f32 %v1153_v1, %v284_v53  ;;  %790 = vst [vmem:[%s1381_s5 + $0x48] sm:$0xff] %v758_v21  ;;  %v759_v44 = vsel %vm599_vm10, %v1360_v60, %v936_v54 }
  0x4d   : > { %v1021_v3 = vpop.eup %1020  ;;  %v937_v47 = vadd.f32 -1.0, %v1019_v33  ;;  %1036 = vpow2.f32 %v437_v55  ;;  %v285_v61 = vmul.f32 %v1142_v0, %v1393_v19  ;;  %791 = vst [vmem:[%s1381_s5 + $0x50] sm:$0xff] %v759_v44  ;;  %vm349_vm13 = vcmp.gt.f32.partialorder %v1291_v17, 0.0  ;;  %v543_v44 = vld [vmem:[%s1241_s28 + $0x90] sm:$0xff] }
  0x4e   : > { %v1023_v56 = vpop.eup %1022  ;;  %v938_v48 = vadd.f32 -1.0, %v1021_v3  ;;  %v439_v62 = vmul.f32 1.442695, %v386_v46  ;;  %v387_v51 = vmin.f32 %v1510_v41, 0.0  ;;  %v286_v19 = vmul.f32 %v1142_v0, %v1396_v20 }
  0x4f   : > { %v1025_v58 = vpop.eup %1024  ;;  %v760_v60 = vsel %vm600_vm11, %v1370_v59, %v937_v47  ;;  %v908_v63 = vadd.f32 -1.0, %v1023_v56  ;;  %v1526_v5 = vadd.f32 %v1153_v1, %v285_v61  ;;  %vm602_vm14 = vcmp.gt.f32.partialorder %v1439_v57, 0.0  ;;  %v544_v56 = vld [vmem:[%s1241_s28 + $0x98] sm:$0xff] }
  0x50   : > { %792 = vst [vmem:[%s1381_s5 + $0x58] sm:$0xff] %v760_v60  ;;  %v761_v6 = vsel %vm601_vm12, %v1375_v9, %v938_v48  ;;  %v909_v23 = vadd.f32 -1.0, %v1025_v58  ;;  %1038 = vpow2.f32 %v439_v62  ;;  %v441_v39 = vmul.f32 1.442695, %v387_v51  ;;  %v1027_v10 = vpop.eup %1026 }
  0x51   : > { %793 = vst [vmem:[%s1381_s5 + $0x60] sm:$0xff] %v761_v6  ;;  %v507_v59 = vsel %vm347_vm7, %v1279_v43, %v908_v63  ;;  %v388_v20 = vmin.f32 %v1526_v5, 0.0  ;;  %v1542_v7 = vadd.f32 %v1153_v1, %v286_v19  ;;  %v1029_v28 = vpop.eup %1028  ;;  %v910_v14 = vadd.f32 -1.0, %v1027_v10  ;;  %v545_v63 = vld [vmem:[%s1241_s28 + $0xa0] sm:$0xff] }
  0x52   : > { %v1544_v12 = vadd.f32 %v539_v2, %v507_v59  ;;  %v508_v9 = vsel %vm348_vm9, %v1282_v45, %v909_v23  ;;  %1040 = vpow2.f32 %v441_v39  ;;  %v939_v27 = vadd.f32 -1.0, %v1029_v28  ;;  %v546_v39 = vld [vmem:[%s1241_s28 + $0xa8] sm:$0xff] }
  0x53   : > { %v1550_v29 = vadd.f32 %v540_v8, %v508_v9  ;;  %v443_v43 = vmul.f32 1.442695, %v388_v20  ;;  %v509_v18 = vsel %vm349_vm13, %v1291_v17, %v910_v14  ;;  %v389_v36 = vmin.f32 %v1542_v7, 0.0 }
  0x54   : > { %v1031_v35 = vpop.eup %1030  ;;  %v635_v37 = vmin.f32 %v1544_v12, 0.0  ;;  %v762_v45 = vsel %vm602_vm14, %v1439_v57, %v939_v27  ;;  %v1561_v38 = vadd.f32 %v541_v26, %v509_v18  ;;  %vm350_vm15 = vcmp.gt.f32.partialorder %v1448_v4, 0.0 }
  0x55   : > { %v636_v25 = vmin.f32 %v1550_v29, 0.0  ;;  %794 = vst [vmem:[%s1381_s5 + $0x68] sm:$0xff] %v762_v45  ;;  %v911_v34 = vadd.f32 -1.0, %v1031_v35  ;;  %1042 = vpow2.f32 %v443_v43  ;;  %v445_v52 = vmul.f32 1.442695, %v389_v36  ;;  %v547_v35 = vld [vmem:[%s1241_s28 + $0xb0] sm:$0xff] }
  0x56   : > { %v681_v50 = vmul.f32 1.442695, %v635_v37  ;;  %v637_v53 = vmin.f32 %v1561_v38, 0.0  ;;  %vm351_vm0 = vcmp.gt.f32.partialorder %v1469_v24, 0.0  ;;  %v287_v57 = vmul.f32 %v1142_v0, %v1399_v30 }
  0x57   : > { %v683_v17 = vmul.f32 1.442695, %v636_v25  ;;  %v510_v55 = vsel %vm350_vm15, %v1448_v4, %v911_v34  ;;  %vm352_vm1 = vcmp.gt.f32.partialorder %v1473_v11, 0.0  ;;  %vm353_vm2 = vcmp.gt.f32.partialorder %v1476_v13, 0.0 }
  0x58   : > { %v1033_v54 = vpop.eup %1032  ;;  %1044 = vpow2.f32 %v681_v50  ;;  %v685_v21 = vmul.f32 1.442695, %v637_v53  ;;  %v1573_v46 = vadd.f32 %v542_v42, %v510_v55  ;;  %v1578_v30 = vadd.f32 %v1153_v1, %v287_v57  ;;  %v548_v42 = vld [vmem:[%s1241_s28 + $0xb8] sm:$0xff] }
  0x59   : > { %v1035_v33 = vpop.eup %1034  ;;  %1046 = vpow2.f32 %v683_v17  ;;  %v912_v3 = vadd.f32 -1.0, %v1033_v54  ;;  %v288_v4 = vmul.f32 %v1142_v0, %v1402_v22  ;;  %vm354_vm3 = vcmp.gt.f32.partialorder %v1496_v49, 0.0 }
  0x5a   : > { %v1037_v47 = vpop.eup %1036  ;;  %v913_v61 = vadd.f32 -1.0, %v1035_v33  ;;  %1048 = vpow2.f32 %v445_v52  ;;  %v638_v48 = vmin.f32 %v1573_v46, 0.0  ;;  %vm355_vm4 = vcmp.gt.f32.partialorder %v1510_v41, 0.0 }
  0x5b   : > { %1050 = vpow2.f32 %v685_v21  ;;  %v511_v62 = vsel %vm351_vm0, %v1469_v24, %v912_v3  ;;  %v914_v60 = vadd.f32 -1.0, %v1037_v47  ;;  %v390_v6 = vmin.f32 %v1578_v30, 0.0 }
  0x5c   : > { %v1587_v51 = vadd.f32 %v543_v44, %v511_v62  ;;  %v512_v58 = vsel %vm352_vm1, %v1473_v11, %v913_v61  ;;  %v687_v2 = vmul.f32 1.442695, %v638_v48  ;;  %v289_v24 = vmul.f32 %v1142_v0, %v1407_v31  ;;  %v549_v62 = vld [vmem:[%s1241_s28 + $0xc0] sm:$0xff] }
  0x5d   : > { %v1039_v22 = vpop.eup %1038  ;;  %v1594_v19 = vadd.f32 %v544_v56, %v512_v58  ;;  %v513_v8 = vsel %vm353_vm2, %v1476_v13, %v914_v60  ;;  %v1605_v10 = vadd.f32 %v1153_v1, %v288_v4  ;;  %vm356_vm5 = vcmp.gt.f32.partialorder %v1526_v5, 0.0 }
  0x5e   : > { %v639_v23 = vmin.f32 %v1587_v51, 0.0  ;;  %v915_v11 = vadd.f32 -1.0, %v1039_v22  ;;  %1052 = vpow2.f32 %v687_v2  ;;  %v1608_v28 = vadd.f32 %v545_v63, %v513_v8 }
  0x5f   : > { %v1041_v59 = vpop.eup %1040  ;;  %v640_v20 = vmin.f32 %v1594_v19, 0.0  ;;  %v447_v14 = vmul.f32 1.442695, %v390_v6  ;;  %vm357_vm6 = vcmp.gt.f32.partialorder %v1542_v7, 0.0  ;;  %v391_v18 = vmin.f32 %v1605_v10, 0.0 }
  0x60   : > { %v689_v31 = vmul.f32 1.442695, %v639_v23  ;;  %v514_v9 = vsel %vm354_vm3, %v1496_v49, %v915_v11  ;;  %v916_v13 = vadd.f32 -1.0, %v1041_v59  ;;  %v641_v27 = vmin.f32 %v1608_v28, 0.0 }
  0x61   : > { %v691_v26 = vmul.f32 1.442695, %v640_v20  ;;  %v1615_v43 = vadd.f32 %v546_v39, %v514_v9  ;;  %v1624_v49 = vadd.f32 %v1153_v1, %v289_v24  ;;  %vm603_vm7 = vcmp.gt.f32.partialorder %v1544_v12, 0.0 }
  0x62   : > { %1054 = vpow2.f32 %v689_v31  ;;  %v515_v37 = vsel %vm355_vm4, %v1510_v41, %v916_v13  ;;  %v1043_v36 = vpop.eup %1042  ;;  %v693_v45 = vmul.f32 1.442695, %v641_v27  ;;  %v449_v52 = vmul.f32 1.442695, %v391_v18 }
  0x63   : > { %1056 = vpow2.f32 %v691_v26  ;;  %v642_v25 = vmin.f32 %v1615_v43, 0.0  ;;  %v1628_v50 = vadd.f32 %v547_v35, %v515_v37  ;;  %v917_v34 = vadd.f32 -1.0, %v1043_v36  ;;  %v550_v36 = vld [vmem:[%s1241_s28 + $0xc8] sm:$0xff] }
  0x64   : > { %1058 = vpow2.f32 %v447_v14  ;;  %vm604_vm8 = vcmp.gt.f32.partialorder %v1550_v29, 0.0  ;;  %v392_v53 = vmin.f32 %v1624_v49, 0.0  ;;  %vm605_vm9 = vcmp.gt.f32.partialorder %v1561_v38, 0.0 }
  0x65   : > { %v1045_v17 = vpop.eup %1044  ;;  %1060 = vpow2.f32 %v693_v45  ;;  %v695_v41 = vmul.f32 1.442695, %v642_v25  ;;  %v643_v55 = vmin.f32 %v1628_v50, 0.0  ;;  %v516_v33 = vsel %vm356_vm5, %v1526_v5, %v917_v34 }
  0x66   : > { %v1047_v57 = vpop.eup %1046  ;;  %v940_v54 = vadd.f32 -1.0, %v1045_v17  ;;  %v1638_v44 = vadd.f32 %v548_v42, %v516_v33  ;;  %v451_v47 = vmul.f32 1.442695, %v392_v53  ;;  %vm606_vm10 = vcmp.gt.f32.partialorder %v1573_v46, 0.0 }
  0x67   : > { %v1049_v21 = vpop.eup %1048  ;;  %v941_v3 = vadd.f32 -1.0, %v1047_v57  ;;  %1062 = vpow2.f32 %v695_v41  ;;  %v697_v4 = vmul.f32 1.442695, %v643_v55  ;;  %v290_v63 = vmul.f32 %v1142_v0, %v1410_v32  ;;  %v551_v57 = vld [vmem:[%s1241_s28 + $0xd0] sm:$0xff] }
  0x68   : > { %v1051_v61 = vpop.eup %1050  ;;  %v763_v56 = vsel %vm603_vm7, %v1544_v12, %v940_v54  ;;  %v918_v48 = vadd.f32 -1.0, %v1049_v21  ;;  %1064 = vpow2.f32 %v449_v52  ;;  %v644_v60 = vmin.f32 %v1638_v44, 0.0 }
  0x69   : > { %795 = vst [vmem:[%s1381_s5 + $0x70] sm:$0xff] %v763_v56  ;;  %v764_v5 = vsel %vm604_vm8, %v1550_v29, %v941_v3  ;;  %v942_v58 = vadd.f32 -1.0, %v1051_v61  ;;  %1066 = vpow2.f32 %v697_v4  ;;  %v291_v22 = vmul.f32 %v1142_v0, %v1416_v40 }
  0x6a   : > { %796 = vst [vmem:[%s1381_s5 + $0x78] sm:$0xff] %v764_v5  ;;  %v517_v12 = vsel %vm357_vm6, %v1542_v7, %v918_v48  ;;  %v699_v2 = vmul.f32 1.442695, %v644_v60  ;;  %1068 = vpow2.f32 %v451_v47  ;;  %v1665_v23 = vadd.f32 %v1153_v1, %v290_v63  ;;  %v552_v48 = vld [vmem:[%s1241_s28 + $0xd8] sm:$0xff] }
  0x6b   : > { %v765_v29 = vsel %vm605_vm9, %v1561_v38, %v942_v58  ;;  %v1661_v6 = vadd.f32 %v549_v62, %v517_v12  ;;  %v1053_v24 = vpop.eup %1052  ;;  %v1668_v7 = vadd.f32 %v1153_v1, %v291_v22  ;;  %v292_v32 = vmul.f32 %v1142_v0, %v1419_v15 }
  0x6c   : > { %797 = vst [vmem:[%s1381_s5 + $0x80] sm:$0xff] %v765_v29  ;;  %v293_v40 = vmul.f32 %v1142_v0, %v1422_v16  ;;  %v943_v38 = vadd.f32 -1.0, %v1053_v24  ;;  %1070 = vpow2.f32 %v699_v2  ;;  %vm607_vm11 = vcmp.gt.f32.partialorder %v1587_v51, 0.0 }
  0x6d   : > { %v645_v8 = vmin.f32 %v1661_v6, 0.0  ;;  %v393_v11 = vmin.f32 %v1665_v23, 0.0  ;;  %v394_v39 = vmin.f32 %v1668_v7, 0.0  ;;  %vm608_vm12 = vcmp.gt.f32.partialorder %v1594_v19, 0.0 }
  0x6e   : > { %v766_v20 = vsel %vm606_vm10, %v1573_v46, %v943_v38  ;;  %v1683_v0 = vadd.f32 %v1153_v1, %v292_v32  ;;  %v1687_v14 = vadd.f32 %v1153_v1, %v293_v40  ;;  %vm358_vm13 = vcmp.gt.f32.partialorder %v1578_v30, 0.0  ;;  %v554_v38 = vld [vmem:[%s1241_s28 + $0xe8] sm:$0xff] }
  0x6f   : > { %v1055_v59 = vpop.eup %1054  ;;  %v701_v15 = vmul.f32 1.442695, %v645_v8  ;;  %798 = vst [vmem:[%s1381_s5 + $0x88] sm:$0xff] %v766_v20  ;;  %v453_v9 = vmul.f32 1.442695, %v393_v11  ;;  %vm609_vm14 = vcmp.gt.f32.partialorder %v1608_v28, 0.0 }
  0x70   : > { %v1057_v16 = vpop.eup %1056  ;;  %v944_v31 = vadd.f32 -1.0, %v1055_v59  ;;  %v455_v13 = vmul.f32 1.442695, %v394_v39  ;;  %v395_v46 = vmin.f32 %v1683_v0, 0.0  ;;  %vm610_vm15 = vcmp.gt.f32.partialorder %v1615_v43, 0.0 }
  0x71   : > { %v1059_v26 = vpop.eup %1058  ;;  %v945_v27 = vadd.f32 -1.0, %v1057_v16  ;;  %1072 = vpow2.f32 %v701_v15  ;;  %vm359_vm0 = vcmp.gt.f32.partialorder %v1605_v10, 0.0  ;;  %v396_v42 = vmin.f32 %v1687_v14, 0.0  ;;  %v555_v15 = vld [vmem:[%s1241_s28 + $0xf0] sm:$0xff] }
  0x72   : > { %v1061_v35 = vpop.eup %1060  ;;  %v767_v37 = vsel %vm607_vm11, %v1587_v51, %v944_v31  ;;  %v919_v18 = vadd.f32 -1.0, %v1059_v26  ;;  %1074 = vpow2.f32 %v453_v9  ;;  %v457_v25 = vmul.f32 1.442695, %v395_v46 }
  0x73   : > { %799 = vst [vmem:[%s1381_s5 + $0x90] sm:$0xff] %v767_v37  ;;  %v768_v1 = vsel %vm608_vm12, %v1594_v19, %v945_v27  ;;  %v946_v45 = vadd.f32 -1.0, %v1061_v35  ;;  %1076 = vpow2.f32 %v455_v13  ;;  %v459_v54 = vmul.f32 1.442695, %v396_v42 }
  0x74   : > { %v1063_v34 = vpop.eup %1062  ;;  %800 = vst [vmem:[%s1381_s5 + $0x98] sm:$0xff] %v768_v1  ;;  %v518_v51 = vsel %vm358_vm13, %v1578_v30, %v919_v18  ;;  %1078 = vpow2.f32 %v457_v25  ;;  %vm611_vm1 = vcmp.gt.f32.partialorder %v1628_v50, 0.0  ;;  %vm360_vm2 = vcmp.gt.f32.partialorder %v1624_v49, 0.0 }
  0x75   : > { %v1065_v52 = vpop.eup %1064  ;;  %v769_v19 = vsel %vm609_vm14, %v1608_v28, %v946_v45  ;;  %v947_v17 = vadd.f32 -1.0, %v1063_v34  ;;  %v1710_v41 = vadd.f32 %v550_v36, %v518_v51  ;;  %1080 = vpow2.f32 %v459_v54 }
  0x76   : > { %801 = vst [vmem:[%s1381_s5 + $0xa0] sm:$0xff] %v769_v19  ;;  %v920_v53 = vadd.f32 -1.0, %v1065_v52  ;;  %v1067_v55 = vpop.eup %1066  ;;  %vm612_vm3 = vcmp.gt.f32.partialorder %v1638_v44, 0.0  ;;  %vm613_vm4 = vcmp.gt.f32.partialorder %v1661_v6, 0.0  ;;  %vm361_vm5 = vcmp.gt.f32.partialorder %v1665_v23, 0.0 }
  0x77   : > { %v770_v30 = vsel %vm610_vm15, %v1615_v43, %v947_v17  ;;  %v646_v33 = vmin.f32 %v1710_v41, 0.0  ;;  %v1069_v21 = vpop.eup %1068  ;;  %v948_v28 = vadd.f32 -1.0, %v1067_v55  ;;  %vm362_vm6 = vcmp.gt.f32.partialorder %v1668_v7, 0.0 }
  0x78   : > { %802 = vst [vmem:[%s1381_s5 + $0xa8] sm:$0xff] %v770_v30  ;;  %v519_v3 = vsel %vm359_vm0, %v1605_v10, %v920_v53  ;;  %v921_v43 = vadd.f32 -1.0, %v1069_v21  ;;  %vm363_vm7 = vcmp.gt.f32.partialorder %v1683_v0, 0.0  ;;  %vm364_vm8 = vcmp.gt.f32.partialorder %v1687_v14, 0.0 }
  0x79   : > { %v703_v47 = vmul.f32 1.442695, %v646_v33  ;;  %v1721_v61 = vadd.f32 %v551_v57, %v519_v3  ;;  %v1071_v56 = vpop.eup %1070  ;;  %v771_v4 = vsel %vm611_vm1, %v1628_v50, %v948_v28  ;;  %vm614_vm9 = vcmp.gt.f32.partialorder %v1710_v41, 0.0 }
  0x7a   : > { %803 = vst [vmem:[%s1381_s5 + $0xb0] sm:$0xff] %v771_v4  ;;  %v949_v62 = vadd.f32 -1.0, %v1071_v56  ;;  %v520_v5 = vsel %vm360_vm2, %v1624_v49, %v921_v43  ;;  %v553_v49 = vld [vmem:[%s1241_s28 + $0xe0] sm:$0xff] }
  0x7b   : > { %1082 = vpow2.f32 %v703_v47  ;;  %v647_v10 = vmin.f32 %v1721_v61, 0.0  ;;  %v584_v12 = vadd.f32 %v552_v48, %v520_v5  ;;  %vm615_vm10 = vcmp.gt.f32.partialorder %v1721_v61, 0.0 }
  0x7c   : > { %v772_v58 = vsel %vm612_vm3, %v1638_v44, %v949_v62 }
  0x7d   : > { %v705_v60 = vmul.f32 1.442695, %v647_v10  ;;  %804 = vst [vmem:[%s1381_s5 + $0xb8] sm:$0xff] %v772_v58  ;;  %v648_v29 = vmin.f32 %v584_v12, 0.0  ;;  %vm616_vm11 = vcmp.gt.f32.partialorder %v584_v12, 0.0 }
  0x7e   : > { %v1073_v63 = vpop.eup %1072 }
  0x7f   : > { %v1075_v50 = vpop.eup %1074  ;;  %v950_v22 = vadd.f32 -1.0, %v1073_v63  ;;  %1084 = vpow2.f32 %v705_v60  ;;  %v707_v32 = vmul.f32 1.442695, %v648_v29 }
  0x80   : > { %v1077_v2 = vpop.eup %1076  ;;  %v922_v24 = vadd.f32 -1.0, %v1075_v50 }
  0x81   : > { %v773_v44 = vsel %vm613_vm4, %v1661_v6, %v950_v22  ;;  %v923_v40 = vadd.f32 -1.0, %v1077_v2  ;;  %v1079_v8 = vpop.eup %1078  ;;  %1086 = vpow2.f32 %v707_v32 }
  0x82   : > { %805 = vst [vmem:[%s1381_s5 + $0xc0] sm:$0xff] %v773_v44  ;;  %v521_v11 = vsel %vm361_vm5, %v1665_v23, %v922_v24  ;;  %v924_v20 = vadd.f32 -1.0, %v1079_v8  ;;  %v1081_v31 = vpop.eup %1080  ;;  %v556_v23 = vld [vmem:[%s1241_s28 + $0xf8] sm:$0xff] }
  0x83   : > { %v585_v39 = vadd.f32 %v553_v49, %v521_v11  ;;  %v522_v59 = vsel %vm362_vm6, %v1668_v7, %v923_v40  ;;  %v925_v27 = vadd.f32 -1.0, %v1081_v31 }
  0x84   : > { %v586_v16 = vadd.f32 %v554_v38, %v522_v59  ;;  %v523_v6 = vsel %vm363_vm7, %v1683_v0, %v924_v20 }
  0x85   : > { %v649_v9 = vmin.f32 %v585_v39, 0.0  ;;  %v587_v26 = vadd.f32 %v555_v15, %v523_v6  ;;  %v524_v18 = vsel %vm364_vm8, %v1687_v14, %v925_v27  ;;  %vm617_vm12 = vcmp.gt.f32.partialorder %v585_v39, 0.0 }
  0x86   : > { %v650_v13 = vmin.f32 %v586_v16, 0.0  ;;  %v588_v1 = vadd.f32 %v556_v23, %v524_v18  ;;  %vm618_vm13 = vcmp.gt.f32.partialorder %v586_v16, 0.0 }
  0x87   : > { %v709_v46 = vmul.f32 1.442695, %v649_v9  ;;  %v651_v7 = vmin.f32 %v587_v26, 0.0  ;;  %vm619_vm14 = vcmp.gt.f32.partialorder %v587_v26, 0.0 }
  0x88   : > { %v1083_v35 = vpop.eup %1082  ;;  %v711_v37 = vmul.f32 1.442695, %v650_v13  ;;  %v652_v25 = vmin.f32 %v588_v1, 0.0  ;;  %vm620_vm15 = vcmp.gt.f32.partialorder %v588_v1, 0.0 }
  0x89   : > { %v951_v36 = vadd.f32 -1.0, %v1083_v35  ;;  %1088 = vpow2.f32 %v709_v46  ;;  %v713_v0 = vmul.f32 1.442695, %v651_v7 }
  0x8a   : > { %1090 = vpow2.f32 %v711_v37  ;;  %v715_v42 = vmul.f32 1.442695, %v652_v25 }
  0x8b   : > { %v774_v45 = vsel %vm614_vm9, %v1710_v41, %v951_v36  ;;  %1092 = vpow2.f32 %v713_v0 }
  0x8c   : > { %v1085_v34 = vpop.eup %1084  ;;  %806 = vst [vmem:[%s1381_s5 + $0xc8] sm:$0xff] %v774_v45  ;;  %1094 = vpow2.f32 %v715_v42 }
  0x8d   : > { %v952_v51 = vadd.f32 -1.0, %v1085_v34 }
  0x8e   : > { %v1087_v14 = vpop.eup %1086 }
  0x8f   : > { %v775_v52 = vsel %vm615_vm10, %v1721_v61, %v952_v51  ;;  %v953_v19 = vadd.f32 -1.0, %v1087_v14 }
  0x90   : > { %807 = vst [vmem:[%s1381_s5 + $0xd0] sm:$0xff] %v775_v52 }
  0x91   : > { %v776_v17 = vsel %vm616_vm11, %v584_v12, %v953_v19 }
  0x92   : > { %808 = vst [vmem:[%s1381_s5 + $0xd8] sm:$0xff] %v776_v17 }
  0x96   : > { %v1089_v41 = vpop.eup %1088 }
  0x97   : > { %v1091_v53 = vpop.eup %1090  ;;  %v954_v57 = vadd.f32 -1.0, %v1089_v41 }
  0x98   : > { %v955_v54 = vadd.f32 -1.0, %v1091_v53  ;;  %v1093_v55 = vpop.eup %1092 }
  0x99   : > { %v777_v30 = vsel %vm617_vm12, %v585_v39, %v954_v57  ;;  %v956_v21 = vadd.f32 -1.0, %v1093_v55  ;;  %v1095_v28 = vpop.eup %1094 }
  0x9a   : > { %809 = vst [vmem:[%s1381_s5 + $0xe0] sm:$0xff] %v777_v30  ;;  %v778_v33 = vsel %vm618_vm13, %v586_v16, %v955_v54  ;;  %v957_v47 = vadd.f32 -1.0, %v1095_v28 }
  0x9b   : > { %810 = vst [vmem:[%s1381_s5 + $0xe8] sm:$0xff] %v778_v33  ;;  %v779_v3 = vsel %vm619_vm14, %v587_v26, %v956_v21 }
  0x9c   : > { %811 = vst [vmem:[%s1381_s5 + $0xf0] sm:$0xff] %v779_v3  ;;  %v780_v61 = vsel %vm620_vm15, %v588_v1, %v957_v47 }
  0x9d   : > { %812 = vst [vmem:[%s1381_s5 + $0xf8] sm:$0xff] %v780_v61 }
  0x9e PF: > { %s14_s15 = sadd.s32 1, %s1102_s15  }
  0x9f   : > { %p11_p4 = scmp.ge.s32.totalorder %s14_s15, 6  }
  0xa1   :  { %13 = sbr.rel (!%p11_p4) target bundleno = 1 (0x1), region = 69 }

</bundles_post_ra>
